<compile_context>
chip_gen: v7x
topology: tpu7x:2x2x1
jax: 0.10.0
libtpu: 0.0.40
codegen_flags: <defaults>
</compile_context>

<pallas_src>
import functools

import jax
import jax.numpy as jnp
from jax import lax
from jax.experimental import pallas as pl
from jax.experimental.pallas import tpu as pltpu


def bert_embeddings_kernel(wid_ref, tid_ref, pid_ref,          # scalar prefetch (SMEM ids)
                           word_hbm, type_hbm, pos_hbm,        # embedding tables (HBM / ANY)
                           gamma_ref, beta_ref,                # LayerNorm params (1, H) VMEM
                           o_ref,                              # (tm, H) output tile
                           wbuf, tbuf, pbuf, sem,              # scratch: gather buffers + sems
                           *, tm: int, eps: float):
    base = pl.program_id(0) * tm

    # ---- manual DMA gather: tm rows from each embedding table -------------------
    def issue(tbl, ids_ref, buf, s):
        for r in range(tm):                       # tm is static -> fully unrolled issues
            idx = ids_ref[base + r]               # dynamic scalar read from SMEM
            pltpu.make_async_copy(tbl.at[idx], buf.at[r], s).start()

    def drain(tbl, buf, s):
        for r in range(tm):                       # same-shaped descriptor is enough to wait
            pltpu.make_async_copy(tbl.at[0], buf.at[r], s).wait()

    # issue everything first so all 3*tm row copies are in flight concurrently
    issue(word_hbm, wid_ref, wbuf, sem.at[0])
    issue(type_hbm, tid_ref, tbuf, sem.at[1])
    issue(pos_hbm,  pid_ref, pbuf, sem.at[2])
    drain(word_hbm, wbuf, sem.at[0])
    drain(type_hbm, tbuf, sem.at[1])
    drain(pos_hbm,  pbuf, sem.at[2])

    # ---- sum of embeddings + LayerNorm (single-pass stats, f32 epilogue) --------
    y = (wbuf[...].astype(jnp.float32)
         + tbuf[...].astype(jnp.float32)
         + pbuf[...].astype(jnp.float32))
    inv_h = 1.0 / y.shape[-1]
    mean = jnp.sum(y, axis=-1, keepdims=True) * inv_h
    var = jnp.sum(y * y, axis=-1, keepdims=True) * inv_h - mean * mean
    yn = (y - mean) * lax.rsqrt(var + eps)
    out = yn * gamma_ref[...].astype(jnp.float32) + beta_ref[...].astype(jnp.float32)

    # Dropout: identity in eval mode.
    # TODO(synk): training-mode dropout would use pltpu.prng_seed / pltpu.prng_random_bits.
    o_ref[...] = out.astype(o_ref.dtype)


def bert_embeddings(input_ids, word_emb, pos_emb, type_emb, gamma, beta,
                    token_type_ids=None, position_ids=None,
                    *, eps=1e-12, tm=32):
    """input_ids: (B, S) int. Tables: (vocab,H), (max_pos,H), (type_vocab,H)."""
    B, S = input_ids.shape
    H = word_emb.shape[1]

    # Default buffers exactly like the PyTorch module (past_key_values_length=0).
    if position_ids is None:
        position_ids = jnp.broadcast_to(jnp.arange(S, dtype=jnp.int32)[None, :], (B, S))
    if token_type_ids is None:
        token_type_ids = jnp.zeros((B, S), dtype=jnp.int32)

    M = B * S
    m_pad = pl.cdiv(M, tm) * tm                    # pad rows instead of asserting divisibility

    def flat_pad(ids):
        ids = ids.reshape(M).astype(jnp.int32)
        return jnp.pad(ids, (0, m_pad - M))        # padded rows gather row 0; sliced off below

    wid = flat_pad(input_ids)
    tid = flat_pad(token_type_ids)
    pid = flat_pad(position_ids)

    gamma2 = gamma.reshape(1, H)
    beta2 = beta.reshape(1, H)

    kernel = functools.partial(bert_embeddings_kernel, tm=tm, eps=eps)

    out = pl.pallas_call(
        kernel,
        out_shape=jax.ShapeDtypeStruct((m_pad, H), word_emb.dtype),
        grid_spec=pltpu.PrefetchScalarGridSpec(
            num_scalar_prefetch=3,                 # word / token-type / position ids in SMEM
            grid=(m_pad // tm,),
            in_specs=[
                pl.BlockSpec(memory_space=pl.ANY),               # word table stays in HBM
                pl.BlockSpec(memory_space=pl.ANY),               # token-type table (HBM)
                pl.BlockSpec(memory_space=pl.ANY),               # position table (HBM)
                pl.BlockSpec((1, H), lambda i, w, t, p: (0, 0)),  # LN gamma (resident)
                pl.BlockSpec((1, H), lambda i, w, t, p: (0, 0)),  # LN beta  (resident)
            ],
            out_specs=pl.BlockSpec((tm, H), lambda i, w, t, p: (i, 0)),
            scratch_shapes=[
                pltpu.VMEM((tm, H), word_emb.dtype),
                pltpu.VMEM((tm, H), type_emb.dtype),
                pltpu.VMEM((tm, H), pos_emb.dtype),
                pltpu.SemaphoreType.DMA((3,)),
            ],
        ),
        compiler_params=pltpu.CompilerParams(
            dimension_semantics=("parallel",)),    # rows are independent -> shard across TCs
    )(wid, tid, pid, word_emb, type_emb, pos_emb, gamma2, beta2)

    return out[:M].reshape(B, S, H)


def reference(input_ids, token_type_ids, position_ids, word_emb, pos_emb, type_emb,
              gamma, beta, eps=1e-12):
    e = word_emb[input_ids] + type_emb[token_type_ids] + pos_emb[position_ids]
    mean = e.mean(-1, keepdims=True)
    var = ((e - mean) ** 2).mean(-1, keepdims=True)
    return (e - mean) / jnp.sqrt(var + eps) * gamma + beta


if __name__ == "__main__":
    # Small BERT-like config: batch=2, seq=64, hidden=128, vocab=512.
    B, S, H = 2, 64, 128
    vocab, max_pos, type_vocab = 512, 128, 2
    eps = 1e-12

    key = jax.random.PRNGKey(0)
    k_ids, k_tok, k_w, k_p, k_t, k_g, k_b = jax.random.split(key, 7)

    input_ids = jax.random.randint(k_ids, (B, S), 0, vocab, dtype=jnp.int32)
    token_type_ids = jax.random.randint(k_tok, (B, S), 0, type_vocab, dtype=jnp.int32)

    word_emb = 0.02 * jax.random.normal(k_w, (vocab, H), dtype=jnp.float32)
    pos_emb = 0.02 * jax.random.normal(k_p, (max_pos, H), dtype=jnp.float32)
    type_emb = 0.02 * jax.random.normal(k_t, (type_vocab, H), dtype=jnp.float32)
    gamma = 1.0 + 0.1 * jax.random.normal(k_g, (H,), dtype=jnp.float32)
    beta = 0.1 * jax.random.normal(k_b, (H,), dtype=jnp.float32)

    out = bert_embeddings(input_ids, word_emb, pos_emb, type_emb, gamma, beta,
                          token_type_ids=token_type_ids, eps=eps, tm=32)
    out = jax.block_until_ready(out)

    position_ids = jnp.broadcast_to(jnp.arange(S, dtype=jnp.int32)[None, :], (B, S))
    ref = reference(input_ids, token_type_ids, position_ids,
                    word_emb, pos_emb, type_emb, gamma, beta, eps=eps)

    assert out.shape == (B, S, H)
    assert jnp.allclose(out, ref, atol=1e-4, rtol=1e-4), "mismatch vs reference"

    print("KERNEL_OK")
</pallas_src>

<mosaic_0001>
module attributes {stable_mosaic.version = 11 : i64} {
  func.func @bert_embeddings_kernel(%arg0: i32, %arg1: memref<128xi32, #tpu.memory_space<smem>>, %arg2: memref<128xi32, #tpu.memory_space<smem>>, %arg3: memref<128xi32, #tpu.memory_space<smem>>, %arg4: memref<512x128xf32, #tpu.memory_space<any>>, %arg5: memref<2x128xf32, #tpu.memory_space<any>>, %arg6: memref<128x128xf32, #tpu.memory_space<any>>, %arg7: memref<1x128xf32, #tpu.memory_space<vmem>>, %arg8: memref<1x128xf32, #tpu.memory_space<vmem>>, %arg9: memref<32x128xf32, #tpu.memory_space<vmem>>, %arg10: memref<32x128xf32, #tpu.memory_space<vmem>>, %arg11: memref<32x128xf32, #tpu.memory_space<vmem>>, %arg12: memref<32x128xf32, #tpu.memory_space<vmem>>, %arg13: memref<3x!tpu.dma_semaphore, #tpu.memory_space<semaphore_mem>>) attributes {dimension_semantics = [#tpu.dimension_semantics<parallel>], iteration_bounds = array<i64: 4>, scalar_prefetch = 3 : i64, scratch_operands = 4 : i64, tpu.core_type = #tpu.core_type<tc>, window_params = [{}, {}, {}, {pipeline_mode = #tpu.pipeline_mode<synchronous>, transform_indices = @transform_3, window_bounds = array<i64: 1, 128>}, {pipeline_mode = #tpu.pipeline_mode<synchronous>, transform_indices = @transform_4, window_bounds = array<i64: 1, 128>}, {transform_indices = @transform_5, window_bounds = array<i64: 32, 128>}]} {
    %c32_i32 = arith.constant 32 : i32
    %0 = arith.muli %arg0, %c32_i32 : i32
    %c0_i32 = arith.constant 0 : i32
    %1 = arith.addi %0, %c0_i32 : i32
    %2 = arith.index_cast %1 : i32 to index
    %3 = memref.load %arg1[%2] : memref<128xi32, #tpu.memory_space<smem>>
    %c0_i32_0 = arith.constant 0 : i32
    %c0_i32_1 = arith.constant 0 : i32
    %c0_i32_2 = arith.constant 0 : i32
    %4 = tpu.memref_slice %arg4[%3, %c0_i32_2] : memref<512x128xf32, #tpu.memory_space<any>> -> memref<1x128xf32, #tpu.memory_space<any>>
    %5 = tpu.memref_squeeze %4 : memref<1x128xf32, #tpu.memory_space<any>> -> memref<128xf32, #tpu.memory_space<any>>
    %c0_i32_3 = arith.constant 0 : i32
    %6 = tpu.memref_slice %arg10[%c0_i32_0, %c0_i32_3] : memref<32x128xf32, #tpu.memory_space<vmem>> -> memref<1x128xf32, #tpu.memory_space<vmem>>
    %7 = tpu.memref_squeeze %6 : memref<1x128xf32, #tpu.memory_space<vmem>> -> memref<128xf32, #tpu.memory_space<vmem>>
    %8 = tpu.memref_slice %arg13[%c0_i32_1] : memref<3x!tpu.dma_semaphore, #tpu.memory_space<semaphore_mem>> -> memref<1x!tpu.dma_semaphore, #tpu.memory_space<semaphore_mem>>
    %9 = tpu.memref_squeeze %8 : memref<1x!tpu.dma_semaphore, #tpu.memory_space<semaphore_mem>> -> memref<!tpu.dma_semaphore, #tpu.memory_space<semaphore_mem>>
    tpu.enqueue_dma source(%5 : memref<128xf32, #tpu.memory_space<any>>) target(%7 : memref<128xf32, #tpu.memory_space<vmem>>) target_semaphore(%9 : memref<!tpu.dma_semaphore, #tpu.memory_space<semaphore_mem>>)
    %c1_i32 = arith.constant 1 : i32
    %10 = arith.addi %0, %c1_i32 : i32
    %11 = arith.index_cast %10 : i32 to index
    %12 = memref.load %arg1[%11] : memref<128xi32, #tpu.memory_space<smem>>
    %c1_i32_4 = arith.constant 1 : i32
    %c0_i32_5 = arith.constant 0 : i32
    %c0_i32_6 = arith.constant 0 : i32
    %13 = tpu.memref_slice %arg4[%12, %c0_i32_6] : memref<512x128xf32, #tpu.memory_space<any>> -> memref<1x128xf32, #tpu.memory_space<any>>
    %14 = tpu.memref_squeeze %13 : memref<1x128xf32, #tpu.memory_space<any>> -> memref<128xf32, #tpu.memory_space<any>>
    %c0_i32_7 = arith.constant 0 : i32
    %15 = tpu.memref_slice %arg10[%c1_i32_4, %c0_i32_7] : memref<32x128xf32, #tpu.memory_space<vmem>> -> memref<1x128xf32, #tpu.memory_space<vmem>>
    %16 = tpu.memref_squeeze %15 : memref<1x128xf32, #tpu.memory_space<vmem>> -> memref<128xf32, #tpu.memory_space<vmem>>
    %17 = tpu.memref_slice %arg13[%c0_i32_5] : memref<3x!tpu.dma_semaphore, #tpu.memory_space<semaphore_mem>> -> memref<1x!tpu.dma_semaphore, #tpu.memory_space<semaphore_mem>>
    %18 = tpu.memref_squeeze %17 : memref<1x!tpu.dma_semaphore, #tpu.memory_space<semaphore_mem>> -> memref<!tpu.dma_semaphore, #tpu.memory_space<semaphore_mem>>
    tpu.enqueue_dma source(%14 : memref<128xf32, #tpu.memory_space<any>>) target(%16 : memref<128xf32, #tpu.memory_space<vmem>>) target_semaphore(%18 : memref<!tpu.dma_semaphore, #tpu.memory_space<semaphore_mem>>)
    %c2_i32 = arith.constant 2 : i32
    %19 = arith.addi %0, %c2_i32 : i32
    %20 = arith.index_cast %19 : i32 to index
    %21 = memref.load %arg1[%20] : memref<128xi32, #tpu.memory_space<smem>>
    %c2_i32_8 = arith.constant 2 : i32
    %c0_i32_9 = arith.constant 0 : i32
    %c0_i32_10 = arith.constant 0 : i32
    %22 = tpu.memref_slice %arg4[%21, %c0_i32_10] : memref<512x128xf32, #tpu.memory_space<any>> -> memref<1x128xf32, #tpu.memory_space<any>>
    %23 = tpu.memref_squeeze %22 : memref<1x128xf32, #tpu.memory_space<any>> -> memref<128xf32, #tpu.memory_space<any>>
    %c0_i32_11 = arith.constant 0 : i32
    %24 = tpu.memref_slice %arg10[%c2_i32_8, %c0_i32_11] : memref<32x128xf32, #tpu.memory_space<vmem>> -> memref<1x128xf32, #tpu.memory_space<vmem>>
    %25 = tpu.memref_squeeze %24 : memref<1x128xf32, #tpu.memory_space<vmem>> -> memref<128xf32, #tpu.memory_space<vmem>>
    %26 = tpu.memref_slice %arg13[%c0_i32_9] : memref<3x!tpu.dma_semaphore, #tpu.memory_space<semaphore_mem>> -> memref<1x!tpu.dma_semaphore, #tpu.memory_space<semaphore_mem>>
    %27 = tpu.memref_squeeze %26 : memref<1x!tpu.dma_semaphore, #tpu.memory_space<semaphore_mem>> -> memref<!tpu.dma_semaphore, #tpu.memory_space<semaphore_mem>>
    tpu.enqueue_dma source(%23 : memref<128xf32, #tpu.memory_space<any>>) target(%25 : memref<128xf32, #tpu.memory_space<vmem>>) target_semaphore(%27 : memref<!tpu.dma_semaphore, #tpu.memory_space<semaphore_mem>>)
    %c3_i32 = arith.constant 3 : i32
    %28 = arith.addi %0, %c3_i32 : i32
    %29 = arith.index_cast %28 : i32 to index
    %30 = memref.load %arg1[%29] : memref<128xi32, #tpu.memory_space<smem>>
    %c3_i32_12 = arith.constant 3 : i32
    %c0_i32_13 = arith.constant 0 : i32
    %c0_i32_14 = arith.constant 0 : i32
    %31 = tpu.memref_slice %arg4[%30, %c0_i32_14] : memref<512x128xf32, #tpu.memory_space<any>> -> memref<1x128xf32, #tpu.memory_space<any>>
    %32 = tpu.memref_squeeze %31 : memref<1x128xf32, #tpu.memory_space<any>> -> memref<128xf32, #tpu.memory_space<any>>
    %c0_i32_15 = arith.constant 0 : i32
    %33 = tpu.memref_slice %arg10[%c3_i32_12, %c0_i32_15] : memref<32x128xf32, #tpu.memory_space<vmem>> -> memref<1x128xf32, #tpu.memory_space<vmem>>
    %34 = tpu.memref_squeeze %33 : memref<1x128xf32, #tpu.memory_space<vmem>> -> memref<128xf32, #tpu.memory_space<vmem>>
    %35 = tpu.memref_slice %arg13[%c0_i32_13] : memref<3x!tpu.dma_semaphore, #tpu.memory_space<semaphore_mem>> -> memref<1x!tpu.dma_semaphore, #tpu.memory_space<semaphore_mem>>
    %36 = tpu.memref_squeeze %35 : memref<1x!tpu.dma_semaphore, #tpu.memory_space<semaphore_mem>> -> memref<!tpu.dma_semaphore, #tpu.memory_space<semaphore_mem>>
    tpu.enqueue_dma source(%32 : memref<128xf32, #tpu.memory_space<any>>) target(%34 : memref<128xf32, #tpu.memory_space<vmem>>) target_semaphore(%36 : memref<!tpu.dma_semaphore, #tpu.memory_space<semaphore_mem>>)
    %c4_i32 = arith.constant 4 : i32
    %37 = arith.addi %0, %c4_i32 : i32
    %38 = arith.index_cast %37 : i32 to index
    %39 = memref.load %arg1[%38] : memref<128xi32, #tpu.memory_space<smem>>
    %c4_i32_16 = arith.constant 4 : i32
    %c0_i32_17 = arith.constant 0 : i32
    %c0_i32_18 = arith.constant 0 : i32
    %40 = tpu.memref_slice %arg4[%39, %c0_i32_18] : memref<512x128xf32, #tpu.memory_space<any>> -> memref<1x128xf32, #tpu.memory_space<any>>
    %41 = tpu.memref_squeeze %40 : memref<1x128xf32, #tpu.memory_space<any>> -> memref<128xf32, #tpu.memory_space<any>>
    %c0_i32_19 = arith.constant 0 : i32
    %42 = tpu.memref_slice %arg10[%c4_i32_16, %c0_i32_19] : memref<32x128xf32, #tpu.memory_space<vmem>> -> memref<1x128xf32, #tpu.memory_space<vmem>>
    %43 = tpu.memref_squeeze %42 : memref<1x128xf32, #tpu.memory_space<vmem>> -> memref<128xf32, #tpu.memory_space<vmem>>
    %44 = tpu.memref_slice %arg13[%c0_i32_17] : memref<3x!tpu.dma_semaphore, #tpu.memory_space<semaphore_mem>> -> memref<1x!tpu.dma_semaphore, #tpu.memory_space<semaphore_mem>>
    %45 = tpu.memref_squeeze %44 : memref<1x!tpu.dma_semaphore, #tpu.memory_space<semaphore_mem>> -> memref<!tpu.dma_semaphore, #tpu.memory_space<semaphore_mem>>
    tpu.enqueue_dma source(%41 : memref<128xf32, #tpu.memory_space<any>>) target(%43 : memref<128xf32, #tpu.memory_space<vmem>>) target_semaphore(%45 : memref<!tpu.dma_semaphore, #tpu.memory_space<semaphore_mem>>)
    %c5_i32 = arith.constant 5 : i32
    %46 = arith.addi %0, %c5_i32 : i32
    %47 = arith.index_cast %46 : i32 to index
    %48 = memref.load %arg1[%47] : memref<128xi32, #tpu.memory_space<smem>>
    %c5_i32_20 = arith.constant 5 : i32
    %c0_i32_21 = arith.constant 0 : i32
    %c0_i32_22 = arith.constant 0 : i32
    %49 = tpu.memref_slice %arg4[%48, %c0_i32_22] : memref<512x128xf32, #tpu.memory_space<any>> -> memref<1x128xf32, #tpu.memory_space<any>>
    %50 = tpu.memref_squeeze %49 : memref<1x128xf32, #tpu.memory_space<any>> -> memref<128xf32, #tpu.memory_space<any>>
    %c0_i32_23 = arith.constant 0 : i32
    %51 = tpu.memref_slice %arg10[%c5_i32_20, %c0_i32_23] : memref<32x128xf32, #tpu.memory_space<vmem>> -> memref<1x128xf32, #tpu.memory_space<vmem>>
    %52 = tpu.memref_squeeze %51 : memref<1x128xf32, #tpu.memory_space<vmem>> -> memref<128xf32, #tpu.memory_space<vmem>>
    %53 = tpu.memref_slice %arg13[%c0_i32_21] : memref<3x!tpu.dma_semaphore, #tpu.memory_space<semaphore_mem>> -> memref<1x!tpu.dma_semaphore, #tpu.memory_space<semaphore_mem>>
    %54 = tpu.memref_squeeze %53 : memref<1x!tpu.dma_semaphore, #tpu.memory_space<semaphore_mem>> -> memref<!tpu.dma_semaphore, #tpu.memory_space<semaphore_mem>>
    tpu.enqueue_dma source(%50 : memref<128xf32, #tpu.memory_space<any>>) target(%52 : memref<128xf32, #tpu.memory_space<vmem>>) target_semaphore(%54 : memref<!tpu.dma_semaphore, #tpu.memory_space<semaphore_mem>>)
    %c6_i32 = arith.constant 6 : i32
    %55 = arith.addi %0, %c6_i32 : i32
    %56 = arith.index_cast %55 : i32 to index
    %57 = memref.load %arg1[%56] : memref<128xi32, #tpu.memory_space<smem>>
    %c6_i32_24 = arith.constant 6 : i32
    %c0_i32_25 = arith.constant 0 : i32
    %c0_i32_26 = arith.constant 0 : i32
    %58 = tpu.memref_slice %arg4[%57, %c0_i32_26] : memref<512x128xf32, #tpu.memory_space<any>> -> memref<1x128xf32, #tpu.memory_space<any>>
    %59 = tpu.memref_squeeze %58 : memref<1x128xf32, #tpu.memory_space<any>> -> memref<128xf32, #tpu.memory_space<any>>
    %c0_i32_27 = arith.constant 0 : i32
    %60 = tpu.memref_slice %arg10[%c6_i32_24, %c0_i32_27] : memref<32x128xf32, #tpu.memory_space<vmem>> -> memref<1x128xf32, #tpu.memory_space<vmem>>
    %61 = tpu.memref_squeeze %60 : memref<1x128xf32, #tpu.memory_space<vmem>> -> memref<128xf32, #tpu.memory_space<vmem>>
    %62 = tpu.memref_slice %arg13[%c0_i32_25] : memref<3x!tpu.dma_semaphore, #tpu.memory_space<semaphore_mem>> -> memref<1x!tpu.dma_semaphore, #tpu.memory_space<semaphore_mem>>
    %63 = tpu.memref_squeeze %62 : memref<1x!tpu.dma_semaphore, #tpu.memory_space<semaphore_mem>> -> memref<!tpu.dma_semaphore, #tpu.memory_space<semaphore_mem>>
    tpu.enqueue_dma source(%59 : memref<128xf32, #tpu.memory_space<any>>) target(%61 : memref<128xf32, #tpu.memory_space<vmem>>) target_semaphore(%63 : memref<!tpu.dma_semaphore, #tpu.memory_space<semaphore_mem>>)
    %c7_i32 = arith.constant 7 : i32
    %64 = arith.addi %0, %c7_i32 : i32
    %65 = arith.index_cast %64 : i32 to index
    %66 = memref.load %arg1[%65] : memref<128xi32, #tpu.memory_space<smem>>
    %c7_i32_28 = arith.constant 7 : i32
    %c0_i32_29 = arith.constant 0 : i32
    %c0_i32_30 = arith.constant 0 : i32
    %67 = tpu.memref_slice %arg4[%66, %c0_i32_30] : memref<512x128xf32, #tpu.memory_space<any>> -> memref<1x128xf32, #tpu.memory_space<any>>
    %68 = tpu.memref_squeeze %67 : memref<1x128xf32, #tpu.memory_space<any>> -> memref<128xf32, #tpu.memory_space<any>>
    %c0_i32_31 = arith.constant 0 : i32
    %69 = tpu.memref_slice %arg10[%c7_i32_28, %c0_i32_31] : memref<32x128xf32, #tpu.memory_space<vmem>> -> memref<1x128xf32, #tpu.memory_space<vmem>>
    %70 = tpu.memref_squeeze %69 : memref<1x128xf32, #tpu.memory_space<vmem>> -> memref<128xf32, #tpu.memory_space<vmem>>
    %71 = tpu.memref_slice %arg13[%c0_i32_29] : memref<3x!tpu.dma_semaphore, #tpu.memory_space<semaphore_mem>> -> memref<1x!tpu.dma_semaphore, #tpu.memory_space<semaphore_mem>>
    %72 = tpu.memref_squeeze %71 : memref<1x!tpu.dma_semaphore, #tpu.memory_space<semaphore_mem>> -> memref<!tpu.dma_semaphore, #tpu.memory_space<semaphore_mem>>
    tpu.enqueue_dma source(%68 : memref<128xf32, #tpu.memory_space<any>>) target(%70 : memref<128xf32, #tpu.memory_space<vmem>>) target_semaphore(%72 : memref<!tpu.dma_semaphore, #tpu.memory_space<semaphore_mem>>)
    %c8_i32 = arith.constant 8 : i32
    %73 = arith.addi %0, %c8_i32 : i32
    %74 = arith.index_cast %73 : i32 to index
    %75 = memref.load %arg1[%74] : memref<128xi32, #tpu.memory_space<smem>>
    %c8_i32_32 = arith.constant 8 : i32
    %c0_i32_33 = arith.constant 0 : i32
    %c0_i32_34 = arith.constant 0 : i32
    %76 = tpu.memref_slice %arg4[%75, %c0_i32_34] : memref<512x128xf32, #tpu.memory_space<any>> -> memref<1x128xf32, #tpu.memory_space<any>>
    %77 = tpu.memref_squeeze %76 : memref<1x128xf32, #tpu.memory_space<any>> -> memref<128xf32, #tpu.memory_space<any>>
    %c0_i32_35 = arith.constant 0 : i32
    %78 = tpu.memref_slice %arg10[%c8_i32_32, %c0_i32_35] : memref<32x128xf32, #tpu.memory_space<vmem>> -> memref<1x128xf32, #tpu.memory_space<vmem>>
    %79 = tpu.memref_squeeze %78 : memref<1x128xf32, #tpu.memory_space<vmem>> -> memref<128xf32, #tpu.memory_space<vmem>>
    %80 = tpu.memref_slice %arg13[%c0_i32_33] : memref<3x!tpu.dma_semaphore, #tpu.memory_space<semaphore_mem>> -> memref<1x!tpu.dma_semaphore, #tpu.memory_space<semaphore_mem>>
    %81 = tpu.memref_squeeze %80 : memref<1x!tpu.dma_semaphore, #tpu.memory_space<semaphore_mem>> -> memref<!tpu.dma_semaphore, #tpu.memory_space<semaphore_mem>>
    tpu.enqueue_dma source(%77 : memref<128xf32, #tpu.memory_space<any>>) target(%79 : memref<128xf32, #tpu.memory_space<vmem>>) target_semaphore(%81 : memref<!tpu.dma_semaphore, #tpu.memory_space<semaphore_mem>>)
    %c9_i32 = arith.constant 9 : i32
    %82 = arith.addi %0, %c9_i32 : i32
    %83 = arith.index_cast %82 : i32 to index
    %84 = memref.load %arg1[%83] : memref<128xi32, #tpu.memory_space<smem>>
    %c9_i32_36 = arith.constant 9 : i32
    %c0_i32_37 = arith.constant 0 : i32
    %c0_i32_38 = arith.constant 0 : i32
    %85 = tpu.memref_slice %arg4[%84, %c0_i32_38] : memref<512x128xf32, #tpu.memory_space<any>> -> memref<1x128xf32, #tpu.memory_space<any>>
    %86 = tpu.memref_squeeze %85 : memref<1x128xf32, #tpu.memory_space<any>> -> memref<128xf32, #tpu.memory_space<any>>
    %c0_i32_39 = arith.constant 0 : i32
    %87 = tpu.memref_slice %arg10[%c9_i32_36, %c0_i32_39] : memref<32x128xf32, #tpu.memory_space<vmem>> -> memref<1x128xf32, #tpu.memory_space<vmem>>
    %88 = tpu.memref_squeeze %87 : memref<1x128xf32, #tpu.memory_space<vmem>> -> memref<128xf32, #tpu.memory_space<vmem>>
    %89 = tpu.memref_slice %arg13[%c0_i32_37] : memref<3x!tpu.dma_semaphore, #tpu.memory_space<semaphore_mem>> -> memref<1x!tpu.dma_semaphore, #tpu.memory_space<semaphore_mem>>
    %90 = tpu.memref_squeeze %89 : memref<1x!tpu.dma_semaphore, #tpu.memory_space<semaphore_mem>> -> memref<!tpu.dma_semaphore, #tpu.memory_space<semaphore_mem>>
    tpu.enqueue_dma source(%86 : memref<128xf32, #tpu.memory_space<any>>) target(%88 : memref<128xf32, #tpu.memory_space<vmem>>) target_semaphore(%90 : memref<!tpu.dma_semaphore, #tpu.memory_space<semaphore_mem>>)
    %c10_i32 = arith.constant 10 : i32
    %91 = arith.addi %0, %c10_i32 : i32
    %92 = arith.index_cast %91 : i32 to index
    %93 = memref.load %arg1[%92] : memref<128xi32, #tpu.memory_space<smem>>
    %c10_i32_40 = arith.constant 10 : i32
    %c0_i32_41 = arith.constant 0 : i32
    %c0_i32_42 = arith.constant 0 : i32
    %94 = tpu.memref_slice %arg4[%93, %c0_i32_42] : memref<512x128xf32, #tpu.memory_space<any>> -> memref<1x128xf32, #tpu.memory_space<any>>
    %95 = tpu.memref_squeeze %94 : memref<1x128xf32, #tpu.memory_space<any>> -> memref<128xf32, #tpu.memory_space<any>>
    %c0_i32_43 = arith.constant 0 : i32
    %96 = tpu.memref_slice %arg10[%c10_i32_40, %c0_i32_43] : memref<32x128xf32, #tpu.memory_space<vmem>> -> memref<1x128xf32, #tpu.memory_space<vmem>>
    %97 = tpu.memref_squeeze %96 : memref<1x128xf32, #tpu.memory_space<vmem>> -> memref<128xf32, #tpu.memory_space<vmem>>
    %98 = tpu.memref_slice %arg13[%c0_i32_41] : memref<3x!tpu.dma_semaphore, #tpu.memory_space<semaphore_mem>> -> memref<1x!tpu.dma_semaphore, #tpu.memory_space<semaphore_mem>>
    %99 = tpu.memref_squeeze %98 : memref<1x!tpu.dma_semaphore, #tpu.memory_space<semaphore_mem>> -> memref<!tpu.dma_semaphore, #tpu.memory_space<semaphore_mem>>
    tpu.enqueue_dma source(%95 : memref<128xf32, #tpu.memory_space<any>>) target(%97 : memref<128xf32, #tpu.memory_space<vmem>>) target_semaphore(%99 : memref<!tpu.dma_semaphore, #tpu.memory_space<semaphore_mem>>)
    %c11_i32 = arith.constant 11 : i32
    %100 = arith.addi %0, %c11_i32 : i32
    %101 = arith.index_cast %100 : i32 to index
    %102 = memref.load %arg1[%101] : memref<128xi32, #tpu.memory_space<smem>>
    %c11_i32_44 = arith.constant 11 : i32
    %c0_i32_45 = arith.constant 0 : i32
    %c0_i32_46 = arith.constant 0 : i32
    %103 = tpu.memref_slice %arg4[%102, %c0_i32_46] : memref<512x128xf32, #tpu.memory_space<any>> -> memref<1x128xf32, #tpu.memory_space<any>>
    %104 = tpu.memref_squeeze %103 : memref<1x128xf32, #tpu.memory_space<any>> -> memref<128xf32, #tpu.memory_space<any>>
    %c0_i32_47 = arith.constant 0 : i32
    %105 = tpu.memref_slice %arg10[%c11_i32_44, %c0_i32_47] : memref<32x128xf32, #tpu.memory_space<vmem>> -> memref<1x128xf32, #tpu.memory_space<vmem>>
    %106 = tpu.memref_squeeze %105 : memref<1x128xf32, #tpu.memory_space<vmem>> -> memref<128xf32, #tpu.memory_space<vmem>>
    %107 = tpu.memref_slice %arg13[%c0_i32_45] : memref<3x!tpu.dma_semaphore, #tpu.memory_space<semaphore_mem>> -> memref<1x!tpu.dma_semaphore, #tpu.memory_space<semaphore_mem>>
    %108 = tpu.memref_squeeze %107 : memref<1x!tpu.dma_semaphore, #tpu.memory_space<semaphore_mem>> -> memref<!tpu.dma_semaphore, #tpu.memory_space<semaphore_mem>>
    tpu.enqueue_dma source(%104 : memref<128xf32, #tpu.memory_space<any>>) target(%106 : memref<128xf32, #tpu.memory_space<vmem>>) target_semaphore(%108 : memref<!tpu.dma_semaphore, #tpu.memory_space<semaphore_mem>>)
    %c12_i32 = arith.constant 12 : i32
    %109 = arith.addi %0, %c12_i32 : i32
    %110 = arith.index_cast %109 : i32 to index
    %111 = memref.load %arg1[%110] : memref<128xi32, #tpu.memory_space<smem>>
    %c12_i32_48 = arith.constant 12 : i32
    %c0_i32_49 = arith.constant 0 : i32
    %c0_i32_50 = arith.constant 0 : i32
    %112 = tpu.memref_slice %arg4[%111, %c0_i32_50] : memref<512x128xf32, #tpu.memory_space<any>> -> memref<1x128xf32, #tpu.memory_space<any>>
    %113 = tpu.memref_squeeze %112 : memref<1x128xf32, #tpu.memory_space<any>> -> memref<128xf32, #tpu.memory_space<any>>
    %c0_i32_51 = arith.constant 0 : i32
    %114 = tpu.memref_slice %arg10[%c12_i32_48, %c0_i32_51] : memref<32x128xf32, #tpu.memory_space<vmem>> -> memref<1x128xf32, #tpu.memory_space<vmem>>
    %115 = tpu.memref_squeeze %114 : memref<1x128xf32, #tpu.memory_space<vmem>> -> memref<128xf32, #tpu.memory_space<vmem>>
    %116 = tpu.memref_slice %arg13[%c0_i32_49] : memref<3x!tpu.dma_semaphore, #tpu.memory_space<semaphore_mem>> -> memref<1x!tpu.dma_semaphore, #tpu.memory_space<semaphore_mem>>
    %117 = tpu.memref_squeeze %116 : memref<1x!tpu.dma_semaphore, #tpu.memory_space<semaphore_mem>> -> memref<!tpu.dma_semaphore, #tpu.memory_space<semaphore_mem>>
    tpu.enqueue_dma source(%113 : memref<128xf32, #tpu.memory_space<any>>) target(%115 : memref<128xf32, #tpu.memory_space<vmem>>) target_semaphore(%117 : memref<!tpu.dma_semaphore, #tpu.memory_space<semaphore_mem>>)
    %c13_i32 = arith.constant 13 : i32
    %118 = arith.addi %0, %c13_i32 : i32
    %119 = arith.index_cast %118 : i32 to index
    %120 = memref.load %arg1[%119] : memref<128xi32, #tpu.memory_space<smem>>
    %c13_i32_52 = arith.constant 13 : i32
    %c0_i32_53 = arith.constant 0 : i32
    %c0_i32_54 = arith.constant 0 : i32
    %121 = tpu.memref_slice %arg4[%120, %c0_i32_54] : memref<512x128xf32, #tpu.memory_space<any>> -> memref<1x128xf32, #tpu.memory_space<any>>
    %122 = tpu.memref_squeeze %121 : memref<1x128xf32, #tpu.memory_space<any>> -> memref<128xf32, #tpu.memory_space<any>>
    %c0_i32_55 = arith.constant 0 : i32
    %123 = tpu.memref_slice %arg10[%c13_i32_52, %c0_i32_55] : memref<32x128xf32, #tpu.memory_space<vmem>> -> memref<1x128xf32, #tpu.memory_space<vmem>>
    %124 = tpu.memref_squeeze %123 : memref<1x128xf32, #tpu.memory_space<vmem>> -> memref<128xf32, #tpu.memory_space<vmem>>
    %125 = tpu.memref_slice %arg13[%c0_i32_53] : memref<3x!tpu.dma_semaphore, #tpu.memory_space<semaphore_mem>> -> memref<1x!tpu.dma_semaphore, #tpu.memory_space<semaphore_mem>>
    %126 = tpu.memref_squeeze %125 : memref<1x!tpu.dma_semaphore, #tpu.memory_space<semaphore_mem>> -> memref<!tpu.dma_semaphore, #tpu.memory_space<semaphore_mem>>
    tpu.enqueue_dma source(%122 : memref<128xf32, #tpu.memory_space<any>>) target(%124 : memref<128xf32, #tpu.memory_space<vmem>>) target_semaphore(%126 : memref<!tpu.dma_semaphore, #tpu.memory_space<semaphore_mem>>)
    %c14_i32 = arith.constant 14 : i32
    %127 = arith.addi %0, %c14_i32 : i32
    %128 = arith.index_cast %127 : i32 to index
    %129 = memref.load %arg1[%128] : memref<128xi32, #tpu.memory_space<smem>>
    %c14_i32_56 = arith.constant 14 : i32
    %c0_i32_57 = arith.constant 0 : i32
    %c0_i32_58 = arith.constant 0 : i32
    %130 = tpu.memref_slice %arg4[%129, %c0_i32_58] : memref<512x128xf32, #tpu.memory_space<any>> -> memref<1x128xf32, #tpu.memory_space<any>>
    %131 = tpu.memref_squeeze %130 : memref<1x128xf32, #tpu.memory_space<any>> -> memref<128xf32, #tpu.memory_space<any>>
    %c0_i32_59 = arith.constant 0 : i32
    %132 = tpu.memref_slice %arg10[%c14_i32_56, %c0_i32_59] : memref<32x128xf32, #tpu.memory_space<vmem>> -> memref<1x128xf32, #tpu.memory_space<vmem>>
    %133 = tpu.memref_squeeze %132 : memref<1x128xf32, #tpu.memory_space<vmem>> -> memref<128xf32, #tpu.memory_space<vmem>>
    %134 = tpu.memref_slice %arg13[%c0_i32_57] : memref<3x!tpu.dma_semaphore, #tpu.memory_space<semaphore_mem>> -> memref<1x!tpu.dma_semaphore, #tpu.memory_space<semaphore_mem>>
    %135 = tpu.memref_squeeze %134 : memref<1x!tpu.dma_semaphore, #tpu.memory_space<semaphore_mem>> -> memref<!tpu.dma_semaphore, #tpu.memory_space<semaphore_mem>>
    tpu.enqueue_dma source(%131 : memref<128xf32, #tpu.memory_space<any>>) target(%133 : memref<128xf32, #tpu.memory_space<vmem>>) target_semaphore(%135 : memref<!tpu.dma_semaphore, #tpu.memory_space<semaphore_mem>>)
    %c15_i32 = arith.constant 15 : i32
    %136 = arith.addi %0, %c15_i32 : i32
    %137 = arith.index_cast %136 : i32 to index
    %138 = memref.load %arg1[%137] : memref<128xi32, #tpu.memory_space<smem>>
    %c15_i32_60 = arith.constant 15 : i32
    %c0_i32_61 = arith.constant 0 : i32
    %c0_i32_62 = arith.constant 0 : i32
    %139 = tpu.memref_slice %arg4[%138, %c0_i32_62] : memref<512x128xf32, #tpu.memory_space<any>> -> memref<1x128xf32, #tpu.memory_space<any>>
    %140 = tpu.memref_squeeze %139 : memref<1x128xf32, #tpu.memory_space<any>> -> memref<128xf32, #tpu.memory_space<any>>
    %c0_i32_63 = arith.constant 0 : i32
    %141 = tpu.memref_slice %arg10[%c15_i32_60, %c0_i32_63] : memref<32x128xf32, #tpu.memory_space<vmem>> -> memref<1x128xf32, #tpu.memory_space<vmem>>
    %142 = tpu.memref_squeeze %141 : memref<1x128xf32, #tpu.memory_space<vmem>> -> memref<128xf32, #tpu.memory_space<vmem>>
    %143 = tpu.memref_slice %arg13[%c0_i32_61] : memref<3x!tpu.dma_semaphore, #tpu.memory_space<semaphore_mem>> -> memref<1x!tpu.dma_semaphore, #tpu.memory_space<semaphore_mem>>
    %144 = tpu.memref_squeeze %143 : memref<1x!tpu.dma_semaphore, #tpu.memory_space<semaphore_mem>> -> memref<!tpu.dma_semaphore, #tpu.memory_space<semaphore_mem>>
    tpu.enqueue_dma source(%140 : memref<128xf32, #tpu.memory_space<any>>) target(%142 : memref<128xf32, #tpu.memory_space<vmem>>) target_semaphore(%144 : memref<!tpu.dma_semaphore, #tpu.memory_space<semaphore_mem>>)
    %c16_i32 = arith.constant 16 : i32
    %145 = arith.addi %0, %c16_i32 : i32
    %146 = arith.index_cast %145 : i32 to index
    %147 = memref.load %arg1[%146] : memref<128xi32, #tpu.memory_space<smem>>
    %c16_i32_64 = arith.constant 16 : i32
    %c0_i32_65 = arith.constant 0 : i32
    %c0_i32_66 = arith.constant 0 : i32
    %148 = tpu.memref_slice %arg4[%147, %c0_i32_66] : memref<512x128xf32, #tpu.memory_space<any>> -> memref<1x128xf32, #tpu.memory_space<any>>
    %149 = tpu.memref_squeeze %148 : memref<1x128xf32, #tpu.memory_space<any>> -> memref<128xf32, #tpu.memory_space<any>>
    %c0_i32_67 = arith.constant 0 : i32
    %150 = tpu.memref_slice %arg10[%c16_i32_64, %c0_i32_67] : memref<32x128xf32, #tpu.memory_space<vmem>> -> memref<1x128xf32, #tpu.memory_space<vmem>>
    %151 = tpu.memref_squeeze %150 : memref<1x128xf32, #tpu.memory_space<vmem>> -> memref<128xf32, #tpu.memory_space<vmem>>
    %152 = tpu.memref_slice %arg13[%c0_i32_65] : memref<3x!tpu.dma_semaphore, #tpu.memory_space<semaphore_mem>> -> memref<1x!tpu.dma_semaphore, #tpu.memory_space<semaphore_mem>>
    %153 = tpu.memref_squeeze %152 : memref<1x!tpu.dma_semaphore, #tpu.memory_space<semaphore_mem>> -> memref<!tpu.dma_semaphore, #tpu.memory_space<semaphore_mem>>
    tpu.enqueue_dma source(%149 : memref<128xf32, #tpu.memory_space<any>>) target(%151 : memref<128xf32, #tpu.memory_space<vmem>>) target_semaphore(%153 : memref<!tpu.dma_semaphore, #tpu.memory_space<semaphore_mem>>)
    %c17_i32 = arith.constant 17 : i32
    %154 = arith.addi %0, %c17_i32 : i32
    %155 = arith.index_cast %154 : i32 to index
    %156 = memref.load %arg1[%155] : memref<128xi32, #tpu.memory_space<smem>>
    %c17_i32_68 = arith.constant 17 : i32
    %c0_i32_69 = arith.constant 0 : i32
    %c0_i32_70 = arith.constant 0 : i32
    %157 = tpu.memref_slice %arg4[%156, %c0_i32_70] : memref<512x128xf32, #tpu.memory_space<any>> -> memref<1x128xf32, #tpu.memory_space<any>>
    %158 = tpu.memref_squeeze %157 : memref<1x128xf32, #tpu.memory_space<any>> -> memref<128xf32, #tpu.memory_space<any>>
    %c0_i32_71 = arith.constant 0 : i32
    %159 = tpu.memref_slice %arg10[%c17_i32_68, %c0_i32_71] : memref<32x128xf32, #tpu.memory_space<vmem>> -> memref<1x128xf32, #tpu.memory_space<vmem>>
    %160 = tpu.memref_squeeze %159 : memref<1x128xf32, #tpu.memory_space<vmem>> -> memref<128xf32, #tpu.memory_space<vmem>>
    %161 = tpu.memref_slice %arg13[%c0_i32_69] : memref<3x!tpu.dma_semaphore, #tpu.memory_space<semaphore_mem>> -> memref<1x!tpu.dma_semaphore, #tpu.memory_space<semaphore_mem>>
    %162 = tpu.memref_squeeze %161 : memref<1x!tpu.dma_semaphore, #tpu.memory_space<semaphore_mem>> -> memref<!tpu.dma_semaphore, #tpu.memory_space<semaphore_mem>>
    tpu.enqueue_dma source(%158 : memref<128xf32, #tpu.memory_space<any>>) target(%160 : memref<128xf32, #tpu.memory_space<vmem>>) target_semaphore(%162 : memref<!tpu.dma_semaphore, #tpu.memory_space<semaphore_mem>>)
    %c18_i32 = arith.constant 18 : i32
    %163 = arith.addi %0, %c18_i32 : i32
    %164 = arith.index_cast %163 : i32 to index
    %165 = memref.load %arg1[%164] : memref<128xi32, #tpu.memory_space<smem>>
    %c18_i32_72 = arith.constant 18 : i32
    %c0_i32_73 = arith.constant 0 : i32
    %c0_i32_74 = arith.constant 0 : i32
    %166 = tpu.memref_slice %arg4[%165, %c0_i32_74] : memref<512x128xf32, #tpu.memory_space<any>> -> memref<1x128xf32, #tpu.memory_space<any>>
    %167 = tpu.memref_squeeze %166 : memref<1x128xf32, #tpu.memory_space<any>> -> memref<128xf32, #tpu.memory_space<any>>
    %c0_i32_75 = arith.constant 0 : i32
    %168 = tpu.memref_slice %arg10[%c18_i32_72, %c0_i32_75] : memref<32x128xf32, #tpu.memory_space<vmem>> -> memref<1x128xf32, #tpu.memory_space<vmem>>
    %169 = tpu.memref_squeeze %168 : memref<1x128xf32, #tpu.memory_space<vmem>> -> memref<128xf32, #tpu.memory_space<vmem>>
    %170 = tpu.memref_slice %arg13[%c0_i32_73] : memref<3x!tpu.dma_semaphore, #tpu.memory_space<semaphore_mem>> -> memref<1x!tpu.dma_semaphore, #tpu.memory_space<semaphore_mem>>
    %171 = tpu.memref_squeeze %170 : memref<1x!tpu.dma_semaphore, #tpu.memory_space<semaphore_mem>> -> memref<!tpu.dma_semaphore, #tpu.memory_space<semaphore_mem>>
    tpu.enqueue_dma source(%167 : memref<128xf32, #tpu.memory_space<any>>) target(%169 : memref<128xf32, #tpu.memory_space<vmem>>) target_semaphore(%171 : memref<!tpu.dma_semaphore, #tpu.memory_space<semaphore_mem>>)
    %c19_i32 = arith.constant 19 : i32
    %172 = arith.addi %0, %c19_i32 : i32
    %173 = arith.index_cast %172 : i32 to index
    %174 = memref.load %arg1[%173] : memref<128xi32, #tpu.memory_space<smem>>
    %c19_i32_76 = arith.constant 19 : i32
    %c0_i32_77 = arith.constant 0 : i32
    %c0_i32_78 = arith.constant 0 : i32
    %175 = tpu.memref_slice %arg4[%174, %c0_i32_78] : memref<512x128xf32, #tpu.memory_space<any>> -> memref<1x128xf32, #tpu.memory_space<any>>
    %176 = tpu.memref_squeeze %175 : memref<1x128xf32, #tpu.memory_space<any>> -> memref<128xf32, #tpu.memory_space<any>>
    %c0_i32_79 = arith.constant 0 : i32
    %177 = tpu.memref_slice %arg10[%c19_i32_76, %c0_i32_79] : memref<32x128xf32, #tpu.memory_space<vmem>> -> memref<1x128xf32, #tpu.memory_space<vmem>>
    %178 = tpu.memref_squeeze %177 : memref<1x128xf32, #tpu.memory_space<vmem>> -> memref<128xf32, #tpu.memory_space<vmem>>
    %179 = tpu.memref_slice %arg13[%c0_i32_77] : memref<3x!tpu.dma_semaphore, #tpu.memory_space<semaphore_mem>> -> memref<1x!tpu.dma_semaphore, #tpu.memory_space<semaphore_mem>>
    %180 = tpu.memref_squeeze %179 : memref<1x!tpu.dma_semaphore, #tpu.memory_space<semaphore_mem>> -> memref<!tpu.dma_semaphore, #tpu.memory_space<semaphore_mem>>
    tpu.enqueue_dma source(%176 : memref<128xf32, #tpu.memory_space<any>>) target(%178 : memref<128xf32, #tpu.memory_space<vmem>>) target_semaphore(%180 : memref<!tpu.dma_semaphore, #tpu.memory_space<semaphore_mem>>)
    %c20_i32 = arith.constant 20 : i32
    %181 = arith.addi %0, %c20_i32 : i32
    %182 = arith.index_cast %181 : i32 to index
    %183 = memref.load %arg1[%182] : memref<128xi32, #tpu.memory_space<smem>>
    %c20_i32_80 = arith.constant 20 : i32
    %c0_i32_81 = arith.constant 0 : i32
    %c0_i32_82 = arith.constant 0 : i32
    %184 = tpu.memref_slice %arg4[%183, %c0_i32_82] : memref<512x128xf32, #tpu.memory_space<any>> -> memref<1x128xf32, #tpu.memory_space<any>>
    %185 = tpu.memref_squeeze %184 : memref<1x128xf32, #tpu.memory_space<any>> -> memref<128xf32, #tpu.memory_space<any>>
    %c0_i32_83 = arith.constant 0 : i32
    %186 = tpu.memref_slice %arg10[%c20_i32_80, %c0_i32_83] : memref<32x128xf32, #tpu.memory_space<vmem>> -> memref<1x128xf32, #tpu.memory_space<vmem>>
    %187 = tpu.memref_squeeze %186 : memref<1x128xf32, #tpu.memory_space<vmem>> -> memref<128xf32, #tpu.memory_space<vmem>>
    %188 = tpu.memref_slice %arg13[%c0_i32_81] : memref<3x!tpu.dma_semaphore, #tpu.memory_space<semaphore_mem>> -> memref<1x!tpu.dma_semaphore, #tpu.memory_space<semaphore_mem>>
    %189 = tpu.memref_squeeze %188 : memref<1x!tpu.dma_semaphore, #tpu.memory_space<semaphore_mem>> -> memref<!tpu.dma_semaphore, #tpu.memory_space<semaphore_mem>>
    tpu.enqueue_dma source(%185 : memref<128xf32, #tpu.memory_space<any>>) target(%187 : memref<128xf32, #tpu.memory_space<vmem>>) target_semaphore(%189 : memref<!tpu.dma_semaphore, #tpu.memory_space<semaphore_mem>>)
    %c21_i32 = arith.constant 21 : i32
    %190 = arith.addi %0, %c21_i32 : i32
    %191 = arith.index_cast %190 : i32 to index
    %192 = memref.load %arg1[%191] : memref<128xi32, #tpu.memory_space<smem>>
    %c21_i32_84 = arith.constant 21 : i32
    %c0_i32_85 = arith.constant 0 : i32
    %c0_i32_86 = arith.constant 0 : i32
    %193 = tpu.memref_slice %arg4[%192, %c0_i32_86] : memref<512x128xf32, #tpu.memory_space<any>> -> memref<1x128xf32, #tpu.memory_space<any>>
    %194 = tpu.memref_squeeze %193 : memref<1x128xf32, #tpu.memory_space<any>> -> memref<128xf32, #tpu.memory_space<any>>
    %c0_i32_87 = arith.constant 0 : i32
    %195 = tpu.memref_slice %arg10[%c21_i32_84, %c0_i32_87] : memref<32x128xf32, #tpu.memory_space<vmem>> -> memref<1x128xf32, #tpu.memory_space<vmem>>
    %196 = tpu.memref_squeeze %195 : memref<1x128xf32, #tpu.memory_space<vmem>> -> memref<128xf32, #tpu.memory_space<vmem>>
    %197 = tpu.memref_slice %arg13[%c0_i32_85] : memref<3x!tpu.dma_semaphore, #tpu.memory_space<semaphore_mem>> -> memref<1x!tpu.dma_semaphore, #tpu.memory_space<semaphore_mem>>
    %198 = tpu.memref_squeeze %197 : memref<1x!tpu.dma_semaphore, #tpu.memory_space<semaphore_mem>> -> memref<!tpu.dma_semaphore, #tpu.memory_space<semaphore_mem>>
    tpu.enqueue_dma source(%194 : memref<128xf32, #tpu.memory_space<any>>) target(%196 : memref<128xf32, #tpu.memory_space<vmem>>) target_semaphore(%198 : memref<!tpu.dma_semaphore, #tpu.memory_space<semaphore_mem>>)
    %c22_i32 = arith.constant 22 : i32
    %199 = arith.addi %0, %c22_i32 : i32
    %200 = arith.index_cast %199 : i32 to index
    %201 = memref.load %arg1[%200] : memref<128xi32, #tpu.memory_space<smem>>
    %c22_i32_88 = arith.constant 22 : i32
    %c0_i32_89 = arith.constant 0 : i32
    %c0_i32_90 = arith.constant 0 : i32
    %202 = tpu.memref_slice %arg4[%201, %c0_i32_90] : memref<512x128xf32, #tpu.memory_space<any>> -> memref<1x128xf32, #tpu.memory_space<any>>
    %203 = tpu.memref_squeeze %202 : memref<1x128xf32, #tpu.memory_space<any>> -> memref<128xf32, #tpu.memory_space<any>>
    %c0_i32_91 = arith.constant 0 : i32
    %204 = tpu.memref_slice %arg10[%c22_i32_88, %c0_i32_91] : memref<32x128xf32, #tpu.memory_space<vmem>> -> memref<1x128xf32, #tpu.memory_space<vmem>>
    %205 = tpu.memref_squeeze %204 : memref<1x128xf32, #tpu.memory_space<vmem>> -> memref<128xf32, #tpu.memory_space<vmem>>
    %206 = tpu.memref_slice %arg13[%c0_i32_89] : memref<3x!tpu.dma_semaphore, #tpu.memory_space<semaphore_mem>> -> memref<1x!tpu.dma_semaphore, #tpu.memory_space<semaphore_mem>>
    %207 = tpu.memref_squeeze %206 : memref<1x!tpu.dma_semaphore, #tpu.memory_space<semaphore_mem>> -> memref<!tpu.dma_semaphore, #tpu.memory_space<semaphore_mem>>
    tpu.enqueue_dma source(%203 : memref<128xf32, #tpu.memory_space<any>>) target(%205 : memref<128xf32, #tpu.memory_space<vmem>>) target_semaphore(%207 : memref<!tpu.dma_semaphore, #tpu.memory_space<semaphore_mem>>)
    %c23_i32 = arith.constant 23 : i32
    %208 = arith.addi %0, %c23_i32 : i32
    %209 = arith.index_cast %208 : i32 to index
    %210 = memref.load %arg1[%209] : memref<128xi32, #tpu.memory_space<smem>>
    %c23_i32_92 = arith.constant 23 : i32
    %c0_i32_93 = arith.constant 0 : i32
    %c0_i32_94 = arith.constant 0 : i32
    %211 = tpu.memref_slice %arg4[%210, %c0_i32_94] : memref<512x128xf32, #tpu.memory_space<any>> -> memref<1x128xf32, #tpu.memory_space<any>>
    %212 = tpu.memref_squeeze %211 : memref<1x128xf32, #tpu.memory_space<any>> -> memref<128xf32, #tpu.memory_space<any>>
    %c0_i32_95 = arith.constant 0 : i32
    %213 = tpu.memref_slice %arg10[%c23_i32_92, %c0_i32_95] : memref<32x128xf32, #tpu.memory_space<vmem>> -> memref<1x128xf32, #tpu.memory_space<vmem>>
    %214 = tpu.memref_squeeze %213 : memref<1x128xf32, #tpu.memory_space<vmem>> -> memref<128xf32, #tpu.memory_space<vmem>>
    %215 = tpu.memref_slice %arg13[%c0_i32_93] : memref<3x!tpu.dma_semaphore, #tpu.memory_space<semaphore_mem>> -> memref<1x!tpu.dma_semaphore, #tpu.memory_space<semaphore_mem>>
    %216 = tpu.memref_squeeze %215 : memref<1x!tpu.dma_semaphore, #tpu.memory_space<semaphore_mem>> -> memref<!tpu.dma_semaphore, #tpu.memory_space<semaphore_mem>>
    tpu.enqueue_dma source(%212 : memref<128xf32, #tpu.memory_space<any>>) target(%214 : memref<128xf32, #tpu.memory_space<vmem>>) target_semaphore(%216 : memref<!tpu.dma_semaphore, #tpu.memory_space<semaphore_mem>>)
    %c24_i32 = arith.constant 24 : i32
    %217 = arith.addi %0, %c24_i32 : i32
    %218 = arith.index_cast %217 : i32 to index
    %219 = memref.load %arg1[%218] : memref<128xi32, #tpu.memory_space<smem>>
    %c24_i32_96 = arith.constant 24 : i32
    %c0_i32_97 = arith.constant 0 : i32
    %c0_i32_98 = arith.constant 0 : i32
    %220 = tpu.memref_slice %arg4[%219, %c0_i32_98] : memref<512x128xf32, #tpu.memory_space<any>> -> memref<1x128xf32, #tpu.memory_space<any>>
    %221 = tpu.memref_squeeze %220 : memref<1x128xf32, #tpu.memory_space<any>> -> memref<128xf32, #tpu.memory_space<any>>
    %c0_i32_99 = arith.constant 0 : i32
    %222 = tpu.memref_slice %arg10[%c24_i32_96, %c0_i32_99] : memref<32x128xf32, #tpu.memory_space<vmem>> -> memref<1x128xf32, #tpu.memory_space<vmem>>
    %223 = tpu.memref_squeeze %222 : memref<1x128xf32, #tpu.memory_space<vmem>> -> memref<128xf32, #tpu.memory_space<vmem>>
    %224 = tpu.memref_slice %arg13[%c0_i32_97] : memref<3x!tpu.dma_semaphore, #tpu.memory_space<semaphore_mem>> -> memref<1x!tpu.dma_semaphore, #tpu.memory_space<semaphore_mem>>
    %225 = tpu.memref_squeeze %224 : memref<1x!tpu.dma_semaphore, #tpu.memory_space<semaphore_mem>> -> memref<!tpu.dma_semaphore, #tpu.memory_space<semaphore_mem>>
    tpu.enqueue_dma source(%221 : memref<128xf32, #tpu.memory_space<any>>) target(%223 : memref<128xf32, #tpu.memory_space<vmem>>) target_semaphore(%225 : memref<!tpu.dma_semaphore, #tpu.memory_space<semaphore_mem>>)
    %c25_i32 = arith.constant 25 : i32
    %226 = arith.addi %0, %c25_i32 : i32
    %227 = arith.index_cast %226 : i32 to index
    %228 = memref.load %arg1[%227] : memref<128xi32, #tpu.memory_space<smem>>
    %c25_i32_100 = arith.constant 25 : i32
    %c0_i32_101 = arith.constant 0 : i32
    %c0_i32_102 = arith.constant 0 : i32
    %229 = tpu.memref_slice %arg4[%228, %c0_i32_102] : memref<512x128xf32, #tpu.memory_space<any>> -> memref<1x128xf32, #tpu.memory_space<any>>
    %230 = tpu.memref_squeeze %229 : memref<1x128xf32, #tpu.memory_space<any>> -> memref<128xf32, #tpu.memory_space<any>>
    %c0_i32_103 = arith.constant 0 : i32
    %231 = tpu.memref_slice %arg10[%c25_i32_100, %c0_i32_103] : memref<32x128xf32, #tpu.memory_space<vmem>> -> memref<1x128xf32, #tpu.memory_space<vmem>>
    %232 = tpu.memref_squeeze %231 : memref<1x128xf32, #tpu.memory_space<vmem>> -> memref<128xf32, #tpu.memory_space<vmem>>
    %233 = tpu.memref_slice %arg13[%c0_i32_101] : memref<3x!tpu.dma_semaphore, #tpu.memory_space<semaphore_mem>> -> memref<1x!tpu.dma_semaphore, #tpu.memory_space<semaphore_mem>>
    %234 = tpu.memref_squeeze %233 : memref<1x!tpu.dma_semaphore, #tpu.memory_space<semaphore_mem>> -> memref<!tpu.dma_semaphore, #tpu.memory_space<semaphore_mem>>
    tpu.enqueue_dma source(%230 : memref<128xf32, #tpu.memory_space<any>>) target(%232 : memref<128xf32, #tpu.memory_space<vmem>>) target_semaphore(%234 : memref<!tpu.dma_semaphore, #tpu.memory_space<semaphore_mem>>)
    %c26_i32 = arith.constant 26 : i32
    %235 = arith.addi %0, %c26_i32 : i32
    %236 = arith.index_cast %235 : i32 to index
    %237 = memref.load %arg1[%236] : memref<128xi32, #tpu.memory_space<smem>>
    %c26_i32_104 = arith.constant 26 : i32
    %c0_i32_105 = arith.constant 0 : i32
    %c0_i32_106 = arith.constant 0 : i32
    %238 = tpu.memref_slice %arg4[%237, %c0_i32_106] : memref<512x128xf32, #tpu.memory_space<any>> -> memref<1x128xf32, #tpu.memory_space<any>>
    %239 = tpu.memref_squeeze %238 : memref<1x128xf32, #tpu.memory_space<any>> -> memref<128xf32, #tpu.memory_space<any>>
    %c0_i32_107 = arith.constant 0 : i32
    %240 = tpu.memref_slice %arg10[%c26_i32_104, %c0_i32_107] : memref<32x128xf32, #tpu.memory_space<vmem>> -> memref<1x128xf32, #tpu.memory_space<vmem>>
    %241 = tpu.memref_squeeze %240 : memref<1x128xf32, #tpu.memory_space<vmem>> -> memref<128xf32, #tpu.memory_space<vmem>>
    %242 = tpu.memref_slice %arg13[%c0_i32_105] : memref<3x!tpu.dma_semaphore, #tpu.memory_space<semaphore_mem>> -> memref<1x!tpu.dma_semaphore, #tpu.memory_space<semaphore_mem>>
    %243 = tpu.memref_squeeze %242 : memref<1x!tpu.dma_semaphore, #tpu.memory_space<semaphore_mem>> -> memref<!tpu.dma_semaphore, #tpu.memory_space<semaphore_mem>>
    tpu.enqueue_dma source(%239 : memref<128xf32, #tpu.memory_space<any>>) target(%241 : memref<128xf32, #tpu.memory_space<vmem>>) target_semaphore(%243 : memref<!tpu.dma_semaphore, #tpu.memory_space<semaphore_mem>>)
    %c27_i32 = arith.constant 27 : i32
    %244 = arith.addi %0, %c27_i32 : i32
    %245 = arith.index_cast %244 : i32 to index
    %246 = memref.load %arg1[%245] : memref<128xi32, #tpu.memory_space<smem>>
    %c27_i32_108 = arith.constant 27 : i32
    %c0_i32_109 = arith.constant 0 : i32
    %c0_i32_110 = arith.constant 0 : i32
    %247 = tpu.memref_slice %arg4[%246, %c0_i32_110] : memref<512x128xf32, #tpu.memory_space<any>> -> memref<1x128xf32, #tpu.memory_space<any>>
    %248 = tpu.memref_squeeze %247 : memref<1x128xf32, #tpu.memory_space<any>> -> memref<128xf32, #tpu.memory_space<any>>
    %c0_i32_111 = arith.constant 0 : i32
    %249 = tpu.memref_slice %arg10[%c27_i32_108, %c0_i32_111] : memref<32x128xf32, #tpu.memory_space<vmem>> -> memref<1x128xf32, #tpu.memory_space<vmem>>
    %250 = tpu.memref_squeeze %249 : memref<1x128xf32, #tpu.memory_space<vmem>> -> memref<128xf32, #tpu.memory_space<vmem>>
    %251 = tpu.memref_slice %arg13[%c0_i32_109] : memref<3x!tpu.dma_semaphore, #tpu.memory_space<semaphore_mem>> -> memref<1x!tpu.dma_semaphore, #tpu.memory_space<semaphore_mem>>
    %252 = tpu.memref_squeeze %251 : memref<1x!tpu.dma_semaphore, #tpu.memory_space<semaphore_mem>> -> memref<!tpu.dma_semaphore, #tpu.memory_space<semaphore_mem>>
    tpu.enqueue_dma source(%248 : memref<128xf32, #tpu.memory_space<any>>) target(%250 : memref<128xf32, #tpu.memory_space<vmem>>) target_semaphore(%252 : memref<!tpu.dma_semaphore, #tpu.memory_space<semaphore_mem>>)
    %c28_i32 = arith.constant 28 : i32
    %253 = arith.addi %0, %c28_i32 : i32
    %254 = arith.index_cast %253 : i32 to index
    %255 = memref.load %arg1[%254] : memref<128xi32, #tpu.memory_space<smem>>
    %c28_i32_112 = arith.constant 28 : i32
    %c0_i32_113 = arith.constant 0 : i32
    %c0_i32_114 = arith.constant 0 : i32
    %256 = tpu.memref_slice %arg4[%255, %c0_i32_114] : memref<512x128xf32, #tpu.memory_space<any>> -> memref<1x128xf32, #tpu.memory_space<any>>
    %257 = tpu.memref_squeeze %256 : memref<1x128xf32, #tpu.memory_space<any>> -> memref<128xf32, #tpu.memory_space<any>>
    %c0_i32_115 = arith.constant 0 : i32
    %258 = tpu.memref_slice %arg10[%c28_i32_112, %c0_i32_115] : memref<32x128xf32, #tpu.memory_space<vmem>> -> memref<1x128xf32, #tpu.memory_space<vmem>>
    %259 = tpu.memref_squeeze %258 : memref<1x128xf32, #tpu.memory_space<vmem>> -> memref<128xf32, #tpu.memory_space<vmem>>
    %260 = tpu.memref_slice %arg13[%c0_i32_113] : memref<3x!tpu.dma_semaphore, #tpu.memory_space<semaphore_mem>> -> memref<1x!tpu.dma_semaphore, #tpu.memory_space<semaphore_mem>>
    %261 = tpu.memref_squeeze %260 : memref<1x!tpu.dma_semaphore, #tpu.memory_space<semaphore_mem>> -> memref<!tpu.dma_semaphore, #tpu.memory_space<semaphore_mem>>
    tpu.enqueue_dma source(%257 : memref<128xf32, #tpu.memory_space<any>>) target(%259 : memref<128xf32, #tpu.memory_space<vmem>>) target_semaphore(%261 : memref<!tpu.dma_semaphore, #tpu.memory_space<semaphore_mem>>)
    %c29_i32 = arith.constant 29 : i32
    %262 = arith.addi %0, %c29_i32 : i32
    %263 = arith.index_cast %262 : i32 to index
    %264 = memref.load %arg1[%263] : memref<128xi32, #tpu.memory_space<smem>>
    %c29_i32_116 = arith.constant 29 : i32
    %c0_i32_117 = arith.constant 0 : i32
    %c0_i32_118 = arith.constant 0 : i32
    %265 = tpu.memref_slice %arg4[%264, %c0_i32_118] : memref<512x128xf32, #tpu.memory_space<any>> -> memref<1x128xf32, #tpu.memory_space<any>>
    %266 = tpu.memref_squeeze %265 : memref<1x128xf32, #tpu.memory_space<any>> -> memref<128xf32, #tpu.memory_space<any>>
    %c0_i32_119 = arith.constant 0 : i32
    %267 = tpu.memref_slice %arg10[%c29_i32_116, %c0_i32_119] : memref<32x128xf32, #tpu.memory_space<vmem>> -> memref<1x128xf32, #tpu.memory_space<vmem>>
    %268 = tpu.memref_squeeze %267 : memref<1x128xf32, #tpu.memory_space<vmem>> -> memref<128xf32, #tpu.memory_space<vmem>>
    %269 = tpu.memref_slice %arg13[%c0_i32_117] : memref<3x!tpu.dma_semaphore, #tpu.memory_space<semaphore_mem>> -> memref<1x!tpu.dma_semaphore, #tpu.memory_space<semaphore_mem>>
    %270 = tpu.memref_squeeze %269 : memref<1x!tpu.dma_semaphore, #tpu.memory_space<semaphore_mem>> -> memref<!tpu.dma_semaphore, #tpu.memory_space<semaphore_mem>>
    tpu.enqueue_dma source(%266 : memref<128xf32, #tpu.memory_space<any>>) target(%268 : memref<128xf32, #tpu.memory_space<vmem>>) target_semaphore(%270 : memref<!tpu.dma_semaphore, #tpu.memory_space<semaphore_mem>>)
    %c30_i32 = arith.constant 30 : i32
    %271 = arith.addi %0, %c30_i32 : i32
    %272 = arith.index_cast %271 : i32 to index
    %273 = memref.load %arg1[%272] : memref<128xi32, #tpu.memory_space<smem>>
    %c30_i32_120 = arith.constant 30 : i32
    %c0_i32_121 = arith.constant 0 : i32
    %c0_i32_122 = arith.constant 0 : i32
    %274 = tpu.memref_slice %arg4[%273, %c0_i32_122] : memref<512x128xf32, #tpu.memory_space<any>> -> memref<1x128xf32, #tpu.memory_space<any>>
    %275 = tpu.memref_squeeze %274 : memref<1x128xf32, #tpu.memory_space<any>> -> memref<128xf32, #tpu.memory_space<any>>
    %c0_i32_123 = arith.constant 0 : i32
    %276 = tpu.memref_slice %arg10[%c30_i32_120, %c0_i32_123] : memref<32x128xf32, #tpu.memory_space<vmem>> -> memref<1x128xf32, #tpu.memory_space<vmem>>
    %277 = tpu.memref_squeeze %276 : memref<1x128xf32, #tpu.memory_space<vmem>> -> memref<128xf32, #tpu.memory_space<vmem>>
    %278 = tpu.memref_slice %arg13[%c0_i32_121] : memref<3x!tpu.dma_semaphore, #tpu.memory_space<semaphore_mem>> -> memref<1x!tpu.dma_semaphore, #tpu.memory_space<semaphore_mem>>
    %279 = tpu.memref_squeeze %278 : memref<1x!tpu.dma_semaphore, #tpu.memory_space<semaphore_mem>> -> memref<!tpu.dma_semaphore, #tpu.memory_space<semaphore_mem>>
    tpu.enqueue_dma source(%275 : memref<128xf32, #tpu.memory_space<any>>) target(%277 : memref<128xf32, #tpu.memory_space<vmem>>) target_semaphore(%279 : memref<!tpu.dma_semaphore, #tpu.memory_space<semaphore_mem>>)
    %c31_i32 = arith.constant 31 : i32
    %280 = arith.addi %0, %c31_i32 : i32
    %281 = arith.index_cast %280 : i32 to index
    %282 = memref.load %arg1[%281] : memref<128xi32, #tpu.memory_space<smem>>
    %c31_i32_124 = arith.constant 31 : i32
    %c0_i32_125 = arith.constant 0 : i32
    %c0_i32_126 = arith.constant 0 : i32
    %283 = tpu.memref_slice %arg4[%282, %c0_i32_126] : memref<512x128xf32, #tpu.memory_space<any>> -> memref<1x128xf32, #tpu.memory_space<any>>
    %284 = tpu.memref_squeeze %283 : memref<1x128xf32, #tpu.memory_space<any>> -> memref<128xf32, #tpu.memory_space<any>>
    %c0_i32_127 = arith.constant 0 : i32
    %285 = tpu.memref_slice %arg10[%c31_i32_124, %c0_i32_127] : memref<32x128xf32, #tpu.memory_space<vmem>> -> memref<1x128xf32, #tpu.memory_space<vmem>>
    %286 = tpu.memref_squeeze %285 : memref<1x128xf32, #tpu.memory_space<vmem>> -> memref<128xf32, #tpu.memory_space<vmem>>
    %287 = tpu.memref_slice %arg13[%c0_i32_125] : memref<3x!tpu.dma_semaphore, #tpu.memory_space<semaphore_mem>> -> memref<1x!tpu.dma_semaphore, #tpu.memory_space<semaphore_mem>>
    %288 = tpu.memref_squeeze %287 : memref<1x!tpu.dma_semaphore, #tpu.memory_space<semaphore_mem>> -> memref<!tpu.dma_semaphore, #tpu.memory_space<semaphore_mem>>
    tpu.enqueue_dma source(%284 : memref<128xf32, #tpu.memory_space<any>>) target(%286 : memref<128xf32, #tpu.memory_space<vmem>>) target_semaphore(%288 : memref<!tpu.dma_semaphore, #tpu.memory_space<semaphore_mem>>)
    %c0_i32_128 = arith.constant 0 : i32
    %289 = arith.addi %0, %c0_i32_128 : i32
    %290 = arith.index_cast %289 : i32 to index
    %291 = memref.load %arg2[%290] : memref<128xi32, #tpu.memory_space<smem>>
    %c0_i32_129 = arith.constant 0 : i32
    %c1_i32_130 = arith.constant 1 : i32
    %c0_i32_131 = arith.constant 0 : i32
    %292 = tpu.memref_slice %arg5[%291, %c0_i32_131] : memref<2x128xf32, #tpu.memory_space<any>> -> memref<1x128xf32, #tpu.memory_space<any>>
    %293 = tpu.memref_squeeze %292 : memref<1x128xf32, #tpu.memory_space<any>> -> memref<128xf32, #tpu.memory_space<any>>
    %c0_i32_132 = arith.constant 0 : i32
    %294 = tpu.memref_slice %arg11[%c0_i32_129, %c0_i32_132] : memref<32x128xf32, #tpu.memory_space<vmem>> -> memref<1x128xf32, #tpu.memory_space<vmem>>
    %295 = tpu.memref_squeeze %294 : memref<1x128xf32, #tpu.memory_space<vmem>> -> memref<128xf32, #tpu.memory_space<vmem>>
    %296 = tpu.memref_slice %arg13[%c1_i32_130] : memref<3x!tpu.dma_semaphore, #tpu.memory_space<semaphore_mem>> -> memref<1x!tpu.dma_semaphore, #tpu.memory_space<semaphore_mem>>
    %297 = tpu.memref_squeeze %296 : memref<1x!tpu.dma_semaphore, #tpu.memory_space<semaphore_mem>> -> memref<!tpu.dma_semaphore, #tpu.memory_space<semaphore_mem>>
    tpu.enqueue_dma source(%293 : memref<128xf32, #tpu.memory_space<any>>) target(%295 : memref<128xf32, #tpu.memory_space<vmem>>) target_semaphore(%297 : memref<!tpu.dma_semaphore, #tpu.memory_space<semaphore_mem>>)
    %c1_i32_133 = arith.constant 1 : i32
    %298 = arith.addi %0, %c1_i32_133 : i32
    %299 = arith.index_cast %298 : i32 to index
    %300 = memref.load %arg2[%299] : memref<128xi32, #tpu.memory_space<smem>>
    %c1_i32_134 = arith.constant 1 : i32
    %c1_i32_135 = arith.constant 1 : i32
    %c0_i32_136 = arith.constant 0 : i32
    %301 = tpu.memref_slice %arg5[%300, %c0_i32_136] : memref<2x128xf32, #tpu.memory_space<any>> -> memref<1x128xf32, #tpu.memory_space<any>>
    %302 = tpu.memref_squeeze %301 : memref<1x128xf32, #tpu.memory_space<any>> -> memref<128xf32, #tpu.memory_space<any>>
    %c0_i32_137 = arith.constant 0 : i32
    %303 = tpu.memref_slice %arg11[%c1_i32_134, %c0_i32_137] : memref<32x128xf32, #tpu.memory_space<vmem>> -> memref<1x128xf32, #tpu.memory_space<vmem>>
    %304 = tpu.memref_squeeze %303 : memref<1x128xf32, #tpu.memory_space<vmem>> -> memref<128xf32, #tpu.memory_space<vmem>>
    %305 = tpu.memref_slice %arg13[%c1_i32_135] : memref<3x!tpu.dma_semaphore, #tpu.memory_space<semaphore_mem>> -> memref<1x!tpu.dma_semaphore, #tpu.memory_space<semaphore_mem>>
    %306 = tpu.memref_squeeze %305 : memref<1x!tpu.dma_semaphore, #tpu.memory_space<semaphore_mem>> -> memref<!tpu.dma_semaphore, #tpu.memory_space<semaphore_mem>>
    tpu.enqueue_dma source(%302 : memref<128xf32, #tpu.memory_space<any>>) target(%304 : memref<128xf32, #tpu.memory_space<vmem>>) target_semaphore(%306 : memref<!tpu.dma_semaphore, #tpu.memory_space<semaphore_mem>>)
    %c2_i32_138 = arith.constant 2 : i32
    %307 = arith.addi %0, %c2_i32_138 : i32
    %308 = arith.index_cast %307 : i32 to index
    %309 = memref.load %arg2[%308] : memref<128xi32, #tpu.memory_space<smem>>
    %c2_i32_139 = arith.constant 2 : i32
    %c1_i32_140 = arith.constant 1 : i32
    %c0_i32_141 = arith.constant 0 : i32
    %310 = tpu.memref_slice %arg5[%309, %c0_i32_141] : memref<2x128xf32, #tpu.memory_space<any>> -> memref<1x128xf32, #tpu.memory_space<any>>
    %311 = tpu.memref_squeeze %310 : memref<1x128xf32, #tpu.memory_space<any>> -> memref<128xf32, #tpu.memory_space<any>>
    %c0_i32_142 = arith.constant 0 : i32
    %312 = tpu.memref_slice %arg11[%c2_i32_139, %c0_i32_142] : memref<32x128xf32, #tpu.memory_space<vmem>> -> memref<1x128xf32, #tpu.memory_space<vmem>>
    %313 = tpu.memref_squeeze %312 : memref<1x128xf32, #tpu.memory_space<vmem>> -> memref<128xf32, #tpu.memory_space<vmem>>
    %314 = tpu.memref_slice %arg13[%c1_i32_140] : memref<3x!tpu.dma_semaphore, #tpu.memory_space<semaphore_mem>> -> memref<1x!tpu.dma_semaphore, #tpu.memory_space<semaphore_mem>>
    %315 = tpu.memref_squeeze %314 : memref<1x!tpu.dma_semaphore, #tpu.memory_space<semaphore_mem>> -> memref<!tpu.dma_semaphore, #tpu.memory_space<semaphore_mem>>
    tpu.enqueue_dma source(%311 : memref<128xf32, #tpu.memory_space<any>>) target(%313 : memref<128xf32, #tpu.memory_space<vmem>>) target_semaphore(%315 : memref<!tpu.dma_semaphore, #tpu.memory_space<semaphore_mem>>)
    %c3_i32_143 = arith.constant 3 : i32
    %316 = arith.addi %0, %c3_i32_143 : i32
    %317 = arith.index_cast %316 : i32 to index
    %318 = memref.load %arg2[%317] : memref<128xi32, #tpu.memory_space<smem>>
    %c3_i32_144 = arith.constant 3 : i32
    %c1_i32_145 = arith.constant 1 : i32
    %c0_i32_146 = arith.constant 0 : i32
    %319 = tpu.memref_slice %arg5[%318, %c0_i32_146] : memref<2x128xf32, #tpu.memory_space<any>> -> memref<1x128xf32, #tpu.memory_space<any>>
    %320 = tpu.memref_squeeze %319 : memref<1x128xf32, #tpu.memory_space<any>> -> memref<128xf32, #tpu.memory_space<any>>
    %c0_i32_147 = arith.constant 0 : i32
    %321 = tpu.memref_slice %arg11[%c3_i32_144, %c0_i32_147] : memref<32x128xf32, #tpu.memory_space<vmem>> -> memref<1x128xf32, #tpu.memory_space<vmem>>
    %322 = tpu.memref_squeeze %321 : memref<1x128xf32, #tpu.memory_space<vmem>> -> memref<128xf32, #tpu.memory_space<vmem>>
    %323 = tpu.memref_slice %arg13[%c1_i32_145] : memref<3x!tpu.dma_semaphore, #tpu.memory_space<semaphore_mem>> -> memref<1x!tpu.dma_semaphore, #tpu.memory_space<semaphore_mem>>
    %324 = tpu.memref_squeeze %323 : memref<1x!tpu.dma_semaphore, #tpu.memory_space<semaphore_mem>> -> memref<!tpu.dma_semaphore, #tpu.memory_space<semaphore_mem>>
    tpu.enqueue_dma source(%320 : memref<128xf32, #tpu.memory_space<any>>) target(%322 : memref<128xf32, #tpu.memory_space<vmem>>) target_semaphore(%324 : memref<!tpu.dma_semaphore, #tpu.memory_space<semaphore_mem>>)
    %c4_i32_148 = arith.constant 4 : i32
    %325 = arith.addi %0, %c4_i32_148 : i32
    %326 = arith.index_cast %325 : i32 to index
    %327 = memref.load %arg2[%326] : memref<128xi32, #tpu.memory_space<smem>>
    %c4_i32_149 = arith.constant 4 : i32
    %c1_i32_150 = arith.constant 1 : i32
    %c0_i32_151 = arith.constant 0 : i32
    %328 = tpu.memref_slice %arg5[%327, %c0_i32_151] : memref<2x128xf32, #tpu.memory_space<any>> -> memref<1x128xf32, #tpu.memory_space<any>>
    %329 = tpu.memref_squeeze %328 : memref<1x128xf32, #tpu.memory_space<any>> -> memref<128xf32, #tpu.memory_space<any>>
    %c0_i32_152 = arith.constant 0 : i32
    %330 = tpu.memref_slice %arg11[%c4_i32_149, %c0_i32_152] : memref<32x128xf32, #tpu.memory_space<vmem>> -> memref<1x128xf32, #tpu.memory_space<vmem>>
    %331 = tpu.memref_squeeze %330 : memref<1x128xf32, #tpu.memory_space<vmem>> -> memref<128xf32, #tpu.memory_space<vmem>>
    %332 = tpu.memref_slice %arg13[%c1_i32_150] : memref<3x!tpu.dma_semaphore, #tpu.memory_space<semaphore_mem>> -> memref<1x!tpu.dma_semaphore, #tpu.memory_space<semaphore_mem>>
    %333 = tpu.memref_squeeze %332 : memref<1x!tpu.dma_semaphore, #tpu.memory_space<semaphore_mem>> -> memref<!tpu.dma_semaphore, #tpu.memory_space<semaphore_mem>>
    tpu.enqueue_dma source(%329 : memref<128xf32, #tpu.memory_space<any>>) target(%331 : memref<128xf32, #tpu.memory_space<vmem>>) target_semaphore(%333 : memref<!tpu.dma_semaphore, #tpu.memory_space<semaphore_mem>>)
    %c5_i32_153 = arith.constant 5 : i32
    %334 = arith.addi %0, %c5_i32_153 : i32
    %335 = arith.index_cast %334 : i32 to index
    %336 = memref.load %arg2[%335] : memref<128xi32, #tpu.memory_space<smem>>
    %c5_i32_154 = arith.constant 5 : i32
    %c1_i32_155 = arith.constant 1 : i32
    %c0_i32_156 = arith.constant 0 : i32
    %337 = tpu.memref_slice %arg5[%336, %c0_i32_156] : memref<2x128xf32, #tpu.memory_space<any>> -> memref<1x128xf32, #tpu.memory_space<any>>
    %338 = tpu.memref_squeeze %337 : memref<1x128xf32, #tpu.memory_space<any>> -> memref<128xf32, #tpu.memory_space<any>>
    %c0_i32_157 = arith.constant 0 : i32
    %339 = tpu.memref_slice %arg11[%c5_i32_154, %c0_i32_157] : memref<32x128xf32, #tpu.memory_space<vmem>> -> memref<1x128xf32, #tpu.memory_space<vmem>>
    %340 = tpu.memref_squeeze %339 : memref<1x128xf32, #tpu.memory_space<vmem>> -> memref<128xf32, #tpu.memory_space<vmem>>
    %341 = tpu.memref_slice %arg13[%c1_i32_155] : memref<3x!tpu.dma_semaphore, #tpu.memory_space<semaphore_mem>> -> memref<1x!tpu.dma_semaphore, #tpu.memory_space<semaphore_mem>>
    %342 = tpu.memref_squeeze %341 : memref<1x!tpu.dma_semaphore, #tpu.memory_space<semaphore_mem>> -> memref<!tpu.dma_semaphore, #tpu.memory_space<semaphore_mem>>
    tpu.enqueue_dma source(%338 : memref<128xf32, #tpu.memory_space<any>>) target(%340 : memref<128xf32, #tpu.memory_space<vmem>>) target_semaphore(%342 : memref<!tpu.dma_semaphore, #tpu.memory_space<semaphore_mem>>)
    %c6_i32_158 = arith.constant 6 : i32
    %343 = arith.addi %0, %c6_i32_158 : i32
    %344 = arith.index_cast %343 : i32 to index
    %345 = memref.load %arg2[%344] : memref<128xi32, #tpu.memory_space<smem>>
    %c6_i32_159 = arith.constant 6 : i32
    %c1_i32_160 = arith.constant 1 : i32
    %c0_i32_161 = arith.constant 0 : i32
    %346 = tpu.memref_slice %arg5[%345, %c0_i32_161] : memref<2x128xf32, #tpu.memory_space<any>> -> memref<1x128xf32, #tpu.memory_space<any>>
    %347 = tpu.memref_squeeze %346 : memref<1x128xf32, #tpu.memory_space<any>> -> memref<128xf32, #tpu.memory_space<any>>
    %c0_i32_162 = arith.constant 0 : i32
    %348 = tpu.memref_slice %arg11[%c6_i32_159, %c0_i32_162] : memref<32x128xf32, #tpu.memory_space<vmem>> -> memref<1x128xf32, #tpu.memory_space<vmem>>
    %349 = tpu.memref_squeeze %348 : memref<1x128xf32, #tpu.memory_space<vmem>> -> memref<128xf32, #tpu.memory_space<vmem>>
    %350 = tpu.memref_slice %arg13[%c1_i32_160] : memref<3x!tpu.dma_semaphore, #tpu.memory_space<semaphore_mem>> -> memref<1x!tpu.dma_semaphore, #tpu.memory_space<semaphore_mem>>
    %351 = tpu.memref_squeeze %350 : memref<1x!tpu.dma_semaphore, #tpu.memory_space<semaphore_mem>> -> memref<!tpu.dma_semaphore, #tpu.memory_space<semaphore_mem>>
    tpu.enqueue_dma source(%347 : memref<128xf32, #tpu.memory_space<any>>) target(%349 : memref<128xf32, #tpu.memory_space<vmem>>) target_semaphore(%351 : memref<!tpu.dma_semaphore, #tpu.memory_space<semaphore_mem>>)
    %c7_i32_163 = arith.constant 7 : i32
    %352 = arith.addi %0, %c7_i32_163 : i32
    %353 = arith.index_cast %352 : i32 to index
    %354 = memref.load %arg2[%353] : memref<128xi32, #tpu.memory_space<smem>>
    %c7_i32_164 = arith.constant 7 : i32
    %c1_i32_165 = arith.constant 1 : i32
    %c0_i32_166 = arith.constant 0 : i32
    %355 = tpu.memref_slice %arg5[%354, %c0_i32_166] : memref<2x128xf32, #tpu.memory_space<any>> -> memref<1x128xf32, #tpu.memory_space<any>>
    %356 = tpu.memref_squeeze %355 : memref<1x128xf32, #tpu.memory_space<any>> -> memref<128xf32, #tpu.memory_space<any>>
    %c0_i32_167 = arith.constant 0 : i32
    %357 = tpu.memref_slice %arg11[%c7_i32_164, %c0_i32_167] : memref<32x128xf32, #tpu.memory_space<vmem>> -> memref<1x128xf32, #tpu.memory_space<vmem>>
    %358 = tpu.memref_squeeze %357 : memref<1x128xf32, #tpu.memory_space<vmem>> -> memref<128xf32, #tpu.memory_space<vmem>>
    %359 = tpu.memref_slice %arg13[%c1_i32_165] : memref<3x!tpu.dma_semaphore, #tpu.memory_space<semaphore_mem>> -> memref<1x!tpu.dma_semaphore, #tpu.memory_space<semaphore_mem>>
    %360 = tpu.memref_squeeze %359 : memref<1x!tpu.dma_semaphore, #tpu.memory_space<semaphore_mem>> -> memref<!tpu.dma_semaphore, #tpu.memory_space<semaphore_mem>>
    tpu.enqueue_dma source(%356 : memref<128xf32, #tpu.memory_space<any>>) target(%358 : memref<128xf32, #tpu.memory_space<vmem>>) target_semaphore(%360 : memref<!tpu.dma_semaphore, #tpu.memory_space<semaphore_mem>>)
    %c8_i32_168 = arith.constant 8 : i32
    %361 = arith.addi %0, %c8_i32_168 : i32
    %362 = arith.index_cast %361 : i32 to index
    %363 = memref.load %arg2[%362] : memref<128xi32, #tpu.memory_space<smem>>
    %c8_i32_169 = arith.constant 8 : i32
    %c1_i32_170 = arith.constant 1 : i32
    %c0_i32_171 = arith.constant 0 : i32
    %364 = tpu.memref_slice %arg5[%363, %c0_i32_171] : memref<2x128xf32, #tpu.memory_space<any>> -> memref<1x128xf32, #tpu.memory_space<any>>
    %365 = tpu.memref_squeeze %364 : memref<1x128xf32, #tpu.memory_space<any>> -> memref<128xf32, #tpu.memory_space<any>>
    %c0_i32_172 = arith.constant 0 : i32
    %366 = tpu.memref_slice %arg11[%c8_i32_169, %c0_i32_172] : memref<32x128xf32, #tpu.memory_space<vmem>> -> memref<1x128xf32, #tpu.memory_space<vmem>>
    %367 = tpu.memref_squeeze %366 : memref<1x128xf32, #tpu.memory_space<vmem>> -> memref<128xf32, #tpu.memory_space<vmem>>
    %368 = tpu.memref_slice %arg13[%c1_i32_170] : memref<3x!tpu.dma_semaphore, #tpu.memory_space<semaphore_mem>> -> memref<1x!tpu.dma_semaphore, #tpu.memory_space<semaphore_mem>>
    %369 = tpu.memref_squeeze %368 : memref<1x!tpu.dma_semaphore, #tpu.memory_space<semaphore_mem>> -> memref<!tpu.dma_semaphore, #tpu.memory_space<semaphore_mem>>
    tpu.enqueue_dma source(%365 : memref<128xf32, #tpu.memory_space<any>>) target(%367 : memref<128xf32, #tpu.memory_space<vmem>>) target_semaphore(%369 : memref<!tpu.dma_semaphore, #tpu.memory_space<semaphore_mem>>)
    %c9_i32_173 = arith.constant 9 : i32
    %370 = arith.addi %0, %c9_i32_173 : i32
    %371 = arith.index_cast %370 : i32 to index
    %372 = memref.load %arg2[%371] : memref<128xi32, #tpu.memory_space<smem>>
    %c9_i32_174 = arith.constant 9 : i32
    %c1_i32_175 = arith.constant 1 : i32
    %c0_i32_176 = arith.constant 0 : i32
    %373 = tpu.memref_slice %arg5[%372, %c0_i32_176] : memref<2x128xf32, #tpu.memory_space<any>> -> memref<1x128xf32, #tpu.memory_space<any>>
    %374 = tpu.memref_squeeze %373 : memref<1x128xf32, #tpu.memory_space<any>> -> memref<128xf32, #tpu.memory_space<any>>
    %c0_i32_177 = arith.constant 0 : i32
    %375 = tpu.memref_slice %arg11[%c9_i32_174, %c0_i32_177] : memref<32x128xf32, #tpu.memory_space<vmem>> -> memref<1x128xf32, #tpu.memory_space<vmem>>
    %376 = tpu.memref_squeeze %375 : memref<1x128xf32, #tpu.memory_space<vmem>> -> memref<128xf32, #tpu.memory_space<vmem>>
    %377 = tpu.memref_slice %arg13[%c1_i32_175] : memref<3x!tpu.dma_semaphore, #tpu.memory_space<semaphore_mem>> -> memref<1x!tpu.dma_semaphore, #tpu.memory_space<semaphore_mem>>
    %378 = tpu.memref_squeeze %377 : memref<1x!tpu.dma_semaphore, #tpu.memory_space<semaphore_mem>> -> memref<!tpu.dma_semaphore, #tpu.memory_space<semaphore_mem>>
    tpu.enqueue_dma source(%374 : memref<128xf32, #tpu.memory_space<any>>) target(%376 : memref<128xf32, #tpu.memory_space<vmem>>) target_semaphore(%378 : memref<!tpu.dma_semaphore, #tpu.memory_space<semaphore_mem>>)
    %c10_i32_178 = arith.constant 10 : i32
    %379 = arith.addi %0, %c10_i32_178 : i32
    %380 = arith.index_cast %379 : i32 to index
    %381 = memref.load %arg2[%380] : memref<128xi32, #tpu.memory_space<smem>>
    %c10_i32_179 = arith.constant 10 : i32
    %c1_i32_180 = arith.constant 1 : i32
    %c0_i32_181 = arith.constant 0 : i32
    %382 = tpu.memref_slice %arg5[%381, %c0_i32_181] : memref<2x128xf32, #tpu.memory_space<any>> -> memref<1x128xf32, #tpu.memory_space<any>>
    %383 = tpu.memref_squeeze %382 : memref<1x128xf32, #tpu.memory_space<any>> -> memref<128xf32, #tpu.memory_space<any>>
    %c0_i32_182 = arith.constant 0 : i32
    %384 = tpu.memref_slice %arg11[%c10_i32_179, %c0_i32_182] : memref<32x128xf32, #tpu.memory_space<vmem>> -> memref<1x128xf32, #tpu.memory_space<vmem>>
    %385 = tpu.memref_squeeze %384 : memref<1x128xf32, #tpu.memory_space<vmem>> -> memref<128xf32, #tpu.memory_space<vmem>>
    %386 = tpu.memref_slice %arg13[%c1_i32_180] : memref<3x!tpu.dma_semaphore, #tpu.memory_space<semaphore_mem>> -> memref<1x!tpu.dma_semaphore, #tpu.memory_space<semaphore_mem>>
    %387 = tpu.memref_squeeze %386 : memref<1x!tpu.dma_semaphore, #tpu.memory_space<semaphore_mem>> -> memref<!tpu.dma_semaphore, #tpu.memory_space<semaphore_mem>>
    tpu.enqueue_dma source(%383 : memref<128xf32, #tpu.memory_space<any>>) target(%385 : memref<128xf32, #tpu.memory_space<vmem>>) target_semaphore(%387 : memref<!tpu.dma_semaphore, #tpu.memory_space<semaphore_mem>>)
    %c11_i32_183 = arith.constant 11 : i32
    %388 = arith.addi %0, %c11_i32_183 : i32
    %389 = arith.index_cast %388 : i32 to index
    %390 = memref.load %arg2[%389] : memref<128xi32, #tpu.memory_space<smem>>
    %c11_i32_184 = arith.constant 11 : i32
    %c1_i32_185 = arith.constant 1 : i32
    %c0_i32_186 = arith.constant 0 : i32
    %391 = tpu.memref_slice %arg5[%390, %c0_i32_186] : memref<2x128xf32, #tpu.memory_space<any>> -> memref<1x128xf32, #tpu.memory_space<any>>
    %392 = tpu.memref_squeeze %391 : memref<1x128xf32, #tpu.memory_space<any>> -> memref<128xf32, #tpu.memory_space<any>>
    %c0_i32_187 = arith.constant 0 : i32
    %393 = tpu.memref_slice %arg11[%c11_i32_184, %c0_i32_187] : memref<32x128xf32, #tpu.memory_space<vmem>> -> memref<1x128xf32, #tpu.memory_space<vmem>>
    %394 = tpu.memref_squeeze %393 : memref<1x128xf32, #tpu.memory_space<vmem>> -> memref<128xf32, #tpu.memory_space<vmem>>
    %395 = tpu.memref_slice %arg13[%c1_i32_185] : memref<3x!tpu.dma_semaphore, #tpu.memory_space<semaphore_mem>> -> memref<1x!tpu.dma_semaphore, #tpu.memory_space<semaphore_mem>>
    %396 = tpu.memref_squeeze %395 : memref<1x!tpu.dma_semaphore, #tpu.memory_space<semaphore_mem>> -> memref<!tpu.dma_semaphore, #tpu.memory_space<semaphore_mem>>
    tpu.enqueue_dma source(%392 : memref<128xf32, #tpu.memory_space<any>>) target(%394 : memref<128xf32, #tpu.memory_space<vmem>>) target_semaphore(%396 : memref<!tpu.dma_semaphore, #tpu.memory_space<semaphore_mem>>)
    %c12_i32_188 = arith.constant 12 : i32
    %397 = arith.addi %0, %c12_i32_188 : i32
    %398 = arith.index_cast %397 : i32 to index
    %399 = memref.load %arg2[%398] : memref<128xi32, #tpu.memory_space<smem>>
    %c12_i32_189 = arith.constant 12 : i32
    %c1_i32_190 = arith.constant 1 : i32
    %c0_i32_191 = arith.constant 0 : i32
    %400 = tpu.memref_slice %arg5[%399, %c0_i32_191] : memref<2x128xf32, #tpu.memory_space<any>> -> memref<1x128xf32, #tpu.memory_space<any>>
    %401 = tpu.memref_squeeze %400 : memref<1x128xf32, #tpu.memory_space<any>> -> memref<128xf32, #tpu.memory_space<any>>
    %c0_i32_192 = arith.constant 0 : i32
    %402 = tpu.memref_slice %arg11[%c12_i32_189, %c0_i32_192] : memref<32x128xf32, #tpu.memory_space<vmem>> -> memref<1x128xf32, #tpu.memory_space<vmem>>
    %403 = tpu.memref_squeeze %402 : memref<1x128xf32, #tpu.memory_space<vmem>> -> memref<128xf32, #tpu.memory_space<vmem>>
    %404 = tpu.memref_slice %arg13[%c1_i32_190] : memref<3x!tpu.dma_semaphore, #tpu.memory_space<semaphore_mem>> -> memref<1x!tpu.dma_semaphore, #tpu.memory_space<semaphore_mem>>
    %405 = tpu.memref_squeeze %404 : memref<1x!tpu.dma_semaphore, #tpu.memory_space<semaphore_mem>> -> memref<!tpu.dma_semaphore, #tpu.memory_space<semaphore_mem>>
    tpu.enqueue_dma source(%401 : memref<128xf32, #tpu.memory_space<any>>) target(%403 : memref<128xf32, #tpu.memory_space<vmem>>) target_semaphore(%405 : memref<!tpu.dma_semaphore, #tpu.memory_space<semaphore_mem>>)
    %c13_i32_193 = arith.constant 13 : i32
    %406 = arith.addi %0, %c13_i32_193 : i32
    %407 = arith.index_cast %406 : i32 to index
    %408 = memref.load %arg2[%407] : memref<128xi32, #tpu.memory_space<smem>>
    %c13_i32_194 = arith.constant 13 : i32
    %c1_i32_195 = arith.constant 1 : i32
    %c0_i32_196 = arith.constant 0 : i32
    %409 = tpu.memref_slice %arg5[%408, %c0_i32_196] : memref<2x128xf32, #tpu.memory_space<any>> -> memref<1x128xf32, #tpu.memory_space<any>>
    %410 = tpu.memref_squeeze %409 : memref<1x128xf32, #tpu.memory_space<any>> -> memref<128xf32, #tpu.memory_space<any>>
    %c0_i32_197 = arith.constant 0 : i32
    %411 = tpu.memref_slice %arg11[%c13_i32_194, %c0_i32_197] : memref<32x128xf32, #tpu.memory_space<vmem>> -> memref<1x128xf32, #tpu.memory_space<vmem>>
    %412 = tpu.memref_squeeze %411 : memref<1x128xf32, #tpu.memory_space<vmem>> -> memref<128xf32, #tpu.memory_space<vmem>>
    %413 = tpu.memref_slice %arg13[%c1_i32_195] : memref<3x!tpu.dma_semaphore, #tpu.memory_space<semaphore_mem>> -> memref<1x!tpu.dma_semaphore, #tpu.memory_space<semaphore_mem>>
    %414 = tpu.memref_squeeze %413 : memref<1x!tpu.dma_semaphore, #tpu.memory_space<semaphore_mem>> -> memref<!tpu.dma_semaphore, #tpu.memory_space<semaphore_mem>>
    tpu.enqueue_dma source(%410 : memref<128xf32, #tpu.memory_space<any>>) target(%412 : memref<128xf32, #tpu.memory_space<vmem>>) target_semaphore(%414 : memref<!tpu.dma_semaphore, #tpu.memory_space<semaphore_mem>>)
    %c14_i32_198 = arith.constant 14 : i32
    %415 = arith.addi %0, %c14_i32_198 : i32
    %416 = arith.index_cast %415 : i32 to index
    %417 = memref.load %arg2[%416] : memref<128xi32, #tpu.memory_space<smem>>
    %c14_i32_199 = arith.constant 14 : i32
    %c1_i32_200 = arith.constant 1 : i32
    %c0_i32_201 = arith.constant 0 : i32
    %418 = tpu.memref_slice %arg5[%417, %c0_i32_201] : memref<2x128xf32, #tpu.memory_space<any>> -> memref<1x128xf32, #tpu.memory_space<any>>
    %419 = tpu.memref_squeeze %418 : memref<1x128xf32, #tpu.memory_space<any>> -> memref<128xf32, #tpu.memory_space<any>>
    %c0_i32_202 = arith.constant 0 : i32
    %420 = tpu.memref_slice %arg11[%c14_i32_199, %c0_i32_202] : memref<32x128xf32, #tpu.memory_space<vmem>> -> memref<1x128xf32, #tpu.memory_space<vmem>>
    %421 = tpu.memref_squeeze %420 : memref<1x128xf32, #tpu.memory_space<vmem>> -> memref<128xf32, #tpu.memory_space<vmem>>
    %422 = tpu.memref_slice %arg13[%c1_i32_200] : memref<3x!tpu.dma_semaphore, #tpu.memory_space<semaphore_mem>> -> memref<1x!tpu.dma_semaphore, #tpu.memory_space<semaphore_mem>>
    %423 = tpu.memref_squeeze %422 : memref<1x!tpu.dma_semaphore, #tpu.memory_space<semaphore_mem>> -> memref<!tpu.dma_semaphore, #tpu.memory_space<semaphore_mem>>
    tpu.enqueue_dma source(%419 : memref<128xf32, #tpu.memory_space<any>>) target(%421 : memref<128xf32, #tpu.memory_space<vmem>>) target_semaphore(%423 : memref<!tpu.dma_semaphore, #tpu.memory_space<semaphore_mem>>)
    %c15_i32_203 = arith.constant 15 : i32
    %424 = arith.addi %0, %c15_i32_203 : i32
    %425 = arith.index_cast %424 : i32 to index
    %426 = memref.load %arg2[%425] : memref<128xi32, #tpu.memory_space<smem>>
    %c15_i32_204 = arith.constant 15 : i32
    %c1_i32_205 = arith.constant 1 : i32
    %c0_i32_206 = arith.constant 0 : i32
    %427 = tpu.memref_slice %arg5[%426, %c0_i32_206] : memref<2x128xf32, #tpu.memory_space<any>> -> memref<1x128xf32, #tpu.memory_space<any>>
    %428 = tpu.memref_squeeze %427 : memref<1x128xf32, #tpu.memory_space<any>> -> memref<128xf32, #tpu.memory_space<any>>
    %c0_i32_207 = arith.constant 0 : i32
    %429 = tpu.memref_slice %arg11[%c15_i32_204, %c0_i32_207] : memref<32x128xf32, #tpu.memory_space<vmem>> -> memref<1x128xf32, #tpu.memory_space<vmem>>
    %430 = tpu.memref_squeeze %429 : memref<1x128xf32, #tpu.memory_space<vmem>> -> memref<128xf32, #tpu.memory_space<vmem>>
    %431 = tpu.memref_slice %arg13[%c1_i32_205] : memref<3x!tpu.dma_semaphore, #tpu.memory_space<semaphore_mem>> -> memref<1x!tpu.dma_semaphore, #tpu.memory_space<semaphore_mem>>
    %432 = tpu.memref_squeeze %431 : memref<1x!tpu.dma_semaphore, #tpu.memory_space<semaphore_mem>> -> memref<!tpu.dma_semaphore, #tpu.memory_space<semaphore_mem>>
    tpu.enqueue_dma source(%428 : memref<128xf32, #tpu.memory_space<any>>) target(%430 : memref<128xf32, #tpu.memory_space<vmem>>) target_semaphore(%432 : memref<!tpu.dma_semaphore, #tpu.memory_space<semaphore_mem>>)
    %c16_i32_208 = arith.constant 16 : i32
    %433 = arith.addi %0, %c16_i32_208 : i32
    %434 = arith.index_cast %433 : i32 to index
    %435 = memref.load %arg2[%434] : memref<128xi32, #tpu.memory_space<smem>>
    %c16_i32_209 = arith.constant 16 : i32
    %c1_i32_210 = arith.constant 1 : i32
    %c0_i32_211 = arith.constant 0 : i32
    %436 = tpu.memref_slice %arg5[%435, %c0_i32_211] : memref<2x128xf32, #tpu.memory_space<any>> -> memref<1x128xf32, #tpu.memory_space<any>>
    %437 = tpu.memref_squeeze %436 : memref<1x128xf32, #tpu.memory_space<any>> -> memref<128xf32, #tpu.memory_space<any>>
    %c0_i32_212 = arith.constant 0 : i32
    %438 = tpu.memref_slice %arg11[%c16_i32_209, %c0_i32_212] : memref<32x128xf32, #tpu.memory_space<vmem>> -> memref<1x128xf32, #tpu.memory_space<vmem>>
    %439 = tpu.memref_squeeze %438 : memref<1x128xf32, #tpu.memory_space<vmem>> -> memref<128xf32, #tpu.memory_space<vmem>>
    %440 = tpu.memref_slice %arg13[%c1_i32_210] : memref<3x!tpu.dma_semaphore, #tpu.memory_space<semaphore_mem>> -> memref<1x!tpu.dma_semaphore, #tpu.memory_space<semaphore_mem>>
    %441 = tpu.memref_squeeze %440 : memref<1x!tpu.dma_semaphore, #tpu.memory_space<semaphore_mem>> -> memref<!tpu.dma_semaphore, #tpu.memory_space<semaphore_mem>>
    tpu.enqueue_dma source(%437 : memref<128xf32, #tpu.memory_space<any>>) target(%439 : memref<128xf32, #tpu.memory_space<vmem>>) target_semaphore(%441 : memref<!tpu.dma_semaphore, #tpu.memory_space<semaphore_mem>>)
    %c17_i32_213 = arith.constant 17 : i32
    %442 = arith.addi %0, %c17_i32_213 : i32
    %443 = arith.index_cast %442 : i32 to index
    %444 = memref.load %arg2[%443] : memref<128xi32, #tpu.memory_space<smem>>
    %c17_i32_214 = arith.constant 17 : i32
    %c1_i32_215 = arith.constant 1 : i32
    %c0_i32_216 = arith.constant 0 : i32
    %445 = tpu.memref_slice %arg5[%444, %c0_i32_216] : memref<2x128xf32, #tpu.memory_space<any>> -> memref<1x128xf32, #tpu.memory_space<any>>
    %446 = tpu.memref_squeeze %445 : memref<1x128xf32, #tpu.memory_space<any>> -> memref<128xf32, #tpu.memory_space<any>>
    %c0_i32_217 = arith.constant 0 : i32
    %447 = tpu.memref_slice %arg11[%c17_i32_214, %c0_i32_217] : memref<32x128xf32, #tpu.memory_space<vmem>> -> memref<1x128xf32, #tpu.memory_space<vmem>>
    %448 = tpu.memref_squeeze %447 : memref<1x128xf32, #tpu.memory_space<vmem>> -> memref<128xf32, #tpu.memory_space<vmem>>
    %449 = tpu.memref_slice %arg13[%c1_i32_215] : memref<3x!tpu.dma_semaphore, #tpu.memory_space<semaphore_mem>> -> memref<1x!tpu.dma_semaphore, #tpu.memory_space<semaphore_mem>>
    %450 = tpu.memref_squeeze %449 : memref<1x!tpu.dma_semaphore, #tpu.memory_space<semaphore_mem>> -> memref<!tpu.dma_semaphore, #tpu.memory_space<semaphore_mem>>
    tpu.enqueue_dma source(%446 : memref<128xf32, #tpu.memory_space<any>>) target(%448 : memref<128xf32, #tpu.memory_space<vmem>>) target_semaphore(%450 : memref<!tpu.dma_semaphore, #tpu.memory_space<semaphore_mem>>)
    %c18_i32_218 = arith.constant 18 : i32
    %451 = arith.addi %0, %c18_i32_218 : i32
    %452 = arith.index_cast %451 : i32 to index
    %453 = memref.load %arg2[%452] : memref<128xi32, #tpu.memory_space<smem>>
    %c18_i32_219 = arith.constant 18 : i32
    %c1_i32_220 = arith.constant 1 : i32
    %c0_i32_221 = arith.constant 0 : i32
    %454 = tpu.memref_slice %arg5[%453, %c0_i32_221] : memref<2x128xf32, #tpu.memory_space<any>> -> memref<1x128xf32, #tpu.memory_space<any>>
    %455 = tpu.memref_squeeze %454 : memref<1x128xf32, #tpu.memory_space<any>> -> memref<128xf32, #tpu.memory_space<any>>
    %c0_i32_222 = arith.constant 0 : i32
    %456 = tpu.memref_slice %arg11[%c18_i32_219, %c0_i32_222] : memref<32x128xf32, #tpu.memory_space<vmem>> -> memref<1x128xf32, #tpu.memory_space<vmem>>
    %457 = tpu.memref_squeeze %456 : memref<1x128xf32, #tpu.memory_space<vmem>> -> memref<128xf32, #tpu.memory_space<vmem>>
    %458 = tpu.memref_slice %arg13[%c1_i32_220] : memref<3x!tpu.dma_semaphore, #tpu.memory_space<semaphore_mem>> -> memref<1x!tpu.dma_semaphore, #tpu.memory_space<semaphore_mem>>
    %459 = tpu.memref_squeeze %458 : memref<1x!tpu.dma_semaphore, #tpu.memory_space<semaphore_mem>> -> memref<!tpu.dma_semaphore, #tpu.memory_space<semaphore_mem>>
    tpu.enqueue_dma source(%455 : memref<128xf32, #tpu.memory_space<any>>) target(%457 : memref<128xf32, #tpu.memory_space<vmem>>) target_semaphore(%459 : memref<!tpu.dma_semaphore, #tpu.memory_space<semaphore_mem>>)
    %c19_i32_223 = arith.constant 19 : i32
    %460 = arith.addi %0, %c19_i32_223 : i32
    %461 = arith.index_cast %460 : i32 to index
    %462 = memref.load %arg2[%461] : memref<128xi32, #tpu.memory_space<smem>>
    %c19_i32_224 = arith.constant 19 : i32
    %c1_i32_225 = arith.constant 1 : i32
    %c0_i32_226 = arith.constant 0 : i32
    %463 = tpu.memref_slice %arg5[%462, %c0_i32_226] : memref<2x128xf32, #tpu.memory_space<any>> -> memref<1x128xf32, #tpu.memory_space<any>>
    %464 = tpu.memref_squeeze %463 : memref<1x128xf32, #tpu.memory_space<any>> -> memref<128xf32, #tpu.memory_space<any>>
    %c0_i32_227 = arith.constant 0 : i32
    %465 = tpu.memref_slice %arg11[%c19_i32_224, %c0_i32_227] : memref<32x128xf32, #tpu.memory_space<vmem>> -> memref<1x128xf32, #tpu.memory_space<vmem>>
    %466 = tpu.memref_squeeze %465 : memref<1x128xf32, #tpu.memory_space<vmem>> -> memref<128xf32, #tpu.memory_space<vmem>>
    %467 = tpu.memref_slice %arg13[%c1_i32_225] : memref<3x!tpu.dma_semaphore, #tpu.memory_space<semaphore_mem>> -> memref<1x!tpu.dma_semaphore, #tpu.memory_space<semaphore_mem>>
    %468 = tpu.memref_squeeze %467 : memref<1x!tpu.dma_semaphore, #tpu.memory_space<semaphore_mem>> -> memref<!tpu.dma_semaphore, #tpu.memory_space<semaphore_mem>>
    tpu.enqueue_dma source(%464 : memref<128xf32, #tpu.memory_space<any>>) target(%466 : memref<128xf32, #tpu.memory_space<vmem>>) target_semaphore(%468 : memref<!tpu.dma_semaphore, #tpu.memory_space<semaphore_mem>>)
    %c20_i32_228 = arith.constant 20 : i32
    %469 = arith.addi %0, %c20_i32_228 : i32
    %470 = arith.index_cast %469 : i32 to index
    %471 = memref.load %arg2[%470] : memref<128xi32, #tpu.memory_space<smem>>
    %c20_i32_229 = arith.constant 20 : i32
    %c1_i32_230 = arith.constant 1 : i32
    %c0_i32_231 = arith.constant 0 : i32
    %472 = tpu.memref_slice %arg5[%471, %c0_i32_231] : memref<2x128xf32, #tpu.memory_space<any>> -> memref<1x128xf32, #tpu.memory_space<any>>
    %473 = tpu.memref_squeeze %472 : memref<1x128xf32, #tpu.memory_space<any>> -> memref<128xf32, #tpu.memory_space<any>>
    %c0_i32_232 = arith.constant 0 : i32
    %474 = tpu.memref_slice %arg11[%c20_i32_229, %c0_i32_232] : memref<32x128xf32, #tpu.memory_space<vmem>> -> memref<1x128xf32, #tpu.memory_space<vmem>>
    %475 = tpu.memref_squeeze %474 : memref<1x128xf32, #tpu.memory_space<vmem>> -> memref<128xf32, #tpu.memory_space<vmem>>
    %476 = tpu.memref_slice %arg13[%c1_i32_230] : memref<3x!tpu.dma_semaphore, #tpu.memory_space<semaphore_mem>> -> memref<1x!tpu.dma_semaphore, #tpu.memory_space<semaphore_mem>>
    %477 = tpu.memref_squeeze %476 : memref<1x!tpu.dma_semaphore, #tpu.memory_space<semaphore_mem>> -> memref<!tpu.dma_semaphore, #tpu.memory_space<semaphore_mem>>
    tpu.enqueue_dma source(%473 : memref<128xf32, #tpu.memory_space<any>>) target(%475 : memref<128xf32, #tpu.memory_space<vmem>>) target_semaphore(%477 : memref<!tpu.dma_semaphore, #tpu.memory_space<semaphore_mem>>)
    %c21_i32_233 = arith.constant 21 : i32
    %478 = arith.addi %0, %c21_i32_233 : i32
    %479 = arith.index_cast %478 : i32 to index
    %480 = memref.load %arg2[%479] : memref<128xi32, #tpu.memory_space<smem>>
    %c21_i32_234 = arith.constant 21 : i32
    %c1_i32_235 = arith.constant 1 : i32
    %c0_i32_236 = arith.constant 0 : i32
    %481 = tpu.memref_slice %arg5[%480, %c0_i32_236] : memref<2x128xf32, #tpu.memory_space<any>> -> memref<1x128xf32, #tpu.memory_space<any>>
    %482 = tpu.memref_squeeze %481 : memref<1x128xf32, #tpu.memory_space<any>> -> memref<128xf32, #tpu.memory_space<any>>
    %c0_i32_237 = arith.constant 0 : i32
    %483 = tpu.memref_slice %arg11[%c21_i32_234, %c0_i32_237] : memref<32x128xf32, #tpu.memory_space<vmem>> -> memref<1x128xf32, #tpu.memory_space<vmem>>
    %484 = tpu.memref_squeeze %483 : memref<1x128xf32, #tpu.memory_space<vmem>> -> memref<128xf32, #tpu.memory_space<vmem>>
    %485 = tpu.memref_slice %arg13[%c1_i32_235] : memref<3x!tpu.dma_semaphore, #tpu.memory_space<semaphore_mem>> -> memref<1x!tpu.dma_semaphore, #tpu.memory_space<semaphore_mem>>
    %486 = tpu.memref_squeeze %485 : memref<1x!tpu.dma_semaphore, #tpu.memory_space<semaphore_mem>> -> memref<!tpu.dma_semaphore, #tpu.memory_space<semaphore_mem>>
    tpu.enqueue_dma source(%482 : memref<128xf32, #tpu.memory_space<any>>) target(%484 : memref<128xf32, #tpu.memory_space<vmem>>) target_semaphore(%486 : memref<!tpu.dma_semaphore, #tpu.memory_space<semaphore_mem>>)
    %c22_i32_238 = arith.constant 22 : i32
    %487 = arith.addi %0, %c22_i32_238 : i32
    %488 = arith.index_cast %487 : i32 to index
    %489 = memref.load %arg2[%488] : memref<128xi32, #tpu.memory_space<smem>>
    %c22_i32_239 = arith.constant 22 : i32
    %c1_i32_240 = arith.constant 1 : i32
    %c0_i32_241 = arith.constant 0 : i32
    %490 = tpu.memref_slice %arg5[%489, %c0_i32_241] : memref<2x128xf32, #tpu.memory_space<any>> -> memref<1x128xf32, #tpu.memory_space<any>>
    %491 = tpu.memref_squeeze %490 : memref<1x128xf32, #tpu.memory_space<any>> -> memref<128xf32, #tpu.memory_space<any>>
    %c0_i32_242 = arith.constant 0 : i32
    %492 = tpu.memref_slice %arg11[%c22_i32_239, %c0_i32_242] : memref<32x128xf32, #tpu.memory_space<vmem>> -> memref<1x128xf32, #tpu.memory_space<vmem>>
    %493 = tpu.memref_squeeze %492 : memref<1x128xf32, #tpu.memory_space<vmem>> -> memref<128xf32, #tpu.memory_space<vmem>>
    %494 = tpu.memref_slice %arg13[%c1_i32_240] : memref<3x!tpu.dma_semaphore, #tpu.memory_space<semaphore_mem>> -> memref<1x!tpu.dma_semaphore, #tpu.memory_space<semaphore_mem>>
    %495 = tpu.memref_squeeze %494 : memref<1x!tpu.dma_semaphore, #tpu.memory_space<semaphore_mem>> -> memref<!tpu.dma_semaphore, #tpu.memory_space<semaphore_mem>>
    tpu.enqueue_dma source(%491 : memref<128xf32, #tpu.memory_space<any>>) target(%493 : memref<128xf32, #tpu.memory_space<vmem>>) target_semaphore(%495 : memref<!tpu.dma_semaphore, #tpu.memory_space<semaphore_mem>>)
    %c23_i32_243 = arith.constant 23 : i32
    %496 = arith.addi %0, %c23_i32_243 : i32
    %497 = arith.index_cast %496 : i32 to index
    %498 = memref.load %arg2[%497] : memref<128xi32, #tpu.memory_space<smem>>
    %c23_i32_244 = arith.constant 23 : i32
    %c1_i32_245 = arith.constant 1 : i32
    %c0_i32_246 = arith.constant 0 : i32
    %499 = tpu.memref_slice %arg5[%498, %c0_i32_246] : memref<2x128xf32, #tpu.memory_space<any>> -> memref<1x128xf32, #tpu.memory_space<any>>
    %500 = tpu.memref_squeeze %499 : memref<1x128xf32, #tpu.memory_space<any>> -> memref<128xf32, #tpu.memory_space<any>>
    %c0_i32_247 = arith.constant 0 : i32
    %501 = tpu.memref_slice %arg11[%c23_i32_244, %c0_i32_247] : memref<32x128xf32, #tpu.memory_space<vmem>> -> memref<1x128xf32, #tpu.memory_space<vmem>>
    %502 = tpu.memref_squeeze %501 : memref<1x128xf32, #tpu.memory_space<vmem>> -> memref<128xf32, #tpu.memory_space<vmem>>
    %503 = tpu.memref_slice %arg13[%c1_i32_245] : memref<3x!tpu.dma_semaphore, #tpu.memory_space<semaphore_mem>> -> memref<1x!tpu.dma_semaphore, #tpu.memory_space<semaphore_mem>>
    %504 = tpu.memref_squeeze %503 : memref<1x!tpu.dma_semaphore, #tpu.memory_space<semaphore_mem>> -> memref<!tpu.dma_semaphore, #tpu.memory_space<semaphore_mem>>
    tpu.enqueue_dma source(%500 : memref<128xf32, #tpu.memory_space<any>>) target(%502 : memref<128xf32, #tpu.memory_space<vmem>>) target_semaphore(%504 : memref<!tpu.dma_semaphore, #tpu.memory_space<semaphore_mem>>)
    %c24_i32_248 = arith.constant 24 : i32
    %505 = arith.addi %0, %c24_i32_248 : i32
    %506 = arith.index_cast %505 : i32 to index
    %507 = memref.load %arg2[%506] : memref<128xi32, #tpu.memory_space<smem>>
    %c24_i32_249 = arith.constant 24 : i32
    %c1_i32_250 = arith.constant 1 : i32
    %c0_i32_251 = arith.constant 0 : i32
    %508 = tpu.memref_slice %arg5[%507, %c0_i32_251] : memref<2x128xf32, #tpu.memory_space<any>> -> memref<1x128xf32, #tpu.memory_space<any>>
    %509 = tpu.memref_squeeze %508 : memref<1x128xf32, #tpu.memory_space<any>> -> memref<128xf32, #tpu.memory_space<any>>
    %c0_i32_252 = arith.constant 0 : i32
    %510 = tpu.memref_slice %arg11[%c24_i32_249, %c0_i32_252] : memref<32x128xf32, #tpu.memory_space<vmem>> -> memref<1x128xf32, #tpu.memory_space<vmem>>
    %511 = tpu.memref_squeeze %510 : memref<1x128xf32, #tpu.memory_space<vmem>> -> memref<128xf32, #tpu.memory_space<vmem>>
    %512 = tpu.memref_slice %arg13[%c1_i32_250] : memref<3x!tpu.dma_semaphore, #tpu.memory_space<semaphore_mem>> -> memref<1x!tpu.dma_semaphore, #tpu.memory_space<semaphore_mem>>
    %513 = tpu.memref_squeeze %512 : memref<1x!tpu.dma_semaphore, #tpu.memory_space<semaphore_mem>> -> memref<!tpu.dma_semaphore, #tpu.memory_space<semaphore_mem>>
    tpu.enqueue_dma source(%509 : memref<128xf32, #tpu.memory_space<any>>) target(%511 : memref<128xf32, #tpu.memory_space<vmem>>) target_semaphore(%513 : memref<!tpu.dma_semaphore, #tpu.memory_space<semaphore_mem>>)
    %c25_i32_253 = arith.constant 25 : i32
    %514 = arith.addi %0, %c25_i32_253 : i32
    %515 = arith.index_cast %514 : i32 to index
    %516 = memref.load %arg2[%515] : memref<128xi32, #tpu.memory_space<smem>>
    %c25_i32_254 = arith.constant 25 : i32
    %c1_i32_255 = arith.constant 1 : i32
    %c0_i32_256 = arith.constant 0 : i32
    %517 = tpu.memref_slice %arg5[%516, %c0_i32_256] : memref<2x128xf32, #tpu.memory_space<any>> -> memref<1x128xf32, #tpu.memory_space<any>>
    %518 = tpu.memref_squeeze %517 : memref<1x128xf32, #tpu.memory_space<any>> -> memref<128xf32, #tpu.memory_space<any>>
    %c0_i32_257 = arith.constant 0 : i32
    %519 = tpu.memref_slice %arg11[%c25_i32_254, %c0_i32_257] : memref<32x128xf32, #tpu.memory_space<vmem>> -> memref<1x128xf32, #tpu.memory_space<vmem>>
    %520 = tpu.memref_squeeze %519 : memref<1x128xf32, #tpu.memory_space<vmem>> -> memref<128xf32, #tpu.memory_space<vmem>>
    %521 = tpu.memref_slice %arg13[%c1_i32_255] : memref<3x!tpu.dma_semaphore, #tpu.memory_space<semaphore_mem>> -> memref<1x!tpu.dma_semaphore, #tpu.memory_space<semaphore_mem>>
    %522 = tpu.memref_squeeze %521 : memref<1x!tpu.dma_semaphore, #tpu.memory_space<semaphore_mem>> -> memref<!tpu.dma_semaphore, #tpu.memory_space<semaphore_mem>>
    tpu.enqueue_dma source(%518 : memref<128xf32, #tpu.memory_space<any>>) target(%520 : memref<128xf32, #tpu.memory_space<vmem>>) target_semaphore(%522 : memref<!tpu.dma_semaphore, #tpu.memory_space<semaphore_mem>>)
    %c26_i32_258 = arith.constant 26 : i32
    %523 = arith.addi %0, %c26_i32_258 : i32
    %524 = arith.index_cast %523 : i32 to index
    %525 = memref.load %arg2[%524] : memref<128xi32, #tpu.memory_space<smem>>
    %c26_i32_259 = arith.constant 26 : i32
    %c1_i32_260 = arith.constant 1 : i32
    %c0_i32_261 = arith.constant 0 : i32
    %526 = tpu.memref_slice %arg5[%525, %c0_i32_261] : memref<2x128xf32, #tpu.memory_space<any>> -> memref<1x128xf32, #tpu.memory_space<any>>
    %527 = tpu.memref_squeeze %526 : memref<1x128xf32, #tpu.memory_space<any>> -> memref<128xf32, #tpu.memory_space<any>>
    %c0_i32_262 = arith.constant 0 : i32
    %528 = tpu.memref_slice %arg11[%c26_i32_259, %c0_i32_262] : memref<32x128xf32, #tpu.memory_space<vmem>> -> memref<1x128xf32, #tpu.memory_space<vmem>>
    %529 = tpu.memref_squeeze %528 : memref<1x128xf32, #tpu.memory_space<vmem>> -> memref<128xf32, #tpu.memory_space<vmem>>
    %530 = tpu.memref_slice %arg13[%c1_i32_260] : memref<3x!tpu.dma_semaphore, #tpu.memory_space<semaphore_mem>> -> memref<1x!tpu.dma_semaphore, #tpu.memory_space<semaphore_mem>>
    %531 = tpu.memref_squeeze %530 : memref<1x!tpu.dma_semaphore, #tpu.memory_space<semaphore_mem>> -> memref<!tpu.dma_semaphore, #tpu.memory_space<semaphore_mem>>
    tpu.enqueue_dma source(%527 : memref<128xf32, #tpu.memory_space<any>>) target(%529 : memref<128xf32, #tpu.memory_space<vmem>>) target_semaphore(%531 : memref<!tpu.dma_semaphore, #tpu.memory_space<semaphore_mem>>)
    %c27_i32_263 = arith.constant 27 : i32
    %532 = arith.addi %0, %c27_i32_263 : i32
    %533 = arith.index_cast %532 : i32 to index
    %534 = memref.load %arg2[%533] : memref<128xi32, #tpu.memory_space<smem>>
    %c27_i32_264 = arith.constant 27 : i32
    %c1_i32_265 = arith.constant 1 : i32
    %c0_i32_266 = arith.constant 0 : i32
    %535 = tpu.memref_slice %arg5[%534, %c0_i32_266] : memref<2x128xf32, #tpu.memory_space<any>> -> memref<1x128xf32, #tpu.memory_space<any>>
    %536 = tpu.memref_squeeze %535 : memref<1x128xf32, #tpu.memory_space<any>> -> memref<128xf32, #tpu.memory_space<any>>
    %c0_i32_267 = arith.constant 0 : i32
    %537 = tpu.memref_slice %arg11[%c27_i32_264, %c0_i32_267] : memref<32x128xf32, #tpu.memory_space<vmem>> -> memref<1x128xf32, #tpu.memory_space<vmem>>
    %538 = tpu.memref_squeeze %537 : memref<1x128xf32, #tpu.memory_space<vmem>> -> memref<128xf32, #tpu.memory_space<vmem>>
    %539 = tpu.memref_slice %arg13[%c1_i32_265] : memref<3x!tpu.dma_semaphore, #tpu.memory_space<semaphore_mem>> -> memref<1x!tpu.dma_semaphore, #tpu.memory_space<semaphore_mem>>
    %540 = tpu.memref_squeeze %539 : memref<1x!tpu.dma_semaphore, #tpu.memory_space<semaphore_mem>> -> memref<!tpu.dma_semaphore, #tpu.memory_space<semaphore_mem>>
    tpu.enqueue_dma source(%536 : memref<128xf32, #tpu.memory_space<any>>) target(%538 : memref<128xf32, #tpu.memory_space<vmem>>) target_semaphore(%540 : memref<!tpu.dma_semaphore, #tpu.memory_space<semaphore_mem>>)
    %c28_i32_268 = arith.constant 28 : i32
    %541 = arith.addi %0, %c28_i32_268 : i32
    %542 = arith.index_cast %541 : i32 to index
    %543 = memref.load %arg2[%542] : memref<128xi32, #tpu.memory_space<smem>>
    %c28_i32_269 = arith.constant 28 : i32
    %c1_i32_270 = arith.constant 1 : i32
    %c0_i32_271 = arith.constant 0 : i32
    %544 = tpu.memref_slice %arg5[%543, %c0_i32_271] : memref<2x128xf32, #tpu.memory_space<any>> -> memref<1x128xf32, #tpu.memory_space<any>>
    %545 = tpu.memref_squeeze %544 : memref<1x128xf32, #tpu.memory_space<any>> -> memref<128xf32, #tpu.memory_space<any>>
    %c0_i32_272 = arith.constant 0 : i32
    %546 = tpu.memref_slice %arg11[%c28_i32_269, %c0_i32_272] : memref<32x128xf32, #tpu.memory_space<vmem>> -> memref<1x128xf32, #tpu.memory_space<vmem>>
    %547 = tpu.memref_squeeze %546 : memref<1x128xf32, #tpu.memory_space<vmem>> -> memref<128xf32, #tpu.memory_space<vmem>>
    %548 = tpu.memref_slice %arg13[%c1_i32_270] : memref<3x!tpu.dma_semaphore, #tpu.memory_space<semaphore_mem>> -> memref<1x!tpu.dma_semaphore, #tpu.memory_space<semaphore_mem>>
    %549 = tpu.memref_squeeze %548 : memref<1x!tpu.dma_semaphore, #tpu.memory_space<semaphore_mem>> -> memref<!tpu.dma_semaphore, #tpu.memory_space<semaphore_mem>>
    tpu.enqueue_dma source(%545 : memref<128xf32, #tpu.memory_space<any>>) target(%547 : memref<128xf32, #tpu.memory_space<vmem>>) target_semaphore(%549 : memref<!tpu.dma_semaphore, #tpu.memory_space<semaphore_mem>>)
    %c29_i32_273 = arith.constant 29 : i32
    %550 = arith.addi %0, %c29_i32_273 : i32
    %551 = arith.index_cast %550 : i32 to index
    %552 = memref.load %arg2[%551] : memref<128xi32, #tpu.memory_space<smem>>
    %c29_i32_274 = arith.constant 29 : i32
    %c1_i32_275 = arith.constant 1 : i32
    %c0_i32_276 = arith.constant 0 : i32
    %553 = tpu.memref_slice %arg5[%552, %c0_i32_276] : memref<2x128xf32, #tpu.memory_space<any>> -> memref<1x128xf32, #tpu.memory_space<any>>
    %554 = tpu.memref_squeeze %553 : memref<1x128xf32, #tpu.memory_space<any>> -> memref<128xf32, #tpu.memory_space<any>>
    %c0_i32_277 = arith.constant 0 : i32
    %555 = tpu.memref_slice %arg11[%c29_i32_274, %c0_i32_277] : memref<32x128xf32, #tpu.memory_space<vmem>> -> memref<1x128xf32, #tpu.memory_space<vmem>>
    %556 = tpu.memref_squeeze %555 : memref<1x128xf32, #tpu.memory_space<vmem>> -> memref<128xf32, #tpu.memory_space<vmem>>
    %557 = tpu.memref_slice %arg13[%c1_i32_275] : memref<3x!tpu.dma_semaphore, #tpu.memory_space<semaphore_mem>> -> memref<1x!tpu.dma_semaphore, #tpu.memory_space<semaphore_mem>>
    %558 = tpu.memref_squeeze %557 : memref<1x!tpu.dma_semaphore, #tpu.memory_space<semaphore_mem>> -> memref<!tpu.dma_semaphore, #tpu.memory_space<semaphore_mem>>
    tpu.enqueue_dma source(%554 : memref<128xf32, #tpu.memory_space<any>>) target(%556 : memref<128xf32, #tpu.memory_space<vmem>>) target_semaphore(%558 : memref<!tpu.dma_semaphore, #tpu.memory_space<semaphore_mem>>)
    %c30_i32_278 = arith.constant 30 : i32
    %559 = arith.addi %0, %c30_i32_278 : i32
    %560 = arith.index_cast %559 : i32 to index
    %561 = memref.load %arg2[%560] : memref<128xi32, #tpu.memory_space<smem>>
    %c30_i32_279 = arith.constant 30 : i32
    %c1_i32_280 = arith.constant 1 : i32
    %c0_i32_281 = arith.constant 0 : i32
    %562 = tpu.memref_slice %arg5[%561, %c0_i32_281] : memref<2x128xf32, #tpu.memory_space<any>> -> memref<1x128xf32, #tpu.memory_space<any>>
    %563 = tpu.memref_squeeze %562 : memref<1x128xf32, #tpu.memory_space<any>> -> memref<128xf32, #tpu.memory_space<any>>
    %c0_i32_282 = arith.constant 0 : i32
    %564 = tpu.memref_slice %arg11[%c30_i32_279, %c0_i32_282] : memref<32x128xf32, #tpu.memory_space<vmem>> -> memref<1x128xf32, #tpu.memory_space<vmem>>
    %565 = tpu.memref_squeeze %564 : memref<1x128xf32, #tpu.memory_space<vmem>> -> memref<128xf32, #tpu.memory_space<vmem>>
    %566 = tpu.memref_slice %arg13[%c1_i32_280] : memref<3x!tpu.dma_semaphore, #tpu.memory_space<semaphore_mem>> -> memref<1x!tpu.dma_semaphore, #tpu.memory_space<semaphore_mem>>
    %567 = tpu.memref_squeeze %566 : memref<1x!tpu.dma_semaphore, #tpu.memory_space<semaphore_mem>> -> memref<!tpu.dma_semaphore, #tpu.memory_space<semaphore_mem>>
    tpu.enqueue_dma source(%563 : memref<128xf32, #tpu.memory_space<any>>) target(%565 : memref<128xf32, #tpu.memory_space<vmem>>) target_semaphore(%567 : memref<!tpu.dma_semaphore, #tpu.memory_space<semaphore_mem>>)
    %c31_i32_283 = arith.constant 31 : i32
    %568 = arith.addi %0, %c31_i32_283 : i32
    %569 = arith.index_cast %568 : i32 to index
    %570 = memref.load %arg2[%569] : memref<128xi32, #tpu.memory_space<smem>>
    %c31_i32_284 = arith.constant 31 : i32
    %c1_i32_285 = arith.constant 1 : i32
    %c0_i32_286 = arith.constant 0 : i32
    %571 = tpu.memref_slice %arg5[%570, %c0_i32_286] : memref<2x128xf32, #tpu.memory_space<any>> -> memref<1x128xf32, #tpu.memory_space<any>>
    %572 = tpu.memref_squeeze %571 : memref<1x128xf32, #tpu.memory_space<any>> -> memref<128xf32, #tpu.memory_space<any>>
    %c0_i32_287 = arith.constant 0 : i32
    %573 = tpu.memref_slice %arg11[%c31_i32_284, %c0_i32_287] : memref<32x128xf32, #tpu.memory_space<vmem>> -> memref<1x128xf32, #tpu.memory_space<vmem>>
    %574 = tpu.memref_squeeze %573 : memref<1x128xf32, #tpu.memory_space<vmem>> -> memref<128xf32, #tpu.memory_space<vmem>>
    %575 = tpu.memref_slice %arg13[%c1_i32_285] : memref<3x!tpu.dma_semaphore, #tpu.memory_space<semaphore_mem>> -> memref<1x!tpu.dma_semaphore, #tpu.memory_space<semaphore_mem>>
    %576 = tpu.memref_squeeze %575 : memref<1x!tpu.dma_semaphore, #tpu.memory_space<semaphore_mem>> -> memref<!tpu.dma_semaphore, #tpu.memory_space<semaphore_mem>>
    tpu.enqueue_dma source(%572 : memref<128xf32, #tpu.memory_space<any>>) target(%574 : memref<128xf32, #tpu.memory_space<vmem>>) target_semaphore(%576 : memref<!tpu.dma_semaphore, #tpu.memory_space<semaphore_mem>>)
    %c0_i32_288 = arith.constant 0 : i32
    %577 = arith.addi %0, %c0_i32_288 : i32
    %578 = arith.index_cast %577 : i32 to index
    %579 = memref.load %arg3[%578] : memref<128xi32, #tpu.memory_space<smem>>
    %c0_i32_289 = arith.constant 0 : i32
    %c2_i32_290 = arith.constant 2 : i32
    %c0_i32_291 = arith.constant 0 : i32
    %580 = tpu.memref_slice %arg6[%579, %c0_i32_291] : memref<128x128xf32, #tpu.memory_space<any>> -> memref<1x128xf32, #tpu.memory_space<any>>
    %581 = tpu.memref_squeeze %580 : memref<1x128xf32, #tpu.memory_space<any>> -> memref<128xf32, #tpu.memory_space<any>>
    %c0_i32_292 = arith.constant 0 : i32
    %582 = tpu.memref_slice %arg12[%c0_i32_289, %c0_i32_292] : memref<32x128xf32, #tpu.memory_space<vmem>> -> memref<1x128xf32, #tpu.memory_space<vmem>>
    %583 = tpu.memref_squeeze %582 : memref<1x128xf32, #tpu.memory_space<vmem>> -> memref<128xf32, #tpu.memory_space<vmem>>
    %584 = tpu.memref_slice %arg13[%c2_i32_290] : memref<3x!tpu.dma_semaphore, #tpu.memory_space<semaphore_mem>> -> memref<1x!tpu.dma_semaphore, #tpu.memory_space<semaphore_mem>>
    %585 = tpu.memref_squeeze %584 : memref<1x!tpu.dma_semaphore, #tpu.memory_space<semaphore_mem>> -> memref<!tpu.dma_semaphore, #tpu.memory_space<semaphore_mem>>
    tpu.enqueue_dma source(%581 : memref<128xf32, #tpu.memory_space<any>>) target(%583 : memref<128xf32, #tpu.memory_space<vmem>>) target_semaphore(%585 : memref<!tpu.dma_semaphore, #tpu.memory_space<semaphore_mem>>)
    %c1_i32_293 = arith.constant 1 : i32
    %586 = arith.addi %0, %c1_i32_293 : i32
    %587 = arith.index_cast %586 : i32 to index
    %588 = memref.load %arg3[%587] : memref<128xi32, #tpu.memory_space<smem>>
    %c1_i32_294 = arith.constant 1 : i32
    %c2_i32_295 = arith.constant 2 : i32
    %c0_i32_296 = arith.constant 0 : i32
    %589 = tpu.memref_slice %arg6[%588, %c0_i32_296] : memref<128x128xf32, #tpu.memory_space<any>> -> memref<1x128xf32, #tpu.memory_space<any>>
    %590 = tpu.memref_squeeze %589 : memref<1x128xf32, #tpu.memory_space<any>> -> memref<128xf32, #tpu.memory_space<any>>
    %c0_i32_297 = arith.constant 0 : i32
    %591 = tpu.memref_slice %arg12[%c1_i32_294, %c0_i32_297] : memref<32x128xf32, #tpu.memory_space<vmem>> -> memref<1x128xf32, #tpu.memory_space<vmem>>
    %592 = tpu.memref_squeeze %591 : memref<1x128xf32, #tpu.memory_space<vmem>> -> memref<128xf32, #tpu.memory_space<vmem>>
    %593 = tpu.memref_slice %arg13[%c2_i32_295] : memref<3x!tpu.dma_semaphore, #tpu.memory_space<semaphore_mem>> -> memref<1x!tpu.dma_semaphore, #tpu.memory_space<semaphore_mem>>
    %594 = tpu.memref_squeeze %593 : memref<1x!tpu.dma_semaphore, #tpu.memory_space<semaphore_mem>> -> memref<!tpu.dma_semaphore, #tpu.memory_space<semaphore_mem>>
    tpu.enqueue_dma source(%590 : memref<128xf32, #tpu.memory_space<any>>) target(%592 : memref<128xf32, #tpu.memory_space<vmem>>) target_semaphore(%594 : memref<!tpu.dma_semaphore, #tpu.memory_space<semaphore_mem>>)
    %c2_i32_298 = arith.constant 2 : i32
    %595 = arith.addi %0, %c2_i32_298 : i32
    %596 = arith.index_cast %595 : i32 to index
    %597 = memref.load %arg3[%596] : memref<128xi32, #tpu.memory_space<smem>>
    %c2_i32_299 = arith.constant 2 : i32
    %c2_i32_300 = arith.constant 2 : i32
    %c0_i32_301 = arith.constant 0 : i32
    %598 = tpu.memref_slice %arg6[%597, %c0_i32_301] : memref<128x128xf32, #tpu.memory_space<any>> -> memref<1x128xf32, #tpu.memory_space<any>>
    %599 = tpu.memref_squeeze %598 : memref<1x128xf32, #tpu.memory_space<any>> -> memref<128xf32, #tpu.memory_space<any>>
    %c0_i32_302 = arith.constant 0 : i32
    %600 = tpu.memref_slice %arg12[%c2_i32_299, %c0_i32_302] : memref<32x128xf32, #tpu.memory_space<vmem>> -> memref<1x128xf32, #tpu.memory_space<vmem>>
    %601 = tpu.memref_squeeze %600 : memref<1x128xf32, #tpu.memory_space<vmem>> -> memref<128xf32, #tpu.memory_space<vmem>>
    %602 = tpu.memref_slice %arg13[%c2_i32_300] : memref<3x!tpu.dma_semaphore, #tpu.memory_space<semaphore_mem>> -> memref<1x!tpu.dma_semaphore, #tpu.memory_space<semaphore_mem>>
    %603 = tpu.memref_squeeze %602 : memref<1x!tpu.dma_semaphore, #tpu.memory_space<semaphore_mem>> -> memref<!tpu.dma_semaphore, #tpu.memory_space<semaphore_mem>>
    tpu.enqueue_dma source(%599 : memref<128xf32, #tpu.memory_space<any>>) target(%601 : memref<128xf32, #tpu.memory_space<vmem>>) target_semaphore(%603 : memref<!tpu.dma_semaphore, #tpu.memory_space<semaphore_mem>>)
    %c3_i32_303 = arith.constant 3 : i32
    %604 = arith.addi %0, %c3_i32_303 : i32
    %605 = arith.index_cast %604 : i32 to index
    %606 = memref.load %arg3[%605] : memref<128xi32, #tpu.memory_space<smem>>
    %c3_i32_304 = arith.constant 3 : i32
    %c2_i32_305 = arith.constant 2 : i32
    %c0_i32_306 = arith.constant 0 : i32
    %607 = tpu.memref_slice %arg6[%606, %c0_i32_306] : memref<128x128xf32, #tpu.memory_space<any>> -> memref<1x128xf32, #tpu.memory_space<any>>
    %608 = tpu.memref_squeeze %607 : memref<1x128xf32, #tpu.memory_space<any>> -> memref<128xf32, #tpu.memory_space<any>>
    %c0_i32_307 = arith.constant 0 : i32
    %609 = tpu.memref_slice %arg12[%c3_i32_304, %c0_i32_307] : memref<32x128xf32, #tpu.memory_space<vmem>> -> memref<1x128xf32, #tpu.memory_space<vmem>>
    %610 = tpu.memref_squeeze %609 : memref<1x128xf32, #tpu.memory_space<vmem>> -> memref<128xf32, #tpu.memory_space<vmem>>
    %611 = tpu.memref_slice %arg13[%c2_i32_305] : memref<3x!tpu.dma_semaphore, #tpu.memory_space<semaphore_mem>> -> memref<1x!tpu.dma_semaphore, #tpu.memory_space<semaphore_mem>>
    %612 = tpu.memref_squeeze %611 : memref<1x!tpu.dma_semaphore, #tpu.memory_space<semaphore_mem>> -> memref<!tpu.dma_semaphore, #tpu.memory_space<semaphore_mem>>
    tpu.enqueue_dma source(%608 : memref<128xf32, #tpu.memory_space<any>>) target(%610 : memref<128xf32, #tpu.memory_space<vmem>>) target_semaphore(%612 : memref<!tpu.dma_semaphore, #tpu.memory_space<semaphore_mem>>)
    %c4_i32_308 = arith.constant 4 : i32
    %613 = arith.addi %0, %c4_i32_308 : i32
    %614 = arith.index_cast %613 : i32 to index
    %615 = memref.load %arg3[%614] : memref<128xi32, #tpu.memory_space<smem>>
    %c4_i32_309 = arith.constant 4 : i32
    %c2_i32_310 = arith.constant 2 : i32
    %c0_i32_311 = arith.constant 0 : i32
    %616 = tpu.memref_slice %arg6[%615, %c0_i32_311] : memref<128x128xf32, #tpu.memory_space<any>> -> memref<1x128xf32, #tpu.memory_space<any>>
    %617 = tpu.memref_squeeze %616 : memref<1x128xf32, #tpu.memory_space<any>> -> memref<128xf32, #tpu.memory_space<any>>
    %c0_i32_312 = arith.constant 0 : i32
    %618 = tpu.memref_slice %arg12[%c4_i32_309, %c0_i32_312] : memref<32x128xf32, #tpu.memory_space<vmem>> -> memref<1x128xf32, #tpu.memory_space<vmem>>
    %619 = tpu.memref_squeeze %618 : memref<1x128xf32, #tpu.memory_space<vmem>> -> memref<128xf32, #tpu.memory_space<vmem>>
    %620 = tpu.memref_slice %arg13[%c2_i32_310] : memref<3x!tpu.dma_semaphore, #tpu.memory_space<semaphore_mem>> -> memref<1x!tpu.dma_semaphore, #tpu.memory_space<semaphore_mem>>
    %621 = tpu.memref_squeeze %620 : memref<1x!tpu.dma_semaphore, #tpu.memory_space<semaphore_mem>> -> memref<!tpu.dma_semaphore, #tpu.memory_space<semaphore_mem>>
    tpu.enqueue_dma source(%617 : memref<128xf32, #tpu.memory_space<any>>) target(%619 : memref<128xf32, #tpu.memory_space<vmem>>) target_semaphore(%621 : memref<!tpu.dma_semaphore, #tpu.memory_space<semaphore_mem>>)
    %c5_i32_313 = arith.constant 5 : i32
    %622 = arith.addi %0, %c5_i32_313 : i32
    %623 = arith.index_cast %622 : i32 to index
    %624 = memref.load %arg3[%623] : memref<128xi32, #tpu.memory_space<smem>>
    %c5_i32_314 = arith.constant 5 : i32
    %c2_i32_315 = arith.constant 2 : i32
    %c0_i32_316 = arith.constant 0 : i32
    %625 = tpu.memref_slice %arg6[%624, %c0_i32_316] : memref<128x128xf32, #tpu.memory_space<any>> -> memref<1x128xf32, #tpu.memory_space<any>>
    %626 = tpu.memref_squeeze %625 : memref<1x128xf32, #tpu.memory_space<any>> -> memref<128xf32, #tpu.memory_space<any>>
    %c0_i32_317 = arith.constant 0 : i32
    %627 = tpu.memref_slice %arg12[%c5_i32_314, %c0_i32_317] : memref<32x128xf32, #tpu.memory_space<vmem>> -> memref<1x128xf32, #tpu.memory_space<vmem>>
    %628 = tpu.memref_squeeze %627 : memref<1x128xf32, #tpu.memory_space<vmem>> -> memref<128xf32, #tpu.memory_space<vmem>>
    %629 = tpu.memref_slice %arg13[%c2_i32_315] : memref<3x!tpu.dma_semaphore, #tpu.memory_space<semaphore_mem>> -> memref<1x!tpu.dma_semaphore, #tpu.memory_space<semaphore_mem>>
    %630 = tpu.memref_squeeze %629 : memref<1x!tpu.dma_semaphore, #tpu.memory_space<semaphore_mem>> -> memref<!tpu.dma_semaphore, #tpu.memory_space<semaphore_mem>>
    tpu.enqueue_dma source(%626 : memref<128xf32, #tpu.memory_space<any>>) target(%628 : memref<128xf32, #tpu.memory_space<vmem>>) target_semaphore(%630 : memref<!tpu.dma_semaphore, #tpu.memory_space<semaphore_mem>>)
    %c6_i32_318 = arith.constant 6 : i32
    %631 = arith.addi %0, %c6_i32_318 : i32
    %632 = arith.index_cast %631 : i32 to index
    %633 = memref.load %arg3[%632] : memref<128xi32, #tpu.memory_space<smem>>
    %c6_i32_319 = arith.constant 6 : i32
    %c2_i32_320 = arith.constant 2 : i32
    %c0_i32_321 = arith.constant 0 : i32
    %634 = tpu.memref_slice %arg6[%633, %c0_i32_321] : memref<128x128xf32, #tpu.memory_space<any>> -> memref<1x128xf32, #tpu.memory_space<any>>
    %635 = tpu.memref_squeeze %634 : memref<1x128xf32, #tpu.memory_space<any>> -> memref<128xf32, #tpu.memory_space<any>>
    %c0_i32_322 = arith.constant 0 : i32
    %636 = tpu.memref_slice %arg12[%c6_i32_319, %c0_i32_322] : memref<32x128xf32, #tpu.memory_space<vmem>> -> memref<1x128xf32, #tpu.memory_space<vmem>>
    %637 = tpu.memref_squeeze %636 : memref<1x128xf32, #tpu.memory_space<vmem>> -> memref<128xf32, #tpu.memory_space<vmem>>
    %638 = tpu.memref_slice %arg13[%c2_i32_320] : memref<3x!tpu.dma_semaphore, #tpu.memory_space<semaphore_mem>> -> memref<1x!tpu.dma_semaphore, #tpu.memory_space<semaphore_mem>>
    %639 = tpu.memref_squeeze %638 : memref<1x!tpu.dma_semaphore, #tpu.memory_space<semaphore_mem>> -> memref<!tpu.dma_semaphore, #tpu.memory_space<semaphore_mem>>
    tpu.enqueue_dma source(%635 : memref<128xf32, #tpu.memory_space<any>>) target(%637 : memref<128xf32, #tpu.memory_space<vmem>>) target_semaphore(%639 : memref<!tpu.dma_semaphore, #tpu.memory_space<semaphore_mem>>)
    %c7_i32_323 = arith.constant 7 : i32
    %640 = arith.addi %0, %c7_i32_323 : i32
    %641 = arith.index_cast %640 : i32 to index
    %642 = memref.load %arg3[%641] : memref<128xi32, #tpu.memory_space<smem>>
    %c7_i32_324 = arith.constant 7 : i32
    %c2_i32_325 = arith.constant 2 : i32
    %c0_i32_326 = arith.constant 0 : i32
    %643 = tpu.memref_slice %arg6[%642, %c0_i32_326] : memref<128x128xf32, #tpu.memory_space<any>> -> memref<1x128xf32, #tpu.memory_space<any>>
    %644 = tpu.memref_squeeze %643 : memref<1x128xf32, #tpu.memory_space<any>> -> memref<128xf32, #tpu.memory_space<any>>
    %c0_i32_327 = arith.constant 0 : i32
    %645 = tpu.memref_slice %arg12[%c7_i32_324, %c0_i32_327] : memref<32x128xf32, #tpu.memory_space<vmem>> -> memref<1x128xf32, #tpu.memory_space<vmem>>
    %646 = tpu.memref_squeeze %645 : memref<1x128xf32, #tpu.memory_space<vmem>> -> memref<128xf32, #tpu.memory_space<vmem>>
    %647 = tpu.memref_slice %arg13[%c2_i32_325] : memref<3x!tpu.dma_semaphore, #tpu.memory_space<semaphore_mem>> -> memref<1x!tpu.dma_semaphore, #tpu.memory_space<semaphore_mem>>
    %648 = tpu.memref_squeeze %647 : memref<1x!tpu.dma_semaphore, #tpu.memory_space<semaphore_mem>> -> memref<!tpu.dma_semaphore, #tpu.memory_space<semaphore_mem>>
    tpu.enqueue_dma source(%644 : memref<128xf32, #tpu.memory_space<any>>) target(%646 : memref<128xf32, #tpu.memory_space<vmem>>) target_semaphore(%648 : memref<!tpu.dma_semaphore, #tpu.memory_space<semaphore_mem>>)
    %c8_i32_328 = arith.constant 8 : i32
    %649 = arith.addi %0, %c8_i32_328 : i32
    %650 = arith.index_cast %649 : i32 to index
    %651 = memref.load %arg3[%650] : memref<128xi32, #tpu.memory_space<smem>>
    %c8_i32_329 = arith.constant 8 : i32
    %c2_i32_330 = arith.constant 2 : i32
    %c0_i32_331 = arith.constant 0 : i32
    %652 = tpu.memref_slice %arg6[%651, %c0_i32_331] : memref<128x128xf32, #tpu.memory_space<any>> -> memref<1x128xf32, #tpu.memory_space<any>>
    %653 = tpu.memref_squeeze %652 : memref<1x128xf32, #tpu.memory_space<any>> -> memref<128xf32, #tpu.memory_space<any>>
    %c0_i32_332 = arith.constant 0 : i32
    %654 = tpu.memref_slice %arg12[%c8_i32_329, %c0_i32_332] : memref<32x128xf32, #tpu.memory_space<vmem>> -> memref<1x128xf32, #tpu.memory_space<vmem>>
    %655 = tpu.memref_squeeze %654 : memref<1x128xf32, #tpu.memory_space<vmem>> -> memref<128xf32, #tpu.memory_space<vmem>>
    %656 = tpu.memref_slice %arg13[%c2_i32_330] : memref<3x!tpu.dma_semaphore, #tpu.memory_space<semaphore_mem>> -> memref<1x!tpu.dma_semaphore, #tpu.memory_space<semaphore_mem>>
    %657 = tpu.memref_squeeze %656 : memref<1x!tpu.dma_semaphore, #tpu.memory_space<semaphore_mem>> -> memref<!tpu.dma_semaphore, #tpu.memory_space<semaphore_mem>>
    tpu.enqueue_dma source(%653 : memref<128xf32, #tpu.memory_space<any>>) target(%655 : memref<128xf32, #tpu.memory_space<vmem>>) target_semaphore(%657 : memref<!tpu.dma_semaphore, #tpu.memory_space<semaphore_mem>>)
    %c9_i32_333 = arith.constant 9 : i32
    %658 = arith.addi %0, %c9_i32_333 : i32
    %659 = arith.index_cast %658 : i32 to index
    %660 = memref.load %arg3[%659] : memref<128xi32, #tpu.memory_space<smem>>
    %c9_i32_334 = arith.constant 9 : i32
    %c2_i32_335 = arith.constant 2 : i32
    %c0_i32_336 = arith.constant 0 : i32
    %661 = tpu.memref_slice %arg6[%660, %c0_i32_336] : memref<128x128xf32, #tpu.memory_space<any>> -> memref<1x128xf32, #tpu.memory_space<any>>
    %662 = tpu.memref_squeeze %661 : memref<1x128xf32, #tpu.memory_space<any>> -> memref<128xf32, #tpu.memory_space<any>>
    %c0_i32_337 = arith.constant 0 : i32
    %663 = tpu.memref_slice %arg12[%c9_i32_334, %c0_i32_337] : memref<32x128xf32, #tpu.memory_space<vmem>> -> memref<1x128xf32, #tpu.memory_space<vmem>>
    %664 = tpu.memref_squeeze %663 : memref<1x128xf32, #tpu.memory_space<vmem>> -> memref<128xf32, #tpu.memory_space<vmem>>
    %665 = tpu.memref_slice %arg13[%c2_i32_335] : memref<3x!tpu.dma_semaphore, #tpu.memory_space<semaphore_mem>> -> memref<1x!tpu.dma_semaphore, #tpu.memory_space<semaphore_mem>>
    %666 = tpu.memref_squeeze %665 : memref<1x!tpu.dma_semaphore, #tpu.memory_space<semaphore_mem>> -> memref<!tpu.dma_semaphore, #tpu.memory_space<semaphore_mem>>
    tpu.enqueue_dma source(%662 : memref<128xf32, #tpu.memory_space<any>>) target(%664 : memref<128xf32, #tpu.memory_space<vmem>>) target_semaphore(%666 : memref<!tpu.dma_semaphore, #tpu.memory_space<semaphore_mem>>)
    %c10_i32_338 = arith.constant 10 : i32
    %667 = arith.addi %0, %c10_i32_338 : i32
    %668 = arith.index_cast %667 : i32 to index
    %669 = memref.load %arg3[%668] : memref<128xi32, #tpu.memory_space<smem>>
    %c10_i32_339 = arith.constant 10 : i32
    %c2_i32_340 = arith.constant 2 : i32
    %c0_i32_341 = arith.constant 0 : i32
    %670 = tpu.memref_slice %arg6[%669, %c0_i32_341] : memref<128x128xf32, #tpu.memory_space<any>> -> memref<1x128xf32, #tpu.memory_space<any>>
    %671 = tpu.memref_squeeze %670 : memref<1x128xf32, #tpu.memory_space<any>> -> memref<128xf32, #tpu.memory_space<any>>
    %c0_i32_342 = arith.constant 0 : i32
    %672 = tpu.memref_slice %arg12[%c10_i32_339, %c0_i32_342] : memref<32x128xf32, #tpu.memory_space<vmem>> -> memref<1x128xf32, #tpu.memory_space<vmem>>
    %673 = tpu.memref_squeeze %672 : memref<1x128xf32, #tpu.memory_space<vmem>> -> memref<128xf32, #tpu.memory_space<vmem>>
    %674 = tpu.memref_slice %arg13[%c2_i32_340] : memref<3x!tpu.dma_semaphore, #tpu.memory_space<semaphore_mem>> -> memref<1x!tpu.dma_semaphore, #tpu.memory_space<semaphore_mem>>
    %675 = tpu.memref_squeeze %674 : memref<1x!tpu.dma_semaphore, #tpu.memory_space<semaphore_mem>> -> memref<!tpu.dma_semaphore, #tpu.memory_space<semaphore_mem>>
    tpu.enqueue_dma source(%671 : memref<128xf32, #tpu.memory_space<any>>) target(%673 : memref<128xf32, #tpu.memory_space<vmem>>) target_semaphore(%675 : memref<!tpu.dma_semaphore, #tpu.memory_space<semaphore_mem>>)
    %c11_i32_343 = arith.constant 11 : i32
    %676 = arith.addi %0, %c11_i32_343 : i32
    %677 = arith.index_cast %676 : i32 to index
    %678 = memref.load %arg3[%677] : memref<128xi32, #tpu.memory_space<smem>>
    %c11_i32_344 = arith.constant 11 : i32
    %c2_i32_345 = arith.constant 2 : i32
    %c0_i32_346 = arith.constant 0 : i32
    %679 = tpu.memref_slice %arg6[%678, %c0_i32_346] : memref<128x128xf32, #tpu.memory_space<any>> -> memref<1x128xf32, #tpu.memory_space<any>>
    %680 = tpu.memref_squeeze %679 : memref<1x128xf32, #tpu.memory_space<any>> -> memref<128xf32, #tpu.memory_space<any>>
    %c0_i32_347 = arith.constant 0 : i32
    %681 = tpu.memref_slice %arg12[%c11_i32_344, %c0_i32_347] : memref<32x128xf32, #tpu.memory_space<vmem>> -> memref<1x128xf32, #tpu.memory_space<vmem>>
    %682 = tpu.memref_squeeze %681 : memref<1x128xf32, #tpu.memory_space<vmem>> -> memref<128xf32, #tpu.memory_space<vmem>>
    %683 = tpu.memref_slice %arg13[%c2_i32_345] : memref<3x!tpu.dma_semaphore, #tpu.memory_space<semaphore_mem>> -> memref<1x!tpu.dma_semaphore, #tpu.memory_space<semaphore_mem>>
    %684 = tpu.memref_squeeze %683 : memref<1x!tpu.dma_semaphore, #tpu.memory_space<semaphore_mem>> -> memref<!tpu.dma_semaphore, #tpu.memory_space<semaphore_mem>>
    tpu.enqueue_dma source(%680 : memref<128xf32, #tpu.memory_space<any>>) target(%682 : memref<128xf32, #tpu.memory_space<vmem>>) target_semaphore(%684 : memref<!tpu.dma_semaphore, #tpu.memory_space<semaphore_mem>>)
    %c12_i32_348 = arith.constant 12 : i32
    %685 = arith.addi %0, %c12_i32_348 : i32
    %686 = arith.index_cast %685 : i32 to index
    %687 = memref.load %arg3[%686] : memref<128xi32, #tpu.memory_space<smem>>
    %c12_i32_349 = arith.constant 12 : i32
    %c2_i32_350 = arith.constant 2 : i32
    %c0_i32_351 = arith.constant 0 : i32
    %688 = tpu.memref_slice %arg6[%687, %c0_i32_351] : memref<128x128xf32, #tpu.memory_space<any>> -> memref<1x128xf32, #tpu.memory_space<any>>
    %689 = tpu.memref_squeeze %688 : memref<1x128xf32, #tpu.memory_space<any>> -> memref<128xf32, #tpu.memory_space<any>>
    %c0_i32_352 = arith.constant 0 : i32
    %690 = tpu.memref_slice %arg12[%c12_i32_349, %c0_i32_352] : memref<32x128xf32, #tpu.memory_space<vmem>> -> memref<1x128xf32, #tpu.memory_space<vmem>>
    %691 = tpu.memref_squeeze %690 : memref<1x128xf32, #tpu.memory_space<vmem>> -> memref<128xf32, #tpu.memory_space<vmem>>
    %692 = tpu.memref_slice %arg13[%c2_i32_350] : memref<3x!tpu.dma_semaphore, #tpu.memory_space<semaphore_mem>> -> memref<1x!tpu.dma_semaphore, #tpu.memory_space<semaphore_mem>>
    %693 = tpu.memref_squeeze %692 : memref<1x!tpu.dma_semaphore, #tpu.memory_space<semaphore_mem>> -> memref<!tpu.dma_semaphore, #tpu.memory_space<semaphore_mem>>
    tpu.enqueue_dma source(%689 : memref<128xf32, #tpu.memory_space<any>>) target(%691 : memref<128xf32, #tpu.memory_space<vmem>>) target_semaphore(%693 : memref<!tpu.dma_semaphore, #tpu.memory_space<semaphore_mem>>)
    %c13_i32_353 = arith.constant 13 : i32
    %694 = arith.addi %0, %c13_i32_353 : i32
    %695 = arith.index_cast %694 : i32 to index
    %696 = memref.load %arg3[%695] : memref<128xi32, #tpu.memory_space<smem>>
    %c13_i32_354 = arith.constant 13 : i32
    %c2_i32_355 = arith.constant 2 : i32
    %c0_i32_356 = arith.constant 0 : i32
    %697 = tpu.memref_slice %arg6[%696, %c0_i32_356] : memref<128x128xf32, #tpu.memory_space<any>> -> memref<1x128xf32, #tpu.memory_space<any>>
    %698 = tpu.memref_squeeze %697 : memref<1x128xf32, #tpu.memory_space<any>> -> memref<128xf32, #tpu.memory_space<any>>
    %c0_i32_357 = arith.constant 0 : i32
    %699 = tpu.memref_slice %arg12[%c13_i32_354, %c0_i32_357] : memref<32x128xf32, #tpu.memory_space<vmem>> -> memref<1x128xf32, #tpu.memory_space<vmem>>
    %700 = tpu.memref_squeeze %699 : memref<1x128xf32, #tpu.memory_space<vmem>> -> memref<128xf32, #tpu.memory_space<vmem>>
    %701 = tpu.memref_slice %arg13[%c2_i32_355] : memref<3x!tpu.dma_semaphore, #tpu.memory_space<semaphore_mem>> -> memref<1x!tpu.dma_semaphore, #tpu.memory_space<semaphore_mem>>
    %702 = tpu.memref_squeeze %701 : memref<1x!tpu.dma_semaphore, #tpu.memory_space<semaphore_mem>> -> memref<!tpu.dma_semaphore, #tpu.memory_space<semaphore_mem>>
    tpu.enqueue_dma source(%698 : memref<128xf32, #tpu.memory_space<any>>) target(%700 : memref<128xf32, #tpu.memory_space<vmem>>) target_semaphore(%702 : memref<!tpu.dma_semaphore, #tpu.memory_space<semaphore_mem>>)
    %c14_i32_358 = arith.constant 14 : i32
    %703 = arith.addi %0, %c14_i32_358 : i32
    %704 = arith.index_cast %703 : i32 to index
    %705 = memref.load %arg3[%704] : memref<128xi32, #tpu.memory_space<smem>>
    %c14_i32_359 = arith.constant 14 : i32
    %c2_i32_360 = arith.constant 2 : i32
    %c0_i32_361 = arith.constant 0 : i32
    %706 = tpu.memref_slice %arg6[%705, %c0_i32_361] : memref<128x128xf32, #tpu.memory_space<any>> -> memref<1x128xf32, #tpu.memory_space<any>>
    %707 = tpu.memref_squeeze %706 : memref<1x128xf32, #tpu.memory_space<any>> -> memref<128xf32, #tpu.memory_space<any>>
    %c0_i32_362 = arith.constant 0 : i32
    %708 = tpu.memref_slice %arg12[%c14_i32_359, %c0_i32_362] : memref<32x128xf32, #tpu.memory_space<vmem>> -> memref<1x128xf32, #tpu.memory_space<vmem>>
    %709 = tpu.memref_squeeze %708 : memref<1x128xf32, #tpu.memory_space<vmem>> -> memref<128xf32, #tpu.memory_space<vmem>>
    %710 = tpu.memref_slice %arg13[%c2_i32_360] : memref<3x!tpu.dma_semaphore, #tpu.memory_space<semaphore_mem>> -> memref<1x!tpu.dma_semaphore, #tpu.memory_space<semaphore_mem>>
    %711 = tpu.memref_squeeze %710 : memref<1x!tpu.dma_semaphore, #tpu.memory_space<semaphore_mem>> -> memref<!tpu.dma_semaphore, #tpu.memory_space<semaphore_mem>>
    tpu.enqueue_dma source(%707 : memref<128xf32, #tpu.memory_space<any>>) target(%709 : memref<128xf32, #tpu.memory_space<vmem>>) target_semaphore(%711 : memref<!tpu.dma_semaphore, #tpu.memory_space<semaphore_mem>>)
    %c15_i32_363 = arith.constant 15 : i32
    %712 = arith.addi %0, %c15_i32_363 : i32
    %713 = arith.index_cast %712 : i32 to index
    %714 = memref.load %arg3[%713] : memref<128xi32, #tpu.memory_space<smem>>
    %c15_i32_364 = arith.constant 15 : i32
    %c2_i32_365 = arith.constant 2 : i32
    %c0_i32_366 = arith.constant 0 : i32
    %715 = tpu.memref_slice %arg6[%714, %c0_i32_366] : memref<128x128xf32, #tpu.memory_space<any>> -> memref<1x128xf32, #tpu.memory_space<any>>
    %716 = tpu.memref_squeeze %715 : memref<1x128xf32, #tpu.memory_space<any>> -> memref<128xf32, #tpu.memory_space<any>>
    %c0_i32_367 = arith.constant 0 : i32
    %717 = tpu.memref_slice %arg12[%c15_i32_364, %c0_i32_367] : memref<32x128xf32, #tpu.memory_space<vmem>> -> memref<1x128xf32, #tpu.memory_space<vmem>>
    %718 = tpu.memref_squeeze %717 : memref<1x128xf32, #tpu.memory_space<vmem>> -> memref<128xf32, #tpu.memory_space<vmem>>
    %719 = tpu.memref_slice %arg13[%c2_i32_365] : memref<3x!tpu.dma_semaphore, #tpu.memory_space<semaphore_mem>> -> memref<1x!tpu.dma_semaphore, #tpu.memory_space<semaphore_mem>>
    %720 = tpu.memref_squeeze %719 : memref<1x!tpu.dma_semaphore, #tpu.memory_space<semaphore_mem>> -> memref<!tpu.dma_semaphore, #tpu.memory_space<semaphore_mem>>
    tpu.enqueue_dma source(%716 : memref<128xf32, #tpu.memory_space<any>>) target(%718 : memref<128xf32, #tpu.memory_space<vmem>>) target_semaphore(%720 : memref<!tpu.dma_semaphore, #tpu.memory_space<semaphore_mem>>)
    %c16_i32_368 = arith.constant 16 : i32
    %721 = arith.addi %0, %c16_i32_368 : i32
    %722 = arith.index_cast %721 : i32 to index
    %723 = memref.load %arg3[%722] : memref<128xi32, #tpu.memory_space<smem>>
    %c16_i32_369 = arith.constant 16 : i32
    %c2_i32_370 = arith.constant 2 : i32
    %c0_i32_371 = arith.constant 0 : i32
    %724 = tpu.memref_slice %arg6[%723, %c0_i32_371] : memref<128x128xf32, #tpu.memory_space<any>> -> memref<1x128xf32, #tpu.memory_space<any>>
    %725 = tpu.memref_squeeze %724 : memref<1x128xf32, #tpu.memory_space<any>> -> memref<128xf32, #tpu.memory_space<any>>
    %c0_i32_372 = arith.constant 0 : i32
    %726 = tpu.memref_slice %arg12[%c16_i32_369, %c0_i32_372] : memref<32x128xf32, #tpu.memory_space<vmem>> -> memref<1x128xf32, #tpu.memory_space<vmem>>
    %727 = tpu.memref_squeeze %726 : memref<1x128xf32, #tpu.memory_space<vmem>> -> memref<128xf32, #tpu.memory_space<vmem>>
    %728 = tpu.memref_slice %arg13[%c2_i32_370] : memref<3x!tpu.dma_semaphore, #tpu.memory_space<semaphore_mem>> -> memref<1x!tpu.dma_semaphore, #tpu.memory_space<semaphore_mem>>
    %729 = tpu.memref_squeeze %728 : memref<1x!tpu.dma_semaphore, #tpu.memory_space<semaphore_mem>> -> memref<!tpu.dma_semaphore, #tpu.memory_space<semaphore_mem>>
    tpu.enqueue_dma source(%725 : memref<128xf32, #tpu.memory_space<any>>) target(%727 : memref<128xf32, #tpu.memory_space<vmem>>) target_semaphore(%729 : memref<!tpu.dma_semaphore, #tpu.memory_space<semaphore_mem>>)
    %c17_i32_373 = arith.constant 17 : i32
    %730 = arith.addi %0, %c17_i32_373 : i32
    %731 = arith.index_cast %730 : i32 to index
    %732 = memref.load %arg3[%731] : memref<128xi32, #tpu.memory_space<smem>>
    %c17_i32_374 = arith.constant 17 : i32
    %c2_i32_375 = arith.constant 2 : i32
    %c0_i32_376 = arith.constant 0 : i32
    %733 = tpu.memref_slice %arg6[%732, %c0_i32_376] : memref<128x128xf32, #tpu.memory_space<any>> -> memref<1x128xf32, #tpu.memory_space<any>>
    %734 = tpu.memref_squeeze %733 : memref<1x128xf32, #tpu.memory_space<any>> -> memref<128xf32, #tpu.memory_space<any>>
    %c0_i32_377 = arith.constant 0 : i32
    %735 = tpu.memref_slice %arg12[%c17_i32_374, %c0_i32_377] : memref<32x128xf32, #tpu.memory_space<vmem>> -> memref<1x128xf32, #tpu.memory_space<vmem>>
    %736 = tpu.memref_squeeze %735 : memref<1x128xf32, #tpu.memory_space<vmem>> -> memref<128xf32, #tpu.memory_space<vmem>>
    %737 = tpu.memref_slice %arg13[%c2_i32_375] : memref<3x!tpu.dma_semaphore, #tpu.memory_space<semaphore_mem>> -> memref<1x!tpu.dma_semaphore, #tpu.memory_space<semaphore_mem>>
    %738 = tpu.memref_squeeze %737 : memref<1x!tpu.dma_semaphore, #tpu.memory_space<semaphore_mem>> -> memref<!tpu.dma_semaphore, #tpu.memory_space<semaphore_mem>>
    tpu.enqueue_dma source(%734 : memref<128xf32, #tpu.memory_space<any>>) target(%736 : memref<128xf32, #tpu.memory_space<vmem>>) target_semaphore(%738 : memref<!tpu.dma_semaphore, #tpu.memory_space<semaphore_mem>>)
    %c18_i32_378 = arith.constant 18 : i32
    %739 = arith.addi %0, %c18_i32_378 : i32
    %740 = arith.index_cast %739 : i32 to index
    %741 = memref.load %arg3[%740] : memref<128xi32, #tpu.memory_space<smem>>
    %c18_i32_379 = arith.constant 18 : i32
    %c2_i32_380 = arith.constant 2 : i32
    %c0_i32_381 = arith.constant 0 : i32
    %742 = tpu.memref_slice %arg6[%741, %c0_i32_381] : memref<128x128xf32, #tpu.memory_space<any>> -> memref<1x128xf32, #tpu.memory_space<any>>
    %743 = tpu.memref_squeeze %742 : memref<1x128xf32, #tpu.memory_space<any>> -> memref<128xf32, #tpu.memory_space<any>>
    %c0_i32_382 = arith.constant 0 : i32
    %744 = tpu.memref_slice %arg12[%c18_i32_379, %c0_i32_382] : memref<32x128xf32, #tpu.memory_space<vmem>> -> memref<1x128xf32, #tpu.memory_space<vmem>>
    %745 = tpu.memref_squeeze %744 : memref<1x128xf32, #tpu.memory_space<vmem>> -> memref<128xf32, #tpu.memory_space<vmem>>
    %746 = tpu.memref_slice %arg13[%c2_i32_380] : memref<3x!tpu.dma_semaphore, #tpu.memory_space<semaphore_mem>> -> memref<1x!tpu.dma_semaphore, #tpu.memory_space<semaphore_mem>>
    %747 = tpu.memref_squeeze %746 : memref<1x!tpu.dma_semaphore, #tpu.memory_space<semaphore_mem>> -> memref<!tpu.dma_semaphore, #tpu.memory_space<semaphore_mem>>
    tpu.enqueue_dma source(%743 : memref<128xf32, #tpu.memory_space<any>>) target(%745 : memref<128xf32, #tpu.memory_space<vmem>>) target_semaphore(%747 : memref<!tpu.dma_semaphore, #tpu.memory_space<semaphore_mem>>)
    %c19_i32_383 = arith.constant 19 : i32
    %748 = arith.addi %0, %c19_i32_383 : i32
    %749 = arith.index_cast %748 : i32 to index
    %750 = memref.load %arg3[%749] : memref<128xi32, #tpu.memory_space<smem>>
    %c19_i32_384 = arith.constant 19 : i32
    %c2_i32_385 = arith.constant 2 : i32
    %c0_i32_386 = arith.constant 0 : i32
    %751 = tpu.memref_slice %arg6[%750, %c0_i32_386] : memref<128x128xf32, #tpu.memory_space<any>> -> memref<1x128xf32, #tpu.memory_space<any>>
    %752 = tpu.memref_squeeze %751 : memref<1x128xf32, #tpu.memory_space<any>> -> memref<128xf32, #tpu.memory_space<any>>
    %c0_i32_387 = arith.constant 0 : i32
    %753 = tpu.memref_slice %arg12[%c19_i32_384, %c0_i32_387] : memref<32x128xf32, #tpu.memory_space<vmem>> -> memref<1x128xf32, #tpu.memory_space<vmem>>
    %754 = tpu.memref_squeeze %753 : memref<1x128xf32, #tpu.memory_space<vmem>> -> memref<128xf32, #tpu.memory_space<vmem>>
    %755 = tpu.memref_slice %arg13[%c2_i32_385] : memref<3x!tpu.dma_semaphore, #tpu.memory_space<semaphore_mem>> -> memref<1x!tpu.dma_semaphore, #tpu.memory_space<semaphore_mem>>
    %756 = tpu.memref_squeeze %755 : memref<1x!tpu.dma_semaphore, #tpu.memory_space<semaphore_mem>> -> memref<!tpu.dma_semaphore, #tpu.memory_space<semaphore_mem>>
    tpu.enqueue_dma source(%752 : memref<128xf32, #tpu.memory_space<any>>) target(%754 : memref<128xf32, #tpu.memory_space<vmem>>) target_semaphore(%756 : memref<!tpu.dma_semaphore, #tpu.memory_space<semaphore_mem>>)
    %c20_i32_388 = arith.constant 20 : i32
    %757 = arith.addi %0, %c20_i32_388 : i32
    %758 = arith.index_cast %757 : i32 to index
    %759 = memref.load %arg3[%758] : memref<128xi32, #tpu.memory_space<smem>>
    %c20_i32_389 = arith.constant 20 : i32
    %c2_i32_390 = arith.constant 2 : i32
    %c0_i32_391 = arith.constant 0 : i32
    %760 = tpu.memref_slice %arg6[%759, %c0_i32_391] : memref<128x128xf32, #tpu.memory_space<any>> -> memref<1x128xf32, #tpu.memory_space<any>>
    %761 = tpu.memref_squeeze %760 : memref<1x128xf32, #tpu.memory_space<any>> -> memref<128xf32, #tpu.memory_space<any>>
    %c0_i32_392 = arith.constant 0 : i32
    %762 = tpu.memref_slice %arg12[%c20_i32_389, %c0_i32_392] : memref<32x128xf32, #tpu.memory_space<vmem>> -> memref<1x128xf32, #tpu.memory_space<vmem>>
    %763 = tpu.memref_squeeze %762 : memref<1x128xf32, #tpu.memory_space<vmem>> -> memref<128xf32, #tpu.memory_space<vmem>>
    %764 = tpu.memref_slice %arg13[%c2_i32_390] : memref<3x!tpu.dma_semaphore, #tpu.memory_space<semaphore_mem>> -> memref<1x!tpu.dma_semaphore, #tpu.memory_space<semaphore_mem>>
    %765 = tpu.memref_squeeze %764 : memref<1x!tpu.dma_semaphore, #tpu.memory_space<semaphore_mem>> -> memref<!tpu.dma_semaphore, #tpu.memory_space<semaphore_mem>>
    tpu.enqueue_dma source(%761 : memref<128xf32, #tpu.memory_space<any>>) target(%763 : memref<128xf32, #tpu.memory_space<vmem>>) target_semaphore(%765 : memref<!tpu.dma_semaphore, #tpu.memory_space<semaphore_mem>>)
    %c21_i32_393 = arith.constant 21 : i32
    %766 = arith.addi %0, %c21_i32_393 : i32
    %767 = arith.index_cast %766 : i32 to index
    %768 = memref.load %arg3[%767] : memref<128xi32, #tpu.memory_space<smem>>
    %c21_i32_394 = arith.constant 21 : i32
    %c2_i32_395 = arith.constant 2 : i32
    %c0_i32_396 = arith.constant 0 : i32
    %769 = tpu.memref_slice %arg6[%768, %c0_i32_396] : memref<128x128xf32, #tpu.memory_space<any>> -> memref<1x128xf32, #tpu.memory_space<any>>
    %770 = tpu.memref_squeeze %769 : memref<1x128xf32, #tpu.memory_space<any>> -> memref<128xf32, #tpu.memory_space<any>>
    %c0_i32_397 = arith.constant 0 : i32
    %771 = tpu.memref_slice %arg12[%c21_i32_394, %c0_i32_397] : memref<32x128xf32, #tpu.memory_space<vmem>> -> memref<1x128xf32, #tpu.memory_space<vmem>>
    %772 = tpu.memref_squeeze %771 : memref<1x128xf32, #tpu.memory_space<vmem>> -> memref<128xf32, #tpu.memory_space<vmem>>
    %773 = tpu.memref_slice %arg13[%c2_i32_395] : memref<3x!tpu.dma_semaphore, #tpu.memory_space<semaphore_mem>> -> memref<1x!tpu.dma_semaphore, #tpu.memory_space<semaphore_mem>>
    %774 = tpu.memref_squeeze %773 : memref<1x!tpu.dma_semaphore, #tpu.memory_space<semaphore_mem>> -> memref<!tpu.dma_semaphore, #tpu.memory_space<semaphore_mem>>
    tpu.enqueue_dma source(%770 : memref<128xf32, #tpu.memory_space<any>>) target(%772 : memref<128xf32, #tpu.memory_space<vmem>>) target_semaphore(%774 : memref<!tpu.dma_semaphore, #tpu.memory_space<semaphore_mem>>)
    %c22_i32_398 = arith.constant 22 : i32
    %775 = arith.addi %0, %c22_i32_398 : i32
    %776 = arith.index_cast %775 : i32 to index
    %777 = memref.load %arg3[%776] : memref<128xi32, #tpu.memory_space<smem>>
    %c22_i32_399 = arith.constant 22 : i32
    %c2_i32_400 = arith.constant 2 : i32
    %c0_i32_401 = arith.constant 0 : i32
    %778 = tpu.memref_slice %arg6[%777, %c0_i32_401] : memref<128x128xf32, #tpu.memory_space<any>> -> memref<1x128xf32, #tpu.memory_space<any>>
    %779 = tpu.memref_squeeze %778 : memref<1x128xf32, #tpu.memory_space<any>> -> memref<128xf32, #tpu.memory_space<any>>
    %c0_i32_402 = arith.constant 0 : i32
    %780 = tpu.memref_slice %arg12[%c22_i32_399, %c0_i32_402] : memref<32x128xf32, #tpu.memory_space<vmem>> -> memref<1x128xf32, #tpu.memory_space<vmem>>
    %781 = tpu.memref_squeeze %780 : memref<1x128xf32, #tpu.memory_space<vmem>> -> memref<128xf32, #tpu.memory_space<vmem>>
    %782 = tpu.memref_slice %arg13[%c2_i32_400] : memref<3x!tpu.dma_semaphore, #tpu.memory_space<semaphore_mem>> -> memref<1x!tpu.dma_semaphore, #tpu.memory_space<semaphore_mem>>
    %783 = tpu.memref_squeeze %782 : memref<1x!tpu.dma_semaphore, #tpu.memory_space<semaphore_mem>> -> memref<!tpu.dma_semaphore, #tpu.memory_space<semaphore_mem>>
    tpu.enqueue_dma source(%779 : memref<128xf32, #tpu.memory_space<any>>) target(%781 : memref<128xf32, #tpu.memory_space<vmem>>) target_semaphore(%783 : memref<!tpu.dma_semaphore, #tpu.memory_space<semaphore_mem>>)
    %c23_i32_403 = arith.constant 23 : i32
    %784 = arith.addi %0, %c23_i32_403 : i32
    %785 = arith.index_cast %784 : i32 to index
    %786 = memref.load %arg3[%785] : memref<128xi32, #tpu.memory_space<smem>>
    %c23_i32_404 = arith.constant 23 : i32
    %c2_i32_405 = arith.constant 2 : i32
    %c0_i32_406 = arith.constant 0 : i32
    %787 = tpu.memref_slice %arg6[%786, %c0_i32_406] : memref<128x128xf32, #tpu.memory_space<any>> -> memref<1x128xf32, #tpu.memory_space<any>>
    %788 = tpu.memref_squeeze %787 : memref<1x128xf32, #tpu.memory_space<any>> -> memref<128xf32, #tpu.memory_space<any>>
    %c0_i32_407 = arith.constant 0 : i32
    %789 = tpu.memref_slice %arg12[%c23_i32_404, %c0_i32_407] : memref<32x128xf32, #tpu.memory_space<vmem>> -> memref<1x128xf32, #tpu.memory_space<vmem>>
    %790 = tpu.memref_squeeze %789 : memref<1x128xf32, #tpu.memory_space<vmem>> -> memref<128xf32, #tpu.memory_space<vmem>>
    %791 = tpu.memref_slice %arg13[%c2_i32_405] : memref<3x!tpu.dma_semaphore, #tpu.memory_space<semaphore_mem>> -> memref<1x!tpu.dma_semaphore, #tpu.memory_space<semaphore_mem>>
    %792 = tpu.memref_squeeze %791 : memref<1x!tpu.dma_semaphore, #tpu.memory_space<semaphore_mem>> -> memref<!tpu.dma_semaphore, #tpu.memory_space<semaphore_mem>>
    tpu.enqueue_dma source(%788 : memref<128xf32, #tpu.memory_space<any>>) target(%790 : memref<128xf32, #tpu.memory_space<vmem>>) target_semaphore(%792 : memref<!tpu.dma_semaphore, #tpu.memory_space<semaphore_mem>>)
    %c24_i32_408 = arith.constant 24 : i32
    %793 = arith.addi %0, %c24_i32_408 : i32
    %794 = arith.index_cast %793 : i32 to index
    %795 = memref.load %arg3[%794] : memref<128xi32, #tpu.memory_space<smem>>
    %c24_i32_409 = arith.constant 24 : i32
    %c2_i32_410 = arith.constant 2 : i32
    %c0_i32_411 = arith.constant 0 : i32
    %796 = tpu.memref_slice %arg6[%795, %c0_i32_411] : memref<128x128xf32, #tpu.memory_space<any>> -> memref<1x128xf32, #tpu.memory_space<any>>
    %797 = tpu.memref_squeeze %796 : memref<1x128xf32, #tpu.memory_space<any>> -> memref<128xf32, #tpu.memory_space<any>>
    %c0_i32_412 = arith.constant 0 : i32
    %798 = tpu.memref_slice %arg12[%c24_i32_409, %c0_i32_412] : memref<32x128xf32, #tpu.memory_space<vmem>> -> memref<1x128xf32, #tpu.memory_space<vmem>>
    %799 = tpu.memref_squeeze %798 : memref<1x128xf32, #tpu.memory_space<vmem>> -> memref<128xf32, #tpu.memory_space<vmem>>
    %800 = tpu.memref_slice %arg13[%c2_i32_410] : memref<3x!tpu.dma_semaphore, #tpu.memory_space<semaphore_mem>> -> memref<1x!tpu.dma_semaphore, #tpu.memory_space<semaphore_mem>>
    %801 = tpu.memref_squeeze %800 : memref<1x!tpu.dma_semaphore, #tpu.memory_space<semaphore_mem>> -> memref<!tpu.dma_semaphore, #tpu.memory_space<semaphore_mem>>
    tpu.enqueue_dma source(%797 : memref<128xf32, #tpu.memory_space<any>>) target(%799 : memref<128xf32, #tpu.memory_space<vmem>>) target_semaphore(%801 : memref<!tpu.dma_semaphore, #tpu.memory_space<semaphore_mem>>)
    %c25_i32_413 = arith.constant 25 : i32
    %802 = arith.addi %0, %c25_i32_413 : i32
    %803 = arith.index_cast %802 : i32 to index
    %804 = memref.load %arg3[%803] : memref<128xi32, #tpu.memory_space<smem>>
    %c25_i32_414 = arith.constant 25 : i32
    %c2_i32_415 = arith.constant 2 : i32
    %c0_i32_416 = arith.constant 0 : i32
    %805 = tpu.memref_slice %arg6[%804, %c0_i32_416] : memref<128x128xf32, #tpu.memory_space<any>> -> memref<1x128xf32, #tpu.memory_space<any>>
    %806 = tpu.memref_squeeze %805 : memref<1x128xf32, #tpu.memory_space<any>> -> memref<128xf32, #tpu.memory_space<any>>
    %c0_i32_417 = arith.constant 0 : i32
    %807 = tpu.memref_slice %arg12[%c25_i32_414, %c0_i32_417] : memref<32x128xf32, #tpu.memory_space<vmem>> -> memref<1x128xf32, #tpu.memory_space<vmem>>
    %808 = tpu.memref_squeeze %807 : memref<1x128xf32, #tpu.memory_space<vmem>> -> memref<128xf32, #tpu.memory_space<vmem>>
    %809 = tpu.memref_slice %arg13[%c2_i32_415] : memref<3x!tpu.dma_semaphore, #tpu.memory_space<semaphore_mem>> -> memref<1x!tpu.dma_semaphore, #tpu.memory_space<semaphore_mem>>
    %810 = tpu.memref_squeeze %809 : memref<1x!tpu.dma_semaphore, #tpu.memory_space<semaphore_mem>> -> memref<!tpu.dma_semaphore, #tpu.memory_space<semaphore_mem>>
    tpu.enqueue_dma source(%806 : memref<128xf32, #tpu.memory_space<any>>) target(%808 : memref<128xf32, #tpu.memory_space<vmem>>) target_semaphore(%810 : memref<!tpu.dma_semaphore, #tpu.memory_space<semaphore_mem>>)
    %c26_i32_418 = arith.constant 26 : i32
    %811 = arith.addi %0, %c26_i32_418 : i32
    %812 = arith.index_cast %811 : i32 to index
    %813 = memref.load %arg3[%812] : memref<128xi32, #tpu.memory_space<smem>>
    %c26_i32_419 = arith.constant 26 : i32
    %c2_i32_420 = arith.constant 2 : i32
    %c0_i32_421 = arith.constant 0 : i32
    %814 = tpu.memref_slice %arg6[%813, %c0_i32_421] : memref<128x128xf32, #tpu.memory_space<any>> -> memref<1x128xf32, #tpu.memory_space<any>>
    %815 = tpu.memref_squeeze %814 : memref<1x128xf32, #tpu.memory_space<any>> -> memref<128xf32, #tpu.memory_space<any>>
    %c0_i32_422 = arith.constant 0 : i32
    %816 = tpu.memref_slice %arg12[%c26_i32_419, %c0_i32_422] : memref<32x128xf32, #tpu.memory_space<vmem>> -> memref<1x128xf32, #tpu.memory_space<vmem>>
    %817 = tpu.memref_squeeze %816 : memref<1x128xf32, #tpu.memory_space<vmem>> -> memref<128xf32, #tpu.memory_space<vmem>>
    %818 = tpu.memref_slice %arg13[%c2_i32_420] : memref<3x!tpu.dma_semaphore, #tpu.memory_space<semaphore_mem>> -> memref<1x!tpu.dma_semaphore, #tpu.memory_space<semaphore_mem>>
    %819 = tpu.memref_squeeze %818 : memref<1x!tpu.dma_semaphore, #tpu.memory_space<semaphore_mem>> -> memref<!tpu.dma_semaphore, #tpu.memory_space<semaphore_mem>>
    tpu.enqueue_dma source(%815 : memref<128xf32, #tpu.memory_space<any>>) target(%817 : memref<128xf32, #tpu.memory_space<vmem>>) target_semaphore(%819 : memref<!tpu.dma_semaphore, #tpu.memory_space<semaphore_mem>>)
    %c27_i32_423 = arith.constant 27 : i32
    %820 = arith.addi %0, %c27_i32_423 : i32
    %821 = arith.index_cast %820 : i32 to index
    %822 = memref.load %arg3[%821] : memref<128xi32, #tpu.memory_space<smem>>
    %c27_i32_424 = arith.constant 27 : i32
    %c2_i32_425 = arith.constant 2 : i32
    %c0_i32_426 = arith.constant 0 : i32
    %823 = tpu.memref_slice %arg6[%822, %c0_i32_426] : memref<128x128xf32, #tpu.memory_space<any>> -> memref<1x128xf32, #tpu.memory_space<any>>
    %824 = tpu.memref_squeeze %823 : memref<1x128xf32, #tpu.memory_space<any>> -> memref<128xf32, #tpu.memory_space<any>>
    %c0_i32_427 = arith.constant 0 : i32
    %825 = tpu.memref_slice %arg12[%c27_i32_424, %c0_i32_427] : memref<32x128xf32, #tpu.memory_space<vmem>> -> memref<1x128xf32, #tpu.memory_space<vmem>>
    %826 = tpu.memref_squeeze %825 : memref<1x128xf32, #tpu.memory_space<vmem>> -> memref<128xf32, #tpu.memory_space<vmem>>
    %827 = tpu.memref_slice %arg13[%c2_i32_425] : memref<3x!tpu.dma_semaphore, #tpu.memory_space<semaphore_mem>> -> memref<1x!tpu.dma_semaphore, #tpu.memory_space<semaphore_mem>>
    %828 = tpu.memref_squeeze %827 : memref<1x!tpu.dma_semaphore, #tpu.memory_space<semaphore_mem>> -> memref<!tpu.dma_semaphore, #tpu.memory_space<semaphore_mem>>
    tpu.enqueue_dma source(%824 : memref<128xf32, #tpu.memory_space<any>>) target(%826 : memref<128xf32, #tpu.memory_space<vmem>>) target_semaphore(%828 : memref<!tpu.dma_semaphore, #tpu.memory_space<semaphore_mem>>)
    %c28_i32_428 = arith.constant 28 : i32
    %829 = arith.addi %0, %c28_i32_428 : i32
    %830 = arith.index_cast %829 : i32 to index
    %831 = memref.load %arg3[%830] : memref<128xi32, #tpu.memory_space<smem>>
    %c28_i32_429 = arith.constant 28 : i32
    %c2_i32_430 = arith.constant 2 : i32
    %c0_i32_431 = arith.constant 0 : i32
    %832 = tpu.memref_slice %arg6[%831, %c0_i32_431] : memref<128x128xf32, #tpu.memory_space<any>> -> memref<1x128xf32, #tpu.memory_space<any>>
    %833 = tpu.memref_squeeze %832 : memref<1x128xf32, #tpu.memory_space<any>> -> memref<128xf32, #tpu.memory_space<any>>
    %c0_i32_432 = arith.constant 0 : i32
    %834 = tpu.memref_slice %arg12[%c28_i32_429, %c0_i32_432] : memref<32x128xf32, #tpu.memory_space<vmem>> -> memref<1x128xf32, #tpu.memory_space<vmem>>
    %835 = tpu.memref_squeeze %834 : memref<1x128xf32, #tpu.memory_space<vmem>> -> memref<128xf32, #tpu.memory_space<vmem>>
    %836 = tpu.memref_slice %arg13[%c2_i32_430] : memref<3x!tpu.dma_semaphore, #tpu.memory_space<semaphore_mem>> -> memref<1x!tpu.dma_semaphore, #tpu.memory_space<semaphore_mem>>
    %837 = tpu.memref_squeeze %836 : memref<1x!tpu.dma_semaphore, #tpu.memory_space<semaphore_mem>> -> memref<!tpu.dma_semaphore, #tpu.memory_space<semaphore_mem>>
    tpu.enqueue_dma source(%833 : memref<128xf32, #tpu.memory_space<any>>) target(%835 : memref<128xf32, #tpu.memory_space<vmem>>) target_semaphore(%837 : memref<!tpu.dma_semaphore, #tpu.memory_space<semaphore_mem>>)
    %c29_i32_433 = arith.constant 29 : i32
    %838 = arith.addi %0, %c29_i32_433 : i32
    %839 = arith.index_cast %838 : i32 to index
    %840 = memref.load %arg3[%839] : memref<128xi32, #tpu.memory_space<smem>>
    %c29_i32_434 = arith.constant 29 : i32
    %c2_i32_435 = arith.constant 2 : i32
    %c0_i32_436 = arith.constant 0 : i32
    %841 = tpu.memref_slice %arg6[%840, %c0_i32_436] : memref<128x128xf32, #tpu.memory_space<any>> -> memref<1x128xf32, #tpu.memory_space<any>>
    %842 = tpu.memref_squeeze %841 : memref<1x128xf32, #tpu.memory_space<any>> -> memref<128xf32, #tpu.memory_space<any>>
    %c0_i32_437 = arith.constant 0 : i32
    %843 = tpu.memref_slice %arg12[%c29_i32_434, %c0_i32_437] : memref<32x128xf32, #tpu.memory_space<vmem>> -> memref<1x128xf32, #tpu.memory_space<vmem>>
    %844 = tpu.memref_squeeze %843 : memref<1x128xf32, #tpu.memory_space<vmem>> -> memref<128xf32, #tpu.memory_space<vmem>>
    %845 = tpu.memref_slice %arg13[%c2_i32_435] : memref<3x!tpu.dma_semaphore, #tpu.memory_space<semaphore_mem>> -> memref<1x!tpu.dma_semaphore, #tpu.memory_space<semaphore_mem>>
    %846 = tpu.memref_squeeze %845 : memref<1x!tpu.dma_semaphore, #tpu.memory_space<semaphore_mem>> -> memref<!tpu.dma_semaphore, #tpu.memory_space<semaphore_mem>>
    tpu.enqueue_dma source(%842 : memref<128xf32, #tpu.memory_space<any>>) target(%844 : memref<128xf32, #tpu.memory_space<vmem>>) target_semaphore(%846 : memref<!tpu.dma_semaphore, #tpu.memory_space<semaphore_mem>>)
    %c30_i32_438 = arith.constant 30 : i32
    %847 = arith.addi %0, %c30_i32_438 : i32
    %848 = arith.index_cast %847 : i32 to index
    %849 = memref.load %arg3[%848] : memref<128xi32, #tpu.memory_space<smem>>
    %c30_i32_439 = arith.constant 30 : i32
    %c2_i32_440 = arith.constant 2 : i32
    %c0_i32_441 = arith.constant 0 : i32
    %850 = tpu.memref_slice %arg6[%849, %c0_i32_441] : memref<128x128xf32, #tpu.memory_space<any>> -> memref<1x128xf32, #tpu.memory_space<any>>
    %851 = tpu.memref_squeeze %850 : memref<1x128xf32, #tpu.memory_space<any>> -> memref<128xf32, #tpu.memory_space<any>>
    %c0_i32_442 = arith.constant 0 : i32
    %852 = tpu.memref_slice %arg12[%c30_i32_439, %c0_i32_442] : memref<32x128xf32, #tpu.memory_space<vmem>> -> memref<1x128xf32, #tpu.memory_space<vmem>>
    %853 = tpu.memref_squeeze %852 : memref<1x128xf32, #tpu.memory_space<vmem>> -> memref<128xf32, #tpu.memory_space<vmem>>
    %854 = tpu.memref_slice %arg13[%c2_i32_440] : memref<3x!tpu.dma_semaphore, #tpu.memory_space<semaphore_mem>> -> memref<1x!tpu.dma_semaphore, #tpu.memory_space<semaphore_mem>>
    %855 = tpu.memref_squeeze %854 : memref<1x!tpu.dma_semaphore, #tpu.memory_space<semaphore_mem>> -> memref<!tpu.dma_semaphore, #tpu.memory_space<semaphore_mem>>
    tpu.enqueue_dma source(%851 : memref<128xf32, #tpu.memory_space<any>>) target(%853 : memref<128xf32, #tpu.memory_space<vmem>>) target_semaphore(%855 : memref<!tpu.dma_semaphore, #tpu.memory_space<semaphore_mem>>)
    %c31_i32_443 = arith.constant 31 : i32
    %856 = arith.addi %0, %c31_i32_443 : i32
    %857 = arith.index_cast %856 : i32 to index
    %858 = memref.load %arg3[%857] : memref<128xi32, #tpu.memory_space<smem>>
    %c31_i32_444 = arith.constant 31 : i32
    %c2_i32_445 = arith.constant 2 : i32
    %c0_i32_446 = arith.constant 0 : i32
    %859 = tpu.memref_slice %arg6[%858, %c0_i32_446] : memref<128x128xf32, #tpu.memory_space<any>> -> memref<1x128xf32, #tpu.memory_space<any>>
    %860 = tpu.memref_squeeze %859 : memref<1x128xf32, #tpu.memory_space<any>> -> memref<128xf32, #tpu.memory_space<any>>
    %c0_i32_447 = arith.constant 0 : i32
    %861 = tpu.memref_slice %arg12[%c31_i32_444, %c0_i32_447] : memref<32x128xf32, #tpu.memory_space<vmem>> -> memref<1x128xf32, #tpu.memory_space<vmem>>
    %862 = tpu.memref_squeeze %861 : memref<1x128xf32, #tpu.memory_space<vmem>> -> memref<128xf32, #tpu.memory_space<vmem>>
    %863 = tpu.memref_slice %arg13[%c2_i32_445] : memref<3x!tpu.dma_semaphore, #tpu.memory_space<semaphore_mem>> -> memref<1x!tpu.dma_semaphore, #tpu.memory_space<semaphore_mem>>
    %864 = tpu.memref_squeeze %863 : memref<1x!tpu.dma_semaphore, #tpu.memory_space<semaphore_mem>> -> memref<!tpu.dma_semaphore, #tpu.memory_space<semaphore_mem>>
    tpu.enqueue_dma source(%860 : memref<128xf32, #tpu.memory_space<any>>) target(%862 : memref<128xf32, #tpu.memory_space<vmem>>) target_semaphore(%864 : memref<!tpu.dma_semaphore, #tpu.memory_space<semaphore_mem>>)
    %c0_i32_448 = arith.constant 0 : i32
    %c0_i32_449 = arith.constant 0 : i32
    %c0_i32_450 = arith.constant 0 : i32
    %c0_i32_451 = arith.constant 0 : i32
    %865 = tpu.memref_slice %arg4[%c0_i32_448, %c0_i32_451] : memref<512x128xf32, #tpu.memory_space<any>> -> memref<1x128xf32, #tpu.memory_space<any>>
    %866 = tpu.memref_squeeze %865 : memref<1x128xf32, #tpu.memory_space<any>> -> memref<128xf32, #tpu.memory_space<any>>
    %c0_i32_452 = arith.constant 0 : i32
    %867 = tpu.memref_slice %arg10[%c0_i32_449, %c0_i32_452] : memref<32x128xf32, #tpu.memory_space<vmem>> -> memref<1x128xf32, #tpu.memory_space<vmem>>
    %868 = tpu.memref_squeeze %867 : memref<1x128xf32, #tpu.memory_space<vmem>> -> memref<128xf32, #tpu.memory_space<vmem>>
    %869 = tpu.memref_slice %arg13[%c0_i32_450] : memref<3x!tpu.dma_semaphore, #tpu.memory_space<semaphore_mem>> -> memref<1x!tpu.dma_semaphore, #tpu.memory_space<semaphore_mem>>
    %870 = tpu.memref_squeeze %869 : memref<1x!tpu.dma_semaphore, #tpu.memory_space<semaphore_mem>> -> memref<!tpu.dma_semaphore, #tpu.memory_space<semaphore_mem>>
    tpu.wait_dma2 semaphore(%870 : memref<!tpu.dma_semaphore, #tpu.memory_space<semaphore_mem>>) src(%866 : memref<128xf32, #tpu.memory_space<any>>) dst(%868 : memref<128xf32, #tpu.memory_space<vmem>>)
    %c0_i32_453 = arith.constant 0 : i32
    %c1_i32_454 = arith.constant 1 : i32
    %c0_i32_455 = arith.constant 0 : i32
    %c0_i32_456 = arith.constant 0 : i32
    %871 = tpu.memref_slice %arg4[%c0_i32_453, %c0_i32_456] : memref<512x128xf32, #tpu.memory_space<any>> -> memref<1x128xf32, #tpu.memory_space<any>>
    %872 = tpu.memref_squeeze %871 : memref<1x128xf32, #tpu.memory_space<any>> -> memref<128xf32, #tpu.memory_space<any>>
    %c0_i32_457 = arith.constant 0 : i32
    %873 = tpu.memref_slice %arg10[%c1_i32_454, %c0_i32_457] : memref<32x128xf32, #tpu.memory_space<vmem>> -> memref<1x128xf32, #tpu.memory_space<vmem>>
    %874 = tpu.memref_squeeze %873 : memref<1x128xf32, #tpu.memory_space<vmem>> -> memref<128xf32, #tpu.memory_space<vmem>>
    %875 = tpu.memref_slice %arg13[%c0_i32_455] : memref<3x!tpu.dma_semaphore, #tpu.memory_space<semaphore_mem>> -> memref<1x!tpu.dma_semaphore, #tpu.memory_space<semaphore_mem>>
    %876 = tpu.memref_squeeze %875 : memref<1x!tpu.dma_semaphore, #tpu.memory_space<semaphore_mem>> -> memref<!tpu.dma_semaphore, #tpu.memory_space<semaphore_mem>>
    tpu.wait_dma2 semaphore(%876 : memref<!tpu.dma_semaphore, #tpu.memory_space<semaphore_mem>>) src(%872 : memref<128xf32, #tpu.memory_space<any>>) dst(%874 : memref<128xf32, #tpu.memory_space<vmem>>)
    %c0_i32_458 = arith.constant 0 : i32
    %c2_i32_459 = arith.constant 2 : i32
    %c0_i32_460 = arith.constant 0 : i32
    %c0_i32_461 = arith.constant 0 : i32
    %877 = tpu.memref_slice %arg4[%c0_i32_458, %c0_i32_461] : memref<512x128xf32, #tpu.memory_space<any>> -> memref<1x128xf32, #tpu.memory_space<any>>
    %878 = tpu.memref_squeeze %877 : memref<1x128xf32, #tpu.memory_space<any>> -> memref<128xf32, #tpu.memory_space<any>>
    %c0_i32_462 = arith.constant 0 : i32
    %879 = tpu.memref_slice %arg10[%c2_i32_459, %c0_i32_462] : memref<32x128xf32, #tpu.memory_space<vmem>> -> memref<1x128xf32, #tpu.memory_space<vmem>>
    %880 = tpu.memref_squeeze %879 : memref<1x128xf32, #tpu.memory_space<vmem>> -> memref<128xf32, #tpu.memory_space<vmem>>
    %881 = tpu.memref_slice %arg13[%c0_i32_460] : memref<3x!tpu.dma_semaphore, #tpu.memory_space<semaphore_mem>> -> memref<1x!tpu.dma_semaphore, #tpu.memory_space<semaphore_mem>>
    %882 = tpu.memref_squeeze %881 : memref<1x!tpu.dma_semaphore, #tpu.memory_space<semaphore_mem>> -> memref<!tpu.dma_semaphore, #tpu.memory_space<semaphore_mem>>
    tpu.wait_dma2 semaphore(%882 : memref<!tpu.dma_semaphore, #tpu.memory_space<semaphore_mem>>) src(%878 : memref<128xf32, #tpu.memory_space<any>>) dst(%880 : memref<128xf32, #tpu.memory_space<vmem>>)
    %c0_i32_463 = arith.constant 0 : i32
    %c3_i32_464 = arith.constant 3 : i32
    %c0_i32_465 = arith.constant 0 : i32
    %c0_i32_466 = arith.constant 0 : i32
    %883 = tpu.memref_slice %arg4[%c0_i32_463, %c0_i32_466] : memref<512x128xf32, #tpu.memory_space<any>> -> memref<1x128xf32, #tpu.memory_space<any>>
    %884 = tpu.memref_squeeze %883 : memref<1x128xf32, #tpu.memory_space<any>> -> memref<128xf32, #tpu.memory_space<any>>
    %c0_i32_467 = arith.constant 0 : i32
    %885 = tpu.memref_slice %arg10[%c3_i32_464, %c0_i32_467] : memref<32x128xf32, #tpu.memory_space<vmem>> -> memref<1x128xf32, #tpu.memory_space<vmem>>
    %886 = tpu.memref_squeeze %885 : memref<1x128xf32, #tpu.memory_space<vmem>> -> memref<128xf32, #tpu.memory_space<vmem>>
    %887 = tpu.memref_slice %arg13[%c0_i32_465] : memref<3x!tpu.dma_semaphore, #tpu.memory_space<semaphore_mem>> -> memref<1x!tpu.dma_semaphore, #tpu.memory_space<semaphore_mem>>
    %888 = tpu.memref_squeeze %887 : memref<1x!tpu.dma_semaphore, #tpu.memory_space<semaphore_mem>> -> memref<!tpu.dma_semaphore, #tpu.memory_space<semaphore_mem>>
    tpu.wait_dma2 semaphore(%888 : memref<!tpu.dma_semaphore, #tpu.memory_space<semaphore_mem>>) src(%884 : memref<128xf32, #tpu.memory_space<any>>) dst(%886 : memref<128xf32, #tpu.memory_space<vmem>>)
    %c0_i32_468 = arith.constant 0 : i32
    %c4_i32_469 = arith.constant 4 : i32
    %c0_i32_470 = arith.constant 0 : i32
    %c0_i32_471 = arith.constant 0 : i32
    %889 = tpu.memref_slice %arg4[%c0_i32_468, %c0_i32_471] : memref<512x128xf32, #tpu.memory_space<any>> -> memref<1x128xf32, #tpu.memory_space<any>>
    %890 = tpu.memref_squeeze %889 : memref<1x128xf32, #tpu.memory_space<any>> -> memref<128xf32, #tpu.memory_space<any>>
    %c0_i32_472 = arith.constant 0 : i32
    %891 = tpu.memref_slice %arg10[%c4_i32_469, %c0_i32_472] : memref<32x128xf32, #tpu.memory_space<vmem>> -> memref<1x128xf32, #tpu.memory_space<vmem>>
    %892 = tpu.memref_squeeze %891 : memref<1x128xf32, #tpu.memory_space<vmem>> -> memref<128xf32, #tpu.memory_space<vmem>>
    %893 = tpu.memref_slice %arg13[%c0_i32_470] : memref<3x!tpu.dma_semaphore, #tpu.memory_space<semaphore_mem>> -> memref<1x!tpu.dma_semaphore, #tpu.memory_space<semaphore_mem>>
    %894 = tpu.memref_squeeze %893 : memref<1x!tpu.dma_semaphore, #tpu.memory_space<semaphore_mem>> -> memref<!tpu.dma_semaphore, #tpu.memory_space<semaphore_mem>>
    tpu.wait_dma2 semaphore(%894 : memref<!tpu.dma_semaphore, #tpu.memory_space<semaphore_mem>>) src(%890 : memref<128xf32, #tpu.memory_space<any>>) dst(%892 : memref<128xf32, #tpu.memory_space<vmem>>)
    %c0_i32_473 = arith.constant 0 : i32
    %c5_i32_474 = arith.constant 5 : i32
    %c0_i32_475 = arith.constant 0 : i32
    %c0_i32_476 = arith.constant 0 : i32
    %895 = tpu.memref_slice %arg4[%c0_i32_473, %c0_i32_476] : memref<512x128xf32, #tpu.memory_space<any>> -> memref<1x128xf32, #tpu.memory_space<any>>
    %896 = tpu.memref_squeeze %895 : memref<1x128xf32, #tpu.memory_space<any>> -> memref<128xf32, #tpu.memory_space<any>>
    %c0_i32_477 = arith.constant 0 : i32
    %897 = tpu.memref_slice %arg10[%c5_i32_474, %c0_i32_477] : memref<32x128xf32, #tpu.memory_space<vmem>> -> memref<1x128xf32, #tpu.memory_space<vmem>>
    %898 = tpu.memref_squeeze %897 : memref<1x128xf32, #tpu.memory_space<vmem>> -> memref<128xf32, #tpu.memory_space<vmem>>
    %899 = tpu.memref_slice %arg13[%c0_i32_475] : memref<3x!tpu.dma_semaphore, #tpu.memory_space<semaphore_mem>> -> memref<1x!tpu.dma_semaphore, #tpu.memory_space<semaphore_mem>>
    %900 = tpu.memref_squeeze %899 : memref<1x!tpu.dma_semaphore, #tpu.memory_space<semaphore_mem>> -> memref<!tpu.dma_semaphore, #tpu.memory_space<semaphore_mem>>
    tpu.wait_dma2 semaphore(%900 : memref<!tpu.dma_semaphore, #tpu.memory_space<semaphore_mem>>) src(%896 : memref<128xf32, #tpu.memory_space<any>>) dst(%898 : memref<128xf32, #tpu.memory_space<vmem>>)
    %c0_i32_478 = arith.constant 0 : i32
    %c6_i32_479 = arith.constant 6 : i32
    %c0_i32_480 = arith.constant 0 : i32
    %c0_i32_481 = arith.constant 0 : i32
    %901 = tpu.memref_slice %arg4[%c0_i32_478, %c0_i32_481] : memref<512x128xf32, #tpu.memory_space<any>> -> memref<1x128xf32, #tpu.memory_space<any>>
    %902 = tpu.memref_squeeze %901 : memref<1x128xf32, #tpu.memory_space<any>> -> memref<128xf32, #tpu.memory_space<any>>
    %c0_i32_482 = arith.constant 0 : i32
    %903 = tpu.memref_slice %arg10[%c6_i32_479, %c0_i32_482] : memref<32x128xf32, #tpu.memory_space<vmem>> -> memref<1x128xf32, #tpu.memory_space<vmem>>
    %904 = tpu.memref_squeeze %903 : memref<1x128xf32, #tpu.memory_space<vmem>> -> memref<128xf32, #tpu.memory_space<vmem>>
    %905 = tpu.memref_slice %arg13[%c0_i32_480] : memref<3x!tpu.dma_semaphore, #tpu.memory_space<semaphore_mem>> -> memref<1x!tpu.dma_semaphore, #tpu.memory_space<semaphore_mem>>
    %906 = tpu.memref_squeeze %905 : memref<1x!tpu.dma_semaphore, #tpu.memory_space<semaphore_mem>> -> memref<!tpu.dma_semaphore, #tpu.memory_space<semaphore_mem>>
    tpu.wait_dma2 semaphore(%906 : memref<!tpu.dma_semaphore, #tpu.memory_space<semaphore_mem>>) src(%902 : memref<128xf32, #tpu.memory_space<any>>) dst(%904 : memref<128xf32, #tpu.memory_space<vmem>>)
    %c0_i32_483 = arith.constant 0 : i32
    %c7_i32_484 = arith.constant 7 : i32
    %c0_i32_485 = arith.constant 0 : i32
    %c0_i32_486 = arith.constant 0 : i32
    %907 = tpu.memref_slice %arg4[%c0_i32_483, %c0_i32_486] : memref<512x128xf32, #tpu.memory_space<any>> -> memref<1x128xf32, #tpu.memory_space<any>>
    %908 = tpu.memref_squeeze %907 : memref<1x128xf32, #tpu.memory_space<any>> -> memref<128xf32, #tpu.memory_space<any>>
    %c0_i32_487 = arith.constant 0 : i32
    %909 = tpu.memref_slice %arg10[%c7_i32_484, %c0_i32_487] : memref<32x128xf32, #tpu.memory_space<vmem>> -> memref<1x128xf32, #tpu.memory_space<vmem>>
    %910 = tpu.memref_squeeze %909 : memref<1x128xf32, #tpu.memory_space<vmem>> -> memref<128xf32, #tpu.memory_space<vmem>>
    %911 = tpu.memref_slice %arg13[%c0_i32_485] : memref<3x!tpu.dma_semaphore, #tpu.memory_space<semaphore_mem>> -> memref<1x!tpu.dma_semaphore, #tpu.memory_space<semaphore_mem>>
    %912 = tpu.memref_squeeze %911 : memref<1x!tpu.dma_semaphore, #tpu.memory_space<semaphore_mem>> -> memref<!tpu.dma_semaphore, #tpu.memory_space<semaphore_mem>>
    tpu.wait_dma2 semaphore(%912 : memref<!tpu.dma_semaphore, #tpu.memory_space<semaphore_mem>>) src(%908 : memref<128xf32, #tpu.memory_space<any>>) dst(%910 : memref<128xf32, #tpu.memory_space<vmem>>)
    %c0_i32_488 = arith.constant 0 : i32
    %c8_i32_489 = arith.constant 8 : i32
    %c0_i32_490 = arith.constant 0 : i32
    %c0_i32_491 = arith.constant 0 : i32
    %913 = tpu.memref_slice %arg4[%c0_i32_488, %c0_i32_491] : memref<512x128xf32, #tpu.memory_space<any>> -> memref<1x128xf32, #tpu.memory_space<any>>
    %914 = tpu.memref_squeeze %913 : memref<1x128xf32, #tpu.memory_space<any>> -> memref<128xf32, #tpu.memory_space<any>>
    %c0_i32_492 = arith.constant 0 : i32
    %915 = tpu.memref_slice %arg10[%c8_i32_489, %c0_i32_492] : memref<32x128xf32, #tpu.memory_space<vmem>> -> memref<1x128xf32, #tpu.memory_space<vmem>>
    %916 = tpu.memref_squeeze %915 : memref<1x128xf32, #tpu.memory_space<vmem>> -> memref<128xf32, #tpu.memory_space<vmem>>
    %917 = tpu.memref_slice %arg13[%c0_i32_490] : memref<3x!tpu.dma_semaphore, #tpu.memory_space<semaphore_mem>> -> memref<1x!tpu.dma_semaphore, #tpu.memory_space<semaphore_mem>>
    %918 = tpu.memref_squeeze %917 : memref<1x!tpu.dma_semaphore, #tpu.memory_space<semaphore_mem>> -> memref<!tpu.dma_semaphore, #tpu.memory_space<semaphore_mem>>
    tpu.wait_dma2 semaphore(%918 : memref<!tpu.dma_semaphore, #tpu.memory_space<semaphore_mem>>) src(%914 : memref<128xf32, #tpu.memory_space<any>>) dst(%916 : memref<128xf32, #tpu.memory_space<vmem>>)
    %c0_i32_493 = arith.constant 0 : i32
    %c9_i32_494 = arith.constant 9 : i32
    %c0_i32_495 = arith.constant 0 : i32
    %c0_i32_496 = arith.constant 0 : i32
    %919 = tpu.memref_slice %arg4[%c0_i32_493, %c0_i32_496] : memref<512x128xf32, #tpu.memory_space<any>> -> memref<1x128xf32, #tpu.memory_space<any>>
    %920 = tpu.memref_squeeze %919 : memref<1x128xf32, #tpu.memory_space<any>> -> memref<128xf32, #tpu.memory_space<any>>
    %c0_i32_497 = arith.constant 0 : i32
    %921 = tpu.memref_slice %arg10[%c9_i32_494, %c0_i32_497] : memref<32x128xf32, #tpu.memory_space<vmem>> -> memref<1x128xf32, #tpu.memory_space<vmem>>
    %922 = tpu.memref_squeeze %921 : memref<1x128xf32, #tpu.memory_space<vmem>> -> memref<128xf32, #tpu.memory_space<vmem>>
    %923 = tpu.memref_slice %arg13[%c0_i32_495] : memref<3x!tpu.dma_semaphore, #tpu.memory_space<semaphore_mem>> -> memref<1x!tpu.dma_semaphore, #tpu.memory_space<semaphore_mem>>
    %924 = tpu.memref_squeeze %923 : memref<1x!tpu.dma_semaphore, #tpu.memory_space<semaphore_mem>> -> memref<!tpu.dma_semaphore, #tpu.memory_space<semaphore_mem>>
    tpu.wait_dma2 semaphore(%924 : memref<!tpu.dma_semaphore, #tpu.memory_space<semaphore_mem>>) src(%920 : memref<128xf32, #tpu.memory_space<any>>) dst(%922 : memref<128xf32, #tpu.memory_space<vmem>>)
    %c0_i32_498 = arith.constant 0 : i32
    %c10_i32_499 = arith.constant 10 : i32
    %c0_i32_500 = arith.constant 0 : i32
    %c0_i32_501 = arith.constant 0 : i32
    %925 = tpu.memref_slice %arg4[%c0_i32_498, %c0_i32_501] : memref<512x128xf32, #tpu.memory_space<any>> -> memref<1x128xf32, #tpu.memory_space<any>>
    %926 = tpu.memref_squeeze %925 : memref<1x128xf32, #tpu.memory_space<any>> -> memref<128xf32, #tpu.memory_space<any>>
    %c0_i32_502 = arith.constant 0 : i32
    %927 = tpu.memref_slice %arg10[%c10_i32_499, %c0_i32_502] : memref<32x128xf32, #tpu.memory_space<vmem>> -> memref<1x128xf32, #tpu.memory_space<vmem>>
    %928 = tpu.memref_squeeze %927 : memref<1x128xf32, #tpu.memory_space<vmem>> -> memref<128xf32, #tpu.memory_space<vmem>>
    %929 = tpu.memref_slice %arg13[%c0_i32_500] : memref<3x!tpu.dma_semaphore, #tpu.memory_space<semaphore_mem>> -> memref<1x!tpu.dma_semaphore, #tpu.memory_space<semaphore_mem>>
    %930 = tpu.memref_squeeze %929 : memref<1x!tpu.dma_semaphore, #tpu.memory_space<semaphore_mem>> -> memref<!tpu.dma_semaphore, #tpu.memory_space<semaphore_mem>>
    tpu.wait_dma2 semaphore(%930 : memref<!tpu.dma_semaphore, #tpu.memory_space<semaphore_mem>>) src(%926 : memref<128xf32, #tpu.memory_space<any>>) dst(%928 : memref<128xf32, #tpu.memory_space<vmem>>)
    %c0_i32_503 = arith.constant 0 : i32
    %c11_i32_504 = arith.constant 11 : i32
    %c0_i32_505 = arith.constant 0 : i32
    %c0_i32_506 = arith.constant 0 : i32
    %931 = tpu.memref_slice %arg4[%c0_i32_503, %c0_i32_506] : memref<512x128xf32, #tpu.memory_space<any>> -> memref<1x128xf32, #tpu.memory_space<any>>
    %932 = tpu.memref_squeeze %931 : memref<1x128xf32, #tpu.memory_space<any>> -> memref<128xf32, #tpu.memory_space<any>>
    %c0_i32_507 = arith.constant 0 : i32
    %933 = tpu.memref_slice %arg10[%c11_i32_504, %c0_i32_507] : memref<32x128xf32, #tpu.memory_space<vmem>> -> memref<1x128xf32, #tpu.memory_space<vmem>>
    %934 = tpu.memref_squeeze %933 : memref<1x128xf32, #tpu.memory_space<vmem>> -> memref<128xf32, #tpu.memory_space<vmem>>
    %935 = tpu.memref_slice %arg13[%c0_i32_505] : memref<3x!tpu.dma_semaphore, #tpu.memory_space<semaphore_mem>> -> memref<1x!tpu.dma_semaphore, #tpu.memory_space<semaphore_mem>>
    %936 = tpu.memref_squeeze %935 : memref<1x!tpu.dma_semaphore, #tpu.memory_space<semaphore_mem>> -> memref<!tpu.dma_semaphore, #tpu.memory_space<semaphore_mem>>
    tpu.wait_dma2 semaphore(%936 : memref<!tpu.dma_semaphore, #tpu.memory_space<semaphore_mem>>) src(%932 : memref<128xf32, #tpu.memory_space<any>>) dst(%934 : memref<128xf32, #tpu.memory_space<vmem>>)
    %c0_i32_508 = arith.constant 0 : i32
    %c12_i32_509 = arith.constant 12 : i32
    %c0_i32_510 = arith.constant 0 : i32
    %c0_i32_511 = arith.constant 0 : i32
    %937 = tpu.memref_slice %arg4[%c0_i32_508, %c0_i32_511] : memref<512x128xf32, #tpu.memory_space<any>> -> memref<1x128xf32, #tpu.memory_space<any>>
    %938 = tpu.memref_squeeze %937 : memref<1x128xf32, #tpu.memory_space<any>> -> memref<128xf32, #tpu.memory_space<any>>
    %c0_i32_512 = arith.constant 0 : i32
    %939 = tpu.memref_slice %arg10[%c12_i32_509, %c0_i32_512] : memref<32x128xf32, #tpu.memory_space<vmem>> -> memref<1x128xf32, #tpu.memory_space<vmem>>
    %940 = tpu.memref_squeeze %939 : memref<1x128xf32, #tpu.memory_space<vmem>> -> memref<128xf32, #tpu.memory_space<vmem>>
    %941 = tpu.memref_slice %arg13[%c0_i32_510] : memref<3x!tpu.dma_semaphore, #tpu.memory_space<semaphore_mem>> -> memref<1x!tpu.dma_semaphore, #tpu.memory_space<semaphore_mem>>
    %942 = tpu.memref_squeeze %941 : memref<1x!tpu.dma_semaphore, #tpu.memory_space<semaphore_mem>> -> memref<!tpu.dma_semaphore, #tpu.memory_space<semaphore_mem>>
    tpu.wait_dma2 semaphore(%942 : memref<!tpu.dma_semaphore, #tpu.memory_space<semaphore_mem>>) src(%938 : memref<128xf32, #tpu.memory_space<any>>) dst(%940 : memref<128xf32, #tpu.memory_space<vmem>>)
    %c0_i32_513 = arith.constant 0 : i32
    %c13_i32_514 = arith.constant 13 : i32
    %c0_i32_515 = arith.constant 0 : i32
    %c0_i32_516 = arith.constant 0 : i32
    %943 = tpu.memref_slice %arg4[%c0_i32_513, %c0_i32_516] : memref<512x128xf32, #tpu.memory_space<any>> -> memref<1x128xf32, #tpu.memory_space<any>>
    %944 = tpu.memref_squeeze %943 : memref<1x128xf32, #tpu.memory_space<any>> -> memref<128xf32, #tpu.memory_space<any>>
    %c0_i32_517 = arith.constant 0 : i32
    %945 = tpu.memref_slice %arg10[%c13_i32_514, %c0_i32_517] : memref<32x128xf32, #tpu.memory_space<vmem>> -> memref<1x128xf32, #tpu.memory_space<vmem>>
    %946 = tpu.memref_squeeze %945 : memref<1x128xf32, #tpu.memory_space<vmem>> -> memref<128xf32, #tpu.memory_space<vmem>>
    %947 = tpu.memref_slice %arg13[%c0_i32_515] : memref<3x!tpu.dma_semaphore, #tpu.memory_space<semaphore_mem>> -> memref<1x!tpu.dma_semaphore, #tpu.memory_space<semaphore_mem>>
    %948 = tpu.memref_squeeze %947 : memref<1x!tpu.dma_semaphore, #tpu.memory_space<semaphore_mem>> -> memref<!tpu.dma_semaphore, #tpu.memory_space<semaphore_mem>>
    tpu.wait_dma2 semaphore(%948 : memref<!tpu.dma_semaphore, #tpu.memory_space<semaphore_mem>>) src(%944 : memref<128xf32, #tpu.memory_space<any>>) dst(%946 : memref<128xf32, #tpu.memory_space<vmem>>)
    %c0_i32_518 = arith.constant 0 : i32
    %c14_i32_519 = arith.constant 14 : i32
    %c0_i32_520 = arith.constant 0 : i32
    %c0_i32_521 = arith.constant 0 : i32
    %949 = tpu.memref_slice %arg4[%c0_i32_518, %c0_i32_521] : memref<512x128xf32, #tpu.memory_space<any>> -> memref<1x128xf32, #tpu.memory_space<any>>
    %950 = tpu.memref_squeeze %949 : memref<1x128xf32, #tpu.memory_space<any>> -> memref<128xf32, #tpu.memory_space<any>>
    %c0_i32_522 = arith.constant 0 : i32
    %951 = tpu.memref_slice %arg10[%c14_i32_519, %c0_i32_522] : memref<32x128xf32, #tpu.memory_space<vmem>> -> memref<1x128xf32, #tpu.memory_space<vmem>>
    %952 = tpu.memref_squeeze %951 : memref<1x128xf32, #tpu.memory_space<vmem>> -> memref<128xf32, #tpu.memory_space<vmem>>
    %953 = tpu.memref_slice %arg13[%c0_i32_520] : memref<3x!tpu.dma_semaphore, #tpu.memory_space<semaphore_mem>> -> memref<1x!tpu.dma_semaphore, #tpu.memory_space<semaphore_mem>>
    %954 = tpu.memref_squeeze %953 : memref<1x!tpu.dma_semaphore, #tpu.memory_space<semaphore_mem>> -> memref<!tpu.dma_semaphore, #tpu.memory_space<semaphore_mem>>
    tpu.wait_dma2 semaphore(%954 : memref<!tpu.dma_semaphore, #tpu.memory_space<semaphore_mem>>) src(%950 : memref<128xf32, #tpu.memory_space<any>>) dst(%952 : memref<128xf32, #tpu.memory_space<vmem>>)
    %c0_i32_523 = arith.constant 0 : i32
    %c15_i32_524 = arith.constant 15 : i32
    %c0_i32_525 = arith.constant 0 : i32
    %c0_i32_526 = arith.constant 0 : i32
    %955 = tpu.memref_slice %arg4[%c0_i32_523, %c0_i32_526] : memref<512x128xf32, #tpu.memory_space<any>> -> memref<1x128xf32, #tpu.memory_space<any>>
    %956 = tpu.memref_squeeze %955 : memref<1x128xf32, #tpu.memory_space<any>> -> memref<128xf32, #tpu.memory_space<any>>
    %c0_i32_527 = arith.constant 0 : i32
    %957 = tpu.memref_slice %arg10[%c15_i32_524, %c0_i32_527] : memref<32x128xf32, #tpu.memory_space<vmem>> -> memref<1x128xf32, #tpu.memory_space<vmem>>
    %958 = tpu.memref_squeeze %957 : memref<1x128xf32, #tpu.memory_space<vmem>> -> memref<128xf32, #tpu.memory_space<vmem>>
    %959 = tpu.memref_slice %arg13[%c0_i32_525] : memref<3x!tpu.dma_semaphore, #tpu.memory_space<semaphore_mem>> -> memref<1x!tpu.dma_semaphore, #tpu.memory_space<semaphore_mem>>
    %960 = tpu.memref_squeeze %959 : memref<1x!tpu.dma_semaphore, #tpu.memory_space<semaphore_mem>> -> memref<!tpu.dma_semaphore, #tpu.memory_space<semaphore_mem>>
    tpu.wait_dma2 semaphore(%960 : memref<!tpu.dma_semaphore, #tpu.memory_space<semaphore_mem>>) src(%956 : memref<128xf32, #tpu.memory_space<any>>) dst(%958 : memref<128xf32, #tpu.memory_space<vmem>>)
    %c0_i32_528 = arith.constant 0 : i32
    %c16_i32_529 = arith.constant 16 : i32
    %c0_i32_530 = arith.constant 0 : i32
    %c0_i32_531 = arith.constant 0 : i32
    %961 = tpu.memref_slice %arg4[%c0_i32_528, %c0_i32_531] : memref<512x128xf32, #tpu.memory_space<any>> -> memref<1x128xf32, #tpu.memory_space<any>>
    %962 = tpu.memref_squeeze %961 : memref<1x128xf32, #tpu.memory_space<any>> -> memref<128xf32, #tpu.memory_space<any>>
    %c0_i32_532 = arith.constant 0 : i32
    %963 = tpu.memref_slice %arg10[%c16_i32_529, %c0_i32_532] : memref<32x128xf32, #tpu.memory_space<vmem>> -> memref<1x128xf32, #tpu.memory_space<vmem>>
    %964 = tpu.memref_squeeze %963 : memref<1x128xf32, #tpu.memory_space<vmem>> -> memref<128xf32, #tpu.memory_space<vmem>>
    %965 = tpu.memref_slice %arg13[%c0_i32_530] : memref<3x!tpu.dma_semaphore, #tpu.memory_space<semaphore_mem>> -> memref<1x!tpu.dma_semaphore, #tpu.memory_space<semaphore_mem>>
    %966 = tpu.memref_squeeze %965 : memref<1x!tpu.dma_semaphore, #tpu.memory_space<semaphore_mem>> -> memref<!tpu.dma_semaphore, #tpu.memory_space<semaphore_mem>>
    tpu.wait_dma2 semaphore(%966 : memref<!tpu.dma_semaphore, #tpu.memory_space<semaphore_mem>>) src(%962 : memref<128xf32, #tpu.memory_space<any>>) dst(%964 : memref<128xf32, #tpu.memory_space<vmem>>)
    %c0_i32_533 = arith.constant 0 : i32
    %c17_i32_534 = arith.constant 17 : i32
    %c0_i32_535 = arith.constant 0 : i32
    %c0_i32_536 = arith.constant 0 : i32
    %967 = tpu.memref_slice %arg4[%c0_i32_533, %c0_i32_536] : memref<512x128xf32, #tpu.memory_space<any>> -> memref<1x128xf32, #tpu.memory_space<any>>
    %968 = tpu.memref_squeeze %967 : memref<1x128xf32, #tpu.memory_space<any>> -> memref<128xf32, #tpu.memory_space<any>>
    %c0_i32_537 = arith.constant 0 : i32
    %969 = tpu.memref_slice %arg10[%c17_i32_534, %c0_i32_537] : memref<32x128xf32, #tpu.memory_space<vmem>> -> memref<1x128xf32, #tpu.memory_space<vmem>>
    %970 = tpu.memref_squeeze %969 : memref<1x128xf32, #tpu.memory_space<vmem>> -> memref<128xf32, #tpu.memory_space<vmem>>
    %971 = tpu.memref_slice %arg13[%c0_i32_535] : memref<3x!tpu.dma_semaphore, #tpu.memory_space<semaphore_mem>> -> memref<1x!tpu.dma_semaphore, #tpu.memory_space<semaphore_mem>>
    %972 = tpu.memref_squeeze %971 : memref<1x!tpu.dma_semaphore, #tpu.memory_space<semaphore_mem>> -> memref<!tpu.dma_semaphore, #tpu.memory_space<semaphore_mem>>
    tpu.wait_dma2 semaphore(%972 : memref<!tpu.dma_semaphore, #tpu.memory_space<semaphore_mem>>) src(%968 : memref<128xf32, #tpu.memory_space<any>>) dst(%970 : memref<128xf32, #tpu.memory_space<vmem>>)
    %c0_i32_538 = arith.constant 0 : i32
    %c18_i32_539 = arith.constant 18 : i32
    %c0_i32_540 = arith.constant 0 : i32
    %c0_i32_541 = arith.constant 0 : i32
    %973 = tpu.memref_slice %arg4[%c0_i32_538, %c0_i32_541] : memref<512x128xf32, #tpu.memory_space<any>> -> memref<1x128xf32, #tpu.memory_space<any>>
    %974 = tpu.memref_squeeze %973 : memref<1x128xf32, #tpu.memory_space<any>> -> memref<128xf32, #tpu.memory_space<any>>
    %c0_i32_542 = arith.constant 0 : i32
    %975 = tpu.memref_slice %arg10[%c18_i32_539, %c0_i32_542] : memref<32x128xf32, #tpu.memory_space<vmem>> -> memref<1x128xf32, #tpu.memory_space<vmem>>
    %976 = tpu.memref_squeeze %975 : memref<1x128xf32, #tpu.memory_space<vmem>> -> memref<128xf32, #tpu.memory_space<vmem>>
    %977 = tpu.memref_slice %arg13[%c0_i32_540] : memref<3x!tpu.dma_semaphore, #tpu.memory_space<semaphore_mem>> -> memref<1x!tpu.dma_semaphore, #tpu.memory_space<semaphore_mem>>
    %978 = tpu.memref_squeeze %977 : memref<1x!tpu.dma_semaphore, #tpu.memory_space<semaphore_mem>> -> memref<!tpu.dma_semaphore, #tpu.memory_space<semaphore_mem>>
    tpu.wait_dma2 semaphore(%978 : memref<!tpu.dma_semaphore, #tpu.memory_space<semaphore_mem>>) src(%974 : memref<128xf32, #tpu.memory_space<any>>) dst(%976 : memref<128xf32, #tpu.memory_space<vmem>>)
    %c0_i32_543 = arith.constant 0 : i32
    %c19_i32_544 = arith.constant 19 : i32
    %c0_i32_545 = arith.constant 0 : i32
    %c0_i32_546 = arith.constant 0 : i32
    %979 = tpu.memref_slice %arg4[%c0_i32_543, %c0_i32_546] : memref<512x128xf32, #tpu.memory_space<any>> -> memref<1x128xf32, #tpu.memory_space<any>>
    %980 = tpu.memref_squeeze %979 : memref<1x128xf32, #tpu.memory_space<any>> -> memref<128xf32, #tpu.memory_space<any>>
    %c0_i32_547 = arith.constant 0 : i32
    %981 = tpu.memref_slice %arg10[%c19_i32_544, %c0_i32_547] : memref<32x128xf32, #tpu.memory_space<vmem>> -> memref<1x128xf32, #tpu.memory_space<vmem>>
    %982 = tpu.memref_squeeze %981 : memref<1x128xf32, #tpu.memory_space<vmem>> -> memref<128xf32, #tpu.memory_space<vmem>>
    %983 = tpu.memref_slice %arg13[%c0_i32_545] : memref<3x!tpu.dma_semaphore, #tpu.memory_space<semaphore_mem>> -> memref<1x!tpu.dma_semaphore, #tpu.memory_space<semaphore_mem>>
    %984 = tpu.memref_squeeze %983 : memref<1x!tpu.dma_semaphore, #tpu.memory_space<semaphore_mem>> -> memref<!tpu.dma_semaphore, #tpu.memory_space<semaphore_mem>>
    tpu.wait_dma2 semaphore(%984 : memref<!tpu.dma_semaphore, #tpu.memory_space<semaphore_mem>>) src(%980 : memref<128xf32, #tpu.memory_space<any>>) dst(%982 : memref<128xf32, #tpu.memory_space<vmem>>)
    %c0_i32_548 = arith.constant 0 : i32
    %c20_i32_549 = arith.constant 20 : i32
    %c0_i32_550 = arith.constant 0 : i32
    %c0_i32_551 = arith.constant 0 : i32
    %985 = tpu.memref_slice %arg4[%c0_i32_548, %c0_i32_551] : memref<512x128xf32, #tpu.memory_space<any>> -> memref<1x128xf32, #tpu.memory_space<any>>
    %986 = tpu.memref_squeeze %985 : memref<1x128xf32, #tpu.memory_space<any>> -> memref<128xf32, #tpu.memory_space<any>>
    %c0_i32_552 = arith.constant 0 : i32
    %987 = tpu.memref_slice %arg10[%c20_i32_549, %c0_i32_552] : memref<32x128xf32, #tpu.memory_space<vmem>> -> memref<1x128xf32, #tpu.memory_space<vmem>>
    %988 = tpu.memref_squeeze %987 : memref<1x128xf32, #tpu.memory_space<vmem>> -> memref<128xf32, #tpu.memory_space<vmem>>
    %989 = tpu.memref_slice %arg13[%c0_i32_550] : memref<3x!tpu.dma_semaphore, #tpu.memory_space<semaphore_mem>> -> memref<1x!tpu.dma_semaphore, #tpu.memory_space<semaphore_mem>>
    %990 = tpu.memref_squeeze %989 : memref<1x!tpu.dma_semaphore, #tpu.memory_space<semaphore_mem>> -> memref<!tpu.dma_semaphore, #tpu.memory_space<semaphore_mem>>
    tpu.wait_dma2 semaphore(%990 : memref<!tpu.dma_semaphore, #tpu.memory_space<semaphore_mem>>) src(%986 : memref<128xf32, #tpu.memory_space<any>>) dst(%988 : memref<128xf32, #tpu.memory_space<vmem>>)
    %c0_i32_553 = arith.constant 0 : i32
    %c21_i32_554 = arith.constant 21 : i32
    %c0_i32_555 = arith.constant 0 : i32
    %c0_i32_556 = arith.constant 0 : i32
    %991 = tpu.memref_slice %arg4[%c0_i32_553, %c0_i32_556] : memref<512x128xf32, #tpu.memory_space<any>> -> memref<1x128xf32, #tpu.memory_space<any>>
    %992 = tpu.memref_squeeze %991 : memref<1x128xf32, #tpu.memory_space<any>> -> memref<128xf32, #tpu.memory_space<any>>
    %c0_i32_557 = arith.constant 0 : i32
    %993 = tpu.memref_slice %arg10[%c21_i32_554, %c0_i32_557] : memref<32x128xf32, #tpu.memory_space<vmem>> -> memref<1x128xf32, #tpu.memory_space<vmem>>
    %994 = tpu.memref_squeeze %993 : memref<1x128xf32, #tpu.memory_space<vmem>> -> memref<128xf32, #tpu.memory_space<vmem>>
    %995 = tpu.memref_slice %arg13[%c0_i32_555] : memref<3x!tpu.dma_semaphore, #tpu.memory_space<semaphore_mem>> -> memref<1x!tpu.dma_semaphore, #tpu.memory_space<semaphore_mem>>
    %996 = tpu.memref_squeeze %995 : memref<1x!tpu.dma_semaphore, #tpu.memory_space<semaphore_mem>> -> memref<!tpu.dma_semaphore, #tpu.memory_space<semaphore_mem>>
    tpu.wait_dma2 semaphore(%996 : memref<!tpu.dma_semaphore, #tpu.memory_space<semaphore_mem>>) src(%992 : memref<128xf32, #tpu.memory_space<any>>) dst(%994 : memref<128xf32, #tpu.memory_space<vmem>>)
    %c0_i32_558 = arith.constant 0 : i32
    %c22_i32_559 = arith.constant 22 : i32
    %c0_i32_560 = arith.constant 0 : i32
    %c0_i32_561 = arith.constant 0 : i32
    %997 = tpu.memref_slice %arg4[%c0_i32_558, %c0_i32_561] : memref<512x128xf32, #tpu.memory_space<any>> -> memref<1x128xf32, #tpu.memory_space<any>>
    %998 = tpu.memref_squeeze %997 : memref<1x128xf32, #tpu.memory_space<any>> -> memref<128xf32, #tpu.memory_space<any>>
    %c0_i32_562 = arith.constant 0 : i32
    %999 = tpu.memref_slice %arg10[%c22_i32_559, %c0_i32_562] : memref<32x128xf32, #tpu.memory_space<vmem>> -> memref<1x128xf32, #tpu.memory_space<vmem>>
    %1000 = tpu.memref_squeeze %999 : memref<1x128xf32, #tpu.memory_space<vmem>> -> memref<128xf32, #tpu.memory_space<vmem>>
    %1001 = tpu.memref_slice %arg13[%c0_i32_560] : memref<3x!tpu.dma_semaphore, #tpu.memory_space<semaphore_mem>> -> memref<1x!tpu.dma_semaphore, #tpu.memory_space<semaphore_mem>>
    %1002 = tpu.memref_squeeze %1001 : memref<1x!tpu.dma_semaphore, #tpu.memory_space<semaphore_mem>> -> memref<!tpu.dma_semaphore, #tpu.memory_space<semaphore_mem>>
    tpu.wait_dma2 semaphore(%1002 : memref<!tpu.dma_semaphore, #tpu.memory_space<semaphore_mem>>) src(%998 : memref<128xf32, #tpu.memory_space<any>>) dst(%1000 : memref<128xf32, #tpu.memory_space<vmem>>)
    %c0_i32_563 = arith.constant 0 : i32
    %c23_i32_564 = arith.constant 23 : i32
    %c0_i32_565 = arith.constant 0 : i32
    %c0_i32_566 = arith.constant 0 : i32
    %1003 = tpu.memref_slice %arg4[%c0_i32_563, %c0_i32_566] : memref<512x128xf32, #tpu.memory_space<any>> -> memref<1x128xf32, #tpu.memory_space<any>>
    %1004 = tpu.memref_squeeze %1003 : memref<1x128xf32, #tpu.memory_space<any>> -> memref<128xf32, #tpu.memory_space<any>>
    %c0_i32_567 = arith.constant 0 : i32
    %1005 = tpu.memref_slice %arg10[%c23_i32_564, %c0_i32_567] : memref<32x128xf32, #tpu.memory_space<vmem>> -> memref<1x128xf32, #tpu.memory_space<vmem>>
    %1006 = tpu.memref_squeeze %1005 : memref<1x128xf32, #tpu.memory_space<vmem>> -> memref<128xf32, #tpu.memory_space<vmem>>
    %1007 = tpu.memref_slice %arg13[%c0_i32_565] : memref<3x!tpu.dma_semaphore, #tpu.memory_space<semaphore_mem>> -> memref<1x!tpu.dma_semaphore, #tpu.memory_space<semaphore_mem>>
    %1008 = tpu.memref_squeeze %1007 : memref<1x!tpu.dma_semaphore, #tpu.memory_space<semaphore_mem>> -> memref<!tpu.dma_semaphore, #tpu.memory_space<semaphore_mem>>
    tpu.wait_dma2 semaphore(%1008 : memref<!tpu.dma_semaphore, #tpu.memory_space<semaphore_mem>>) src(%1004 : memref<128xf32, #tpu.memory_space<any>>) dst(%1006 : memref<128xf32, #tpu.memory_space<vmem>>)
    %c0_i32_568 = arith.constant 0 : i32
    %c24_i32_569 = arith.constant 24 : i32
    %c0_i32_570 = arith.constant 0 : i32
    %c0_i32_571 = arith.constant 0 : i32
    %1009 = tpu.memref_slice %arg4[%c0_i32_568, %c0_i32_571] : memref<512x128xf32, #tpu.memory_space<any>> -> memref<1x128xf32, #tpu.memory_space<any>>
    %1010 = tpu.memref_squeeze %1009 : memref<1x128xf32, #tpu.memory_space<any>> -> memref<128xf32, #tpu.memory_space<any>>
    %c0_i32_572 = arith.constant 0 : i32
    %1011 = tpu.memref_slice %arg10[%c24_i32_569, %c0_i32_572] : memref<32x128xf32, #tpu.memory_space<vmem>> -> memref<1x128xf32, #tpu.memory_space<vmem>>
    %1012 = tpu.memref_squeeze %1011 : memref<1x128xf32, #tpu.memory_space<vmem>> -> memref<128xf32, #tpu.memory_space<vmem>>
    %1013 = tpu.memref_slice %arg13[%c0_i32_570] : memref<3x!tpu.dma_semaphore, #tpu.memory_space<semaphore_mem>> -> memref<1x!tpu.dma_semaphore, #tpu.memory_space<semaphore_mem>>
    %1014 = tpu.memref_squeeze %1013 : memref<1x!tpu.dma_semaphore, #tpu.memory_space<semaphore_mem>> -> memref<!tpu.dma_semaphore, #tpu.memory_space<semaphore_mem>>
    tpu.wait_dma2 semaphore(%1014 : memref<!tpu.dma_semaphore, #tpu.memory_space<semaphore_mem>>) src(%1010 : memref<128xf32, #tpu.memory_space<any>>) dst(%1012 : memref<128xf32, #tpu.memory_space<vmem>>)
    %c0_i32_573 = arith.constant 0 : i32
    %c25_i32_574 = arith.constant 25 : i32
    %c0_i32_575 = arith.constant 0 : i32
    %c0_i32_576 = arith.constant 0 : i32
    %1015 = tpu.memref_slice %arg4[%c0_i32_573, %c0_i32_576] : memref<512x128xf32, #tpu.memory_space<any>> -> memref<1x128xf32, #tpu.memory_space<any>>
    %1016 = tpu.memref_squeeze %1015 : memref<1x128xf32, #tpu.memory_space<any>> -> memref<128xf32, #tpu.memory_space<any>>
    %c0_i32_577 = arith.constant 0 : i32
    %1017 = tpu.memref_slice %arg10[%c25_i32_574, %c0_i32_577] : memref<32x128xf32, #tpu.memory_space<vmem>> -> memref<1x128xf32, #tpu.memory_space<vmem>>
    %1018 = tpu.memref_squeeze %1017 : memref<1x128xf32, #tpu.memory_space<vmem>> -> memref<128xf32, #tpu.memory_space<vmem>>
    %1019 = tpu.memref_slice %arg13[%c0_i32_575] : memref<3x!tpu.dma_semaphore, #tpu.memory_space<semaphore_mem>> -> memref<1x!tpu.dma_semaphore, #tpu.memory_space<semaphore_mem>>
    %1020 = tpu.memref_squeeze %1019 : memref<1x!tpu.dma_semaphore, #tpu.memory_space<semaphore_mem>> -> memref<!tpu.dma_semaphore, #tpu.memory_space<semaphore_mem>>
    tpu.wait_dma2 semaphore(%1020 : memref<!tpu.dma_semaphore, #tpu.memory_space<semaphore_mem>>) src(%1016 : memref<128xf32, #tpu.memory_space<any>>) dst(%1018 : memref<128xf32, #tpu.memory_space<vmem>>)
    %c0_i32_578 = arith.constant 0 : i32
    %c26_i32_579 = arith.constant 26 : i32
    %c0_i32_580 = arith.constant 0 : i32
    %c0_i32_581 = arith.constant 0 : i32
    %1021 = tpu.memref_slice %arg4[%c0_i32_578, %c0_i32_581] : memref<512x128xf32, #tpu.memory_space<any>> -> memref<1x128xf32, #tpu.memory_space<any>>
    %1022 = tpu.memref_squeeze %1021 : memref<1x128xf32, #tpu.memory_space<any>> -> memref<128xf32, #tpu.memory_space<any>>
    %c0_i32_582 = arith.constant 0 : i32
    %1023 = tpu.memref_slice %arg10[%c26_i32_579, %c0_i32_582] : memref<32x128xf32, #tpu.memory_space<vmem>> -> memref<1x128xf32, #tpu.memory_space<vmem>>
    %1024 = tpu.memref_squeeze %1023 : memref<1x128xf32, #tpu.memory_space<vmem>> -> memref<128xf32, #tpu.memory_space<vmem>>
    %1025 = tpu.memref_slice %arg13[%c0_i32_580] : memref<3x!tpu.dma_semaphore, #tpu.memory_space<semaphore_mem>> -> memref<1x!tpu.dma_semaphore, #tpu.memory_space<semaphore_mem>>
    %1026 = tpu.memref_squeeze %1025 : memref<1x!tpu.dma_semaphore, #tpu.memory_space<semaphore_mem>> -> memref<!tpu.dma_semaphore, #tpu.memory_space<semaphore_mem>>
    tpu.wait_dma2 semaphore(%1026 : memref<!tpu.dma_semaphore, #tpu.memory_space<semaphore_mem>>) src(%1022 : memref<128xf32, #tpu.memory_space<any>>) dst(%1024 : memref<128xf32, #tpu.memory_space<vmem>>)
    %c0_i32_583 = arith.constant 0 : i32
    %c27_i32_584 = arith.constant 27 : i32
    %c0_i32_585 = arith.constant 0 : i32
    %c0_i32_586 = arith.constant 0 : i32
    %1027 = tpu.memref_slice %arg4[%c0_i32_583, %c0_i32_586] : memref<512x128xf32, #tpu.memory_space<any>> -> memref<1x128xf32, #tpu.memory_space<any>>
    %1028 = tpu.memref_squeeze %1027 : memref<1x128xf32, #tpu.memory_space<any>> -> memref<128xf32, #tpu.memory_space<any>>
    %c0_i32_587 = arith.constant 0 : i32
    %1029 = tpu.memref_slice %arg10[%c27_i32_584, %c0_i32_587] : memref<32x128xf32, #tpu.memory_space<vmem>> -> memref<1x128xf32, #tpu.memory_space<vmem>>
    %1030 = tpu.memref_squeeze %1029 : memref<1x128xf32, #tpu.memory_space<vmem>> -> memref<128xf32, #tpu.memory_space<vmem>>
    %1031 = tpu.memref_slice %arg13[%c0_i32_585] : memref<3x!tpu.dma_semaphore, #tpu.memory_space<semaphore_mem>> -> memref<1x!tpu.dma_semaphore, #tpu.memory_space<semaphore_mem>>
    %1032 = tpu.memref_squeeze %1031 : memref<1x!tpu.dma_semaphore, #tpu.memory_space<semaphore_mem>> -> memref<!tpu.dma_semaphore, #tpu.memory_space<semaphore_mem>>
    tpu.wait_dma2 semaphore(%1032 : memref<!tpu.dma_semaphore, #tpu.memory_space<semaphore_mem>>) src(%1028 : memref<128xf32, #tpu.memory_space<any>>) dst(%1030 : memref<128xf32, #tpu.memory_space<vmem>>)
    %c0_i32_588 = arith.constant 0 : i32
    %c28_i32_589 = arith.constant 28 : i32
    %c0_i32_590 = arith.constant 0 : i32
    %c0_i32_591 = arith.constant 0 : i32
    %1033 = tpu.memref_slice %arg4[%c0_i32_588, %c0_i32_591] : memref<512x128xf32, #tpu.memory_space<any>> -> memref<1x128xf32, #tpu.memory_space<any>>
    %1034 = tpu.memref_squeeze %1033 : memref<1x128xf32, #tpu.memory_space<any>> -> memref<128xf32, #tpu.memory_space<any>>
    %c0_i32_592 = arith.constant 0 : i32
    %1035 = tpu.memref_slice %arg10[%c28_i32_589, %c0_i32_592] : memref<32x128xf32, #tpu.memory_space<vmem>> -> memref<1x128xf32, #tpu.memory_space<vmem>>
    %1036 = tpu.memref_squeeze %1035 : memref<1x128xf32, #tpu.memory_space<vmem>> -> memref<128xf32, #tpu.memory_space<vmem>>
    %1037 = tpu.memref_slice %arg13[%c0_i32_590] : memref<3x!tpu.dma_semaphore, #tpu.memory_space<semaphore_mem>> -> memref<1x!tpu.dma_semaphore, #tpu.memory_space<semaphore_mem>>
    %1038 = tpu.memref_squeeze %1037 : memref<1x!tpu.dma_semaphore, #tpu.memory_space<semaphore_mem>> -> memref<!tpu.dma_semaphore, #tpu.memory_space<semaphore_mem>>
    tpu.wait_dma2 semaphore(%1038 : memref<!tpu.dma_semaphore, #tpu.memory_space<semaphore_mem>>) src(%1034 : memref<128xf32, #tpu.memory_space<any>>) dst(%1036 : memref<128xf32, #tpu.memory_space<vmem>>)
    %c0_i32_593 = arith.constant 0 : i32
    %c29_i32_594 = arith.constant 29 : i32
    %c0_i32_595 = arith.constant 0 : i32
    %c0_i32_596 = arith.constant 0 : i32
    %1039 = tpu.memref_slice %arg4[%c0_i32_593, %c0_i32_596] : memref<512x128xf32, #tpu.memory_space<any>> -> memref<1x128xf32, #tpu.memory_space<any>>
    %1040 = tpu.memref_squeeze %1039 : memref<1x128xf32, #tpu.memory_space<any>> -> memref<128xf32, #tpu.memory_space<any>>
    %c0_i32_597 = arith.constant 0 : i32
    %1041 = tpu.memref_slice %arg10[%c29_i32_594, %c0_i32_597] : memref<32x128xf32, #tpu.memory_space<vmem>> -> memref<1x128xf32, #tpu.memory_space<vmem>>
    %1042 = tpu.memref_squeeze %1041 : memref<1x128xf32, #tpu.memory_space<vmem>> -> memref<128xf32, #tpu.memory_space<vmem>>
    %1043 = tpu.memref_slice %arg13[%c0_i32_595] : memref<3x!tpu.dma_semaphore, #tpu.memory_space<semaphore_mem>> -> memref<1x!tpu.dma_semaphore, #tpu.memory_space<semaphore_mem>>
    %1044 = tpu.memref_squeeze %1043 : memref<1x!tpu.dma_semaphore, #tpu.memory_space<semaphore_mem>> -> memref<!tpu.dma_semaphore, #tpu.memory_space<semaphore_mem>>
    tpu.wait_dma2 semaphore(%1044 : memref<!tpu.dma_semaphore, #tpu.memory_space<semaphore_mem>>) src(%1040 : memref<128xf32, #tpu.memory_space<any>>) dst(%1042 : memref<128xf32, #tpu.memory_space<vmem>>)
    %c0_i32_598 = arith.constant 0 : i32
    %c30_i32_599 = arith.constant 30 : i32
    %c0_i32_600 = arith.constant 0 : i32
    %c0_i32_601 = arith.constant 0 : i32
    %1045 = tpu.memref_slice %arg4[%c0_i32_598, %c0_i32_601] : memref<512x128xf32, #tpu.memory_space<any>> -> memref<1x128xf32, #tpu.memory_space<any>>
    %1046 = tpu.memref_squeeze %1045 : memref<1x128xf32, #tpu.memory_space<any>> -> memref<128xf32, #tpu.memory_space<any>>
    %c0_i32_602 = arith.constant 0 : i32
    %1047 = tpu.memref_slice %arg10[%c30_i32_599, %c0_i32_602] : memref<32x128xf32, #tpu.memory_space<vmem>> -> memref<1x128xf32, #tpu.memory_space<vmem>>
    %1048 = tpu.memref_squeeze %1047 : memref<1x128xf32, #tpu.memory_space<vmem>> -> memref<128xf32, #tpu.memory_space<vmem>>
    %1049 = tpu.memref_slice %arg13[%c0_i32_600] : memref<3x!tpu.dma_semaphore, #tpu.memory_space<semaphore_mem>> -> memref<1x!tpu.dma_semaphore, #tpu.memory_space<semaphore_mem>>
    %1050 = tpu.memref_squeeze %1049 : memref<1x!tpu.dma_semaphore, #tpu.memory_space<semaphore_mem>> -> memref<!tpu.dma_semaphore, #tpu.memory_space<semaphore_mem>>
    tpu.wait_dma2 semaphore(%1050 : memref<!tpu.dma_semaphore, #tpu.memory_space<semaphore_mem>>) src(%1046 : memref<128xf32, #tpu.memory_space<any>>) dst(%1048 : memref<128xf32, #tpu.memory_space<vmem>>)
    %c0_i32_603 = arith.constant 0 : i32
    %c31_i32_604 = arith.constant 31 : i32
    %c0_i32_605 = arith.constant 0 : i32
    %c0_i32_606 = arith.constant 0 : i32
    %1051 = tpu.memref_slice %arg4[%c0_i32_603, %c0_i32_606] : memref<512x128xf32, #tpu.memory_space<any>> -> memref<1x128xf32, #tpu.memory_space<any>>
    %1052 = tpu.memref_squeeze %1051 : memref<1x128xf32, #tpu.memory_space<any>> -> memref<128xf32, #tpu.memory_space<any>>
    %c0_i32_607 = arith.constant 0 : i32
    %1053 = tpu.memref_slice %arg10[%c31_i32_604, %c0_i32_607] : memref<32x128xf32, #tpu.memory_space<vmem>> -> memref<1x128xf32, #tpu.memory_space<vmem>>
    %1054 = tpu.memref_squeeze %1053 : memref<1x128xf32, #tpu.memory_space<vmem>> -> memref<128xf32, #tpu.memory_space<vmem>>
    %1055 = tpu.memref_slice %arg13[%c0_i32_605] : memref<3x!tpu.dma_semaphore, #tpu.memory_space<semaphore_mem>> -> memref<1x!tpu.dma_semaphore, #tpu.memory_space<semaphore_mem>>
    %1056 = tpu.memref_squeeze %1055 : memref<1x!tpu.dma_semaphore, #tpu.memory_space<semaphore_mem>> -> memref<!tpu.dma_semaphore, #tpu.memory_space<semaphore_mem>>
    tpu.wait_dma2 semaphore(%1056 : memref<!tpu.dma_semaphore, #tpu.memory_space<semaphore_mem>>) src(%1052 : memref<128xf32, #tpu.memory_space<any>>) dst(%1054 : memref<128xf32, #tpu.memory_space<vmem>>)
    %c0_i32_608 = arith.constant 0 : i32
    %c0_i32_609 = arith.constant 0 : i32
    %c1_i32_610 = arith.constant 1 : i32
    %c0_i32_611 = arith.constant 0 : i32
    %1057 = tpu.memref_slice %arg5[%c0_i32_608, %c0_i32_611] : memref<2x128xf32, #tpu.memory_space<any>> -> memref<1x128xf32, #tpu.memory_space<any>>
    %1058 = tpu.memref_squeeze %1057 : memref<1x128xf32, #tpu.memory_space<any>> -> memref<128xf32, #tpu.memory_space<any>>
    %c0_i32_612 = arith.constant 0 : i32
    %1059 = tpu.memref_slice %arg11[%c0_i32_609, %c0_i32_612] : memref<32x128xf32, #tpu.memory_space<vmem>> -> memref<1x128xf32, #tpu.memory_space<vmem>>
    %1060 = tpu.memref_squeeze %1059 : memref<1x128xf32, #tpu.memory_space<vmem>> -> memref<128xf32, #tpu.memory_space<vmem>>
    %1061 = tpu.memref_slice %arg13[%c1_i32_610] : memref<3x!tpu.dma_semaphore, #tpu.memory_space<semaphore_mem>> -> memref<1x!tpu.dma_semaphore, #tpu.memory_space<semaphore_mem>>
    %1062 = tpu.memref_squeeze %1061 : memref<1x!tpu.dma_semaphore, #tpu.memory_space<semaphore_mem>> -> memref<!tpu.dma_semaphore, #tpu.memory_space<semaphore_mem>>
    tpu.wait_dma2 semaphore(%1062 : memref<!tpu.dma_semaphore, #tpu.memory_space<semaphore_mem>>) src(%1058 : memref<128xf32, #tpu.memory_space<any>>) dst(%1060 : memref<128xf32, #tpu.memory_space<vmem>>)
    %c0_i32_613 = arith.constant 0 : i32
    %c1_i32_614 = arith.constant 1 : i32
    %c1_i32_615 = arith.constant 1 : i32
    %c0_i32_616 = arith.constant 0 : i32
    %1063 = tpu.memref_slice %arg5[%c0_i32_613, %c0_i32_616] : memref<2x128xf32, #tpu.memory_space<any>> -> memref<1x128xf32, #tpu.memory_space<any>>
    %1064 = tpu.memref_squeeze %1063 : memref<1x128xf32, #tpu.memory_space<any>> -> memref<128xf32, #tpu.memory_space<any>>
    %c0_i32_617 = arith.constant 0 : i32
    %1065 = tpu.memref_slice %arg11[%c1_i32_614, %c0_i32_617] : memref<32x128xf32, #tpu.memory_space<vmem>> -> memref<1x128xf32, #tpu.memory_space<vmem>>
    %1066 = tpu.memref_squeeze %1065 : memref<1x128xf32, #tpu.memory_space<vmem>> -> memref<128xf32, #tpu.memory_space<vmem>>
    %1067 = tpu.memref_slice %arg13[%c1_i32_615] : memref<3x!tpu.dma_semaphore, #tpu.memory_space<semaphore_mem>> -> memref<1x!tpu.dma_semaphore, #tpu.memory_space<semaphore_mem>>
    %1068 = tpu.memref_squeeze %1067 : memref<1x!tpu.dma_semaphore, #tpu.memory_space<semaphore_mem>> -> memref<!tpu.dma_semaphore, #tpu.memory_space<semaphore_mem>>
    tpu.wait_dma2 semaphore(%1068 : memref<!tpu.dma_semaphore, #tpu.memory_space<semaphore_mem>>) src(%1064 : memref<128xf32, #tpu.memory_space<any>>) dst(%1066 : memref<128xf32, #tpu.memory_space<vmem>>)
    %c0_i32_618 = arith.constant 0 : i32
    %c2_i32_619 = arith.constant 2 : i32
    %c1_i32_620 = arith.constant 1 : i32
    %c0_i32_621 = arith.constant 0 : i32
    %1069 = tpu.memref_slice %arg5[%c0_i32_618, %c0_i32_621] : memref<2x128xf32, #tpu.memory_space<any>> -> memref<1x128xf32, #tpu.memory_space<any>>
    %1070 = tpu.memref_squeeze %1069 : memref<1x128xf32, #tpu.memory_space<any>> -> memref<128xf32, #tpu.memory_space<any>>
    %c0_i32_622 = arith.constant 0 : i32
    %1071 = tpu.memref_slice %arg11[%c2_i32_619, %c0_i32_622] : memref<32x128xf32, #tpu.memory_space<vmem>> -> memref<1x128xf32, #tpu.memory_space<vmem>>
    %1072 = tpu.memref_squeeze %1071 : memref<1x128xf32, #tpu.memory_space<vmem>> -> memref<128xf32, #tpu.memory_space<vmem>>
    %1073 = tpu.memref_slice %arg13[%c1_i32_620] : memref<3x!tpu.dma_semaphore, #tpu.memory_space<semaphore_mem>> -> memref<1x!tpu.dma_semaphore, #tpu.memory_space<semaphore_mem>>
    %1074 = tpu.memref_squeeze %1073 : memref<1x!tpu.dma_semaphore, #tpu.memory_space<semaphore_mem>> -> memref<!tpu.dma_semaphore, #tpu.memory_space<semaphore_mem>>
    tpu.wait_dma2 semaphore(%1074 : memref<!tpu.dma_semaphore, #tpu.memory_space<semaphore_mem>>) src(%1070 : memref<128xf32, #tpu.memory_space<any>>) dst(%1072 : memref<128xf32, #tpu.memory_space<vmem>>)
    %c0_i32_623 = arith.constant 0 : i32
    %c3_i32_624 = arith.constant 3 : i32
    %c1_i32_625 = arith.constant 1 : i32
    %c0_i32_626 = arith.constant 0 : i32
    %1075 = tpu.memref_slice %arg5[%c0_i32_623, %c0_i32_626] : memref<2x128xf32, #tpu.memory_space<any>> -> memref<1x128xf32, #tpu.memory_space<any>>
    %1076 = tpu.memref_squeeze %1075 : memref<1x128xf32, #tpu.memory_space<any>> -> memref<128xf32, #tpu.memory_space<any>>
    %c0_i32_627 = arith.constant 0 : i32
    %1077 = tpu.memref_slice %arg11[%c3_i32_624, %c0_i32_627] : memref<32x128xf32, #tpu.memory_space<vmem>> -> memref<1x128xf32, #tpu.memory_space<vmem>>
    %1078 = tpu.memref_squeeze %1077 : memref<1x128xf32, #tpu.memory_space<vmem>> -> memref<128xf32, #tpu.memory_space<vmem>>
    %1079 = tpu.memref_slice %arg13[%c1_i32_625] : memref<3x!tpu.dma_semaphore, #tpu.memory_space<semaphore_mem>> -> memref<1x!tpu.dma_semaphore, #tpu.memory_space<semaphore_mem>>
    %1080 = tpu.memref_squeeze %1079 : memref<1x!tpu.dma_semaphore, #tpu.memory_space<semaphore_mem>> -> memref<!tpu.dma_semaphore, #tpu.memory_space<semaphore_mem>>
    tpu.wait_dma2 semaphore(%1080 : memref<!tpu.dma_semaphore, #tpu.memory_space<semaphore_mem>>) src(%1076 : memref<128xf32, #tpu.memory_space<any>>) dst(%1078 : memref<128xf32, #tpu.memory_space<vmem>>)
    %c0_i32_628 = arith.constant 0 : i32
    %c4_i32_629 = arith.constant 4 : i32
    %c1_i32_630 = arith.constant 1 : i32
    %c0_i32_631 = arith.constant 0 : i32
    %1081 = tpu.memref_slice %arg5[%c0_i32_628, %c0_i32_631] : memref<2x128xf32, #tpu.memory_space<any>> -> memref<1x128xf32, #tpu.memory_space<any>>
    %1082 = tpu.memref_squeeze %1081 : memref<1x128xf32, #tpu.memory_space<any>> -> memref<128xf32, #tpu.memory_space<any>>
    %c0_i32_632 = arith.constant 0 : i32
    %1083 = tpu.memref_slice %arg11[%c4_i32_629, %c0_i32_632] : memref<32x128xf32, #tpu.memory_space<vmem>> -> memref<1x128xf32, #tpu.memory_space<vmem>>
    %1084 = tpu.memref_squeeze %1083 : memref<1x128xf32, #tpu.memory_space<vmem>> -> memref<128xf32, #tpu.memory_space<vmem>>
    %1085 = tpu.memref_slice %arg13[%c1_i32_630] : memref<3x!tpu.dma_semaphore, #tpu.memory_space<semaphore_mem>> -> memref<1x!tpu.dma_semaphore, #tpu.memory_space<semaphore_mem>>
    %1086 = tpu.memref_squeeze %1085 : memref<1x!tpu.dma_semaphore, #tpu.memory_space<semaphore_mem>> -> memref<!tpu.dma_semaphore, #tpu.memory_space<semaphore_mem>>
    tpu.wait_dma2 semaphore(%1086 : memref<!tpu.dma_semaphore, #tpu.memory_space<semaphore_mem>>) src(%1082 : memref<128xf32, #tpu.memory_space<any>>) dst(%1084 : memref<128xf32, #tpu.memory_space<vmem>>)
    %c0_i32_633 = arith.constant 0 : i32
    %c5_i32_634 = arith.constant 5 : i32
    %c1_i32_635 = arith.constant 1 : i32
    %c0_i32_636 = arith.constant 0 : i32
    %1087 = tpu.memref_slice %arg5[%c0_i32_633, %c0_i32_636] : memref<2x128xf32, #tpu.memory_space<any>> -> memref<1x128xf32, #tpu.memory_space<any>>
    %1088 = tpu.memref_squeeze %1087 : memref<1x128xf32, #tpu.memory_space<any>> -> memref<128xf32, #tpu.memory_space<any>>
    %c0_i32_637 = arith.constant 0 : i32
    %1089 = tpu.memref_slice %arg11[%c5_i32_634, %c0_i32_637] : memref<32x128xf32, #tpu.memory_space<vmem>> -> memref<1x128xf32, #tpu.memory_space<vmem>>
    %1090 = tpu.memref_squeeze %1089 : memref<1x128xf32, #tpu.memory_space<vmem>> -> memref<128xf32, #tpu.memory_space<vmem>>
    %1091 = tpu.memref_slice %arg13[%c1_i32_635] : memref<3x!tpu.dma_semaphore, #tpu.memory_space<semaphore_mem>> -> memref<1x!tpu.dma_semaphore, #tpu.memory_space<semaphore_mem>>
    %1092 = tpu.memref_squeeze %1091 : memref<1x!tpu.dma_semaphore, #tpu.memory_space<semaphore_mem>> -> memref<!tpu.dma_semaphore, #tpu.memory_space<semaphore_mem>>
    tpu.wait_dma2 semaphore(%1092 : memref<!tpu.dma_semaphore, #tpu.memory_space<semaphore_mem>>) src(%1088 : memref<128xf32, #tpu.memory_space<any>>) dst(%1090 : memref<128xf32, #tpu.memory_space<vmem>>)
    %c0_i32_638 = arith.constant 0 : i32
    %c6_i32_639 = arith.constant 6 : i32
    %c1_i32_640 = arith.constant 1 : i32
    %c0_i32_641 = arith.constant 0 : i32
    %1093 = tpu.memref_slice %arg5[%c0_i32_638, %c0_i32_641] : memref<2x128xf32, #tpu.memory_space<any>> -> memref<1x128xf32, #tpu.memory_space<any>>
    %1094 = tpu.memref_squeeze %1093 : memref<1x128xf32, #tpu.memory_space<any>> -> memref<128xf32, #tpu.memory_space<any>>
    %c0_i32_642 = arith.constant 0 : i32
    %1095 = tpu.memref_slice %arg11[%c6_i32_639, %c0_i32_642] : memref<32x128xf32, #tpu.memory_space<vmem>> -> memref<1x128xf32, #tpu.memory_space<vmem>>
    %1096 = tpu.memref_squeeze %1095 : memref<1x128xf32, #tpu.memory_space<vmem>> -> memref<128xf32, #tpu.memory_space<vmem>>
    %1097 = tpu.memref_slice %arg13[%c1_i32_640] : memref<3x!tpu.dma_semaphore, #tpu.memory_space<semaphore_mem>> -> memref<1x!tpu.dma_semaphore, #tpu.memory_space<semaphore_mem>>
    %1098 = tpu.memref_squeeze %1097 : memref<1x!tpu.dma_semaphore, #tpu.memory_space<semaphore_mem>> -> memref<!tpu.dma_semaphore, #tpu.memory_space<semaphore_mem>>
    tpu.wait_dma2 semaphore(%1098 : memref<!tpu.dma_semaphore, #tpu.memory_space<semaphore_mem>>) src(%1094 : memref<128xf32, #tpu.memory_space<any>>) dst(%1096 : memref<128xf32, #tpu.memory_space<vmem>>)
    %c0_i32_643 = arith.constant 0 : i32
    %c7_i32_644 = arith.constant 7 : i32
    %c1_i32_645 = arith.constant 1 : i32
    %c0_i32_646 = arith.constant 0 : i32
    %1099 = tpu.memref_slice %arg5[%c0_i32_643, %c0_i32_646] : memref<2x128xf32, #tpu.memory_space<any>> -> memref<1x128xf32, #tpu.memory_space<any>>
    %1100 = tpu.memref_squeeze %1099 : memref<1x128xf32, #tpu.memory_space<any>> -> memref<128xf32, #tpu.memory_space<any>>
    %c0_i32_647 = arith.constant 0 : i32
    %1101 = tpu.memref_slice %arg11[%c7_i32_644, %c0_i32_647] : memref<32x128xf32, #tpu.memory_space<vmem>> -> memref<1x128xf32, #tpu.memory_space<vmem>>
    %1102 = tpu.memref_squeeze %1101 : memref<1x128xf32, #tpu.memory_space<vmem>> -> memref<128xf32, #tpu.memory_space<vmem>>
    %1103 = tpu.memref_slice %arg13[%c1_i32_645] : memref<3x!tpu.dma_semaphore, #tpu.memory_space<semaphore_mem>> -> memref<1x!tpu.dma_semaphore, #tpu.memory_space<semaphore_mem>>
    %1104 = tpu.memref_squeeze %1103 : memref<1x!tpu.dma_semaphore, #tpu.memory_space<semaphore_mem>> -> memref<!tpu.dma_semaphore, #tpu.memory_space<semaphore_mem>>
    tpu.wait_dma2 semaphore(%1104 : memref<!tpu.dma_semaphore, #tpu.memory_space<semaphore_mem>>) src(%1100 : memref<128xf32, #tpu.memory_space<any>>) dst(%1102 : memref<128xf32, #tpu.memory_space<vmem>>)
    %c0_i32_648 = arith.constant 0 : i32
    %c8_i32_649 = arith.constant 8 : i32
    %c1_i32_650 = arith.constant 1 : i32
    %c0_i32_651 = arith.constant 0 : i32
    %1105 = tpu.memref_slice %arg5[%c0_i32_648, %c0_i32_651] : memref<2x128xf32, #tpu.memory_space<any>> -> memref<1x128xf32, #tpu.memory_space<any>>
    %1106 = tpu.memref_squeeze %1105 : memref<1x128xf32, #tpu.memory_space<any>> -> memref<128xf32, #tpu.memory_space<any>>
    %c0_i32_652 = arith.constant 0 : i32
    %1107 = tpu.memref_slice %arg11[%c8_i32_649, %c0_i32_652] : memref<32x128xf32, #tpu.memory_space<vmem>> -> memref<1x128xf32, #tpu.memory_space<vmem>>
    %1108 = tpu.memref_squeeze %1107 : memref<1x128xf32, #tpu.memory_space<vmem>> -> memref<128xf32, #tpu.memory_space<vmem>>
    %1109 = tpu.memref_slice %arg13[%c1_i32_650] : memref<3x!tpu.dma_semaphore, #tpu.memory_space<semaphore_mem>> -> memref<1x!tpu.dma_semaphore, #tpu.memory_space<semaphore_mem>>
    %1110 = tpu.memref_squeeze %1109 : memref<1x!tpu.dma_semaphore, #tpu.memory_space<semaphore_mem>> -> memref<!tpu.dma_semaphore, #tpu.memory_space<semaphore_mem>>
    tpu.wait_dma2 semaphore(%1110 : memref<!tpu.dma_semaphore, #tpu.memory_space<semaphore_mem>>) src(%1106 : memref<128xf32, #tpu.memory_space<any>>) dst(%1108 : memref<128xf32, #tpu.memory_space<vmem>>)
    %c0_i32_653 = arith.constant 0 : i32
    %c9_i32_654 = arith.constant 9 : i32
    %c1_i32_655 = arith.constant 1 : i32
    %c0_i32_656 = arith.constant 0 : i32
    %1111 = tpu.memref_slice %arg5[%c0_i32_653, %c0_i32_656] : memref<2x128xf32, #tpu.memory_space<any>> -> memref<1x128xf32, #tpu.memory_space<any>>
    %1112 = tpu.memref_squeeze %1111 : memref<1x128xf32, #tpu.memory_space<any>> -> memref<128xf32, #tpu.memory_space<any>>
    %c0_i32_657 = arith.constant 0 : i32
    %1113 = tpu.memref_slice %arg11[%c9_i32_654, %c0_i32_657] : memref<32x128xf32, #tpu.memory_space<vmem>> -> memref<1x128xf32, #tpu.memory_space<vmem>>
    %1114 = tpu.memref_squeeze %1113 : memref<1x128xf32, #tpu.memory_space<vmem>> -> memref<128xf32, #tpu.memory_space<vmem>>
    %1115 = tpu.memref_slice %arg13[%c1_i32_655] : memref<3x!tpu.dma_semaphore, #tpu.memory_space<semaphore_mem>> -> memref<1x!tpu.dma_semaphore, #tpu.memory_space<semaphore_mem>>
    %1116 = tpu.memref_squeeze %1115 : memref<1x!tpu.dma_semaphore, #tpu.memory_space<semaphore_mem>> -> memref<!tpu.dma_semaphore, #tpu.memory_space<semaphore_mem>>
    tpu.wait_dma2 semaphore(%1116 : memref<!tpu.dma_semaphore, #tpu.memory_space<semaphore_mem>>) src(%1112 : memref<128xf32, #tpu.memory_space<any>>) dst(%1114 : memref<128xf32, #tpu.memory_space<vmem>>)
    %c0_i32_658 = arith.constant 0 : i32
    %c10_i32_659 = arith.constant 10 : i32
    %c1_i32_660 = arith.constant 1 : i32
    %c0_i32_661 = arith.constant 0 : i32
    %1117 = tpu.memref_slice %arg5[%c0_i32_658, %c0_i32_661] : memref<2x128xf32, #tpu.memory_space<any>> -> memref<1x128xf32, #tpu.memory_space<any>>
    %1118 = tpu.memref_squeeze %1117 : memref<1x128xf32, #tpu.memory_space<any>> -> memref<128xf32, #tpu.memory_space<any>>
    %c0_i32_662 = arith.constant 0 : i32
    %1119 = tpu.memref_slice %arg11[%c10_i32_659, %c0_i32_662] : memref<32x128xf32, #tpu.memory_space<vmem>> -> memref<1x128xf32, #tpu.memory_space<vmem>>
    %1120 = tpu.memref_squeeze %1119 : memref<1x128xf32, #tpu.memory_space<vmem>> -> memref<128xf32, #tpu.memory_space<vmem>>
    %1121 = tpu.memref_slice %arg13[%c1_i32_660] : memref<3x!tpu.dma_semaphore, #tpu.memory_space<semaphore_mem>> -> memref<1x!tpu.dma_semaphore, #tpu.memory_space<semaphore_mem>>
    %1122 = tpu.memref_squeeze %1121 : memref<1x!tpu.dma_semaphore, #tpu.memory_space<semaphore_mem>> -> memref<!tpu.dma_semaphore, #tpu.memory_space<semaphore_mem>>
    tpu.wait_dma2 semaphore(%1122 : memref<!tpu.dma_semaphore, #tpu.memory_space<semaphore_mem>>) src(%1118 : memref<128xf32, #tpu.memory_space<any>>) dst(%1120 : memref<128xf32, #tpu.memory_space<vmem>>)
    %c0_i32_663 = arith.constant 0 : i32
    %c11_i32_664 = arith.constant 11 : i32
    %c1_i32_665 = arith.constant 1 : i32
    %c0_i32_666 = arith.constant 0 : i32
    %1123 = tpu.memref_slice %arg5[%c0_i32_663, %c0_i32_666] : memref<2x128xf32, #tpu.memory_space<any>> -> memref<1x128xf32, #tpu.memory_space<any>>
    %1124 = tpu.memref_squeeze %1123 : memref<1x128xf32, #tpu.memory_space<any>> -> memref<128xf32, #tpu.memory_space<any>>
    %c0_i32_667 = arith.constant 0 : i32
    %1125 = tpu.memref_slice %arg11[%c11_i32_664, %c0_i32_667] : memref<32x128xf32, #tpu.memory_space<vmem>> -> memref<1x128xf32, #tpu.memory_space<vmem>>
    %1126 = tpu.memref_squeeze %1125 : memref<1x128xf32, #tpu.memory_space<vmem>> -> memref<128xf32, #tpu.memory_space<vmem>>
    %1127 = tpu.memref_slice %arg13[%c1_i32_665] : memref<3x!tpu.dma_semaphore, #tpu.memory_space<semaphore_mem>> -> memref<1x!tpu.dma_semaphore, #tpu.memory_space<semaphore_mem>>
    %1128 = tpu.memref_squeeze %1127 : memref<1x!tpu.dma_semaphore, #tpu.memory_space<semaphore_mem>> -> memref<!tpu.dma_semaphore, #tpu.memory_space<semaphore_mem>>
    tpu.wait_dma2 semaphore(%1128 : memref<!tpu.dma_semaphore, #tpu.memory_space<semaphore_mem>>) src(%1124 : memref<128xf32, #tpu.memory_space<any>>) dst(%1126 : memref<128xf32, #tpu.memory_space<vmem>>)
    %c0_i32_668 = arith.constant 0 : i32
    %c12_i32_669 = arith.constant 12 : i32
    %c1_i32_670 = arith.constant 1 : i32
    %c0_i32_671 = arith.constant 0 : i32
    %1129 = tpu.memref_slice %arg5[%c0_i32_668, %c0_i32_671] : memref<2x128xf32, #tpu.memory_space<any>> -> memref<1x128xf32, #tpu.memory_space<any>>
    %1130 = tpu.memref_squeeze %1129 : memref<1x128xf32, #tpu.memory_space<any>> -> memref<128xf32, #tpu.memory_space<any>>
    %c0_i32_672 = arith.constant 0 : i32
    %1131 = tpu.memref_slice %arg11[%c12_i32_669, %c0_i32_672] : memref<32x128xf32, #tpu.memory_space<vmem>> -> memref<1x128xf32, #tpu.memory_space<vmem>>
    %1132 = tpu.memref_squeeze %1131 : memref<1x128xf32, #tpu.memory_space<vmem>> -> memref<128xf32, #tpu.memory_space<vmem>>
    %1133 = tpu.memref_slice %arg13[%c1_i32_670] : memref<3x!tpu.dma_semaphore, #tpu.memory_space<semaphore_mem>> -> memref<1x!tpu.dma_semaphore, #tpu.memory_space<semaphore_mem>>
    %1134 = tpu.memref_squeeze %1133 : memref<1x!tpu.dma_semaphore, #tpu.memory_space<semaphore_mem>> -> memref<!tpu.dma_semaphore, #tpu.memory_space<semaphore_mem>>
    tpu.wait_dma2 semaphore(%1134 : memref<!tpu.dma_semaphore, #tpu.memory_space<semaphore_mem>>) src(%1130 : memref<128xf32, #tpu.memory_space<any>>) dst(%1132 : memref<128xf32, #tpu.memory_space<vmem>>)
    %c0_i32_673 = arith.constant 0 : i32
    %c13_i32_674 = arith.constant 13 : i32
    %c1_i32_675 = arith.constant 1 : i32
    %c0_i32_676 = arith.constant 0 : i32
    %1135 = tpu.memref_slice %arg5[%c0_i32_673, %c0_i32_676] : memref<2x128xf32, #tpu.memory_space<any>> -> memref<1x128xf32, #tpu.memory_space<any>>
    %1136 = tpu.memref_squeeze %1135 : memref<1x128xf32, #tpu.memory_space<any>> -> memref<128xf32, #tpu.memory_space<any>>
    %c0_i32_677 = arith.constant 0 : i32
    %1137 = tpu.memref_slice %arg11[%c13_i32_674, %c0_i32_677] : memref<32x128xf32, #tpu.memory_space<vmem>> -> memref<1x128xf32, #tpu.memory_space<vmem>>
    %1138 = tpu.memref_squeeze %1137 : memref<1x128xf32, #tpu.memory_space<vmem>> -> memref<128xf32, #tpu.memory_space<vmem>>
    %1139 = tpu.memref_slice %arg13[%c1_i32_675] : memref<3x!tpu.dma_semaphore, #tpu.memory_space<semaphore_mem>> -> memref<1x!tpu.dma_semaphore, #tpu.memory_space<semaphore_mem>>
    %1140 = tpu.memref_squeeze %1139 : memref<1x!tpu.dma_semaphore, #tpu.memory_space<semaphore_mem>> -> memref<!tpu.dma_semaphore, #tpu.memory_space<semaphore_mem>>
    tpu.wait_dma2 semaphore(%1140 : memref<!tpu.dma_semaphore, #tpu.memory_space<semaphore_mem>>) src(%1136 : memref<128xf32, #tpu.memory_space<any>>) dst(%1138 : memref<128xf32, #tpu.memory_space<vmem>>)
    %c0_i32_678 = arith.constant 0 : i32
    %c14_i32_679 = arith.constant 14 : i32
    %c1_i32_680 = arith.constant 1 : i32
    %c0_i32_681 = arith.constant 0 : i32
    %1141 = tpu.memref_slice %arg5[%c0_i32_678, %c0_i32_681] : memref<2x128xf32, #tpu.memory_space<any>> -> memref<1x128xf32, #tpu.memory_space<any>>
    %1142 = tpu.memref_squeeze %1141 : memref<1x128xf32, #tpu.memory_space<any>> -> memref<128xf32, #tpu.memory_space<any>>
    %c0_i32_682 = arith.constant 0 : i32
    %1143 = tpu.memref_slice %arg11[%c14_i32_679, %c0_i32_682] : memref<32x128xf32, #tpu.memory_space<vmem>> -> memref<1x128xf32, #tpu.memory_space<vmem>>
    %1144 = tpu.memref_squeeze %1143 : memref<1x128xf32, #tpu.memory_space<vmem>> -> memref<128xf32, #tpu.memory_space<vmem>>
    %1145 = tpu.memref_slice %arg13[%c1_i32_680] : memref<3x!tpu.dma_semaphore, #tpu.memory_space<semaphore_mem>> -> memref<1x!tpu.dma_semaphore, #tpu.memory_space<semaphore_mem>>
    %1146 = tpu.memref_squeeze %1145 : memref<1x!tpu.dma_semaphore, #tpu.memory_space<semaphore_mem>> -> memref<!tpu.dma_semaphore, #tpu.memory_space<semaphore_mem>>
    tpu.wait_dma2 semaphore(%1146 : memref<!tpu.dma_semaphore, #tpu.memory_space<semaphore_mem>>) src(%1142 : memref<128xf32, #tpu.memory_space<any>>) dst(%1144 : memref<128xf32, #tpu.memory_space<vmem>>)
    %c0_i32_683 = arith.constant 0 : i32
    %c15_i32_684 = arith.constant 15 : i32
    %c1_i32_685 = arith.constant 1 : i32
    %c0_i32_686 = arith.constant 0 : i32
    %1147 = tpu.memref_slice %arg5[%c0_i32_683, %c0_i32_686] : memref<2x128xf32, #tpu.memory_space<any>> -> memref<1x128xf32, #tpu.memory_space<any>>
    %1148 = tpu.memref_squeeze %1147 : memref<1x128xf32, #tpu.memory_space<any>> -> memref<128xf32, #tpu.memory_space<any>>
    %c0_i32_687 = arith.constant 0 : i32
    %1149 = tpu.memref_slice %arg11[%c15_i32_684, %c0_i32_687] : memref<32x128xf32, #tpu.memory_space<vmem>> -> memref<1x128xf32, #tpu.memory_space<vmem>>
    %1150 = tpu.memref_squeeze %1149 : memref<1x128xf32, #tpu.memory_space<vmem>> -> memref<128xf32, #tpu.memory_space<vmem>>
    %1151 = tpu.memref_slice %arg13[%c1_i32_685] : memref<3x!tpu.dma_semaphore, #tpu.memory_space<semaphore_mem>> -> memref<1x!tpu.dma_semaphore, #tpu.memory_space<semaphore_mem>>
    %1152 = tpu.memref_squeeze %1151 : memref<1x!tpu.dma_semaphore, #tpu.memory_space<semaphore_mem>> -> memref<!tpu.dma_semaphore, #tpu.memory_space<semaphore_mem>>
    tpu.wait_dma2 semaphore(%1152 : memref<!tpu.dma_semaphore, #tpu.memory_space<semaphore_mem>>) src(%1148 : memref<128xf32, #tpu.memory_space<any>>) dst(%1150 : memref<128xf32, #tpu.memory_space<vmem>>)
    %c0_i32_688 = arith.constant 0 : i32
    %c16_i32_689 = arith.constant 16 : i32
    %c1_i32_690 = arith.constant 1 : i32
    %c0_i32_691 = arith.constant 0 : i32
    %1153 = tpu.memref_slice %arg5[%c0_i32_688, %c0_i32_691] : memref<2x128xf32, #tpu.memory_space<any>> -> memref<1x128xf32, #tpu.memory_space<any>>
    %1154 = tpu.memref_squeeze %1153 : memref<1x128xf32, #tpu.memory_space<any>> -> memref<128xf32, #tpu.memory_space<any>>
    %c0_i32_692 = arith.constant 0 : i32
    %1155 = tpu.memref_slice %arg11[%c16_i32_689, %c0_i32_692] : memref<32x128xf32, #tpu.memory_space<vmem>> -> memref<1x128xf32, #tpu.memory_space<vmem>>
    %1156 = tpu.memref_squeeze %1155 : memref<1x128xf32, #tpu.memory_space<vmem>> -> memref<128xf32, #tpu.memory_space<vmem>>
    %1157 = tpu.memref_slice %arg13[%c1_i32_690] : memref<3x!tpu.dma_semaphore, #tpu.memory_space<semaphore_mem>> -> memref<1x!tpu.dma_semaphore, #tpu.memory_space<semaphore_mem>>
    %1158 = tpu.memref_squeeze %1157 : memref<1x!tpu.dma_semaphore, #tpu.memory_space<semaphore_mem>> -> memref<!tpu.dma_semaphore, #tpu.memory_space<semaphore_mem>>
    tpu.wait_dma2 semaphore(%1158 : memref<!tpu.dma_semaphore, #tpu.memory_space<semaphore_mem>>) src(%1154 : memref<128xf32, #tpu.memory_space<any>>) dst(%1156 : memref<128xf32, #tpu.memory_space<vmem>>)
    %c0_i32_693 = arith.constant 0 : i32
    %c17_i32_694 = arith.constant 17 : i32
    %c1_i32_695 = arith.constant 1 : i32
    %c0_i32_696 = arith.constant 0 : i32
    %1159 = tpu.memref_slice %arg5[%c0_i32_693, %c0_i32_696] : memref<2x128xf32, #tpu.memory_space<any>> -> memref<1x128xf32, #tpu.memory_space<any>>
    %1160 = tpu.memref_squeeze %1159 : memref<1x128xf32, #tpu.memory_space<any>> -> memref<128xf32, #tpu.memory_space<any>>
    %c0_i32_697 = arith.constant 0 : i32
    %1161 = tpu.memref_slice %arg11[%c17_i32_694, %c0_i32_697] : memref<32x128xf32, #tpu.memory_space<vmem>> -> memref<1x128xf32, #tpu.memory_space<vmem>>
    %1162 = tpu.memref_squeeze %1161 : memref<1x128xf32, #tpu.memory_space<vmem>> -> memref<128xf32, #tpu.memory_space<vmem>>
    %1163 = tpu.memref_slice %arg13[%c1_i32_695] : memref<3x!tpu.dma_semaphore, #tpu.memory_space<semaphore_mem>> -> memref<1x!tpu.dma_semaphore, #tpu.memory_space<semaphore_mem>>
    %1164 = tpu.memref_squeeze %1163 : memref<1x!tpu.dma_semaphore, #tpu.memory_space<semaphore_mem>> -> memref<!tpu.dma_semaphore, #tpu.memory_space<semaphore_mem>>
    tpu.wait_dma2 semaphore(%1164 : memref<!tpu.dma_semaphore, #tpu.memory_space<semaphore_mem>>) src(%1160 : memref<128xf32, #tpu.memory_space<any>>) dst(%1162 : memref<128xf32, #tpu.memory_space<vmem>>)
    %c0_i32_698 = arith.constant 0 : i32
    %c18_i32_699 = arith.constant 18 : i32
    %c1_i32_700 = arith.constant 1 : i32
    %c0_i32_701 = arith.constant 0 : i32
    %1165 = tpu.memref_slice %arg5[%c0_i32_698, %c0_i32_701] : memref<2x128xf32, #tpu.memory_space<any>> -> memref<1x128xf32, #tpu.memory_space<any>>
    %1166 = tpu.memref_squeeze %1165 : memref<1x128xf32, #tpu.memory_space<any>> -> memref<128xf32, #tpu.memory_space<any>>
    %c0_i32_702 = arith.constant 0 : i32
    %1167 = tpu.memref_slice %arg11[%c18_i32_699, %c0_i32_702] : memref<32x128xf32, #tpu.memory_space<vmem>> -> memref<1x128xf32, #tpu.memory_space<vmem>>
    %1168 = tpu.memref_squeeze %1167 : memref<1x128xf32, #tpu.memory_space<vmem>> -> memref<128xf32, #tpu.memory_space<vmem>>
    %1169 = tpu.memref_slice %arg13[%c1_i32_700] : memref<3x!tpu.dma_semaphore, #tpu.memory_space<semaphore_mem>> -> memref<1x!tpu.dma_semaphore, #tpu.memory_space<semaphore_mem>>
    %1170 = tpu.memref_squeeze %1169 : memref<1x!tpu.dma_semaphore, #tpu.memory_space<semaphore_mem>> -> memref<!tpu.dma_semaphore, #tpu.memory_space<semaphore_mem>>
    tpu.wait_dma2 semaphore(%1170 : memref<!tpu.dma_semaphore, #tpu.memory_space<semaphore_mem>>) src(%1166 : memref<128xf32, #tpu.memory_space<any>>) dst(%1168 : memref<128xf32, #tpu.memory_space<vmem>>)
    %c0_i32_703 = arith.constant 0 : i32
    %c19_i32_704 = arith.constant 19 : i32
    %c1_i32_705 = arith.constant 1 : i32
    %c0_i32_706 = arith.constant 0 : i32
    %1171 = tpu.memref_slice %arg5[%c0_i32_703, %c0_i32_706] : memref<2x128xf32, #tpu.memory_space<any>> -> memref<1x128xf32, #tpu.memory_space<any>>
    %1172 = tpu.memref_squeeze %1171 : memref<1x128xf32, #tpu.memory_space<any>> -> memref<128xf32, #tpu.memory_space<any>>
    %c0_i32_707 = arith.constant 0 : i32
    %1173 = tpu.memref_slice %arg11[%c19_i32_704, %c0_i32_707] : memref<32x128xf32, #tpu.memory_space<vmem>> -> memref<1x128xf32, #tpu.memory_space<vmem>>
    %1174 = tpu.memref_squeeze %1173 : memref<1x128xf32, #tpu.memory_space<vmem>> -> memref<128xf32, #tpu.memory_space<vmem>>
    %1175 = tpu.memref_slice %arg13[%c1_i32_705] : memref<3x!tpu.dma_semaphore, #tpu.memory_space<semaphore_mem>> -> memref<1x!tpu.dma_semaphore, #tpu.memory_space<semaphore_mem>>
    %1176 = tpu.memref_squeeze %1175 : memref<1x!tpu.dma_semaphore, #tpu.memory_space<semaphore_mem>> -> memref<!tpu.dma_semaphore, #tpu.memory_space<semaphore_mem>>
    tpu.wait_dma2 semaphore(%1176 : memref<!tpu.dma_semaphore, #tpu.memory_space<semaphore_mem>>) src(%1172 : memref<128xf32, #tpu.memory_space<any>>) dst(%1174 : memref<128xf32, #tpu.memory_space<vmem>>)
    %c0_i32_708 = arith.constant 0 : i32
    %c20_i32_709 = arith.constant 20 : i32
    %c1_i32_710 = arith.constant 1 : i32
    %c0_i32_711 = arith.constant 0 : i32
    %1177 = tpu.memref_slice %arg5[%c0_i32_708, %c0_i32_711] : memref<2x128xf32, #tpu.memory_space<any>> -> memref<1x128xf32, #tpu.memory_space<any>>
    %1178 = tpu.memref_squeeze %1177 : memref<1x128xf32, #tpu.memory_space<any>> -> memref<128xf32, #tpu.memory_space<any>>
    %c0_i32_712 = arith.constant 0 : i32
    %1179 = tpu.memref_slice %arg11[%c20_i32_709, %c0_i32_712] : memref<32x128xf32, #tpu.memory_space<vmem>> -> memref<1x128xf32, #tpu.memory_space<vmem>>
    %1180 = tpu.memref_squeeze %1179 : memref<1x128xf32, #tpu.memory_space<vmem>> -> memref<128xf32, #tpu.memory_space<vmem>>
    %1181 = tpu.memref_slice %arg13[%c1_i32_710] : memref<3x!tpu.dma_semaphore, #tpu.memory_space<semaphore_mem>> -> memref<1x!tpu.dma_semaphore, #tpu.memory_space<semaphore_mem>>
    %1182 = tpu.memref_squeeze %1181 : memref<1x!tpu.dma_semaphore, #tpu.memory_space<semaphore_mem>> -> memref<!tpu.dma_semaphore, #tpu.memory_space<semaphore_mem>>
    tpu.wait_dma2 semaphore(%1182 : memref<!tpu.dma_semaphore, #tpu.memory_space<semaphore_mem>>) src(%1178 : memref<128xf32, #tpu.memory_space<any>>) dst(%1180 : memref<128xf32, #tpu.memory_space<vmem>>)
    %c0_i32_713 = arith.constant 0 : i32
    %c21_i32_714 = arith.constant 21 : i32
    %c1_i32_715 = arith.constant 1 : i32
    %c0_i32_716 = arith.constant 0 : i32
    %1183 = tpu.memref_slice %arg5[%c0_i32_713, %c0_i32_716] : memref<2x128xf32, #tpu.memory_space<any>> -> memref<1x128xf32, #tpu.memory_space<any>>
    %1184 = tpu.memref_squeeze %1183 : memref<1x128xf32, #tpu.memory_space<any>> -> memref<128xf32, #tpu.memory_space<any>>
    %c0_i32_717 = arith.constant 0 : i32
    %1185 = tpu.memref_slice %arg11[%c21_i32_714, %c0_i32_717] : memref<32x128xf32, #tpu.memory_space<vmem>> -> memref<1x128xf32, #tpu.memory_space<vmem>>
    %1186 = tpu.memref_squeeze %1185 : memref<1x128xf32, #tpu.memory_space<vmem>> -> memref<128xf32, #tpu.memory_space<vmem>>
    %1187 = tpu.memref_slice %arg13[%c1_i32_715] : memref<3x!tpu.dma_semaphore, #tpu.memory_space<semaphore_mem>> -> memref<1x!tpu.dma_semaphore, #tpu.memory_space<semaphore_mem>>
    %1188 = tpu.memref_squeeze %1187 : memref<1x!tpu.dma_semaphore, #tpu.memory_space<semaphore_mem>> -> memref<!tpu.dma_semaphore, #tpu.memory_space<semaphore_mem>>
    tpu.wait_dma2 semaphore(%1188 : memref<!tpu.dma_semaphore, #tpu.memory_space<semaphore_mem>>) src(%1184 : memref<128xf32, #tpu.memory_space<any>>) dst(%1186 : memref<128xf32, #tpu.memory_space<vmem>>)
    %c0_i32_718 = arith.constant 0 : i32
    %c22_i32_719 = arith.constant 22 : i32
    %c1_i32_720 = arith.constant 1 : i32
    %c0_i32_721 = arith.constant 0 : i32
    %1189 = tpu.memref_slice %arg5[%c0_i32_718, %c0_i32_721] : memref<2x128xf32, #tpu.memory_space<any>> -> memref<1x128xf32, #tpu.memory_space<any>>
    %1190 = tpu.memref_squeeze %1189 : memref<1x128xf32, #tpu.memory_space<any>> -> memref<128xf32, #tpu.memory_space<any>>
    %c0_i32_722 = arith.constant 0 : i32
    %1191 = tpu.memref_slice %arg11[%c22_i32_719, %c0_i32_722] : memref<32x128xf32, #tpu.memory_space<vmem>> -> memref<1x128xf32, #tpu.memory_space<vmem>>
    %1192 = tpu.memref_squeeze %1191 : memref<1x128xf32, #tpu.memory_space<vmem>> -> memref<128xf32, #tpu.memory_space<vmem>>
    %1193 = tpu.memref_slice %arg13[%c1_i32_720] : memref<3x!tpu.dma_semaphore, #tpu.memory_space<semaphore_mem>> -> memref<1x!tpu.dma_semaphore, #tpu.memory_space<semaphore_mem>>
    %1194 = tpu.memref_squeeze %1193 : memref<1x!tpu.dma_semaphore, #tpu.memory_space<semaphore_mem>> -> memref<!tpu.dma_semaphore, #tpu.memory_space<semaphore_mem>>
    tpu.wait_dma2 semaphore(%1194 : memref<!tpu.dma_semaphore, #tpu.memory_space<semaphore_mem>>) src(%1190 : memref<128xf32, #tpu.memory_space<any>>) dst(%1192 : memref<128xf32, #tpu.memory_space<vmem>>)
    %c0_i32_723 = arith.constant 0 : i32
    %c23_i32_724 = arith.constant 23 : i32
    %c1_i32_725 = arith.constant 1 : i32
    %c0_i32_726 = arith.constant 0 : i32
    %1195 = tpu.memref_slice %arg5[%c0_i32_723, %c0_i32_726] : memref<2x128xf32, #tpu.memory_space<any>> -> memref<1x128xf32, #tpu.memory_space<any>>
    %1196 = tpu.memref_squeeze %1195 : memref<1x128xf32, #tpu.memory_space<any>> -> memref<128xf32, #tpu.memory_space<any>>
    %c0_i32_727 = arith.constant 0 : i32
    %1197 = tpu.memref_slice %arg11[%c23_i32_724, %c0_i32_727] : memref<32x128xf32, #tpu.memory_space<vmem>> -> memref<1x128xf32, #tpu.memory_space<vmem>>
    %1198 = tpu.memref_squeeze %1197 : memref<1x128xf32, #tpu.memory_space<vmem>> -> memref<128xf32, #tpu.memory_space<vmem>>
    %1199 = tpu.memref_slice %arg13[%c1_i32_725] : memref<3x!tpu.dma_semaphore, #tpu.memory_space<semaphore_mem>> -> memref<1x!tpu.dma_semaphore, #tpu.memory_space<semaphore_mem>>
    %1200 = tpu.memref_squeeze %1199 : memref<1x!tpu.dma_semaphore, #tpu.memory_space<semaphore_mem>> -> memref<!tpu.dma_semaphore, #tpu.memory_space<semaphore_mem>>
    tpu.wait_dma2 semaphore(%1200 : memref<!tpu.dma_semaphore, #tpu.memory_space<semaphore_mem>>) src(%1196 : memref<128xf32, #tpu.memory_space<any>>) dst(%1198 : memref<128xf32, #tpu.memory_space<vmem>>)
    %c0_i32_728 = arith.constant 0 : i32
    %c24_i32_729 = arith.constant 24 : i32
    %c1_i32_730 = arith.constant 1 : i32
    %c0_i32_731 = arith.constant 0 : i32
    %1201 = tpu.memref_slice %arg5[%c0_i32_728, %c0_i32_731] : memref<2x128xf32, #tpu.memory_space<any>> -> memref<1x128xf32, #tpu.memory_space<any>>
    %1202 = tpu.memref_squeeze %1201 : memref<1x128xf32, #tpu.memory_space<any>> -> memref<128xf32, #tpu.memory_space<any>>
    %c0_i32_732 = arith.constant 0 : i32
    %1203 = tpu.memref_slice %arg11[%c24_i32_729, %c0_i32_732] : memref<32x128xf32, #tpu.memory_space<vmem>> -> memref<1x128xf32, #tpu.memory_space<vmem>>
    %1204 = tpu.memref_squeeze %1203 : memref<1x128xf32, #tpu.memory_space<vmem>> -> memref<128xf32, #tpu.memory_space<vmem>>
    %1205 = tpu.memref_slice %arg13[%c1_i32_730] : memref<3x!tpu.dma_semaphore, #tpu.memory_space<semaphore_mem>> -> memref<1x!tpu.dma_semaphore, #tpu.memory_space<semaphore_mem>>
    %1206 = tpu.memref_squeeze %1205 : memref<1x!tpu.dma_semaphore, #tpu.memory_space<semaphore_mem>> -> memref<!tpu.dma_semaphore, #tpu.memory_space<semaphore_mem>>
    tpu.wait_dma2 semaphore(%1206 : memref<!tpu.dma_semaphore, #tpu.memory_space<semaphore_mem>>) src(%1202 : memref<128xf32, #tpu.memory_space<any>>) dst(%1204 : memref<128xf32, #tpu.memory_space<vmem>>)
    %c0_i32_733 = arith.constant 0 : i32
    %c25_i32_734 = arith.constant 25 : i32
    %c1_i32_735 = arith.constant 1 : i32
    %c0_i32_736 = arith.constant 0 : i32
    %1207 = tpu.memref_slice %arg5[%c0_i32_733, %c0_i32_736] : memref<2x128xf32, #tpu.memory_space<any>> -> memref<1x128xf32, #tpu.memory_space<any>>
    %1208 = tpu.memref_squeeze %1207 : memref<1x128xf32, #tpu.memory_space<any>> -> memref<128xf32, #tpu.memory_space<any>>
    %c0_i32_737 = arith.constant 0 : i32
    %1209 = tpu.memref_slice %arg11[%c25_i32_734, %c0_i32_737] : memref<32x128xf32, #tpu.memory_space<vmem>> -> memref<1x128xf32, #tpu.memory_space<vmem>>
    %1210 = tpu.memref_squeeze %1209 : memref<1x128xf32, #tpu.memory_space<vmem>> -> memref<128xf32, #tpu.memory_space<vmem>>
    %1211 = tpu.memref_slice %arg13[%c1_i32_735] : memref<3x!tpu.dma_semaphore, #tpu.memory_space<semaphore_mem>> -> memref<1x!tpu.dma_semaphore, #tpu.memory_space<semaphore_mem>>
    %1212 = tpu.memref_squeeze %1211 : memref<1x!tpu.dma_semaphore, #tpu.memory_space<semaphore_mem>> -> memref<!tpu.dma_semaphore, #tpu.memory_space<semaphore_mem>>
    tpu.wait_dma2 semaphore(%1212 : memref<!tpu.dma_semaphore, #tpu.memory_space<semaphore_mem>>) src(%1208 : memref<128xf32, #tpu.memory_space<any>>) dst(%1210 : memref<128xf32, #tpu.memory_space<vmem>>)
    %c0_i32_738 = arith.constant 0 : i32
    %c26_i32_739 = arith.constant 26 : i32
    %c1_i32_740 = arith.constant 1 : i32
    %c0_i32_741 = arith.constant 0 : i32
    %1213 = tpu.memref_slice %arg5[%c0_i32_738, %c0_i32_741] : memref<2x128xf32, #tpu.memory_space<any>> -> memref<1x128xf32, #tpu.memory_space<any>>
    %1214 = tpu.memref_squeeze %1213 : memref<1x128xf32, #tpu.memory_space<any>> -> memref<128xf32, #tpu.memory_space<any>>
    %c0_i32_742 = arith.constant 0 : i32
    %1215 = tpu.memref_slice %arg11[%c26_i32_739, %c0_i32_742] : memref<32x128xf32, #tpu.memory_space<vmem>> -> memref<1x128xf32, #tpu.memory_space<vmem>>
    %1216 = tpu.memref_squeeze %1215 : memref<1x128xf32, #tpu.memory_space<vmem>> -> memref<128xf32, #tpu.memory_space<vmem>>
    %1217 = tpu.memref_slice %arg13[%c1_i32_740] : memref<3x!tpu.dma_semaphore, #tpu.memory_space<semaphore_mem>> -> memref<1x!tpu.dma_semaphore, #tpu.memory_space<semaphore_mem>>
    %1218 = tpu.memref_squeeze %1217 : memref<1x!tpu.dma_semaphore, #tpu.memory_space<semaphore_mem>> -> memref<!tpu.dma_semaphore, #tpu.memory_space<semaphore_mem>>
    tpu.wait_dma2 semaphore(%1218 : memref<!tpu.dma_semaphore, #tpu.memory_space<semaphore_mem>>) src(%1214 : memref<128xf32, #tpu.memory_space<any>>) dst(%1216 : memref<128xf32, #tpu.memory_space<vmem>>)
    %c0_i32_743 = arith.constant 0 : i32
    %c27_i32_744 = arith.constant 27 : i32
    %c1_i32_745 = arith.constant 1 : i32
    %c0_i32_746 = arith.constant 0 : i32
    %1219 = tpu.memref_slice %arg5[%c0_i32_743, %c0_i32_746] : memref<2x128xf32, #tpu.memory_space<any>> -> memref<1x128xf32, #tpu.memory_space<any>>
    %1220 = tpu.memref_squeeze %1219 : memref<1x128xf32, #tpu.memory_space<any>> -> memref<128xf32, #tpu.memory_space<any>>
    %c0_i32_747 = arith.constant 0 : i32
    %1221 = tpu.memref_slice %arg11[%c27_i32_744, %c0_i32_747] : memref<32x128xf32, #tpu.memory_space<vmem>> -> memref<1x128xf32, #tpu.memory_space<vmem>>
    %1222 = tpu.memref_squeeze %1221 : memref<1x128xf32, #tpu.memory_space<vmem>> -> memref<128xf32, #tpu.memory_space<vmem>>
    %1223 = tpu.memref_slice %arg13[%c1_i32_745] : memref<3x!tpu.dma_semaphore, #tpu.memory_space<semaphore_mem>> -> memref<1x!tpu.dma_semaphore, #tpu.memory_space<semaphore_mem>>
    %1224 = tpu.memref_squeeze %1223 : memref<1x!tpu.dma_semaphore, #tpu.memory_space<semaphore_mem>> -> memref<!tpu.dma_semaphore, #tpu.memory_space<semaphore_mem>>
    tpu.wait_dma2 semaphore(%1224 : memref<!tpu.dma_semaphore, #tpu.memory_space<semaphore_mem>>) src(%1220 : memref<128xf32, #tpu.memory_space<any>>) dst(%1222 : memref<128xf32, #tpu.memory_space<vmem>>)
    %c0_i32_748 = arith.constant 0 : i32
    %c28_i32_749 = arith.constant 28 : i32
    %c1_i32_750 = arith.constant 1 : i32
    %c0_i32_751 = arith.constant 0 : i32
    %1225 = tpu.memref_slice %arg5[%c0_i32_748, %c0_i32_751] : memref<2x128xf32, #tpu.memory_space<any>> -> memref<1x128xf32, #tpu.memory_space<any>>
    %1226 = tpu.memref_squeeze %1225 : memref<1x128xf32, #tpu.memory_space<any>> -> memref<128xf32, #tpu.memory_space<any>>
    %c0_i32_752 = arith.constant 0 : i32
    %1227 = tpu.memref_slice %arg11[%c28_i32_749, %c0_i32_752] : memref<32x128xf32, #tpu.memory_space<vmem>> -> memref<1x128xf32, #tpu.memory_space<vmem>>
    %1228 = tpu.memref_squeeze %1227 : memref<1x128xf32, #tpu.memory_space<vmem>> -> memref<128xf32, #tpu.memory_space<vmem>>
    %1229 = tpu.memref_slice %arg13[%c1_i32_750] : memref<3x!tpu.dma_semaphore, #tpu.memory_space<semaphore_mem>> -> memref<1x!tpu.dma_semaphore, #tpu.memory_space<semaphore_mem>>
    %1230 = tpu.memref_squeeze %1229 : memref<1x!tpu.dma_semaphore, #tpu.memory_space<semaphore_mem>> -> memref<!tpu.dma_semaphore, #tpu.memory_space<semaphore_mem>>
    tpu.wait_dma2 semaphore(%1230 : memref<!tpu.dma_semaphore, #tpu.memory_space<semaphore_mem>>) src(%1226 : memref<128xf32, #tpu.memory_space<any>>) dst(%1228 : memref<128xf32, #tpu.memory_space<vmem>>)
    %c0_i32_753 = arith.constant 0 : i32
    %c29_i32_754 = arith.constant 29 : i32
    %c1_i32_755 = arith.constant 1 : i32
    %c0_i32_756 = arith.constant 0 : i32
    %1231 = tpu.memref_slice %arg5[%c0_i32_753, %c0_i32_756] : memref<2x128xf32, #tpu.memory_space<any>> -> memref<1x128xf32, #tpu.memory_space<any>>
    %1232 = tpu.memref_squeeze %1231 : memref<1x128xf32, #tpu.memory_space<any>> -> memref<128xf32, #tpu.memory_space<any>>
    %c0_i32_757 = arith.constant 0 : i32
    %1233 = tpu.memref_slice %arg11[%c29_i32_754, %c0_i32_757] : memref<32x128xf32, #tpu.memory_space<vmem>> -> memref<1x128xf32, #tpu.memory_space<vmem>>
    %1234 = tpu.memref_squeeze %1233 : memref<1x128xf32, #tpu.memory_space<vmem>> -> memref<128xf32, #tpu.memory_space<vmem>>
    %1235 = tpu.memref_slice %arg13[%c1_i32_755] : memref<3x!tpu.dma_semaphore, #tpu.memory_space<semaphore_mem>> -> memref<1x!tpu.dma_semaphore, #tpu.memory_space<semaphore_mem>>
    %1236 = tpu.memref_squeeze %1235 : memref<1x!tpu.dma_semaphore, #tpu.memory_space<semaphore_mem>> -> memref<!tpu.dma_semaphore, #tpu.memory_space<semaphore_mem>>
    tpu.wait_dma2 semaphore(%1236 : memref<!tpu.dma_semaphore, #tpu.memory_space<semaphore_mem>>) src(%1232 : memref<128xf32, #tpu.memory_space<any>>) dst(%1234 : memref<128xf32, #tpu.memory_space<vmem>>)
    %c0_i32_758 = arith.constant 0 : i32
    %c30_i32_759 = arith.constant 30 : i32
    %c1_i32_760 = arith.constant 1 : i32
    %c0_i32_761 = arith.constant 0 : i32
    %1237 = tpu.memref_slice %arg5[%c0_i32_758, %c0_i32_761] : memref<2x128xf32, #tpu.memory_space<any>> -> memref<1x128xf32, #tpu.memory_space<any>>
    %1238 = tpu.memref_squeeze %1237 : memref<1x128xf32, #tpu.memory_space<any>> -> memref<128xf32, #tpu.memory_space<any>>
    %c0_i32_762 = arith.constant 0 : i32
    %1239 = tpu.memref_slice %arg11[%c30_i32_759, %c0_i32_762] : memref<32x128xf32, #tpu.memory_space<vmem>> -> memref<1x128xf32, #tpu.memory_space<vmem>>
    %1240 = tpu.memref_squeeze %1239 : memref<1x128xf32, #tpu.memory_space<vmem>> -> memref<128xf32, #tpu.memory_space<vmem>>
    %1241 = tpu.memref_slice %arg13[%c1_i32_760] : memref<3x!tpu.dma_semaphore, #tpu.memory_space<semaphore_mem>> -> memref<1x!tpu.dma_semaphore, #tpu.memory_space<semaphore_mem>>
    %1242 = tpu.memref_squeeze %1241 : memref<1x!tpu.dma_semaphore, #tpu.memory_space<semaphore_mem>> -> memref<!tpu.dma_semaphore, #tpu.memory_space<semaphore_mem>>
    tpu.wait_dma2 semaphore(%1242 : memref<!tpu.dma_semaphore, #tpu.memory_space<semaphore_mem>>) src(%1238 : memref<128xf32, #tpu.memory_space<any>>) dst(%1240 : memref<128xf32, #tpu.memory_space<vmem>>)
    %c0_i32_763 = arith.constant 0 : i32
    %c31_i32_764 = arith.constant 31 : i32
    %c1_i32_765 = arith.constant 1 : i32
    %c0_i32_766 = arith.constant 0 : i32
    %1243 = tpu.memref_slice %arg5[%c0_i32_763, %c0_i32_766] : memref<2x128xf32, #tpu.memory_space<any>> -> memref<1x128xf32, #tpu.memory_space<any>>
    %1244 = tpu.memref_squeeze %1243 : memref<1x128xf32, #tpu.memory_space<any>> -> memref<128xf32, #tpu.memory_space<any>>
    %c0_i32_767 = arith.constant 0 : i32
    %1245 = tpu.memref_slice %arg11[%c31_i32_764, %c0_i32_767] : memref<32x128xf32, #tpu.memory_space<vmem>> -> memref<1x128xf32, #tpu.memory_space<vmem>>
    %1246 = tpu.memref_squeeze %1245 : memref<1x128xf32, #tpu.memory_space<vmem>> -> memref<128xf32, #tpu.memory_space<vmem>>
    %1247 = tpu.memref_slice %arg13[%c1_i32_765] : memref<3x!tpu.dma_semaphore, #tpu.memory_space<semaphore_mem>> -> memref<1x!tpu.dma_semaphore, #tpu.memory_space<semaphore_mem>>
    %1248 = tpu.memref_squeeze %1247 : memref<1x!tpu.dma_semaphore, #tpu.memory_space<semaphore_mem>> -> memref<!tpu.dma_semaphore, #tpu.memory_space<semaphore_mem>>
    tpu.wait_dma2 semaphore(%1248 : memref<!tpu.dma_semaphore, #tpu.memory_space<semaphore_mem>>) src(%1244 : memref<128xf32, #tpu.memory_space<any>>) dst(%1246 : memref<128xf32, #tpu.memory_space<vmem>>)
    %c0_i32_768 = arith.constant 0 : i32
    %c0_i32_769 = arith.constant 0 : i32
    %c2_i32_770 = arith.constant 2 : i32
    %c0_i32_771 = arith.constant 0 : i32
    %1249 = tpu.memref_slice %arg6[%c0_i32_768, %c0_i32_771] : memref<128x128xf32, #tpu.memory_space<any>> -> memref<1x128xf32, #tpu.memory_space<any>>
    %1250 = tpu.memref_squeeze %1249 : memref<1x128xf32, #tpu.memory_space<any>> -> memref<128xf32, #tpu.memory_space<any>>
    %c0_i32_772 = arith.constant 0 : i32
    %1251 = tpu.memref_slice %arg12[%c0_i32_769, %c0_i32_772] : memref<32x128xf32, #tpu.memory_space<vmem>> -> memref<1x128xf32, #tpu.memory_space<vmem>>
    %1252 = tpu.memref_squeeze %1251 : memref<1x128xf32, #tpu.memory_space<vmem>> -> memref<128xf32, #tpu.memory_space<vmem>>
    %1253 = tpu.memref_slice %arg13[%c2_i32_770] : memref<3x!tpu.dma_semaphore, #tpu.memory_space<semaphore_mem>> -> memref<1x!tpu.dma_semaphore, #tpu.memory_space<semaphore_mem>>
    %1254 = tpu.memref_squeeze %1253 : memref<1x!tpu.dma_semaphore, #tpu.memory_space<semaphore_mem>> -> memref<!tpu.dma_semaphore, #tpu.memory_space<semaphore_mem>>
    tpu.wait_dma2 semaphore(%1254 : memref<!tpu.dma_semaphore, #tpu.memory_space<semaphore_mem>>) src(%1250 : memref<128xf32, #tpu.memory_space<any>>) dst(%1252 : memref<128xf32, #tpu.memory_space<vmem>>)
    %c0_i32_773 = arith.constant 0 : i32
    %c1_i32_774 = arith.constant 1 : i32
    %c2_i32_775 = arith.constant 2 : i32
    %c0_i32_776 = arith.constant 0 : i32
    %1255 = tpu.memref_slice %arg6[%c0_i32_773, %c0_i32_776] : memref<128x128xf32, #tpu.memory_space<any>> -> memref<1x128xf32, #tpu.memory_space<any>>
    %1256 = tpu.memref_squeeze %1255 : memref<1x128xf32, #tpu.memory_space<any>> -> memref<128xf32, #tpu.memory_space<any>>
    %c0_i32_777 = arith.constant 0 : i32
    %1257 = tpu.memref_slice %arg12[%c1_i32_774, %c0_i32_777] : memref<32x128xf32, #tpu.memory_space<vmem>> -> memref<1x128xf32, #tpu.memory_space<vmem>>
    %1258 = tpu.memref_squeeze %1257 : memref<1x128xf32, #tpu.memory_space<vmem>> -> memref<128xf32, #tpu.memory_space<vmem>>
    %1259 = tpu.memref_slice %arg13[%c2_i32_775] : memref<3x!tpu.dma_semaphore, #tpu.memory_space<semaphore_mem>> -> memref<1x!tpu.dma_semaphore, #tpu.memory_space<semaphore_mem>>
    %1260 = tpu.memref_squeeze %1259 : memref<1x!tpu.dma_semaphore, #tpu.memory_space<semaphore_mem>> -> memref<!tpu.dma_semaphore, #tpu.memory_space<semaphore_mem>>
    tpu.wait_dma2 semaphore(%1260 : memref<!tpu.dma_semaphore, #tpu.memory_space<semaphore_mem>>) src(%1256 : memref<128xf32, #tpu.memory_space<any>>) dst(%1258 : memref<128xf32, #tpu.memory_space<vmem>>)
    %c0_i32_778 = arith.constant 0 : i32
    %c2_i32_779 = arith.constant 2 : i32
    %c2_i32_780 = arith.constant 2 : i32
    %c0_i32_781 = arith.constant 0 : i32
    %1261 = tpu.memref_slice %arg6[%c0_i32_778, %c0_i32_781] : memref<128x128xf32, #tpu.memory_space<any>> -> memref<1x128xf32, #tpu.memory_space<any>>
    %1262 = tpu.memref_squeeze %1261 : memref<1x128xf32, #tpu.memory_space<any>> -> memref<128xf32, #tpu.memory_space<any>>
    %c0_i32_782 = arith.constant 0 : i32
    %1263 = tpu.memref_slice %arg12[%c2_i32_779, %c0_i32_782] : memref<32x128xf32, #tpu.memory_space<vmem>> -> memref<1x128xf32, #tpu.memory_space<vmem>>
    %1264 = tpu.memref_squeeze %1263 : memref<1x128xf32, #tpu.memory_space<vmem>> -> memref<128xf32, #tpu.memory_space<vmem>>
    %1265 = tpu.memref_slice %arg13[%c2_i32_780] : memref<3x!tpu.dma_semaphore, #tpu.memory_space<semaphore_mem>> -> memref<1x!tpu.dma_semaphore, #tpu.memory_space<semaphore_mem>>
    %1266 = tpu.memref_squeeze %1265 : memref<1x!tpu.dma_semaphore, #tpu.memory_space<semaphore_mem>> -> memref<!tpu.dma_semaphore, #tpu.memory_space<semaphore_mem>>
    tpu.wait_dma2 semaphore(%1266 : memref<!tpu.dma_semaphore, #tpu.memory_space<semaphore_mem>>) src(%1262 : memref<128xf32, #tpu.memory_space<any>>) dst(%1264 : memref<128xf32, #tpu.memory_space<vmem>>)
    %c0_i32_783 = arith.constant 0 : i32
    %c3_i32_784 = arith.constant 3 : i32
    %c2_i32_785 = arith.constant 2 : i32
    %c0_i32_786 = arith.constant 0 : i32
    %1267 = tpu.memref_slice %arg6[%c0_i32_783, %c0_i32_786] : memref<128x128xf32, #tpu.memory_space<any>> -> memref<1x128xf32, #tpu.memory_space<any>>
    %1268 = tpu.memref_squeeze %1267 : memref<1x128xf32, #tpu.memory_space<any>> -> memref<128xf32, #tpu.memory_space<any>>
    %c0_i32_787 = arith.constant 0 : i32
    %1269 = tpu.memref_slice %arg12[%c3_i32_784, %c0_i32_787] : memref<32x128xf32, #tpu.memory_space<vmem>> -> memref<1x128xf32, #tpu.memory_space<vmem>>
    %1270 = tpu.memref_squeeze %1269 : memref<1x128xf32, #tpu.memory_space<vmem>> -> memref<128xf32, #tpu.memory_space<vmem>>
    %1271 = tpu.memref_slice %arg13[%c2_i32_785] : memref<3x!tpu.dma_semaphore, #tpu.memory_space<semaphore_mem>> -> memref<1x!tpu.dma_semaphore, #tpu.memory_space<semaphore_mem>>
    %1272 = tpu.memref_squeeze %1271 : memref<1x!tpu.dma_semaphore, #tpu.memory_space<semaphore_mem>> -> memref<!tpu.dma_semaphore, #tpu.memory_space<semaphore_mem>>
    tpu.wait_dma2 semaphore(%1272 : memref<!tpu.dma_semaphore, #tpu.memory_space<semaphore_mem>>) src(%1268 : memref<128xf32, #tpu.memory_space<any>>) dst(%1270 : memref<128xf32, #tpu.memory_space<vmem>>)
    %c0_i32_788 = arith.constant 0 : i32
    %c4_i32_789 = arith.constant 4 : i32
    %c2_i32_790 = arith.constant 2 : i32
    %c0_i32_791 = arith.constant 0 : i32
    %1273 = tpu.memref_slice %arg6[%c0_i32_788, %c0_i32_791] : memref<128x128xf32, #tpu.memory_space<any>> -> memref<1x128xf32, #tpu.memory_space<any>>
    %1274 = tpu.memref_squeeze %1273 : memref<1x128xf32, #tpu.memory_space<any>> -> memref<128xf32, #tpu.memory_space<any>>
    %c0_i32_792 = arith.constant 0 : i32
    %1275 = tpu.memref_slice %arg12[%c4_i32_789, %c0_i32_792] : memref<32x128xf32, #tpu.memory_space<vmem>> -> memref<1x128xf32, #tpu.memory_space<vmem>>
    %1276 = tpu.memref_squeeze %1275 : memref<1x128xf32, #tpu.memory_space<vmem>> -> memref<128xf32, #tpu.memory_space<vmem>>
    %1277 = tpu.memref_slice %arg13[%c2_i32_790] : memref<3x!tpu.dma_semaphore, #tpu.memory_space<semaphore_mem>> -> memref<1x!tpu.dma_semaphore, #tpu.memory_space<semaphore_mem>>
    %1278 = tpu.memref_squeeze %1277 : memref<1x!tpu.dma_semaphore, #tpu.memory_space<semaphore_mem>> -> memref<!tpu.dma_semaphore, #tpu.memory_space<semaphore_mem>>
    tpu.wait_dma2 semaphore(%1278 : memref<!tpu.dma_semaphore, #tpu.memory_space<semaphore_mem>>) src(%1274 : memref<128xf32, #tpu.memory_space<any>>) dst(%1276 : memref<128xf32, #tpu.memory_space<vmem>>)
    %c0_i32_793 = arith.constant 0 : i32
    %c5_i32_794 = arith.constant 5 : i32
    %c2_i32_795 = arith.constant 2 : i32
    %c0_i32_796 = arith.constant 0 : i32
    %1279 = tpu.memref_slice %arg6[%c0_i32_793, %c0_i32_796] : memref<128x128xf32, #tpu.memory_space<any>> -> memref<1x128xf32, #tpu.memory_space<any>>
    %1280 = tpu.memref_squeeze %1279 : memref<1x128xf32, #tpu.memory_space<any>> -> memref<128xf32, #tpu.memory_space<any>>
    %c0_i32_797 = arith.constant 0 : i32
    %1281 = tpu.memref_slice %arg12[%c5_i32_794, %c0_i32_797] : memref<32x128xf32, #tpu.memory_space<vmem>> -> memref<1x128xf32, #tpu.memory_space<vmem>>
    %1282 = tpu.memref_squeeze %1281 : memref<1x128xf32, #tpu.memory_space<vmem>> -> memref<128xf32, #tpu.memory_space<vmem>>
    %1283 = tpu.memref_slice %arg13[%c2_i32_795] : memref<3x!tpu.dma_semaphore, #tpu.memory_space<semaphore_mem>> -> memref<1x!tpu.dma_semaphore, #tpu.memory_space<semaphore_mem>>
    %1284 = tpu.memref_squeeze %1283 : memref<1x!tpu.dma_semaphore, #tpu.memory_space<semaphore_mem>> -> memref<!tpu.dma_semaphore, #tpu.memory_space<semaphore_mem>>
    tpu.wait_dma2 semaphore(%1284 : memref<!tpu.dma_semaphore, #tpu.memory_space<semaphore_mem>>) src(%1280 : memref<128xf32, #tpu.memory_space<any>>) dst(%1282 : memref<128xf32, #tpu.memory_space<vmem>>)
    %c0_i32_798 = arith.constant 0 : i32
    %c6_i32_799 = arith.constant 6 : i32
    %c2_i32_800 = arith.constant 2 : i32
    %c0_i32_801 = arith.constant 0 : i32
    %1285 = tpu.memref_slice %arg6[%c0_i32_798, %c0_i32_801] : memref<128x128xf32, #tpu.memory_space<any>> -> memref<1x128xf32, #tpu.memory_space<any>>
    %1286 = tpu.memref_squeeze %1285 : memref<1x128xf32, #tpu.memory_space<any>> -> memref<128xf32, #tpu.memory_space<any>>
    %c0_i32_802 = arith.constant 0 : i32
    %1287 = tpu.memref_slice %arg12[%c6_i32_799, %c0_i32_802] : memref<32x128xf32, #tpu.memory_space<vmem>> -> memref<1x128xf32, #tpu.memory_space<vmem>>
    %1288 = tpu.memref_squeeze %1287 : memref<1x128xf32, #tpu.memory_space<vmem>> -> memref<128xf32, #tpu.memory_space<vmem>>
    %1289 = tpu.memref_slice %arg13[%c2_i32_800] : memref<3x!tpu.dma_semaphore, #tpu.memory_space<semaphore_mem>> -> memref<1x!tpu.dma_semaphore, #tpu.memory_space<semaphore_mem>>
    %1290 = tpu.memref_squeeze %1289 : memref<1x!tpu.dma_semaphore, #tpu.memory_space<semaphore_mem>> -> memref<!tpu.dma_semaphore, #tpu.memory_space<semaphore_mem>>
    tpu.wait_dma2 semaphore(%1290 : memref<!tpu.dma_semaphore, #tpu.memory_space<semaphore_mem>>) src(%1286 : memref<128xf32, #tpu.memory_space<any>>) dst(%1288 : memref<128xf32, #tpu.memory_space<vmem>>)
    %c0_i32_803 = arith.constant 0 : i32
    %c7_i32_804 = arith.constant 7 : i32
    %c2_i32_805 = arith.constant 2 : i32
    %c0_i32_806 = arith.constant 0 : i32
    %1291 = tpu.memref_slice %arg6[%c0_i32_803, %c0_i32_806] : memref<128x128xf32, #tpu.memory_space<any>> -> memref<1x128xf32, #tpu.memory_space<any>>
    %1292 = tpu.memref_squeeze %1291 : memref<1x128xf32, #tpu.memory_space<any>> -> memref<128xf32, #tpu.memory_space<any>>
    %c0_i32_807 = arith.constant 0 : i32
    %1293 = tpu.memref_slice %arg12[%c7_i32_804, %c0_i32_807] : memref<32x128xf32, #tpu.memory_space<vmem>> -> memref<1x128xf32, #tpu.memory_space<vmem>>
    %1294 = tpu.memref_squeeze %1293 : memref<1x128xf32, #tpu.memory_space<vmem>> -> memref<128xf32, #tpu.memory_space<vmem>>
    %1295 = tpu.memref_slice %arg13[%c2_i32_805] : memref<3x!tpu.dma_semaphore, #tpu.memory_space<semaphore_mem>> -> memref<1x!tpu.dma_semaphore, #tpu.memory_space<semaphore_mem>>
    %1296 = tpu.memref_squeeze %1295 : memref<1x!tpu.dma_semaphore, #tpu.memory_space<semaphore_mem>> -> memref<!tpu.dma_semaphore, #tpu.memory_space<semaphore_mem>>
    tpu.wait_dma2 semaphore(%1296 : memref<!tpu.dma_semaphore, #tpu.memory_space<semaphore_mem>>) src(%1292 : memref<128xf32, #tpu.memory_space<any>>) dst(%1294 : memref<128xf32, #tpu.memory_space<vmem>>)
    %c0_i32_808 = arith.constant 0 : i32
    %c8_i32_809 = arith.constant 8 : i32
    %c2_i32_810 = arith.constant 2 : i32
    %c0_i32_811 = arith.constant 0 : i32
    %1297 = tpu.memref_slice %arg6[%c0_i32_808, %c0_i32_811] : memref<128x128xf32, #tpu.memory_space<any>> -> memref<1x128xf32, #tpu.memory_space<any>>
    %1298 = tpu.memref_squeeze %1297 : memref<1x128xf32, #tpu.memory_space<any>> -> memref<128xf32, #tpu.memory_space<any>>
    %c0_i32_812 = arith.constant 0 : i32
    %1299 = tpu.memref_slice %arg12[%c8_i32_809, %c0_i32_812] : memref<32x128xf32, #tpu.memory_space<vmem>> -> memref<1x128xf32, #tpu.memory_space<vmem>>
    %1300 = tpu.memref_squeeze %1299 : memref<1x128xf32, #tpu.memory_space<vmem>> -> memref<128xf32, #tpu.memory_space<vmem>>
    %1301 = tpu.memref_slice %arg13[%c2_i32_810] : memref<3x!tpu.dma_semaphore, #tpu.memory_space<semaphore_mem>> -> memref<1x!tpu.dma_semaphore, #tpu.memory_space<semaphore_mem>>
    %1302 = tpu.memref_squeeze %1301 : memref<1x!tpu.dma_semaphore, #tpu.memory_space<semaphore_mem>> -> memref<!tpu.dma_semaphore, #tpu.memory_space<semaphore_mem>>
    tpu.wait_dma2 semaphore(%1302 : memref<!tpu.dma_semaphore, #tpu.memory_space<semaphore_mem>>) src(%1298 : memref<128xf32, #tpu.memory_space<any>>) dst(%1300 : memref<128xf32, #tpu.memory_space<vmem>>)
    %c0_i32_813 = arith.constant 0 : i32
    %c9_i32_814 = arith.constant 9 : i32
    %c2_i32_815 = arith.constant 2 : i32
    %c0_i32_816 = arith.constant 0 : i32
    %1303 = tpu.memref_slice %arg6[%c0_i32_813, %c0_i32_816] : memref<128x128xf32, #tpu.memory_space<any>> -> memref<1x128xf32, #tpu.memory_space<any>>
    %1304 = tpu.memref_squeeze %1303 : memref<1x128xf32, #tpu.memory_space<any>> -> memref<128xf32, #tpu.memory_space<any>>
    %c0_i32_817 = arith.constant 0 : i32
    %1305 = tpu.memref_slice %arg12[%c9_i32_814, %c0_i32_817] : memref<32x128xf32, #tpu.memory_space<vmem>> -> memref<1x128xf32, #tpu.memory_space<vmem>>
    %1306 = tpu.memref_squeeze %1305 : memref<1x128xf32, #tpu.memory_space<vmem>> -> memref<128xf32, #tpu.memory_space<vmem>>
    %1307 = tpu.memref_slice %arg13[%c2_i32_815] : memref<3x!tpu.dma_semaphore, #tpu.memory_space<semaphore_mem>> -> memref<1x!tpu.dma_semaphore, #tpu.memory_space<semaphore_mem>>
    %1308 = tpu.memref_squeeze %1307 : memref<1x!tpu.dma_semaphore, #tpu.memory_space<semaphore_mem>> -> memref<!tpu.dma_semaphore, #tpu.memory_space<semaphore_mem>>
    tpu.wait_dma2 semaphore(%1308 : memref<!tpu.dma_semaphore, #tpu.memory_space<semaphore_mem>>) src(%1304 : memref<128xf32, #tpu.memory_space<any>>) dst(%1306 : memref<128xf32, #tpu.memory_space<vmem>>)
    %c0_i32_818 = arith.constant 0 : i32
    %c10_i32_819 = arith.constant 10 : i32
    %c2_i32_820 = arith.constant 2 : i32
    %c0_i32_821 = arith.constant 0 : i32
    %1309 = tpu.memref_slice %arg6[%c0_i32_818, %c0_i32_821] : memref<128x128xf32, #tpu.memory_space<any>> -> memref<1x128xf32, #tpu.memory_space<any>>
    %1310 = tpu.memref_squeeze %1309 : memref<1x128xf32, #tpu.memory_space<any>> -> memref<128xf32, #tpu.memory_space<any>>
    %c0_i32_822 = arith.constant 0 : i32
    %1311 = tpu.memref_slice %arg12[%c10_i32_819, %c0_i32_822] : memref<32x128xf32, #tpu.memory_space<vmem>> -> memref<1x128xf32, #tpu.memory_space<vmem>>
    %1312 = tpu.memref_squeeze %1311 : memref<1x128xf32, #tpu.memory_space<vmem>> -> memref<128xf32, #tpu.memory_space<vmem>>
    %1313 = tpu.memref_slice %arg13[%c2_i32_820] : memref<3x!tpu.dma_semaphore, #tpu.memory_space<semaphore_mem>> -> memref<1x!tpu.dma_semaphore, #tpu.memory_space<semaphore_mem>>
    %1314 = tpu.memref_squeeze %1313 : memref<1x!tpu.dma_semaphore, #tpu.memory_space<semaphore_mem>> -> memref<!tpu.dma_semaphore, #tpu.memory_space<semaphore_mem>>
    tpu.wait_dma2 semaphore(%1314 : memref<!tpu.dma_semaphore, #tpu.memory_space<semaphore_mem>>) src(%1310 : memref<128xf32, #tpu.memory_space<any>>) dst(%1312 : memref<128xf32, #tpu.memory_space<vmem>>)
    %c0_i32_823 = arith.constant 0 : i32
    %c11_i32_824 = arith.constant 11 : i32
    %c2_i32_825 = arith.constant 2 : i32
    %c0_i32_826 = arith.constant 0 : i32
    %1315 = tpu.memref_slice %arg6[%c0_i32_823, %c0_i32_826] : memref<128x128xf32, #tpu.memory_space<any>> -> memref<1x128xf32, #tpu.memory_space<any>>
    %1316 = tpu.memref_squeeze %1315 : memref<1x128xf32, #tpu.memory_space<any>> -> memref<128xf32, #tpu.memory_space<any>>
    %c0_i32_827 = arith.constant 0 : i32
    %1317 = tpu.memref_slice %arg12[%c11_i32_824, %c0_i32_827] : memref<32x128xf32, #tpu.memory_space<vmem>> -> memref<1x128xf32, #tpu.memory_space<vmem>>
    %1318 = tpu.memref_squeeze %1317 : memref<1x128xf32, #tpu.memory_space<vmem>> -> memref<128xf32, #tpu.memory_space<vmem>>
    %1319 = tpu.memref_slice %arg13[%c2_i32_825] : memref<3x!tpu.dma_semaphore, #tpu.memory_space<semaphore_mem>> -> memref<1x!tpu.dma_semaphore, #tpu.memory_space<semaphore_mem>>
    %1320 = tpu.memref_squeeze %1319 : memref<1x!tpu.dma_semaphore, #tpu.memory_space<semaphore_mem>> -> memref<!tpu.dma_semaphore, #tpu.memory_space<semaphore_mem>>
    tpu.wait_dma2 semaphore(%1320 : memref<!tpu.dma_semaphore, #tpu.memory_space<semaphore_mem>>) src(%1316 : memref<128xf32, #tpu.memory_space<any>>) dst(%1318 : memref<128xf32, #tpu.memory_space<vmem>>)
    %c0_i32_828 = arith.constant 0 : i32
    %c12_i32_829 = arith.constant 12 : i32
    %c2_i32_830 = arith.constant 2 : i32
    %c0_i32_831 = arith.constant 0 : i32
    %1321 = tpu.memref_slice %arg6[%c0_i32_828, %c0_i32_831] : memref<128x128xf32, #tpu.memory_space<any>> -> memref<1x128xf32, #tpu.memory_space<any>>
    %1322 = tpu.memref_squeeze %1321 : memref<1x128xf32, #tpu.memory_space<any>> -> memref<128xf32, #tpu.memory_space<any>>
    %c0_i32_832 = arith.constant 0 : i32
    %1323 = tpu.memref_slice %arg12[%c12_i32_829, %c0_i32_832] : memref<32x128xf32, #tpu.memory_space<vmem>> -> memref<1x128xf32, #tpu.memory_space<vmem>>
    %1324 = tpu.memref_squeeze %1323 : memref<1x128xf32, #tpu.memory_space<vmem>> -> memref<128xf32, #tpu.memory_space<vmem>>
    %1325 = tpu.memref_slice %arg13[%c2_i32_830] : memref<3x!tpu.dma_semaphore, #tpu.memory_space<semaphore_mem>> -> memref<1x!tpu.dma_semaphore, #tpu.memory_space<semaphore_mem>>
    %1326 = tpu.memref_squeeze %1325 : memref<1x!tpu.dma_semaphore, #tpu.memory_space<semaphore_mem>> -> memref<!tpu.dma_semaphore, #tpu.memory_space<semaphore_mem>>
    tpu.wait_dma2 semaphore(%1326 : memref<!tpu.dma_semaphore, #tpu.memory_space<semaphore_mem>>) src(%1322 : memref<128xf32, #tpu.memory_space<any>>) dst(%1324 : memref<128xf32, #tpu.memory_space<vmem>>)
    %c0_i32_833 = arith.constant 0 : i32
    %c13_i32_834 = arith.constant 13 : i32
    %c2_i32_835 = arith.constant 2 : i32
    %c0_i32_836 = arith.constant 0 : i32
    %1327 = tpu.memref_slice %arg6[%c0_i32_833, %c0_i32_836] : memref<128x128xf32, #tpu.memory_space<any>> -> memref<1x128xf32, #tpu.memory_space<any>>
    %1328 = tpu.memref_squeeze %1327 : memref<1x128xf32, #tpu.memory_space<any>> -> memref<128xf32, #tpu.memory_space<any>>
    %c0_i32_837 = arith.constant 0 : i32
    %1329 = tpu.memref_slice %arg12[%c13_i32_834, %c0_i32_837] : memref<32x128xf32, #tpu.memory_space<vmem>> -> memref<1x128xf32, #tpu.memory_space<vmem>>
    %1330 = tpu.memref_squeeze %1329 : memref<1x128xf32, #tpu.memory_space<vmem>> -> memref<128xf32, #tpu.memory_space<vmem>>
    %1331 = tpu.memref_slice %arg13[%c2_i32_835] : memref<3x!tpu.dma_semaphore, #tpu.memory_space<semaphore_mem>> -> memref<1x!tpu.dma_semaphore, #tpu.memory_space<semaphore_mem>>
    %1332 = tpu.memref_squeeze %1331 : memref<1x!tpu.dma_semaphore, #tpu.memory_space<semaphore_mem>> -> memref<!tpu.dma_semaphore, #tpu.memory_space<semaphore_mem>>
    tpu.wait_dma2 semaphore(%1332 : memref<!tpu.dma_semaphore, #tpu.memory_space<semaphore_mem>>) src(%1328 : memref<128xf32, #tpu.memory_space<any>>) dst(%1330 : memref<128xf32, #tpu.memory_space<vmem>>)
    %c0_i32_838 = arith.constant 0 : i32
    %c14_i32_839 = arith.constant 14 : i32
    %c2_i32_840 = arith.constant 2 : i32
    %c0_i32_841 = arith.constant 0 : i32
    %1333 = tpu.memref_slice %arg6[%c0_i32_838, %c0_i32_841] : memref<128x128xf32, #tpu.memory_space<any>> -> memref<1x128xf32, #tpu.memory_space<any>>
    %1334 = tpu.memref_squeeze %1333 : memref<1x128xf32, #tpu.memory_space<any>> -> memref<128xf32, #tpu.memory_space<any>>
    %c0_i32_842 = arith.constant 0 : i32
    %1335 = tpu.memref_slice %arg12[%c14_i32_839, %c0_i32_842] : memref<32x128xf32, #tpu.memory_space<vmem>> -> memref<1x128xf32, #tpu.memory_space<vmem>>
    %1336 = tpu.memref_squeeze %1335 : memref<1x128xf32, #tpu.memory_space<vmem>> -> memref<128xf32, #tpu.memory_space<vmem>>
    %1337 = tpu.memref_slice %arg13[%c2_i32_840] : memref<3x!tpu.dma_semaphore, #tpu.memory_space<semaphore_mem>> -> memref<1x!tpu.dma_semaphore, #tpu.memory_space<semaphore_mem>>
    %1338 = tpu.memref_squeeze %1337 : memref<1x!tpu.dma_semaphore, #tpu.memory_space<semaphore_mem>> -> memref<!tpu.dma_semaphore, #tpu.memory_space<semaphore_mem>>
    tpu.wait_dma2 semaphore(%1338 : memref<!tpu.dma_semaphore, #tpu.memory_space<semaphore_mem>>) src(%1334 : memref<128xf32, #tpu.memory_space<any>>) dst(%1336 : memref<128xf32, #tpu.memory_space<vmem>>)
    %c0_i32_843 = arith.constant 0 : i32
    %c15_i32_844 = arith.constant 15 : i32
    %c2_i32_845 = arith.constant 2 : i32
    %c0_i32_846 = arith.constant 0 : i32
    %1339 = tpu.memref_slice %arg6[%c0_i32_843, %c0_i32_846] : memref<128x128xf32, #tpu.memory_space<any>> -> memref<1x128xf32, #tpu.memory_space<any>>
    %1340 = tpu.memref_squeeze %1339 : memref<1x128xf32, #tpu.memory_space<any>> -> memref<128xf32, #tpu.memory_space<any>>
    %c0_i32_847 = arith.constant 0 : i32
    %1341 = tpu.memref_slice %arg12[%c15_i32_844, %c0_i32_847] : memref<32x128xf32, #tpu.memory_space<vmem>> -> memref<1x128xf32, #tpu.memory_space<vmem>>
    %1342 = tpu.memref_squeeze %1341 : memref<1x128xf32, #tpu.memory_space<vmem>> -> memref<128xf32, #tpu.memory_space<vmem>>
    %1343 = tpu.memref_slice %arg13[%c2_i32_845] : memref<3x!tpu.dma_semaphore, #tpu.memory_space<semaphore_mem>> -> memref<1x!tpu.dma_semaphore, #tpu.memory_space<semaphore_mem>>
    %1344 = tpu.memref_squeeze %1343 : memref<1x!tpu.dma_semaphore, #tpu.memory_space<semaphore_mem>> -> memref<!tpu.dma_semaphore, #tpu.memory_space<semaphore_mem>>
    tpu.wait_dma2 semaphore(%1344 : memref<!tpu.dma_semaphore, #tpu.memory_space<semaphore_mem>>) src(%1340 : memref<128xf32, #tpu.memory_space<any>>) dst(%1342 : memref<128xf32, #tpu.memory_space<vmem>>)
    %c0_i32_848 = arith.constant 0 : i32
    %c16_i32_849 = arith.constant 16 : i32
    %c2_i32_850 = arith.constant 2 : i32
    %c0_i32_851 = arith.constant 0 : i32
    %1345 = tpu.memref_slice %arg6[%c0_i32_848, %c0_i32_851] : memref<128x128xf32, #tpu.memory_space<any>> -> memref<1x128xf32, #tpu.memory_space<any>>
    %1346 = tpu.memref_squeeze %1345 : memref<1x128xf32, #tpu.memory_space<any>> -> memref<128xf32, #tpu.memory_space<any>>
    %c0_i32_852 = arith.constant 0 : i32
    %1347 = tpu.memref_slice %arg12[%c16_i32_849, %c0_i32_852] : memref<32x128xf32, #tpu.memory_space<vmem>> -> memref<1x128xf32, #tpu.memory_space<vmem>>
    %1348 = tpu.memref_squeeze %1347 : memref<1x128xf32, #tpu.memory_space<vmem>> -> memref<128xf32, #tpu.memory_space<vmem>>
    %1349 = tpu.memref_slice %arg13[%c2_i32_850] : memref<3x!tpu.dma_semaphore, #tpu.memory_space<semaphore_mem>> -> memref<1x!tpu.dma_semaphore, #tpu.memory_space<semaphore_mem>>
    %1350 = tpu.memref_squeeze %1349 : memref<1x!tpu.dma_semaphore, #tpu.memory_space<semaphore_mem>> -> memref<!tpu.dma_semaphore, #tpu.memory_space<semaphore_mem>>
    tpu.wait_dma2 semaphore(%1350 : memref<!tpu.dma_semaphore, #tpu.memory_space<semaphore_mem>>) src(%1346 : memref<128xf32, #tpu.memory_space<any>>) dst(%1348 : memref<128xf32, #tpu.memory_space<vmem>>)
    %c0_i32_853 = arith.constant 0 : i32
    %c17_i32_854 = arith.constant 17 : i32
    %c2_i32_855 = arith.constant 2 : i32
    %c0_i32_856 = arith.constant 0 : i32
    %1351 = tpu.memref_slice %arg6[%c0_i32_853, %c0_i32_856] : memref<128x128xf32, #tpu.memory_space<any>> -> memref<1x128xf32, #tpu.memory_space<any>>
    %1352 = tpu.memref_squeeze %1351 : memref<1x128xf32, #tpu.memory_space<any>> -> memref<128xf32, #tpu.memory_space<any>>
    %c0_i32_857 = arith.constant 0 : i32
    %1353 = tpu.memref_slice %arg12[%c17_i32_854, %c0_i32_857] : memref<32x128xf32, #tpu.memory_space<vmem>> -> memref<1x128xf32, #tpu.memory_space<vmem>>
    %1354 = tpu.memref_squeeze %1353 : memref<1x128xf32, #tpu.memory_space<vmem>> -> memref<128xf32, #tpu.memory_space<vmem>>
    %1355 = tpu.memref_slice %arg13[%c2_i32_855] : memref<3x!tpu.dma_semaphore, #tpu.memory_space<semaphore_mem>> -> memref<1x!tpu.dma_semaphore, #tpu.memory_space<semaphore_mem>>
    %1356 = tpu.memref_squeeze %1355 : memref<1x!tpu.dma_semaphore, #tpu.memory_space<semaphore_mem>> -> memref<!tpu.dma_semaphore, #tpu.memory_space<semaphore_mem>>
    tpu.wait_dma2 semaphore(%1356 : memref<!tpu.dma_semaphore, #tpu.memory_space<semaphore_mem>>) src(%1352 : memref<128xf32, #tpu.memory_space<any>>) dst(%1354 : memref<128xf32, #tpu.memory_space<vmem>>)
    %c0_i32_858 = arith.constant 0 : i32
    %c18_i32_859 = arith.constant 18 : i32
    %c2_i32_860 = arith.constant 2 : i32
    %c0_i32_861 = arith.constant 0 : i32
    %1357 = tpu.memref_slice %arg6[%c0_i32_858, %c0_i32_861] : memref<128x128xf32, #tpu.memory_space<any>> -> memref<1x128xf32, #tpu.memory_space<any>>
    %1358 = tpu.memref_squeeze %1357 : memref<1x128xf32, #tpu.memory_space<any>> -> memref<128xf32, #tpu.memory_space<any>>
    %c0_i32_862 = arith.constant 0 : i32
    %1359 = tpu.memref_slice %arg12[%c18_i32_859, %c0_i32_862] : memref<32x128xf32, #tpu.memory_space<vmem>> -> memref<1x128xf32, #tpu.memory_space<vmem>>
    %1360 = tpu.memref_squeeze %1359 : memref<1x128xf32, #tpu.memory_space<vmem>> -> memref<128xf32, #tpu.memory_space<vmem>>
    %1361 = tpu.memref_slice %arg13[%c2_i32_860] : memref<3x!tpu.dma_semaphore, #tpu.memory_space<semaphore_mem>> -> memref<1x!tpu.dma_semaphore, #tpu.memory_space<semaphore_mem>>
    %1362 = tpu.memref_squeeze %1361 : memref<1x!tpu.dma_semaphore, #tpu.memory_space<semaphore_mem>> -> memref<!tpu.dma_semaphore, #tpu.memory_space<semaphore_mem>>
    tpu.wait_dma2 semaphore(%1362 : memref<!tpu.dma_semaphore, #tpu.memory_space<semaphore_mem>>) src(%1358 : memref<128xf32, #tpu.memory_space<any>>) dst(%1360 : memref<128xf32, #tpu.memory_space<vmem>>)
    %c0_i32_863 = arith.constant 0 : i32
    %c19_i32_864 = arith.constant 19 : i32
    %c2_i32_865 = arith.constant 2 : i32
    %c0_i32_866 = arith.constant 0 : i32
    %1363 = tpu.memref_slice %arg6[%c0_i32_863, %c0_i32_866] : memref<128x128xf32, #tpu.memory_space<any>> -> memref<1x128xf32, #tpu.memory_space<any>>
    %1364 = tpu.memref_squeeze %1363 : memref<1x128xf32, #tpu.memory_space<any>> -> memref<128xf32, #tpu.memory_space<any>>
    %c0_i32_867 = arith.constant 0 : i32
    %1365 = tpu.memref_slice %arg12[%c19_i32_864, %c0_i32_867] : memref<32x128xf32, #tpu.memory_space<vmem>> -> memref<1x128xf32, #tpu.memory_space<vmem>>
    %1366 = tpu.memref_squeeze %1365 : memref<1x128xf32, #tpu.memory_space<vmem>> -> memref<128xf32, #tpu.memory_space<vmem>>
    %1367 = tpu.memref_slice %arg13[%c2_i32_865] : memref<3x!tpu.dma_semaphore, #tpu.memory_space<semaphore_mem>> -> memref<1x!tpu.dma_semaphore, #tpu.memory_space<semaphore_mem>>
    %1368 = tpu.memref_squeeze %1367 : memref<1x!tpu.dma_semaphore, #tpu.memory_space<semaphore_mem>> -> memref<!tpu.dma_semaphore, #tpu.memory_space<semaphore_mem>>
    tpu.wait_dma2 semaphore(%1368 : memref<!tpu.dma_semaphore, #tpu.memory_space<semaphore_mem>>) src(%1364 : memref<128xf32, #tpu.memory_space<any>>) dst(%1366 : memref<128xf32, #tpu.memory_space<vmem>>)
    %c0_i32_868 = arith.constant 0 : i32
    %c20_i32_869 = arith.constant 20 : i32
    %c2_i32_870 = arith.constant 2 : i32
    %c0_i32_871 = arith.constant 0 : i32
    %1369 = tpu.memref_slice %arg6[%c0_i32_868, %c0_i32_871] : memref<128x128xf32, #tpu.memory_space<any>> -> memref<1x128xf32, #tpu.memory_space<any>>
    %1370 = tpu.memref_squeeze %1369 : memref<1x128xf32, #tpu.memory_space<any>> -> memref<128xf32, #tpu.memory_space<any>>
    %c0_i32_872 = arith.constant 0 : i32
    %1371 = tpu.memref_slice %arg12[%c20_i32_869, %c0_i32_872] : memref<32x128xf32, #tpu.memory_space<vmem>> -> memref<1x128xf32, #tpu.memory_space<vmem>>
    %1372 = tpu.memref_squeeze %1371 : memref<1x128xf32, #tpu.memory_space<vmem>> -> memref<128xf32, #tpu.memory_space<vmem>>
    %1373 = tpu.memref_slice %arg13[%c2_i32_870] : memref<3x!tpu.dma_semaphore, #tpu.memory_space<semaphore_mem>> -> memref<1x!tpu.dma_semaphore, #tpu.memory_space<semaphore_mem>>
    %1374 = tpu.memref_squeeze %1373 : memref<1x!tpu.dma_semaphore, #tpu.memory_space<semaphore_mem>> -> memref<!tpu.dma_semaphore, #tpu.memory_space<semaphore_mem>>
    tpu.wait_dma2 semaphore(%1374 : memref<!tpu.dma_semaphore, #tpu.memory_space<semaphore_mem>>) src(%1370 : memref<128xf32, #tpu.memory_space<any>>) dst(%1372 : memref<128xf32, #tpu.memory_space<vmem>>)
    %c0_i32_873 = arith.constant 0 : i32
    %c21_i32_874 = arith.constant 21 : i32
    %c2_i32_875 = arith.constant 2 : i32
    %c0_i32_876 = arith.constant 0 : i32
    %1375 = tpu.memref_slice %arg6[%c0_i32_873, %c0_i32_876] : memref<128x128xf32, #tpu.memory_space<any>> -> memref<1x128xf32, #tpu.memory_space<any>>
    %1376 = tpu.memref_squeeze %1375 : memref<1x128xf32, #tpu.memory_space<any>> -> memref<128xf32, #tpu.memory_space<any>>
    %c0_i32_877 = arith.constant 0 : i32
    %1377 = tpu.memref_slice %arg12[%c21_i32_874, %c0_i32_877] : memref<32x128xf32, #tpu.memory_space<vmem>> -> memref<1x128xf32, #tpu.memory_space<vmem>>
    %1378 = tpu.memref_squeeze %1377 : memref<1x128xf32, #tpu.memory_space<vmem>> -> memref<128xf32, #tpu.memory_space<vmem>>
    %1379 = tpu.memref_slice %arg13[%c2_i32_875] : memref<3x!tpu.dma_semaphore, #tpu.memory_space<semaphore_mem>> -> memref<1x!tpu.dma_semaphore, #tpu.memory_space<semaphore_mem>>
    %1380 = tpu.memref_squeeze %1379 : memref<1x!tpu.dma_semaphore, #tpu.memory_space<semaphore_mem>> -> memref<!tpu.dma_semaphore, #tpu.memory_space<semaphore_mem>>
    tpu.wait_dma2 semaphore(%1380 : memref<!tpu.dma_semaphore, #tpu.memory_space<semaphore_mem>>) src(%1376 : memref<128xf32, #tpu.memory_space<any>>) dst(%1378 : memref<128xf32, #tpu.memory_space<vmem>>)
    %c0_i32_878 = arith.constant 0 : i32
    %c22_i32_879 = arith.constant 22 : i32
    %c2_i32_880 = arith.constant 2 : i32
    %c0_i32_881 = arith.constant 0 : i32
    %1381 = tpu.memref_slice %arg6[%c0_i32_878, %c0_i32_881] : memref<128x128xf32, #tpu.memory_space<any>> -> memref<1x128xf32, #tpu.memory_space<any>>
    %1382 = tpu.memref_squeeze %1381 : memref<1x128xf32, #tpu.memory_space<any>> -> memref<128xf32, #tpu.memory_space<any>>
    %c0_i32_882 = arith.constant 0 : i32
    %1383 = tpu.memref_slice %arg12[%c22_i32_879, %c0_i32_882] : memref<32x128xf32, #tpu.memory_space<vmem>> -> memref<1x128xf32, #tpu.memory_space<vmem>>
    %1384 = tpu.memref_squeeze %1383 : memref<1x128xf32, #tpu.memory_space<vmem>> -> memref<128xf32, #tpu.memory_space<vmem>>
    %1385 = tpu.memref_slice %arg13[%c2_i32_880] : memref<3x!tpu.dma_semaphore, #tpu.memory_space<semaphore_mem>> -> memref<1x!tpu.dma_semaphore, #tpu.memory_space<semaphore_mem>>
    %1386 = tpu.memref_squeeze %1385 : memref<1x!tpu.dma_semaphore, #tpu.memory_space<semaphore_mem>> -> memref<!tpu.dma_semaphore, #tpu.memory_space<semaphore_mem>>
    tpu.wait_dma2 semaphore(%1386 : memref<!tpu.dma_semaphore, #tpu.memory_space<semaphore_mem>>) src(%1382 : memref<128xf32, #tpu.memory_space<any>>) dst(%1384 : memref<128xf32, #tpu.memory_space<vmem>>)
    %c0_i32_883 = arith.constant 0 : i32
    %c23_i32_884 = arith.constant 23 : i32
    %c2_i32_885 = arith.constant 2 : i32
    %c0_i32_886 = arith.constant 0 : i32
    %1387 = tpu.memref_slice %arg6[%c0_i32_883, %c0_i32_886] : memref<128x128xf32, #tpu.memory_space<any>> -> memref<1x128xf32, #tpu.memory_space<any>>
    %1388 = tpu.memref_squeeze %1387 : memref<1x128xf32, #tpu.memory_space<any>> -> memref<128xf32, #tpu.memory_space<any>>
    %c0_i32_887 = arith.constant 0 : i32
    %1389 = tpu.memref_slice %arg12[%c23_i32_884, %c0_i32_887] : memref<32x128xf32, #tpu.memory_space<vmem>> -> memref<1x128xf32, #tpu.memory_space<vmem>>
    %1390 = tpu.memref_squeeze %1389 : memref<1x128xf32, #tpu.memory_space<vmem>> -> memref<128xf32, #tpu.memory_space<vmem>>
    %1391 = tpu.memref_slice %arg13[%c2_i32_885] : memref<3x!tpu.dma_semaphore, #tpu.memory_space<semaphore_mem>> -> memref<1x!tpu.dma_semaphore, #tpu.memory_space<semaphore_mem>>
    %1392 = tpu.memref_squeeze %1391 : memref<1x!tpu.dma_semaphore, #tpu.memory_space<semaphore_mem>> -> memref<!tpu.dma_semaphore, #tpu.memory_space<semaphore_mem>>
    tpu.wait_dma2 semaphore(%1392 : memref<!tpu.dma_semaphore, #tpu.memory_space<semaphore_mem>>) src(%1388 : memref<128xf32, #tpu.memory_space<any>>) dst(%1390 : memref<128xf32, #tpu.memory_space<vmem>>)
    %c0_i32_888 = arith.constant 0 : i32
    %c24_i32_889 = arith.constant 24 : i32
    %c2_i32_890 = arith.constant 2 : i32
    %c0_i32_891 = arith.constant 0 : i32
    %1393 = tpu.memref_slice %arg6[%c0_i32_888, %c0_i32_891] : memref<128x128xf32, #tpu.memory_space<any>> -> memref<1x128xf32, #tpu.memory_space<any>>
    %1394 = tpu.memref_squeeze %1393 : memref<1x128xf32, #tpu.memory_space<any>> -> memref<128xf32, #tpu.memory_space<any>>
    %c0_i32_892 = arith.constant 0 : i32
    %1395 = tpu.memref_slice %arg12[%c24_i32_889, %c0_i32_892] : memref<32x128xf32, #tpu.memory_space<vmem>> -> memref<1x128xf32, #tpu.memory_space<vmem>>
    %1396 = tpu.memref_squeeze %1395 : memref<1x128xf32, #tpu.memory_space<vmem>> -> memref<128xf32, #tpu.memory_space<vmem>>
    %1397 = tpu.memref_slice %arg13[%c2_i32_890] : memref<3x!tpu.dma_semaphore, #tpu.memory_space<semaphore_mem>> -> memref<1x!tpu.dma_semaphore, #tpu.memory_space<semaphore_mem>>
    %1398 = tpu.memref_squeeze %1397 : memref<1x!tpu.dma_semaphore, #tpu.memory_space<semaphore_mem>> -> memref<!tpu.dma_semaphore, #tpu.memory_space<semaphore_mem>>
    tpu.wait_dma2 semaphore(%1398 : memref<!tpu.dma_semaphore, #tpu.memory_space<semaphore_mem>>) src(%1394 : memref<128xf32, #tpu.memory_space<any>>) dst(%1396 : memref<128xf32, #tpu.memory_space<vmem>>)
    %c0_i32_893 = arith.constant 0 : i32
    %c25_i32_894 = arith.constant 25 : i32
    %c2_i32_895 = arith.constant 2 : i32
    %c0_i32_896 = arith.constant 0 : i32
    %1399 = tpu.memref_slice %arg6[%c0_i32_893, %c0_i32_896] : memref<128x128xf32, #tpu.memory_space<any>> -> memref<1x128xf32, #tpu.memory_space<any>>
    %1400 = tpu.memref_squeeze %1399 : memref<1x128xf32, #tpu.memory_space<any>> -> memref<128xf32, #tpu.memory_space<any>>
    %c0_i32_897 = arith.constant 0 : i32
    %1401 = tpu.memref_slice %arg12[%c25_i32_894, %c0_i32_897] : memref<32x128xf32, #tpu.memory_space<vmem>> -> memref<1x128xf32, #tpu.memory_space<vmem>>
    %1402 = tpu.memref_squeeze %1401 : memref<1x128xf32, #tpu.memory_space<vmem>> -> memref<128xf32, #tpu.memory_space<vmem>>
    %1403 = tpu.memref_slice %arg13[%c2_i32_895] : memref<3x!tpu.dma_semaphore, #tpu.memory_space<semaphore_mem>> -> memref<1x!tpu.dma_semaphore, #tpu.memory_space<semaphore_mem>>
    %1404 = tpu.memref_squeeze %1403 : memref<1x!tpu.dma_semaphore, #tpu.memory_space<semaphore_mem>> -> memref<!tpu.dma_semaphore, #tpu.memory_space<semaphore_mem>>
    tpu.wait_dma2 semaphore(%1404 : memref<!tpu.dma_semaphore, #tpu.memory_space<semaphore_mem>>) src(%1400 : memref<128xf32, #tpu.memory_space<any>>) dst(%1402 : memref<128xf32, #tpu.memory_space<vmem>>)
    %c0_i32_898 = arith.constant 0 : i32
    %c26_i32_899 = arith.constant 26 : i32
    %c2_i32_900 = arith.constant 2 : i32
    %c0_i32_901 = arith.constant 0 : i32
    %1405 = tpu.memref_slice %arg6[%c0_i32_898, %c0_i32_901] : memref<128x128xf32, #tpu.memory_space<any>> -> memref<1x128xf32, #tpu.memory_space<any>>
    %1406 = tpu.memref_squeeze %1405 : memref<1x128xf32, #tpu.memory_space<any>> -> memref<128xf32, #tpu.memory_space<any>>
    %c0_i32_902 = arith.constant 0 : i32
    %1407 = tpu.memref_slice %arg12[%c26_i32_899, %c0_i32_902] : memref<32x128xf32, #tpu.memory_space<vmem>> -> memref<1x128xf32, #tpu.memory_space<vmem>>
    %1408 = tpu.memref_squeeze %1407 : memref<1x128xf32, #tpu.memory_space<vmem>> -> memref<128xf32, #tpu.memory_space<vmem>>
    %1409 = tpu.memref_slice %arg13[%c2_i32_900] : memref<3x!tpu.dma_semaphore, #tpu.memory_space<semaphore_mem>> -> memref<1x!tpu.dma_semaphore, #tpu.memory_space<semaphore_mem>>
    %1410 = tpu.memref_squeeze %1409 : memref<1x!tpu.dma_semaphore, #tpu.memory_space<semaphore_mem>> -> memref<!tpu.dma_semaphore, #tpu.memory_space<semaphore_mem>>
    tpu.wait_dma2 semaphore(%1410 : memref<!tpu.dma_semaphore, #tpu.memory_space<semaphore_mem>>) src(%1406 : memref<128xf32, #tpu.memory_space<any>>) dst(%1408 : memref<128xf32, #tpu.memory_space<vmem>>)
    %c0_i32_903 = arith.constant 0 : i32
    %c27_i32_904 = arith.constant 27 : i32
    %c2_i32_905 = arith.constant 2 : i32
    %c0_i32_906 = arith.constant 0 : i32
    %1411 = tpu.memref_slice %arg6[%c0_i32_903, %c0_i32_906] : memref<128x128xf32, #tpu.memory_space<any>> -> memref<1x128xf32, #tpu.memory_space<any>>
    %1412 = tpu.memref_squeeze %1411 : memref<1x128xf32, #tpu.memory_space<any>> -> memref<128xf32, #tpu.memory_space<any>>
    %c0_i32_907 = arith.constant 0 : i32
    %1413 = tpu.memref_slice %arg12[%c27_i32_904, %c0_i32_907] : memref<32x128xf32, #tpu.memory_space<vmem>> -> memref<1x128xf32, #tpu.memory_space<vmem>>
    %1414 = tpu.memref_squeeze %1413 : memref<1x128xf32, #tpu.memory_space<vmem>> -> memref<128xf32, #tpu.memory_space<vmem>>
    %1415 = tpu.memref_slice %arg13[%c2_i32_905] : memref<3x!tpu.dma_semaphore, #tpu.memory_space<semaphore_mem>> -> memref<1x!tpu.dma_semaphore, #tpu.memory_space<semaphore_mem>>
    %1416 = tpu.memref_squeeze %1415 : memref<1x!tpu.dma_semaphore, #tpu.memory_space<semaphore_mem>> -> memref<!tpu.dma_semaphore, #tpu.memory_space<semaphore_mem>>
    tpu.wait_dma2 semaphore(%1416 : memref<!tpu.dma_semaphore, #tpu.memory_space<semaphore_mem>>) src(%1412 : memref<128xf32, #tpu.memory_space<any>>) dst(%1414 : memref<128xf32, #tpu.memory_space<vmem>>)
    %c0_i32_908 = arith.constant 0 : i32
    %c28_i32_909 = arith.constant 28 : i32
    %c2_i32_910 = arith.constant 2 : i32
    %c0_i32_911 = arith.constant 0 : i32
    %1417 = tpu.memref_slice %arg6[%c0_i32_908, %c0_i32_911] : memref<128x128xf32, #tpu.memory_space<any>> -> memref<1x128xf32, #tpu.memory_space<any>>
    %1418 = tpu.memref_squeeze %1417 : memref<1x128xf32, #tpu.memory_space<any>> -> memref<128xf32, #tpu.memory_space<any>>
    %c0_i32_912 = arith.constant 0 : i32
    %1419 = tpu.memref_slice %arg12[%c28_i32_909, %c0_i32_912] : memref<32x128xf32, #tpu.memory_space<vmem>> -> memref<1x128xf32, #tpu.memory_space<vmem>>
    %1420 = tpu.memref_squeeze %1419 : memref<1x128xf32, #tpu.memory_space<vmem>> -> memref<128xf32, #tpu.memory_space<vmem>>
    %1421 = tpu.memref_slice %arg13[%c2_i32_910] : memref<3x!tpu.dma_semaphore, #tpu.memory_space<semaphore_mem>> -> memref<1x!tpu.dma_semaphore, #tpu.memory_space<semaphore_mem>>
    %1422 = tpu.memref_squeeze %1421 : memref<1x!tpu.dma_semaphore, #tpu.memory_space<semaphore_mem>> -> memref<!tpu.dma_semaphore, #tpu.memory_space<semaphore_mem>>
    tpu.wait_dma2 semaphore(%1422 : memref<!tpu.dma_semaphore, #tpu.memory_space<semaphore_mem>>) src(%1418 : memref<128xf32, #tpu.memory_space<any>>) dst(%1420 : memref<128xf32, #tpu.memory_space<vmem>>)
    %c0_i32_913 = arith.constant 0 : i32
    %c29_i32_914 = arith.constant 29 : i32
    %c2_i32_915 = arith.constant 2 : i32
    %c0_i32_916 = arith.constant 0 : i32
    %1423 = tpu.memref_slice %arg6[%c0_i32_913, %c0_i32_916] : memref<128x128xf32, #tpu.memory_space<any>> -> memref<1x128xf32, #tpu.memory_space<any>>
    %1424 = tpu.memref_squeeze %1423 : memref<1x128xf32, #tpu.memory_space<any>> -> memref<128xf32, #tpu.memory_space<any>>
    %c0_i32_917 = arith.constant 0 : i32
    %1425 = tpu.memref_slice %arg12[%c29_i32_914, %c0_i32_917] : memref<32x128xf32, #tpu.memory_space<vmem>> -> memref<1x128xf32, #tpu.memory_space<vmem>>
    %1426 = tpu.memref_squeeze %1425 : memref<1x128xf32, #tpu.memory_space<vmem>> -> memref<128xf32, #tpu.memory_space<vmem>>
    %1427 = tpu.memref_slice %arg13[%c2_i32_915] : memref<3x!tpu.dma_semaphore, #tpu.memory_space<semaphore_mem>> -> memref<1x!tpu.dma_semaphore, #tpu.memory_space<semaphore_mem>>
    %1428 = tpu.memref_squeeze %1427 : memref<1x!tpu.dma_semaphore, #tpu.memory_space<semaphore_mem>> -> memref<!tpu.dma_semaphore, #tpu.memory_space<semaphore_mem>>
    tpu.wait_dma2 semaphore(%1428 : memref<!tpu.dma_semaphore, #tpu.memory_space<semaphore_mem>>) src(%1424 : memref<128xf32, #tpu.memory_space<any>>) dst(%1426 : memref<128xf32, #tpu.memory_space<vmem>>)
    %c0_i32_918 = arith.constant 0 : i32
    %c30_i32_919 = arith.constant 30 : i32
    %c2_i32_920 = arith.constant 2 : i32
    %c0_i32_921 = arith.constant 0 : i32
    %1429 = tpu.memref_slice %arg6[%c0_i32_918, %c0_i32_921] : memref<128x128xf32, #tpu.memory_space<any>> -> memref<1x128xf32, #tpu.memory_space<any>>
    %1430 = tpu.memref_squeeze %1429 : memref<1x128xf32, #tpu.memory_space<any>> -> memref<128xf32, #tpu.memory_space<any>>
    %c0_i32_922 = arith.constant 0 : i32
    %1431 = tpu.memref_slice %arg12[%c30_i32_919, %c0_i32_922] : memref<32x128xf32, #tpu.memory_space<vmem>> -> memref<1x128xf32, #tpu.memory_space<vmem>>
    %1432 = tpu.memref_squeeze %1431 : memref<1x128xf32, #tpu.memory_space<vmem>> -> memref<128xf32, #tpu.memory_space<vmem>>
    %1433 = tpu.memref_slice %arg13[%c2_i32_920] : memref<3x!tpu.dma_semaphore, #tpu.memory_space<semaphore_mem>> -> memref<1x!tpu.dma_semaphore, #tpu.memory_space<semaphore_mem>>
    %1434 = tpu.memref_squeeze %1433 : memref<1x!tpu.dma_semaphore, #tpu.memory_space<semaphore_mem>> -> memref<!tpu.dma_semaphore, #tpu.memory_space<semaphore_mem>>
    tpu.wait_dma2 semaphore(%1434 : memref<!tpu.dma_semaphore, #tpu.memory_space<semaphore_mem>>) src(%1430 : memref<128xf32, #tpu.memory_space<any>>) dst(%1432 : memref<128xf32, #tpu.memory_space<vmem>>)
    %c0_i32_923 = arith.constant 0 : i32
    %c31_i32_924 = arith.constant 31 : i32
    %c2_i32_925 = arith.constant 2 : i32
    %c0_i32_926 = arith.constant 0 : i32
    %1435 = tpu.memref_slice %arg6[%c0_i32_923, %c0_i32_926] : memref<128x128xf32, #tpu.memory_space<any>> -> memref<1x128xf32, #tpu.memory_space<any>>
    %1436 = tpu.memref_squeeze %1435 : memref<1x128xf32, #tpu.memory_space<any>> -> memref<128xf32, #tpu.memory_space<any>>
    %c0_i32_927 = arith.constant 0 : i32
    %1437 = tpu.memref_slice %arg12[%c31_i32_924, %c0_i32_927] : memref<32x128xf32, #tpu.memory_space<vmem>> -> memref<1x128xf32, #tpu.memory_space<vmem>>
    %1438 = tpu.memref_squeeze %1437 : memref<1x128xf32, #tpu.memory_space<vmem>> -> memref<128xf32, #tpu.memory_space<vmem>>
    %1439 = tpu.memref_slice %arg13[%c2_i32_925] : memref<3x!tpu.dma_semaphore, #tpu.memory_space<semaphore_mem>> -> memref<1x!tpu.dma_semaphore, #tpu.memory_space<semaphore_mem>>
    %1440 = tpu.memref_squeeze %1439 : memref<1x!tpu.dma_semaphore, #tpu.memory_space<semaphore_mem>> -> memref<!tpu.dma_semaphore, #tpu.memory_space<semaphore_mem>>
    tpu.wait_dma2 semaphore(%1440 : memref<!tpu.dma_semaphore, #tpu.memory_space<semaphore_mem>>) src(%1436 : memref<128xf32, #tpu.memory_space<any>>) dst(%1438 : memref<128xf32, #tpu.memory_space<vmem>>)
    %c0 = arith.constant 0 : index
    %c0_928 = arith.constant 0 : index
    %1441 = vector.load %arg10[%c0, %c0_928] : memref<32x128xf32, #tpu.memory_space<vmem>>, vector<32x128xf32>
    %c0_929 = arith.constant 0 : index
    %c0_930 = arith.constant 0 : index
    %1442 = vector.load %arg11[%c0_929, %c0_930] : memref<32x128xf32, #tpu.memory_space<vmem>>, vector<32x128xf32>
    %1443 = arith.addf %1441, %1442 : vector<32x128xf32>
    %c0_931 = arith.constant 0 : index
    %c0_932 = arith.constant 0 : index
    %1444 = vector.load %arg12[%c0_931, %c0_932] : memref<32x128xf32, #tpu.memory_space<vmem>>, vector<32x128xf32>
    %1445 = arith.addf %1443, %1444 : vector<32x128xf32>
    %cst = arith.constant dense<0.000000e+00> : vector<32xf32>
    %1446 = vector.multi_reduction <add>, %1445, %cst [1] : vector<32x128xf32> to vector<32xf32>
    %1447 = vector.shape_cast %1446 : vector<32xf32> to vector<32x1xf32>
    %cst_933 = arith.constant 7.812500e-03 : f32
    %1448 = vector.broadcast %cst_933 : f32 to vector<32x1xf32>
    %1449 = arith.mulf %1447, %1448 : vector<32x1xf32>
    %1450 = arith.mulf %1445, %1445 : vector<32x128xf32>
    %cst_934 = arith.constant dense<0.000000e+00> : vector<32xf32>
    %1451 = vector.multi_reduction <add>, %1450, %cst_934 [1] : vector<32x128xf32> to vector<32xf32>
    %1452 = vector.shape_cast %1451 : vector<32xf32> to vector<32x1xf32>
    %cst_935 = arith.constant 7.812500e-03 : f32
    %1453 = vector.broadcast %cst_935 : f32 to vector<32x1xf32>
    %1454 = arith.mulf %1452, %1453 : vector<32x1xf32>
    %1455 = arith.mulf %1449, %1449 : vector<32x1xf32>
    %1456 = arith.subf %1454, %1455 : vector<32x1xf32>
    %1457 = vector.broadcast %1449 : vector<32x1xf32> to vector<32x128xf32>
    %1458 = arith.subf %1445, %1457 : vector<32x128xf32>
    %cst_936 = arith.constant 9.99999996E-13 : f32
    %1459 = vector.broadcast %cst_936 : f32 to vector<32x1xf32>
    %1460 = arith.addf %1456, %1459 : vector<32x1xf32>
    %1461 = math.rsqrt %1460 : vector<32x1xf32>
    %1462 = vector.broadcast %1461 : vector<32x1xf32> to vector<32x128xf32>
    %1463 = arith.mulf %1458, %1462 : vector<32x128xf32>
    %c0_937 = arith.constant 0 : index
    %c0_938 = arith.constant 0 : index
    %1464 = vector.load %arg7[%c0_937, %c0_938] : memref<1x128xf32, #tpu.memory_space<vmem>>, vector<1x128xf32>
    %1465 = vector.broadcast %1464 : vector<1x128xf32> to vector<32x128xf32>
    %1466 = arith.mulf %1463, %1465 : vector<32x128xf32>
    %c0_939 = arith.constant 0 : index
    %c0_940 = arith.constant 0 : index
    %1467 = vector.load %arg8[%c0_939, %c0_940] : memref<1x128xf32, #tpu.memory_space<vmem>>, vector<1x128xf32>
    %1468 = vector.broadcast %1467 : vector<1x128xf32> to vector<32x128xf32>
    %1469 = arith.addf %1466, %1468 : vector<32x128xf32>
    %c0_941 = arith.constant 0 : index
    %c0_942 = arith.constant 0 : index
    %1470 = vector.load %arg9[%c0_941, %c0_942] : memref<32x128xf32, #tpu.memory_space<vmem>>, vector<32x128xf32>
    tpu.vector_store %arg9[%c0_941, %c0_942], %1469 {strides = array<i32>} : memref<32x128xf32, #tpu.memory_space<vmem>>, vector<32x128xf32>,
    return
  }
  func.func @transform_3(%arg0: i32, %arg1: memref<128xi32, #tpu.memory_space<smem>>, %arg2: memref<128xi32, #tpu.memory_space<smem>>, %arg3: memref<128xi32, #tpu.memory_space<smem>>) -> (i32, i32) {
    %c0_i32 = arith.constant 0 : i32
    %c0_i32_0 = arith.constant 0 : i32
    %c0_i32_1 = arith.constant 0 : i32
    return %c0_i32, %c0_i32_0 : i32, i32
  }
  func.func @transform_4(%arg0: i32, %arg1: memref<128xi32, #tpu.memory_space<smem>>, %arg2: memref<128xi32, #tpu.memory_space<smem>>, %arg3: memref<128xi32, #tpu.memory_space<smem>>) -> (i32, i32) {
    %c0_i32 = arith.constant 0 : i32
    %c0_i32_0 = arith.constant 0 : i32
    %c0_i32_1 = arith.constant 0 : i32
    return %c0_i32, %c0_i32_0 : i32, i32
  }
  func.func @transform_5(%arg0: i32, %arg1: memref<128xi32, #tpu.memory_space<smem>>, %arg2: memref<128xi32, #tpu.memory_space<smem>>, %arg3: memref<128xi32, #tpu.memory_space<smem>>) -> (i32, i32) {
    %c0_i32 = arith.constant 0 : i32
    %c0_i32_0 = arith.constant 0 : i32
    return %arg0, %c0_i32 : i32, i32
  }
}

</mosaic_0001>

<bundles_post_ra>
// kernel: tpu_custom_call.1
= control target key start
LH: loop header
LB: loop body
LE: loop exit
PB: predicated region body
PF: predicated region fallthrough
CT: control target
= control target key end

     0   :  { %s6946_s0 = inlined_call_operand.hbm [shape: s32[128], index: 0, kind: input, shape index: {}]   ;;  %s6947_s3 = inlined_call_operand.hbm [shape: f32[512,128], index: 3, kind: input, shape index: {}]   ;;  %s6948_s4 = inlined_call_operand.vmem [shape: f32[2,128], index: 4, kind: input, shape index: {}]   ;;  %s6949_s5 = inlined_call_operand.hbm [shape: f32[128,128], index: 5, kind: input, shape index: {}]   ;;  %s6950_s6 = inlined_call_operand.vmem [shape: f32[1,128], index: 6, kind: input, shape index: {}]   ;;  %s6951_s7 = inlined_call_operand.vmem [shape: f32[1,128], index: 7, kind: input, shape index: {}]   ;;  %s6952_s8 = inlined_call_operand.hbm [shape: f32[128,128], index: 8, kind: output, shape index: {}]   ;;  %s6953_s1 = inlined_call_operand.vmem [shape: s32[128], index: 1, kind: input, shape index: {}]   ;;  %s6954_s2 = inlined_call_operand.vmem [shape: s32[128], index: 2, kind: input, shape index: {}]  }
   0x1   :  { %7014 = sst [smem:[#allocation212_spill]] %s6947_s3  ;;  %s3717_s29 = scalar_lea.hbm %s6946_s0, 16 }
   0x2   :  { %7015 = sst [smem:[#allocation213_spill]] %s6948_s4  ;;  %p3718_p0 = scmp.ne.s32.totalorder %s6946_s0, %s3717_s29 }
   0x3   :  { %7016 = sst [smem:[#allocation214_spill]] %s6949_s5  ;;  %p3721_p1 = scmp.lt.u32.totalorder %s3717_s29, %s6946_s0 }
   0x4   :  { %7017 = sst [smem:[#allocation215_spill]] %s6950_s6 }
   0x5   :  { %7018 = sst [smem:[#allocation216_spill]] %s6951_s7  ;;  %p3723_p2 = pnand %p3721_p1, %p3718_p0 }
   0x6   :  { %7019 = sst [smem:[#allocation217_spill]] %s6952_s8 }
   0x7   :  { %3726 = shalt.err (!%p3723_p2)  }
   0x8   :  { %s5359_s12 = smov [#allocation7]   ;;  %s15_s17 = sshll.u32 %s6953_s1, 4  ;;  %s16_s17 = int_to_ptr.vmem [resolvable:$true] %s15_s17 }
   0x9   :  { %14 = dma.hbm_to_smem %s6946_s0, 16, %s5359_s12, [#allocation6] }
   0xa   :  { %s19_s20 = sshll.u32 %s6954_s2, 4  ;;  %s3727_s21 = scalar_lea.vmem %s16_s17, 16  ;;  %s20_s20 = int_to_ptr.vmem [resolvable:$true] %s19_s20 }
   0xb   :  { %p3728_p3 = scmp.ne.s32.totalorder %s16_s17, %s3727_s21  ;;  %p3732_p4 = scmp.lt.s32.totalorder %s16_s17, %s16_s17 }
   0xc   :  { %p3733_p5 = scmp.lt.s32.totalorder %s3727_s21, %s3727_s21 }
   0xe   :  { %p3734_p6 = por %p3733_p5, %p3732_p4 }
  0x10   :  { %p3735_p7 = pnand %p3734_p6, %p3728_p3 }
  0x12   :  { %3738 = shalt.err (!%p3735_p7)  }
  0x13   :  { %s5360_s22 = smov [#allocation8]   ;;  %s3739_s0 = scalar_lea.vmem %s20_s20, 16 }
  0x14   :  { %18 = dma.vmem_to_smem %s16_s17, 16, %s5360_s22, [#allocation6] }
  0x15   :  { %p3740_p8 = scmp.ne.s32.totalorder %s20_s20, %s3739_s0  ;;  %p3744_p9 = scmp.lt.s32.totalorder %s20_s20, %s20_s20 }
  0x16   :  { %p3745_p10 = scmp.lt.s32.totalorder %s3739_s0, %s3739_s0 }
  0x18   :  { %p3746_p11 = por %p3745_p10, %p3744_p9 }
  0x1a   :  { %p3747_p12 = pnand %p3746_p11, %p3740_p8 }
  0x1c   :  { %3750 = shalt.err (!%p3747_p12)  }
  0x1d   :  { %s5361_s1 = smov [#allocation9]  }
  0x1e   :  { %22 = dma.vmem_to_smem %s20_s20, 16, %s5361_s1, [#allocation6] }
  0x1f   :  { %5331 = dma.done.wait [#allocation6], 48 }
  0x20   :  { %5332 = vsyncadd [#allocation6], 4294967248 }
  0x21   :  { %24 = sfence }
  0x22   :  { %25 = vsyncpa [#allocation11], 0 }
  0x23   :  { %27 = vsyncpa [#allocation11 + $0x1], 0  ;;  %s5492_s2 = smov 0   ;;  %s5494_s23 = smov 0  }
  0x24   :  { %s5496_s24 = smov 0   ;;  %s5498_s25 = smov 0  }
  0x25 LB: > { %7020 = sst [smem:[#allocation179_spill]] %s5345_s2  ;;  %s5513_s26 = sadd.s32 4294967295, %s5357_s25   ;;  %s5357_s25 = sphi %s5498_s25, %s7109_s25   ;;  %s5353_s24 = sphi %s5496_s24, %s7112_s24   ;;  %s5349_s23 = sphi %s5494_s23, %s7111_s23   ;;  %s5345_s2 = sphi %s5492_s2, %s7110_s2  }
  0x26   : > { %7021 = sst [smem:[#allocation180_spill]] %s5349_s23  ;;  %s3521_s27 = sadd.s32 4294967294, %s5357_s25  }
  0x27   : > { %7022 = sst [smem:[#allocation181_spill]] %s5353_s24  ;;  %s5517_s28 = sadd.s32 1, %s5357_s25  }
  0x28   : > { %7023 = sst [smem:[#allocation182_spill]] %s5357_s25  ;;  %s82_s29 = sadd.s32 1, %s5353_s24 }
  0x29   : > { %7024 = sst [smem:[#allocation183_spill]] %s5513_s26  ;;  %s79_s30 = ssub.s32 %s5357_s25, %s5517_s28 }
  0x2a   : > { %7025 = sst [smem:[#allocation184_spill]] %s5517_s28  ;;  %p92_p13 = scmp.ne.s32.totalorder %s5353_s24, %s5349_s23 }
  0x2b   : > { %p80_p0 = scmp.eq.s32.totalorder %s79_s30, 0  ;;  %p93_p1 = scmp.eq.s32.totalorder %s5513_s26, 3 }
  0x2c   : > { %p98_p2 = scmp.ne.s32.totalorder %s5349_s23, %s5345_s2  ;;  %p99_p3 = scmp.eq.s32.totalorder %s3521_s27, 3 }
  0x2d   : > { %s5528_s9 = scalar_select %p80_p0, %s5353_s24, %s82_s29  }
  0x2e   : > { %p5530_p4 = por %p93_p1, %p92_p13  ;;  %p5534_p5 = por %p99_p3, %p98_p2 }
  0x2f   : > { %7026 = sst [smem:[#allocation185_spill]] %s5528_s9  ;;  %p3523_p6 = scmp.ge.s32.totalorder %s5357_s25, 1 }
  0x30   : > { %s7027_s10 = scalar_select %p5530_p4, 1, 0 }
  0x31   : > { %s7029_s11 = scalar_select %p5534_p5, 1, 0 }
  0x32   : > { %7028 = sst [smem:[#allocation186_spill]] %s7027_s10  ;;  %p123_p7 = scmp.lt.s32.totalorder %s5357_s25, 5 }
  0x33   : > { %7030 = sst [smem:[#allocation187_spill]] %s7029_s11 }
  0x34   : > { %p124_p8 = pnand %p3523_p6, %p123_p7 }
  0x36   : > { %127 = sbr.rel (%p124_p8) target bundleno = 2125 (0x84d), region = 28 }
  0x3d   : > { %s6955_s12 = sand.u32 1, %s5349_s23   ;;  %s5542_s13 = sshll.u32 %s5513_s26, 5 }
  0x3e   : > { %s5546_s14 = sshll.u32 %s6955_s12, 5  ;;  %s142_s15 = sld [smem:[#allocation7 + %s5542_s13]] }
  0x3f   : > { %s5362_s16 = smov [#allocation2]   ;;  %s5550_s18 = sadd.s32 1, %s5542_s13 }
  0x40   : > { %s152_s17 = sshll.u32 %s5362_s16, 4  ;;  %s5555_s19 = sld [smem:[#allocation7 + %s5550_s18]]  ;;  %s5552_s17 = int_to_ptr.vmem [resolvable:$true] %s152_s17 }
  0x41   : > { %s5558_s20 = sadd.s32 2, %s5542_s13  ;;  %s5363_s21 = smov [#allocation2 + $0x1]  }
  0x42   : > { %s168_s22 = sshll.u32 %s5363_s21, 4  ;;  %s5561_s0 = sld [smem:[#allocation7 + %s5558_s20]]  ;;  %s5563_s22 = int_to_ptr.vmem [resolvable:$true] %s168_s22 }
  0x43   : > { %s7031_s3 = sld [smem:[#allocation212_spill]] }
  0x44   : > { %s3526_s1 = sshll.u32 %s142_s15, 4 }
  0x49   : > { %s144_s30 = scalar_lea.hbm %s7031_s3, %s3526_s1  ;;  %s5571_s24 = scalar_lea.hbm %s7031_s3, 8192 }
  0x4a   : > { %s3751_s16 = scalar_lea.hbm %s144_s30, 16  ;;  %p3754_p10 = scmp.lt.u32.totalorder %s144_s30, %s7031_s3 }
  0x4b   : > { %p3752_p9 = scmp.ne.s32.totalorder %s144_s30, %s3751_s16  ;;  %p3755_p11 = scmp.lt.u32.totalorder %s5571_s24, %s3751_s16 }
  0x4c   : > { %p3757_p13 = scmp.lt.u32.totalorder %s3751_s16, %s144_s30 }
  0x4d   : > { %p3756_p12 = por %p3755_p11, %p3754_p10 }
  0x4f   : > { %p3758_p0 = por %p3757_p13, %p3756_p12 }
  0x51   : > { %p3759_p1 = pnand %p3758_p0, %p3752_p9 }
  0x53   : > { %3762 = shalt.err (!%p3759_p1)  }
  0x54   : > { %s3763_s15 = scalar_lea.vmem %s5552_s17, 16  ;;  %s5580_s9 = scalar_lea.vmem %s5552_s17, 512 }
  0x55   : > { %p3764_p2 = scmp.ne.s32.totalorder %s5552_s17, %s3763_s15  ;;  %p3768_p3 = scmp.lt.s32.totalorder %s5552_s17, %s5552_s17 }
  0x56   : > { %p3769_p6 = scmp.lt.s32.totalorder %s5580_s9, %s3763_s15 }
  0x58   : > { %p3770_p7 = por %p3769_p6, %p3768_p3 }
  0x5a   : > { %p3771_p8 = pnand %p3770_p7, %p3764_p2 }
  0x5c   : > { %3774 = shalt.err (!%p3771_p8)  }
  0x5d   : > { %155 = dma.hbm_to_vmem [thread:$0]  %s144_s30, 16, %s5552_s17, [#allocation5] }
  0x5e   : > { %s3527_s28 = sshll.u32 %s5555_s19, 4  ;;  %s5364_s11 = smov [#allocation2 + $0x2]  }
  0x5f   : > { %s184_s12 = sshll.u32 %s5364_s11, 4  ;;  %s159_s27 = scalar_lea.hbm %s7031_s3, %s3527_s28  ;;  %s5590_s12 = int_to_ptr.vmem [resolvable:$true] %s184_s12 }
  0x60   : > { %s3775_s29 = scalar_lea.hbm %s159_s27, 16  ;;  %p3778_p10 = scmp.lt.u32.totalorder %s159_s27, %s7031_s3 }
  0x61   : > { %p3776_p9 = scmp.ne.s32.totalorder %s159_s27, %s3775_s29  ;;  %p3779_p11 = scmp.lt.u32.totalorder %s5571_s24, %s3775_s29 }
  0x62   : > { %p3781_p13 = scmp.lt.u32.totalorder %s3775_s29, %s159_s27 }
  0x63   : > { %p3780_p12 = por %p3779_p11, %p3778_p10 }
  0x65   : > { %p3782_p0 = por %p3781_p13, %p3780_p12 }
  0x67   : > { %p3783_p1 = pnand %p3782_p0, %p3776_p9 }
  0x69   : > { %3786 = shalt.err (!%p3783_p1)  }
  0x6a   : > { %s3787_s19 = scalar_lea.vmem %s5563_s22, 16  ;;  %p3792_p3 = scmp.lt.s32.totalorder %s5563_s22, %s5552_s17 }
  0x6b   : > { %p3788_p2 = scmp.ne.s32.totalorder %s5563_s22, %s3787_s19  ;;  %p3793_p6 = scmp.lt.s32.totalorder %s5580_s9, %s3787_s19 }
  0x6d   : > { %p3794_p7 = por %p3793_p6, %p3792_p3 }
  0x6f   : > { %p3795_p8 = pnand %p3794_p7, %p3788_p2 }
  0x71   : > { %3798 = shalt.err (!%p3795_p8)  }
  0x72   : > { %171 = dma.hbm_to_vmem [thread:$0]  %s159_s27, 16, %s5563_s22, [#allocation5] }
  0x73   : > { %s3528_s30 = sshll.u32 %s5561_s0, 4  ;;  %s5604_s28 = sadd.s32 3, %s5542_s13 }
  0x74   : > { %s175_s1 = scalar_lea.hbm %s7031_s3, %s3528_s30  ;;  %s5610_s29 = sld [smem:[#allocation7 + %s5604_s28]] }
  0x75   : > { %s3799_s16 = scalar_lea.hbm %s175_s1, 16  ;;  %p3802_p10 = scmp.lt.u32.totalorder %s175_s1, %s7031_s3 }
  0x76   : > { %p3800_p9 = scmp.ne.s32.totalorder %s175_s1, %s3799_s16  ;;  %p3803_p11 = scmp.lt.u32.totalorder %s5571_s24, %s3799_s16 }
  0x77   : > { %p3805_p13 = scmp.lt.u32.totalorder %s3799_s16, %s175_s1 }
  0x78   : > { %p3804_p12 = por %p3803_p11, %p3802_p10 }
  0x7a   : > { %p3806_p0 = por %p3805_p13, %p3804_p12 }
  0x7c   : > { %p3807_p1 = pnand %p3806_p0, %p3800_p9 }
  0x7e   : > { %3810 = shalt.err (!%p3807_p1)  }
  0x7f   : > { %s3811_s22 = scalar_lea.vmem %s5590_s12, 16  ;;  %p3816_p3 = scmp.lt.s32.totalorder %s5590_s12, %s5552_s17 }
  0x80   : > { %p3812_p2 = scmp.ne.s32.totalorder %s5590_s12, %s3811_s22  ;;  %p3817_p6 = scmp.lt.s32.totalorder %s5580_s9, %s3811_s22 }
  0x82   : > { %p3818_p7 = por %p3817_p6, %p3816_p3 }
  0x84   : > { %p3819_p8 = pnand %p3818_p7, %p3812_p2 }
  0x86   : > { %3822 = shalt.err (!%p3819_p8)  }
  0x87   : > { %187 = dma.hbm_to_vmem [thread:$0]  %s175_s1, 16, %s5590_s12, [#allocation5] }
  0x88   : > { %s5623_s0 = sadd.s32 4, %s5542_s13  ;;  %s5365_s27 = smov [#allocation2 + $0x3]  }
  0x89   : > { %s200_s30 = sshll.u32 %s5365_s27, 4  ;;  %s205_s11 = sld [smem:[#allocation7 + %s5623_s0]]  ;;  %s201_s30 = int_to_ptr.vmem [resolvable:$true] %s200_s30 }
  0x8a   : > { %s5366_s21 = smov [#allocation2 + $0x4]   ;;  %s5627_s15 = sadd.s32 5, %s5542_s13 }
  0x8b   : > { %s216_s16 = sshll.u32 %s5366_s21, 4  ;;  %s3529_s19 = sshll.u32 %s5610_s29, 4  ;;  %s5630_s16 = int_to_ptr.vmem [resolvable:$true] %s216_s16 }
  0x8c   : > { %s191_s12 = scalar_lea.hbm %s7031_s3, %s3529_s19  ;;  %s5636_s1 = sld [smem:[#allocation7 + %s5627_s15]] }
  0x8d   : > { %s3823_s25 = scalar_lea.hbm %s191_s12, 16  ;;  %p3826_p10 = scmp.lt.u32.totalorder %s191_s12, %s7031_s3 }
  0x8e   : > { %p3824_p9 = scmp.ne.s32.totalorder %s191_s12, %s3823_s25  ;;  %p3827_p11 = scmp.lt.u32.totalorder %s5571_s24, %s3823_s25 }
  0x8f   : > { %p3829_p13 = scmp.lt.u32.totalorder %s3823_s25, %s191_s12 }
  0x90   : > { %p3828_p12 = por %p3827_p11, %p3826_p10 }
  0x92   : > { %p3830_p0 = por %p3829_p13, %p3828_p12 }
  0x94   : > { %p3831_p1 = pnand %p3830_p0, %p3824_p9 }
  0x96   : > { %3834 = shalt.err (!%p3831_p1)  }
  0x97   : > { %s3835_s29 = scalar_lea.vmem %s201_s30, 16  ;;  %p3840_p3 = scmp.lt.s32.totalorder %s201_s30, %s5552_s17 }
  0x98   : > { %p3836_p2 = scmp.ne.s32.totalorder %s201_s30, %s3835_s29  ;;  %p3841_p6 = scmp.lt.s32.totalorder %s5580_s9, %s3835_s29 }
  0x9a   : > { %p3842_p7 = por %p3841_p6, %p3840_p3 }
  0x9c   : > { %p3843_p8 = pnand %p3842_p7, %p3836_p2 }
  0x9e   : > { %3846 = shalt.err (!%p3843_p8)  }
  0x9f   : > { %203 = dma.hbm_to_vmem [thread:$0]  %s191_s12, 16, %s201_s30, [#allocation5] }
  0xa0   : > { %s3530_s2 = sshll.u32 %s205_s11, 4  ;;  %s5367_s25 = smov [#allocation2 + $0x5]  }
  0xa1   : > { %s207_s19 = scalar_lea.hbm %s7031_s3, %s3530_s2  ;;  %s232_s22 = sshll.u32 %s5367_s25, 4  ;;  %s233_s22 = int_to_ptr.vmem [resolvable:$true] %s232_s22 }
  0xa2   : > { %s3847_s27 = scalar_lea.hbm %s207_s19, 16  ;;  %p3850_p10 = scmp.lt.u32.totalorder %s207_s19, %s7031_s3 }
  0xa3   : > { %p3848_p9 = scmp.ne.s32.totalorder %s207_s19, %s3847_s27  ;;  %p3851_p11 = scmp.lt.u32.totalorder %s5571_s24, %s3847_s27 }
  0xa4   : > { %p3853_p13 = scmp.lt.u32.totalorder %s3847_s27, %s207_s19 }
  0xa5   : > { %p3852_p12 = por %p3851_p11, %p3850_p10 }
  0xa7   : > { %p3854_p0 = por %p3853_p13, %p3852_p12 }
  0xa9   : > { %p3855_p1 = pnand %p3854_p0, %p3848_p9 }
  0xab   : > { %3858 = shalt.err (!%p3855_p1)  }
  0xac   : > { %s3859_s30 = scalar_lea.vmem %s5630_s16, 16  ;;  %p3864_p3 = scmp.lt.s32.totalorder %s5630_s16, %s5552_s17 }
  0xad   : > { %p3860_p2 = scmp.ne.s32.totalorder %s5630_s16, %s3859_s30  ;;  %p3865_p6 = scmp.lt.s32.totalorder %s5580_s9, %s3859_s30 }
  0xaf   : > { %p3866_p7 = por %p3865_p6, %p3864_p3 }
  0xb1   : > { %p3867_p8 = pnand %p3866_p7, %p3860_p2 }
  0xb3   : > { %3870 = shalt.err (!%p3867_p8)  }
  0xb4   : > { %219 = dma.hbm_to_vmem [thread:$0]  %s207_s19, 16, %s5630_s16, [#allocation5] }
  0xb5   : > { %s5658_s23 = sadd.s32 6, %s5542_s13  ;;  %s3531_s10 = sshll.u32 %s5636_s1, 4 }
  0xb6   : > { %s5662_s11 = sld [smem:[#allocation7 + %s5658_s23]]  ;;  %s223_s2 = scalar_lea.hbm %s7031_s3, %s3531_s10 }
  0xb7   : > { %s3871_s8 = scalar_lea.hbm %s223_s2, 16  ;;  %p3874_p10 = scmp.lt.u32.totalorder %s223_s2, %s7031_s3 }
  0xb8   : > { %p3872_p9 = scmp.ne.s32.totalorder %s223_s2, %s3871_s8  ;;  %p3875_p11 = scmp.lt.u32.totalorder %s5571_s24, %s3871_s8 }
  0xb9   : > { %p3877_p13 = scmp.lt.u32.totalorder %s3871_s8, %s223_s2 }
  0xba   : > { %p3876_p12 = por %p3875_p11, %p3874_p10 }
  0xbc   : > { %p3878_p0 = por %p3877_p13, %p3876_p12 }
  0xbe   : > { %p3879_p1 = pnand %p3878_p0, %p3872_p9 }
  0xc0   : > { %3882 = shalt.err (!%p3879_p1)  }
  0xc1   : > { %s3883_s16 = scalar_lea.vmem %s233_s22, 16  ;;  %p3888_p3 = scmp.lt.s32.totalorder %s233_s22, %s5552_s17 }
  0xc2   : > { %p3884_p2 = scmp.ne.s32.totalorder %s233_s22, %s3883_s16  ;;  %p3889_p6 = scmp.lt.s32.totalorder %s5580_s9, %s3883_s16 }
  0xc4   : > { %p3890_p7 = por %p3889_p6, %p3888_p3 }
  0xc6   : > { %p3891_p8 = pnand %p3890_p7, %p3884_p2 }
  0xc8   : > { %3894 = shalt.err (!%p3891_p8)  }
  0xc9   : > { %235 = dma.hbm_to_vmem [thread:$0]  %s223_s2, 16, %s233_s22, [#allocation5] }
  0xca   : > { %s5368_s1 = smov [#allocation2 + $0x6]   ;;  %s5674_s27 = sadd.s32 7, %s5542_s13 }
  0xcb   : > { %s248_s19 = sshll.u32 %s5368_s1, 4  ;;  %s5677_s30 = sld [smem:[#allocation7 + %s5674_s27]]  ;;  %s249_s19 = int_to_ptr.vmem [resolvable:$true] %s248_s19 }
  0xcc   : > { %s5680_s10 = sadd.s32 8, %s5542_s13  ;;  %s3532_s12 = sshll.u32 %s5662_s11, 4 }
  0xcd   : > { %s5369_s29 = smov [#allocation2 + $0x7]   ;;  %s239_s22 = scalar_lea.hbm %s7031_s3, %s3532_s12 }
  0xce   : > { %s264_s8 = sshll.u32 %s5369_s29, 4  ;;  %s3895_s2 = scalar_lea.hbm %s239_s22, 16  ;;  %s5686_s8 = int_to_ptr.vmem [resolvable:$true] %s264_s8 }
  0xcf   : > { %p3896_p9 = scmp.ne.s32.totalorder %s239_s22, %s3895_s2  ;;  %p3898_p10 = scmp.lt.u32.totalorder %s239_s22, %s7031_s3 }
  0xd0   : > { %p3899_p11 = scmp.lt.u32.totalorder %s5571_s24, %s3895_s2  ;;  %p3901_p13 = scmp.lt.u32.totalorder %s3895_s2, %s239_s22 }
  0xd2   : > { %p3900_p12 = por %p3899_p11, %p3898_p10 }
  0xd4   : > { %p3902_p0 = por %p3901_p13, %p3900_p12 }
  0xd6   : > { %p3903_p1 = pnand %p3902_p0, %p3896_p9 }
  0xd8   : > { %3906 = shalt.err (!%p3903_p1)  }
  0xd9   : > { %s3907_s11 = scalar_lea.vmem %s249_s19, 16  ;;  %p3912_p3 = scmp.lt.s32.totalorder %s249_s19, %s5552_s17 }
  0xda   : > { %p3908_p2 = scmp.ne.s32.totalorder %s249_s19, %s3907_s11  ;;  %p3913_p6 = scmp.lt.s32.totalorder %s5580_s9, %s3907_s11 }
  0xdc   : > { %p3914_p7 = por %p3913_p6, %p3912_p3 }
  0xde   : > { %p3915_p8 = pnand %p3914_p7, %p3908_p2 }
  0xe0   : > { %3918 = shalt.err (!%p3915_p8)  }
  0xe1   : > { %251 = dma.hbm_to_vmem [thread:$0]  %s239_s22, 16, %s249_s19, [#allocation5] }
  0xe2   : > { %s5695_s12 = sld [smem:[#allocation7 + %s5680_s10]]  ;;  %s3533_s29 = sshll.u32 %s5677_s30, 4 }
  0xe3   : > { %s5370_s21 = smov [#allocation2 + $0x8]   ;;  %s255_s1 = scalar_lea.hbm %s7031_s3, %s3533_s29 }
  0xe4   : > { %s280_s25 = sshll.u32 %s5370_s21, 4  ;;  %s3919_s7 = scalar_lea.hbm %s255_s1, 16  ;;  %s5701_s25 = int_to_ptr.vmem [resolvable:$true] %s280_s25 }
  0xe5   : > { %p3920_p9 = scmp.ne.s32.totalorder %s255_s1, %s3919_s7  ;;  %p3922_p10 = scmp.lt.u32.totalorder %s255_s1, %s7031_s3 }
  0xe6   : > { %p3923_p11 = scmp.lt.u32.totalorder %s5571_s24, %s3919_s7  ;;  %p3925_p13 = scmp.lt.u32.totalorder %s3919_s7, %s255_s1 }
  0xe8   : > { %p3924_p12 = por %p3923_p11, %p3922_p10 }
  0xea   : > { %p3926_p0 = por %p3925_p13, %p3924_p12 }
  0xec   : > { %p3927_p1 = pnand %p3926_p0, %p3920_p9 }
  0xee   : > { %3930 = shalt.err (!%p3927_p1)  }
  0xef   : > { %s3931_s19 = scalar_lea.vmem %s5686_s8, 16  ;;  %p3936_p3 = scmp.lt.s32.totalorder %s5686_s8, %s5552_s17 }
  0xf0   : > { %p3932_p2 = scmp.ne.s32.totalorder %s5686_s8, %s3931_s19  ;;  %p3937_p6 = scmp.lt.s32.totalorder %s5580_s9, %s3931_s19 }
  0xf2   : > { %p3938_p7 = por %p3937_p6, %p3936_p3 }
  0xf4   : > { %p3939_p8 = pnand %p3938_p7, %p3932_p2 }
  0xf6   : > { %3942 = shalt.err (!%p3939_p8)  }
  0xf7   : > { %267 = dma.hbm_to_vmem [thread:$0]  %s255_s1, 16, %s5686_s8, [#allocation5] }
  0xf8   : > { %s5714_s7 = sadd.s32 9, %s5542_s13  ;;  %s5371_s30 = smov [#allocation2 + $0x9]  }
  0xf9   : > { %7032 = sst [smem:[#allocation188_spill]] %s5714_s7  ;;  %s296_s22 = sshll.u32 %s5371_s30, 4  ;;  %s5720_s22 = int_to_ptr.vmem [resolvable:$true] %s296_s22 }
  0xfa   : > { %s5717_s26 = sld [smem:[#allocation7 + %s5714_s7]]  ;;  %s3534_s29 = sshll.u32 %s5695_s12, 4 }
  0xfb   : > { %s271_s16 = scalar_lea.hbm %s7031_s3, %s3534_s29  ;;  %s5726_s11 = sadd.s32 10, %s5542_s13 }
  0xfc   : > { %7033 = sst [smem:[#allocation189_spill]] %s5726_s11  ;;  %s3943_s19 = scalar_lea.hbm %s271_s16, 16 }
  0xfd   : > { %p3944_p9 = scmp.ne.s32.totalorder %s271_s16, %s3943_s19  ;;  %p3946_p10 = scmp.lt.u32.totalorder %s271_s16, %s7031_s3 }
  0xfe   : > { %p3947_p11 = scmp.lt.u32.totalorder %s5571_s24, %s3943_s19  ;;  %p3949_p13 = scmp.lt.u32.totalorder %s3943_s19, %s271_s16 }
 0x100   : > { %p3948_p12 = por %p3947_p11, %p3946_p10 }
 0x102   : > { %p3950_p0 = por %p3949_p13, %p3948_p12 }
 0x104   : > { %p3951_p1 = pnand %p3950_p0, %p3944_p9 }
 0x106   : > { %3954 = shalt.err (!%p3951_p1)  }
 0x107   : > { %s3955_s12 = scalar_lea.vmem %s5701_s25, 16  ;;  %p3960_p3 = scmp.lt.s32.totalorder %s5701_s25, %s5552_s17 }
 0x108   : > { %p3956_p2 = scmp.ne.s32.totalorder %s5701_s25, %s3955_s12  ;;  %p3961_p6 = scmp.lt.s32.totalorder %s5580_s9, %s3955_s12 }
 0x10a   : > { %p3962_p7 = por %p3961_p6, %p3960_p3 }
 0x10c   : > { %p3963_p8 = pnand %p3962_p7, %p3956_p2 }
 0x10e   : > { %3966 = shalt.err (!%p3963_p8)  }
 0x10f   : > { %283 = dma.hbm_to_vmem [thread:$0]  %s271_s16, 16, %s5701_s25, [#allocation5] }
 0x110   : > { %s5739_s6 = sld [smem:[#allocation7 + %s5726_s11]]  ;;  %s5372_s1 = smov [#allocation2 + $0xa]  }
 0x111   : > { %s312_s30 = sshll.u32 %s5372_s1, 4  ;;  %s5742_s29 = sadd.s32 11, %s5542_s13  ;;  %s5745_s30 = int_to_ptr.vmem [resolvable:$true] %s312_s30 }
 0x112   : > { %7034 = sst [smem:[#allocation190_spill]] %s5742_s29  ;;  %s3535_s21 = sshll.u32 %s5717_s26, 4 }
 0x113   : > { %s287_s8 = scalar_lea.hbm %s7031_s3, %s3535_s21  ;;  %s5751_s12 = sld [smem:[#allocation7 + %s5742_s29]] }
 0x114   : > { %s3967_s5 = scalar_lea.hbm %s287_s8, 16  ;;  %p3970_p10 = scmp.lt.u32.totalorder %s287_s8, %s7031_s3 }
 0x115   : > { %p3968_p9 = scmp.ne.s32.totalorder %s287_s8, %s3967_s5  ;;  %p3971_p11 = scmp.lt.u32.totalorder %s5571_s24, %s3967_s5 }
 0x116   : > { %p3973_p13 = scmp.lt.u32.totalorder %s3967_s5, %s287_s8 }
 0x117   : > { %p3972_p12 = por %p3971_p11, %p3970_p10 }
 0x119   : > { %p3974_p0 = por %p3973_p13, %p3972_p12 }
 0x11b   : > { %p3975_p1 = pnand %p3974_p0, %p3968_p9 }
 0x11d   : > { %3978 = shalt.err (!%p3975_p1)  }
 0x11e   : > { %s3979_s26 = scalar_lea.vmem %s5720_s22, 16  ;;  %p3984_p3 = scmp.lt.s32.totalorder %s5720_s22, %s5552_s17 }
 0x11f   : > { %p3980_p2 = scmp.ne.s32.totalorder %s5720_s22, %s3979_s26  ;;  %p3985_p6 = scmp.lt.s32.totalorder %s5580_s9, %s3979_s26 }
 0x121   : > { %p3986_p7 = por %p3985_p6, %p3984_p3 }
 0x123   : > { %p3987_p8 = pnand %p3986_p7, %p3980_p2 }
 0x125   : > { %3990 = shalt.err (!%p3987_p8)  }
 0x126   : > { %299 = dma.hbm_to_vmem [thread:$0]  %s287_s8, 16, %s5720_s22, [#allocation5] }
 0x127   : > { %s5764_s5 = sadd.s32 12, %s5542_s13  ;;  %s3536_s7 = sshll.u32 %s5739_s6, 4 }
 0x128   : > { %7035 = sst [smem:[#allocation191_spill]] %s5764_s5  ;;  %s5373_s16 = smov [#allocation2 + $0xb]  }
 0x129   : > { %s328_s1 = sshll.u32 %s5373_s16, 4  ;;  %s303_s19 = scalar_lea.hbm %s7031_s3, %s3536_s7  ;;  %s5770_s1 = int_to_ptr.vmem [resolvable:$true] %s328_s1 }
 0x12a   : > { %s3991_s25 = scalar_lea.hbm %s303_s19, 16  ;;  %p3994_p10 = scmp.lt.u32.totalorder %s303_s19, %s7031_s3 }
 0x12b   : > { %p3992_p9 = scmp.ne.s32.totalorder %s303_s19, %s3991_s25  ;;  %p3995_p11 = scmp.lt.u32.totalorder %s5571_s24, %s3991_s25 }
 0x12c   : > { %p3997_p13 = scmp.lt.u32.totalorder %s3991_s25, %s303_s19 }
 0x12d   : > { %p3996_p12 = por %p3995_p11, %p3994_p10 }
 0x12f   : > { %p3998_p0 = por %p3997_p13, %p3996_p12 }
 0x131   : > { %p3999_p1 = pnand %p3998_p0, %p3992_p9 }
 0x133   : > { %4002 = shalt.err (!%p3999_p1)  }
 0x134   : > { %s4003_s22 = scalar_lea.vmem %s5745_s30, 16  ;;  %p4008_p3 = scmp.lt.s32.totalorder %s5745_s30, %s5552_s17 }
 0x135   : > { %p4004_p2 = scmp.ne.s32.totalorder %s5745_s30, %s4003_s22  ;;  %p4009_p6 = scmp.lt.s32.totalorder %s5580_s9, %s4003_s22 }
 0x137   : > { %p4010_p7 = por %p4009_p6, %p4008_p3 }
 0x139   : > { %p4011_p8 = pnand %p4010_p7, %p4004_p2 }
 0x13b   : > { %4014 = shalt.err (!%p4011_p8)  }
 0x13c   : > { %315 = dma.hbm_to_vmem [thread:$0]  %s303_s19, 16, %s5745_s30, [#allocation5] }
 0x13d   : > { %s3537_s6 = sshll.u32 %s5751_s12, 4  ;;  %s5784_s29 = sld [smem:[#allocation7 + %s5764_s5]] }
 0x13e   : > { %s319_s16 = scalar_lea.hbm %s7031_s3, %s3537_s6 }
 0x13f   : > { %s4015_s21 = scalar_lea.hbm %s319_s16, 16  ;;  %p4018_p10 = scmp.lt.u32.totalorder %s319_s16, %s7031_s3 }
 0x140   : > { %p4016_p9 = scmp.ne.s32.totalorder %s319_s16, %s4015_s21  ;;  %p4019_p11 = scmp.lt.u32.totalorder %s5571_s24, %s4015_s21 }
 0x141   : > { %p4021_p13 = scmp.lt.u32.totalorder %s4015_s21, %s319_s16 }
 0x142   : > { %p4020_p12 = por %p4019_p11, %p4018_p10 }
 0x144   : > { %p4022_p0 = por %p4021_p13, %p4020_p12 }
 0x146   : > { %p4023_p1 = pnand %p4022_p0, %p4016_p9 }
 0x148   : > { %4026 = shalt.err (!%p4023_p1)  }
 0x149   : > { %s4027_s30 = scalar_lea.vmem %s5770_s1, 16  ;;  %p4032_p3 = scmp.lt.s32.totalorder %s5770_s1, %s5552_s17 }
 0x14a   : > { %p4028_p2 = scmp.ne.s32.totalorder %s5770_s1, %s4027_s30  ;;  %p4033_p6 = scmp.lt.s32.totalorder %s5580_s9, %s4027_s30 }
 0x14c   : > { %p4034_p7 = por %p4033_p6, %p4032_p3 }
 0x14e   : > { %p4035_p8 = pnand %p4034_p7, %p4028_p2 }
 0x150   : > { %4038 = shalt.err (!%p4035_p8)  }
 0x151   : > { %331 = dma.hbm_to_vmem [thread:$0]  %s319_s16, 16, %s5770_s1, [#allocation5] }
 0x152   : > { %s5374_s12 = smov [#allocation2 + $0xc]   ;;  %s5800_s26 = sadd.s32 13, %s5542_s13 }
 0x153   : > { %s344_s19 = sshll.u32 %s5374_s12, 4  ;;  %7036 = sst [smem:[#allocation192_spill]] %s5800_s26  ;;  %s345_s19 = int_to_ptr.vmem [resolvable:$true] %s344_s19 }
 0x154   : > { %s5803_s22 = sld [smem:[#allocation7 + %s5800_s26]]  ;;  %s5806_s6 = sadd.s32 14, %s5542_s13 }
 0x155   : > { %7037 = sst [smem:[#allocation193_spill]] %s5806_s6  ;;  %s3538_s8 = sshll.u32 %s5784_s29, 4 }
 0x156   : > { %s5375_s7 = smov [#allocation2 + $0xd]   ;;  %s335_s30 = scalar_lea.hbm %s7031_s3, %s3538_s8 }
 0x157   : > { %s360_s21 = sshll.u32 %s5375_s7, 4  ;;  %s4039_s1 = scalar_lea.hbm %s335_s30, 16  ;;  %s5812_s21 = int_to_ptr.vmem [resolvable:$true] %s360_s21 }
 0x158   : > { %p4040_p9 = scmp.ne.s32.totalorder %s335_s30, %s4039_s1  ;;  %p4042_p10 = scmp.lt.u32.totalorder %s335_s30, %s7031_s3 }
 0x159   : > { %p4043_p11 = scmp.lt.u32.totalorder %s5571_s24, %s4039_s1  ;;  %p4045_p13 = scmp.lt.u32.totalorder %s4039_s1, %s335_s30 }
 0x15b   : > { %p4044_p12 = por %p4043_p11, %p4042_p10 }
 0x15d   : > { %p4046_p0 = por %p4045_p13, %p4044_p12 }
 0x15f   : > { %p4047_p1 = pnand %p4046_p0, %p4040_p9 }
 0x161   : > { %4050 = shalt.err (!%p4047_p1)  }
 0x162   : > { %s4051_s29 = scalar_lea.vmem %s345_s19, 16  ;;  %p4056_p3 = scmp.lt.s32.totalorder %s345_s19, %s5552_s17 }
 0x163   : > { %p4052_p2 = scmp.ne.s32.totalorder %s345_s19, %s4051_s29  ;;  %p4057_p6 = scmp.lt.s32.totalorder %s5580_s9, %s4051_s29 }
 0x165   : > { %p4058_p7 = por %p4057_p6, %p4056_p3 }
 0x167   : > { %p4059_p8 = pnand %p4058_p7, %p4052_p2 }
 0x169   : > { %4062 = shalt.err (!%p4059_p8)  }
 0x16a   : > { %347 = dma.hbm_to_vmem [thread:$0]  %s335_s30, 16, %s345_s19, [#allocation5] }
 0x16b   : > { %s5821_s8 = sld [smem:[#allocation7 + %s5806_s6]]  ;;  %s3539_s7 = sshll.u32 %s5803_s22, 4 }
 0x16c   : > { %s5376_s2 = smov [#allocation2 + $0xe]   ;;  %s351_s12 = scalar_lea.hbm %s7031_s3, %s3539_s7 }
 0x16d   : > { %s376_s25 = sshll.u32 %s5376_s2, 4  ;;  %s4063_s26 = scalar_lea.hbm %s351_s12, 16  ;;  %s5827_s25 = int_to_ptr.vmem [resolvable:$true] %s376_s25 }
 0x16e   : > { %p4064_p9 = scmp.ne.s32.totalorder %s351_s12, %s4063_s26  ;;  %p4066_p10 = scmp.lt.u32.totalorder %s351_s12, %s7031_s3 }
 0x16f   : > { %p4067_p11 = scmp.lt.u32.totalorder %s5571_s24, %s4063_s26  ;;  %p4069_p13 = scmp.lt.u32.totalorder %s4063_s26, %s351_s12 }
 0x171   : > { %p4068_p12 = por %p4067_p11, %p4066_p10 }
 0x173   : > { %p4070_p0 = por %p4069_p13, %p4068_p12 }
 0x175   : > { %p4071_p1 = pnand %p4070_p0, %p4064_p9 }
 0x177   : > { %4074 = shalt.err (!%p4071_p1)  }
 0x178   : > { %s4075_s19 = scalar_lea.vmem %s5812_s21, 16  ;;  %p4080_p3 = scmp.lt.s32.totalorder %s5812_s21, %s5552_s17 }
 0x179   : > { %p4076_p2 = scmp.ne.s32.totalorder %s5812_s21, %s4075_s19  ;;  %p4081_p6 = scmp.lt.s32.totalorder %s5580_s9, %s4075_s19 }
 0x17b   : > { %p4082_p7 = por %p4081_p6, %p4080_p3 }
 0x17d   : > { %p4083_p8 = pnand %p4082_p7, %p4076_p2 }
 0x17f   : > { %4086 = shalt.err (!%p4083_p8)  }
 0x180   : > { %363 = dma.hbm_to_vmem [thread:$0]  %s351_s12, 16, %s5812_s21, [#allocation5] }
 0x181   : > { %s5840_s5 = sadd.s32 15, %s5542_s13  ;;  %s5377_s22 = smov [#allocation2 + $0xf]  }
 0x182   : > { %7038 = sst [smem:[#allocation194_spill]] %s5840_s5  ;;  %s392_s30 = sshll.u32 %s5377_s22, 4  ;;  %s5846_s30 = int_to_ptr.vmem [resolvable:$true] %s392_s30 }
 0x183   : > { %s5843_s26 = sld [smem:[#allocation7 + %s5840_s5]]  ;;  %s3540_s7 = sshll.u32 %s5821_s8, 4 }
 0x184   : > { %s367_s16 = scalar_lea.hbm %s7031_s3, %s3540_s7  ;;  %s5852_s29 = sadd.s32 16, %s5542_s13 }
 0x185   : > { %7039 = sst [smem:[#allocation195_spill]] %s5852_s29  ;;  %s4087_s19 = scalar_lea.hbm %s367_s16, 16 }
 0x186   : > { %p4088_p9 = scmp.ne.s32.totalorder %s367_s16, %s4087_s19  ;;  %p4090_p10 = scmp.lt.u32.totalorder %s367_s16, %s7031_s3 }
 0x187   : > { %p4091_p11 = scmp.lt.u32.totalorder %s5571_s24, %s4087_s19  ;;  %p4093_p13 = scmp.lt.u32.totalorder %s4087_s19, %s367_s16 }
 0x189   : > { %p4092_p12 = por %p4091_p11, %p4090_p10 }
 0x18b   : > { %p4094_p0 = por %p4093_p13, %p4092_p12 }
 0x18d   : > { %p4095_p1 = pnand %p4094_p0, %p4088_p9 }
 0x18f   : > { %4098 = shalt.err (!%p4095_p1)  }
 0x190   : > { %s4099_s8 = scalar_lea.vmem %s5827_s25, 16  ;;  %p4104_p3 = scmp.lt.s32.totalorder %s5827_s25, %s5552_s17 }
 0x191   : > { %p4100_p2 = scmp.ne.s32.totalorder %s5827_s25, %s4099_s8  ;;  %p4105_p6 = scmp.lt.s32.totalorder %s5580_s9, %s4099_s8 }
 0x193   : > { %p4106_p7 = por %p4105_p6, %p4104_p3 }
 0x195   : > { %p4107_p8 = pnand %p4106_p7, %p4100_p2 }
 0x197   : > { %4110 = shalt.err (!%p4107_p8)  }
 0x198   : > { %379 = dma.hbm_to_vmem [thread:$0]  %s367_s16, 16, %s5827_s25, [#allocation5] }
 0x199   : > { %s5865_s6 = sld [smem:[#allocation7 + %s5852_s29]]  ;;  %s5378_s12 = smov [#allocation2 + $0x10]  }
 0x19a   : > { %s408_s22 = sshll.u32 %s5378_s12, 4  ;;  %s5868_s7 = sadd.s32 17, %s5542_s13  ;;  %s5871_s22 = int_to_ptr.vmem [resolvable:$true] %s408_s22 }
 0x19b   : > { %7040 = sst [smem:[#allocation196_spill]] %s5868_s7  ;;  %s3541_s2 = sshll.u32 %s5843_s26, 4 }
 0x19c   : > { %s383_s21 = scalar_lea.hbm %s7031_s3, %s3541_s2  ;;  %s5877_s8 = sld [smem:[#allocation7 + %s5868_s7]] }
 0x19d   : > { %s4111_s5 = scalar_lea.hbm %s383_s21, 16  ;;  %p4114_p10 = scmp.lt.u32.totalorder %s383_s21, %s7031_s3 }
 0x19e   : > { %p4112_p9 = scmp.ne.s32.totalorder %s383_s21, %s4111_s5  ;;  %p4115_p11 = scmp.lt.u32.totalorder %s5571_s24, %s4111_s5 }
 0x19f   : > { %p4117_p13 = scmp.lt.u32.totalorder %s4111_s5, %s383_s21 }
 0x1a0   : > { %p4116_p12 = por %p4115_p11, %p4114_p10 }
 0x1a2   : > { %p4118_p0 = por %p4117_p13, %p4116_p12 }
 0x1a4   : > { %p4119_p1 = pnand %p4118_p0, %p4112_p9 }
 0x1a6   : > { %4122 = shalt.err (!%p4119_p1)  }
 0x1a7   : > { %s4123_s26 = scalar_lea.vmem %s5846_s30, 16  ;;  %p4128_p3 = scmp.lt.s32.totalorder %s5846_s30, %s5552_s17 }
 0x1a8   : > { %p4124_p2 = scmp.ne.s32.totalorder %s5846_s30, %s4123_s26  ;;  %p4129_p6 = scmp.lt.s32.totalorder %s5580_s9, %s4123_s26 }
 0x1aa   : > { %p4130_p7 = por %p4129_p6, %p4128_p3 }
 0x1ac   : > { %p4131_p8 = pnand %p4130_p7, %p4124_p2 }
 0x1ae   : > { %4134 = shalt.err (!%p4131_p8)  }
 0x1af   : > { %395 = dma.hbm_to_vmem [thread:$0]  %s383_s21, 16, %s5846_s30, [#allocation5] }
 0x1b0   : > { %s5890_s11 = sadd.s32 18, %s5542_s13  ;;  %s3542_s5 = sshll.u32 %s5865_s6, 4 }
 0x1b1   : > { %7041 = sst [smem:[#allocation197_spill]] %s5890_s11  ;;  %s5379_s16 = smov [#allocation2 + $0x11]  }
 0x1b2   : > { %s424_s12 = sshll.u32 %s5379_s16, 4  ;;  %s399_s19 = scalar_lea.hbm %s7031_s3, %s3542_s5  ;;  %s5896_s12 = int_to_ptr.vmem [resolvable:$true] %s424_s12 }
 0x1b3   : > { %s4135_s25 = scalar_lea.hbm %s399_s19, 16  ;;  %p4138_p10 = scmp.lt.u32.totalorder %s399_s19, %s7031_s3 }
 0x1b4   : > { %p4136_p9 = scmp.ne.s32.totalorder %s399_s19, %s4135_s25  ;;  %p4139_p11 = scmp.lt.u32.totalorder %s5571_s24, %s4135_s25 }
 0x1b5   : > { %p4141_p13 = scmp.lt.u32.totalorder %s4135_s25, %s399_s19 }
 0x1b6   : > { %p4140_p12 = por %p4139_p11, %p4138_p10 }
 0x1b8   : > { %p4142_p0 = por %p4141_p13, %p4140_p12 }
 0x1ba   : > { %p4143_p1 = pnand %p4142_p0, %p4136_p9 }
 0x1bc   : > { %4146 = shalt.err (!%p4143_p1)  }
 0x1bd   : > { %s4147_s30 = scalar_lea.vmem %s5871_s22, 16  ;;  %p4152_p3 = scmp.lt.s32.totalorder %s5871_s22, %s5552_s17 }
 0x1be   : > { %p4148_p2 = scmp.ne.s32.totalorder %s5871_s22, %s4147_s30  ;;  %p4153_p6 = scmp.lt.s32.totalorder %s5580_s9, %s4147_s30 }
 0x1c0   : > { %p4154_p7 = por %p4153_p6, %p4152_p3 }
 0x1c2   : > { %p4155_p8 = pnand %p4154_p7, %p4148_p2 }
 0x1c4   : > { %4158 = shalt.err (!%p4155_p8)  }
 0x1c5   : > { %411 = dma.hbm_to_vmem [thread:$0]  %s399_s19, 16, %s5871_s22, [#allocation5] }
 0x1c6   : > { %s3543_s6 = sshll.u32 %s5877_s8, 4  ;;  %s5910_s7 = sld [smem:[#allocation7 + %s5890_s11]] }
 0x1c7   : > { %s415_s16 = scalar_lea.hbm %s7031_s3, %s3543_s6 }
 0x1c8   : > { %s4159_s2 = scalar_lea.hbm %s415_s16, 16  ;;  %p4162_p10 = scmp.lt.u32.totalorder %s415_s16, %s7031_s3 }
 0x1c9   : > { %p4160_p9 = scmp.ne.s32.totalorder %s415_s16, %s4159_s2  ;;  %p4163_p11 = scmp.lt.u32.totalorder %s5571_s24, %s4159_s2 }
 0x1ca   : > { %p4165_p13 = scmp.lt.u32.totalorder %s4159_s2, %s415_s16 }
 0x1cb   : > { %p4164_p12 = por %p4163_p11, %p4162_p10 }
 0x1cd   : > { %p4166_p0 = por %p4165_p13, %p4164_p12 }
 0x1cf   : > { %p4167_p1 = pnand %p4166_p0, %p4160_p9 }
 0x1d1   : > { %4170 = shalt.err (!%p4167_p1)  }
 0x1d2   : > { %s4171_s22 = scalar_lea.vmem %s5896_s12, 16  ;;  %p4176_p3 = scmp.lt.s32.totalorder %s5896_s12, %s5552_s17 }
 0x1d3   : > { %p4172_p2 = scmp.ne.s32.totalorder %s5896_s12, %s4171_s22  ;;  %p4177_p6 = scmp.lt.s32.totalorder %s5580_s9, %s4171_s22 }
 0x1d5   : > { %p4178_p7 = por %p4177_p6, %p4176_p3 }
 0x1d7   : > { %p4179_p8 = pnand %p4178_p7, %p4172_p2 }
 0x1d9   : > { %4182 = shalt.err (!%p4179_p8)  }
 0x1da   : > { %427 = dma.hbm_to_vmem [thread:$0]  %s415_s16, 16, %s5896_s12, [#allocation5] }
 0x1db   : > { %s5380_s8 = smov [#allocation2 + $0x12]   ;;  %s5926_s26 = sadd.s32 19, %s5542_s13 }
 0x1dc   : > { %s440_s19 = sshll.u32 %s5380_s8, 4  ;;  %7042 = sst [smem:[#allocation198_spill]] %s5926_s26  ;;  %s441_s19 = int_to_ptr.vmem [resolvable:$true] %s440_s19 }
 0x1dd   : > { %s5929_s30 = sld [smem:[#allocation7 + %s5926_s26]]  ;;  %s5932_s6 = sadd.s32 20, %s5542_s13 }
 0x1de   : > { %7043 = sst [smem:[#allocation199_spill]] %s5932_s6  ;;  %s3544_s21 = sshll.u32 %s5910_s7, 4 }
 0x1df   : > { %s5381_s5 = smov [#allocation2 + $0x13]   ;;  %s431_s22 = scalar_lea.hbm %s7031_s3, %s3544_s21 }
 0x1e0   : > { %s456_s2 = sshll.u32 %s5381_s5, 4  ;;  %s4183_s12 = scalar_lea.hbm %s431_s22, 16  ;;  %s5938_s2 = int_to_ptr.vmem [resolvable:$true] %s456_s2 }
 0x1e1   : > { %p4184_p9 = scmp.ne.s32.totalorder %s431_s22, %s4183_s12  ;;  %p4186_p10 = scmp.lt.u32.totalorder %s431_s22, %s7031_s3 }
 0x1e2   : > { %p4187_p11 = scmp.lt.u32.totalorder %s5571_s24, %s4183_s12  ;;  %p4189_p13 = scmp.lt.u32.totalorder %s4183_s12, %s431_s22 }
 0x1e4   : > { %p4188_p12 = por %p4187_p11, %p4186_p10 }
 0x1e6   : > { %p4190_p0 = por %p4189_p13, %p4188_p12 }
 0x1e8   : > { %p4191_p1 = pnand %p4190_p0, %p4184_p9 }
 0x1ea   : > { %4194 = shalt.err (!%p4191_p1)  }
 0x1eb   : > { %s4195_s7 = scalar_lea.vmem %s441_s19, 16  ;;  %p4200_p3 = scmp.lt.s32.totalorder %s441_s19, %s5552_s17 }
 0x1ec   : > { %p4196_p2 = scmp.ne.s32.totalorder %s441_s19, %s4195_s7  ;;  %p4201_p6 = scmp.lt.s32.totalorder %s5580_s9, %s4195_s7 }
 0x1ee   : > { %p4202_p7 = por %p4201_p6, %p4200_p3 }
 0x1f0   : > { %p4203_p8 = pnand %p4202_p7, %p4196_p2 }
 0x1f2   : > { %4206 = shalt.err (!%p4203_p8)  }
 0x1f3   : > { %443 = dma.hbm_to_vmem [thread:$0]  %s431_s22, 16, %s441_s19, [#allocation5] }
 0x1f4   : > { %s5947_s21 = sld [smem:[#allocation7 + %s5932_s6]]  ;;  %s3545_s5 = sshll.u32 %s5929_s30, 4 }
 0x1f5   : > { %s5382_s1 = smov [#allocation2 + $0x14]   ;;  %s447_s8 = scalar_lea.hbm %s7031_s3, %s3545_s5 }
 0x1f6   : > { %s472_s25 = sshll.u32 %s5382_s1, 4  ;;  %s4207_s26 = scalar_lea.hbm %s447_s8, 16  ;;  %s5953_s25 = int_to_ptr.vmem [resolvable:$true] %s472_s25 }
 0x1f7   : > { %p4208_p9 = scmp.ne.s32.totalorder %s447_s8, %s4207_s26  ;;  %p4210_p10 = scmp.lt.u32.totalorder %s447_s8, %s7031_s3 }
 0x1f8   : > { %p4211_p11 = scmp.lt.u32.totalorder %s5571_s24, %s4207_s26  ;;  %p4213_p13 = scmp.lt.u32.totalorder %s4207_s26, %s447_s8 }
 0x1fa   : > { %p4212_p12 = por %p4211_p11, %p4210_p10 }
 0x1fc   : > { %p4214_p0 = por %p4213_p13, %p4212_p12 }
 0x1fe   : > { %p4215_p1 = pnand %p4214_p0, %p4208_p9 }
 0x200   : > { %4218 = shalt.err (!%p4215_p1)  }
 0x201   : > { %s4219_s19 = scalar_lea.vmem %s5938_s2, 16  ;;  %p4224_p3 = scmp.lt.s32.totalorder %s5938_s2, %s5552_s17 }
 0x202   : > { %p4220_p2 = scmp.ne.s32.totalorder %s5938_s2, %s4219_s19  ;;  %p4225_p6 = scmp.lt.s32.totalorder %s5580_s9, %s4219_s19 }
 0x204   : > { %p4226_p7 = por %p4225_p6, %p4224_p3 }
 0x206   : > { %p4227_p8 = pnand %p4226_p7, %p4220_p2 }
 0x208   : > { %4230 = shalt.err (!%p4227_p8)  }
 0x209   : > { %459 = dma.hbm_to_vmem [thread:$0]  %s447_s8, 16, %s5938_s2, [#allocation5] }
 0x20a   : > { %s5966_s11 = sadd.s32 21, %s5542_s13  ;;  %s5383_s30 = smov [#allocation2 + $0x15]  }
 0x20b   : > { %7044 = sst [smem:[#allocation200_spill]] %s5966_s11  ;;  %s488_s22 = sshll.u32 %s5383_s30, 4  ;;  %s5972_s22 = int_to_ptr.vmem [resolvable:$true] %s488_s22 }
 0x20c   : > { %s5969_s26 = sld [smem:[#allocation7 + %s5966_s11]]  ;;  %s3546_s5 = sshll.u32 %s5947_s21, 4 }
 0x20d   : > { %s463_s16 = scalar_lea.hbm %s7031_s3, %s3546_s5  ;;  %s5978_s7 = sadd.s32 22, %s5542_s13 }
 0x20e   : > { %7045 = sst [smem:[#allocation201_spill]] %s5978_s7  ;;  %s4231_s19 = scalar_lea.hbm %s463_s16, 16 }
 0x20f   : > { %p4232_p9 = scmp.ne.s32.totalorder %s463_s16, %s4231_s19  ;;  %p4234_p10 = scmp.lt.u32.totalorder %s463_s16, %s7031_s3 }
 0x210   : > { %p4235_p11 = scmp.lt.u32.totalorder %s5571_s24, %s4231_s19  ;;  %p4237_p13 = scmp.lt.u32.totalorder %s4231_s19, %s463_s16 }
 0x212   : > { %p4236_p12 = por %p4235_p11, %p4234_p10 }
 0x214   : > { %p4238_p0 = por %p4237_p13, %p4236_p12 }
 0x216   : > { %p4239_p1 = pnand %p4238_p0, %p4232_p9 }
 0x218   : > { %4242 = shalt.err (!%p4239_p1)  }
 0x219   : > { %s4243_s21 = scalar_lea.vmem %s5953_s25, 16  ;;  %p4248_p3 = scmp.lt.s32.totalorder %s5953_s25, %s5552_s17 }
 0x21a   : > { %p4244_p2 = scmp.ne.s32.totalorder %s5953_s25, %s4243_s21  ;;  %p4249_p6 = scmp.lt.s32.totalorder %s5580_s9, %s4243_s21 }
 0x21c   : > { %p4250_p7 = por %p4249_p6, %p4248_p3 }
 0x21e   : > { %p4251_p8 = pnand %p4250_p7, %p4244_p2 }
 0x220   : > { %4254 = shalt.err (!%p4251_p8)  }
 0x221   : > { %475 = dma.hbm_to_vmem [thread:$0]  %s463_s16, 16, %s5953_s25, [#allocation5] }
 0x222   : > { %s5991_s6 = sld [smem:[#allocation7 + %s5978_s7]]  ;;  %s5384_s8 = smov [#allocation2 + $0x16]  }
 0x223   : > { %s504_s30 = sshll.u32 %s5384_s8, 4  ;;  %s5994_s5 = sadd.s32 23, %s5542_s13  ;;  %s5997_s30 = int_to_ptr.vmem [resolvable:$true] %s504_s30 }
 0x224   : > { %7046 = sst [smem:[#allocation202_spill]] %s5994_s5  ;;  %s3547_s1 = sshll.u32 %s5969_s26, 4 }
 0x225   : > { %s479_s2 = scalar_lea.hbm %s7031_s3, %s3547_s1  ;;  %s6003_s21 = sld [smem:[#allocation7 + %s5994_s5]] }
 0x226   : > { %s4255_s11 = scalar_lea.hbm %s479_s2, 16  ;;  %p4258_p10 = scmp.lt.u32.totalorder %s479_s2, %s7031_s3 }
 0x227   : > { %p4256_p9 = scmp.ne.s32.totalorder %s479_s2, %s4255_s11  ;;  %p4259_p11 = scmp.lt.u32.totalorder %s5571_s24, %s4255_s11 }
 0x228   : > { %p4261_p13 = scmp.lt.u32.totalorder %s4255_s11, %s479_s2 }
 0x229   : > { %p4260_p12 = por %p4259_p11, %p4258_p10 }
 0x22b   : > { %p4262_p0 = por %p4261_p13, %p4260_p12 }
 0x22d   : > { %p4263_p1 = pnand %p4262_p0, %p4256_p9 }
 0x22f   : > { %4266 = shalt.err (!%p4263_p1)  }
 0x230   : > { %s4267_s26 = scalar_lea.vmem %s5972_s22, 16  ;;  %p4272_p3 = scmp.lt.s32.totalorder %s5972_s22, %s5552_s17 }
 0x231   : > { %p4268_p2 = scmp.ne.s32.totalorder %s5972_s22, %s4267_s26  ;;  %p4273_p6 = scmp.lt.s32.totalorder %s5580_s9, %s4267_s26 }
 0x233   : > { %p4274_p7 = por %p4273_p6, %p4272_p3 }
 0x235   : > { %p4275_p8 = pnand %p4274_p7, %p4268_p2 }
 0x237   : > { %4278 = shalt.err (!%p4275_p8)  }
 0x238   : > { %491 = dma.hbm_to_vmem [thread:$0]  %s479_s2, 16, %s5972_s22, [#allocation5] }
 0x239   : > { %s6016_s29 = sadd.s32 24, %s5542_s13  ;;  %s3548_s11 = sshll.u32 %s5991_s6, 4 }
 0x23a   : > { %7047 = sst [smem:[#allocation203_spill]] %s6016_s29  ;;  %s5385_s16 = smov [#allocation2 + $0x17]  }
 0x23b   : > { %s520_s8 = sshll.u32 %s5385_s16, 4  ;;  %s495_s19 = scalar_lea.hbm %s7031_s3, %s3548_s11  ;;  %s6022_s8 = int_to_ptr.vmem [resolvable:$true] %s520_s8 }
 0x23c   : > { %s4279_s25 = scalar_lea.hbm %s495_s19, 16  ;;  %p4282_p10 = scmp.lt.u32.totalorder %s495_s19, %s7031_s3 }
 0x23d   : > { %p4280_p9 = scmp.ne.s32.totalorder %s495_s19, %s4279_s25  ;;  %p4283_p11 = scmp.lt.u32.totalorder %s5571_s24, %s4279_s25 }
 0x23e   : > { %p4285_p13 = scmp.lt.u32.totalorder %s4279_s25, %s495_s19 }
 0x23f   : > { %p4284_p12 = por %p4283_p11, %p4282_p10 }
 0x241   : > { %p4286_p0 = por %p4285_p13, %p4284_p12 }
 0x243   : > { %p4287_p1 = pnand %p4286_p0, %p4280_p9 }
 0x245   : > { %4290 = shalt.err (!%p4287_p1)  }
 0x246   : > { %s4291_s22 = scalar_lea.vmem %s5997_s30, 16  ;;  %p4296_p3 = scmp.lt.s32.totalorder %s5997_s30, %s5552_s17 }
 0x247   : > { %p4292_p2 = scmp.ne.s32.totalorder %s5997_s30, %s4291_s22  ;;  %p4297_p6 = scmp.lt.s32.totalorder %s5580_s9, %s4291_s22 }
 0x249   : > { %p4298_p7 = por %p4297_p6, %p4296_p3 }
 0x24b   : > { %p4299_p8 = pnand %p4298_p7, %p4292_p2 }
 0x24d   : > { %4302 = shalt.err (!%p4299_p8)  }
 0x24e   : > { %507 = dma.hbm_to_vmem [thread:$0]  %s495_s19, 16, %s5997_s30, [#allocation5] }
 0x24f   : > { %s3549_s6 = sshll.u32 %s6003_s21, 4  ;;  %s6036_s5 = sld [smem:[#allocation7 + %s6016_s29]] }
 0x250   : > { %s511_s16 = scalar_lea.hbm %s7031_s3, %s3549_s6 }
 0x251   : > { %s4303_s1 = scalar_lea.hbm %s511_s16, 16  ;;  %p4306_p10 = scmp.lt.u32.totalorder %s511_s16, %s7031_s3 }
 0x252   : > { %p4304_p9 = scmp.ne.s32.totalorder %s511_s16, %s4303_s1  ;;  %p4307_p11 = scmp.lt.u32.totalorder %s5571_s24, %s4303_s1 }
 0x253   : > { %p4309_p13 = scmp.lt.u32.totalorder %s4303_s1, %s511_s16 }
 0x254   : > { %p4308_p12 = por %p4307_p11, %p4306_p10 }
 0x256   : > { %p4310_p0 = por %p4309_p13, %p4308_p12 }
 0x258   : > { %p4311_p1 = pnand %p4310_p0, %p4304_p9 }
 0x25a   : > { %4314 = shalt.err (!%p4311_p1)  }
 0x25b   : > { %s4315_s30 = scalar_lea.vmem %s6022_s8, 16  ;;  %p4320_p3 = scmp.lt.s32.totalorder %s6022_s8, %s5552_s17 }
 0x25c   : > { %p4316_p2 = scmp.ne.s32.totalorder %s6022_s8, %s4315_s30  ;;  %p4321_p6 = scmp.lt.s32.totalorder %s5580_s9, %s4315_s30 }
 0x25e   : > { %p4322_p7 = por %p4321_p6, %p4320_p3 }
 0x260   : > { %p4323_p8 = pnand %p4322_p7, %p4316_p2 }
 0x262   : > { %4326 = shalt.err (!%p4323_p8)  }
 0x263   : > { %523 = dma.hbm_to_vmem [thread:$0]  %s511_s16, 16, %s6022_s8, [#allocation5] }
 0x264   : > { %s5386_s21 = smov [#allocation2 + $0x18]   ;;  %s6052_s26 = sadd.s32 25, %s5542_s13 }
 0x265   : > { %s536_s19 = sshll.u32 %s5386_s21, 4  ;;  %7048 = sst [smem:[#allocation204_spill]] %s6052_s26  ;;  %s537_s19 = int_to_ptr.vmem [resolvable:$true] %s536_s19 }
 0x266   : > { %s6055_s22 = sld [smem:[#allocation7 + %s6052_s26]]  ;;  %s6058_s6 = sadd.s32 26, %s5542_s13 }
 0x267   : > { %7049 = sst [smem:[#allocation205_spill]] %s6058_s6  ;;  %s3550_s2 = sshll.u32 %s6036_s5, 4 }
 0x268   : > { %s5387_s11 = smov [#allocation2 + $0x19]   ;;  %s527_s30 = scalar_lea.hbm %s7031_s3, %s3550_s2 }
 0x269   : > { %s552_s1 = sshll.u32 %s5387_s11, 4  ;;  %s4327_s8 = scalar_lea.hbm %s527_s30, 16  ;;  %s6064_s1 = int_to_ptr.vmem [resolvable:$true] %s552_s1 }
 0x26a   : > { %p4328_p9 = scmp.ne.s32.totalorder %s527_s30, %s4327_s8  ;;  %p4330_p10 = scmp.lt.u32.totalorder %s527_s30, %s7031_s3 }
 0x26b   : > { %p4331_p11 = scmp.lt.u32.totalorder %s5571_s24, %s4327_s8  ;;  %p4333_p13 = scmp.lt.u32.totalorder %s4327_s8, %s527_s30 }
 0x26d   : > { %p4332_p12 = por %p4331_p11, %p4330_p10 }
 0x26f   : > { %p4334_p0 = por %p4333_p13, %p4332_p12 }
 0x271   : > { %p4335_p1 = pnand %p4334_p0, %p4328_p9 }
 0x273   : > { %4338 = shalt.err (!%p4335_p1)  }
 0x274   : > { %s4339_s5 = scalar_lea.vmem %s537_s19, 16  ;;  %p4344_p3 = scmp.lt.s32.totalorder %s537_s19, %s5552_s17 }
 0x275   : > { %p4340_p2 = scmp.ne.s32.totalorder %s537_s19, %s4339_s5  ;;  %p4345_p6 = scmp.lt.s32.totalorder %s5580_s9, %s4339_s5 }
 0x277   : > { %p4346_p7 = por %p4345_p6, %p4344_p3 }
 0x279   : > { %p4347_p8 = pnand %p4346_p7, %p4340_p2 }
 0x27b   : > { %4350 = shalt.err (!%p4347_p8)  }
 0x27c   : > { %539 = dma.hbm_to_vmem [thread:$0]  %s527_s30, 16, %s537_s19, [#allocation5] }
 0x27d   : > { %s6073_s2 = sld [smem:[#allocation7 + %s6058_s6]]  ;;  %s3551_s11 = sshll.u32 %s6055_s22, 4 }
 0x27e   : > { %s5388_s12 = smov [#allocation2 + $0x1a]   ;;  %s543_s21 = scalar_lea.hbm %s7031_s3, %s3551_s11 }
 0x27f   : > { %s568_s25 = sshll.u32 %s5388_s12, 4  ;;  %s4351_s26 = scalar_lea.hbm %s543_s21, 16  ;;  %s6079_s25 = int_to_ptr.vmem [resolvable:$true] %s568_s25 }
 0x280   : > { %p4352_p9 = scmp.ne.s32.totalorder %s543_s21, %s4351_s26  ;;  %p4354_p10 = scmp.lt.u32.totalorder %s543_s21, %s7031_s3 }
 0x281   : > { %p4355_p11 = scmp.lt.u32.totalorder %s5571_s24, %s4351_s26  ;;  %p4357_p13 = scmp.lt.u32.totalorder %s4351_s26, %s543_s21 }
 0x283   : > { %p4356_p12 = por %p4355_p11, %p4354_p10 }
 0x285   : > { %p4358_p0 = por %p4357_p13, %p4356_p12 }
 0x287   : > { %p4359_p1 = pnand %p4358_p0, %p4352_p9 }
 0x289   : > { %4362 = shalt.err (!%p4359_p1)  }
 0x28a   : > { %s4363_s19 = scalar_lea.vmem %s6064_s1, 16  ;;  %p4368_p3 = scmp.lt.s32.totalorder %s6064_s1, %s5552_s17 }
 0x28b   : > { %p4364_p2 = scmp.ne.s32.totalorder %s6064_s1, %s4363_s19  ;;  %p4369_p6 = scmp.lt.s32.totalorder %s5580_s9, %s4363_s19 }
 0x28d   : > { %p4370_p7 = por %p4369_p6, %p4368_p3 }
 0x28f   : > { %p4371_p8 = pnand %p4370_p7, %p4364_p2 }
 0x291   : > { %4374 = shalt.err (!%p4371_p8)  }
 0x292   : > { %555 = dma.hbm_to_vmem [thread:$0]  %s543_s21, 16, %s6064_s1, [#allocation5] }
 0x293   : > { %s6092_s29 = sadd.s32 27, %s5542_s13  ;;  %s5389_s22 = smov [#allocation2 + $0x1b]  }
 0x294   : > { %7050 = sst [smem:[#allocation206_spill]] %s6092_s29  ;;  %s584_s30 = sshll.u32 %s5389_s22, 4  ;;  %s6098_s30 = int_to_ptr.vmem [resolvable:$true] %s584_s30 }
 0x295   : > { %s6095_s26 = sld [smem:[#allocation7 + %s6092_s29]]  ;;  %s3552_s11 = sshll.u32 %s6073_s2, 4 }
 0x296   : > { %s559_s16 = scalar_lea.hbm %s7031_s3, %s3552_s11  ;;  %s6104_s5 = sadd.s32 28, %s5542_s13 }
 0x297   : > { %7051 = sst [smem:[#allocation207_spill]] %s6104_s5  ;;  %s4375_s19 = scalar_lea.hbm %s559_s16, 16 }
 0x298   : > { %p4376_p9 = scmp.ne.s32.totalorder %s559_s16, %s4375_s19  ;;  %p4378_p10 = scmp.lt.u32.totalorder %s559_s16, %s7031_s3 }
 0x299   : > { %p4379_p11 = scmp.lt.u32.totalorder %s5571_s24, %s4375_s19  ;;  %p4381_p13 = scmp.lt.u32.totalorder %s4375_s19, %s559_s16 }
 0x29b   : > { %p4380_p12 = por %p4379_p11, %p4378_p10 }
 0x29d   : > { %p4382_p0 = por %p4381_p13, %p4380_p12 }
 0x29f   : > { %p4383_p1 = pnand %p4382_p0, %p4376_p9 }
 0x2a1   : > { %4386 = shalt.err (!%p4383_p1)  }
 0x2a2   : > { %s4387_s2 = scalar_lea.vmem %s6079_s25, 16  ;;  %p4392_p3 = scmp.lt.s32.totalorder %s6079_s25, %s5552_s17 }
 0x2a3   : > { %p4388_p2 = scmp.ne.s32.totalorder %s6079_s25, %s4387_s2  ;;  %p4393_p6 = scmp.lt.s32.totalorder %s5580_s9, %s4387_s2 }
 0x2a5   : > { %p4394_p7 = por %p4393_p6, %p4392_p3 }
 0x2a7   : > { %p4395_p8 = pnand %p4394_p7, %p4388_p2 }
 0x2a9   : > { %4398 = shalt.err (!%p4395_p8)  }
 0x2aa   : > { %571 = dma.hbm_to_vmem [thread:$0]  %s559_s16, 16, %s6079_s25, [#allocation5] }
 0x2ab   : > { %s6117_s6 = sld [smem:[#allocation7 + %s6104_s5]]  ;;  %s5390_s21 = smov [#allocation2 + $0x1c]  }
 0x2ac   : > { %s600_s22 = sshll.u32 %s5390_s21, 4  ;;  %s6120_s11 = sadd.s32 29, %s5542_s13  ;;  %s6123_s22 = int_to_ptr.vmem [resolvable:$true] %s600_s22 }
 0x2ad   : > { %7052 = sst [smem:[#allocation208_spill]] %s6120_s11  ;;  %s3553_s12 = sshll.u32 %s6095_s26, 4 }
 0x2ae   : > { %s575_s1 = scalar_lea.hbm %s7031_s3, %s3553_s12  ;;  %s6129_s2 = sld [smem:[#allocation7 + %s6120_s11]] }
 0x2af   : > { %s4399_s29 = scalar_lea.hbm %s575_s1, 16  ;;  %p4402_p10 = scmp.lt.u32.totalorder %s575_s1, %s7031_s3 }
 0x2b0   : > { %p4400_p9 = scmp.ne.s32.totalorder %s575_s1, %s4399_s29  ;;  %p4403_p11 = scmp.lt.u32.totalorder %s5571_s24, %s4399_s29 }
 0x2b1   : > { %p4405_p13 = scmp.lt.u32.totalorder %s4399_s29, %s575_s1 }
 0x2b2   : > { %p4404_p12 = por %p4403_p11, %p4402_p10 }
 0x2b4   : > { %p4406_p0 = por %p4405_p13, %p4404_p12 }
 0x2b6   : > { %p4407_p1 = pnand %p4406_p0, %p4400_p9 }
 0x2b8   : > { %4410 = shalt.err (!%p4407_p1)  }
 0x2b9   : > { %s4411_s26 = scalar_lea.vmem %s6098_s30, 16  ;;  %p4416_p3 = scmp.lt.s32.totalorder %s6098_s30, %s5552_s17 }
 0x2ba   : > { %p4412_p2 = scmp.ne.s32.totalorder %s6098_s30, %s4411_s26  ;;  %p4417_p6 = scmp.lt.s32.totalorder %s5580_s9, %s4411_s26 }
 0x2bc   : > { %p4418_p7 = por %p4417_p6, %p4416_p3 }
 0x2be   : > { %p4419_p8 = pnand %p4418_p7, %p4412_p2 }
 0x2c0   : > { %4422 = shalt.err (!%p4419_p8)  }
 0x2c1   : > { %587 = dma.hbm_to_vmem [thread:$0]  %s575_s1, 16, %s6098_s30, [#allocation5] }
 0x2c2   : > { %s6142_s7 = sadd.s32 30, %s5542_s13  ;;  %s3554_s29 = sshll.u32 %s6117_s6, 4 }
 0x2c3   : > { %7053 = sst [smem:[#allocation209_spill]] %s6142_s7  ;;  %s5391_s16 = smov [#allocation2 + $0x1d]  }
 0x2c4   : > { %s616_s21 = sshll.u32 %s5391_s16, 4  ;;  %s591_s19 = scalar_lea.hbm %s7031_s3, %s3554_s29  ;;  %s6148_s21 = int_to_ptr.vmem [resolvable:$true] %s616_s21 }
 0x2c5   : > { %s4423_s25 = scalar_lea.hbm %s591_s19, 16  ;;  %p4426_p10 = scmp.lt.u32.totalorder %s591_s19, %s7031_s3 }
 0x2c6   : > { %p4424_p9 = scmp.ne.s32.totalorder %s591_s19, %s4423_s25  ;;  %p4427_p11 = scmp.lt.u32.totalorder %s5571_s24, %s4423_s25 }
 0x2c7   : > { %p4429_p13 = scmp.lt.u32.totalorder %s4423_s25, %s591_s19 }
 0x2c8   : > { %p4428_p12 = por %p4427_p11, %p4426_p10 }
 0x2ca   : > { %p4430_p0 = por %p4429_p13, %p4428_p12 }
 0x2cc   : > { %p4431_p1 = pnand %p4430_p0, %p4424_p9 }
 0x2ce   : > { %4434 = shalt.err (!%p4431_p1)  }
 0x2cf   : > { %s4435_s30 = scalar_lea.vmem %s6123_s22, 16  ;;  %p4440_p3 = scmp.lt.s32.totalorder %s6123_s22, %s5552_s17 }
 0x2d0   : > { %p4436_p2 = scmp.ne.s32.totalorder %s6123_s22, %s4435_s30  ;;  %p4441_p6 = scmp.lt.s32.totalorder %s5580_s9, %s4435_s30 }
 0x2d2   : > { %p4442_p7 = por %p4441_p6, %p4440_p3 }
 0x2d4   : > { %p4443_p8 = pnand %p4442_p7, %p4436_p2 }
 0x2d6   : > { %4446 = shalt.err (!%p4443_p8)  }
 0x2d7   : > { %603 = dma.hbm_to_vmem [thread:$0]  %s591_s19, 16, %s6123_s22, [#allocation5] }
 0x2d8   : > { %s3555_s6 = sshll.u32 %s6129_s2, 4  ;;  %s6162_s11 = sld [smem:[#allocation7 + %s6142_s7]] }
 0x2d9   : > { %s607_s16 = scalar_lea.hbm %s7031_s3, %s3555_s6 }
 0x2da   : > { %s4447_s12 = scalar_lea.hbm %s607_s16, 16  ;;  %p4450_p10 = scmp.lt.u32.totalorder %s607_s16, %s7031_s3 }
 0x2db   : > { %p4448_p9 = scmp.ne.s32.totalorder %s607_s16, %s4447_s12  ;;  %p4451_p11 = scmp.lt.u32.totalorder %s5571_s24, %s4447_s12 }
 0x2dc   : > { %p4453_p13 = scmp.lt.u32.totalorder %s4447_s12, %s607_s16 }
 0x2dd   : > { %p4452_p12 = por %p4451_p11, %p4450_p10 }
 0x2df   : > { %p4454_p0 = por %p4453_p13, %p4452_p12 }
 0x2e1   : > { %p4455_p1 = pnand %p4454_p0, %p4448_p9 }
 0x2e3   : > { %4458 = shalt.err (!%p4455_p1)  }
 0x2e4   : > { %s4459_s22 = scalar_lea.vmem %s6148_s21, 16  ;;  %p4464_p3 = scmp.lt.s32.totalorder %s6148_s21, %s5552_s17 }
 0x2e5   : > { %p4460_p2 = scmp.ne.s32.totalorder %s6148_s21, %s4459_s22  ;;  %p4465_p6 = scmp.lt.s32.totalorder %s5580_s9, %s4459_s22 }
 0x2e7   : > { %p4466_p7 = por %p4465_p6, %p4464_p3 }
 0x2e9   : > { %p4467_p8 = pnand %p4466_p7, %p4460_p2 }
 0x2eb   : > { %4470 = shalt.err (!%p4467_p8)  }
 0x2ec   : > { %619 = dma.hbm_to_vmem [thread:$0]  %s607_s16, 16, %s6148_s21, [#allocation5] }
 0x2ed   : > { %s5392_s2 = smov [#allocation2 + $0x1e]   ;;  %s6178_s26 = sadd.s32 31, %s5542_s13 }
 0x2ee   : > { %s632_s19 = sshll.u32 %s5392_s2, 4  ;;  %7054 = sst [smem:[#allocation210_spill]] %s6178_s26  ;;  %s633_s19 = int_to_ptr.vmem [resolvable:$true] %s632_s19 }
 0x2ef   : > { %s637_s30 = sld [smem:[#allocation7 + %s6178_s26]]  ;;  %s3556_s1 = sshll.u32 %s6162_s11, 4 }
 0x2f0   : > { %s6182_s6 = sld [smem:[#allocation8 + %s5542_s13]]  ;;  %s5393_s29 = smov [#allocation2 + $0x1f]  }
 0x2f1   : > { %s648_s12 = sshll.u32 %s5393_s29, 4  ;;  %s623_s22 = scalar_lea.hbm %s7031_s3, %s3556_s1  ;;  %s649_s12 = int_to_ptr.vmem [resolvable:$true] %s648_s12 }
 0x2f2   : > { %s4471_s7 = scalar_lea.hbm %s623_s22, 16  ;;  %p4474_p10 = scmp.lt.u32.totalorder %s623_s22, %s7031_s3 }
 0x2f3   : > { %p4472_p9 = scmp.ne.s32.totalorder %s623_s22, %s4471_s7  ;;  %p4475_p11 = scmp.lt.u32.totalorder %s5571_s24, %s4471_s7 }
 0x2f4   : > { %p4477_p13 = scmp.lt.u32.totalorder %s4471_s7, %s623_s22 }
 0x2f5   : > { %p4476_p12 = por %p4475_p11, %p4474_p10 }
 0x2f7   : > { %p4478_p0 = por %p4477_p13, %p4476_p12 }
 0x2f9   : > { %p4479_p1 = pnand %p4478_p0, %p4472_p9 }
 0x2fb   : > { %4482 = shalt.err (!%p4479_p1)  }
 0x2fc   : > { %s4483_s16 = scalar_lea.vmem %s633_s19, 16  ;;  %p4488_p3 = scmp.lt.s32.totalorder %s633_s19, %s5552_s17 }
 0x2fd   : > { %p4484_p2 = scmp.ne.s32.totalorder %s633_s19, %s4483_s16  ;;  %p4489_p6 = scmp.lt.s32.totalorder %s5580_s9, %s4483_s16 }
 0x2ff   : > { %p4490_p7 = por %p4489_p6, %p4488_p3 }
 0x301   : > { %p4491_p8 = pnand %p4490_p7, %p4484_p2 }
 0x303   : > { %4494 = shalt.err (!%p4491_p8)  }
 0x304   : > { %635 = dma.hbm_to_vmem [thread:$0]  %s623_s22, 16, %s633_s19, [#allocation5] }
 0x305   : > { %s3557_s5 = sshll.u32 %s637_s30, 4  ;;  %s7055_s4 = sld [smem:[#allocation213_spill]] }
 0x306   : > { %s639_s7 = scalar_lea.hbm %s7031_s3, %s3557_s5 }
 0x307   : > { %s4495_s25 = scalar_lea.hbm %s639_s7, 16  ;;  %p4498_p10 = scmp.lt.u32.totalorder %s639_s7, %s7031_s3 }
 0x308   : > { %p4496_p9 = scmp.ne.s32.totalorder %s639_s7, %s4495_s25  ;;  %p4499_p11 = scmp.lt.u32.totalorder %s5571_s24, %s4495_s25 }
 0x309   : > { %p4501_p13 = scmp.lt.u32.totalorder %s4495_s25, %s639_s7 }
 0x30a   : > { %p4500_p12 = por %p4499_p11, %p4498_p10 }
 0x30b   : > { %s653_s8 = scalar_lea.vmem %s7055_s4, %s6182_s6 }
 0x30c   : > { %p4502_p0 = por %p4501_p13, %p4500_p12 }
 0x30e   : > { %p4503_p1 = pnand %p4502_p0, %p4496_p9 }
 0x310   : > { %4506 = shalt.err (!%p4503_p1)  }
 0x311   : > { %s4507_s19 = scalar_lea.vmem %s649_s12, 16  ;;  %p4512_p3 = scmp.lt.s32.totalorder %s649_s12, %s5552_s17 }
 0x312   : > { %p4508_p2 = scmp.ne.s32.totalorder %s649_s12, %s4507_s19  ;;  %p4513_p6 = scmp.lt.s32.totalorder %s5580_s9, %s4507_s19 }
 0x314   : > { %p4514_p7 = por %p4513_p6, %p4512_p3 }
 0x316   : > { %p4515_p8 = pnand %p4514_p7, %p4508_p2 }
 0x318   : > { %4518 = shalt.err (!%p4515_p8)  }
 0x319   : > { %651 = dma.hbm_to_vmem [thread:$0]  %s639_s7, 16, %s649_s12, [#allocation5]  ;;  %v672_v0 = vld [vmem:[%s653_s8] sm:$0x1] }
 0x31a   : > { %673 = vst [vmem:[#allocation3] sm:$0x1] %v672_v0  ;;  %s6208_s30 = scalar_lea.vmem [#allocation10], %s5546_s14 }
 0x31b   : > { %7056 = sst [smem:[#allocation211_spill]] %s6208_s30 }
 0x31c   : > { %698 = vsyncadd [#allocation5 + $0x1], 16  ;;  %s699_s24 = sld [smem:[#allocation8 + %s5550_s18]] }
 0x322   : > { %s700_s5 = scalar_lea.vmem %s7055_s4, %s699_s24 }
 0x323   : > { %v719_v1 = vld [vmem:[%s700_s5] sm:$0x1] }
 0x324   : > { %720 = vst [vmem:[#allocation3 + $0x1] sm:$0x1] %v719_v1 }
 0x325   : > { %745 = vsyncadd [#allocation5 + $0x1], 16  ;;  %s746_s17 = sld [smem:[#allocation8 + %s5558_s20]] }
 0x32b   : > { %s747_s12 = scalar_lea.vmem %s7055_s4, %s746_s17 }
 0x32c   : > { %v766_v2 = vld [vmem:[%s747_s12] sm:$0x1] }
 0x32d   : > { %767 = vst [vmem:[#allocation3 + $0x2] sm:$0x1] %v766_v2 }
 0x32e   : > { %792 = vsyncadd [#allocation5 + $0x1], 16  ;;  %s793_s14 = sld [smem:[#allocation8 + %s5604_s28]] }
 0x334   : > { %s794_s1 = scalar_lea.vmem %s7055_s4, %s793_s14 }
 0x335   : > { %v813_v3 = vld [vmem:[%s794_s1] sm:$0x1] }
 0x336   : > { %814 = vst [vmem:[#allocation3 + $0x3] sm:$0x1] %v813_v3 }
 0x337   : > { %839 = vsyncadd [#allocation5 + $0x1], 16  ;;  %s840_s29 = sld [smem:[#allocation8 + %s5623_s0]] }
 0x33d   : > { %s841_s21 = scalar_lea.vmem %s7055_s4, %s840_s29 }
 0x33e   : > { %v860_v4 = vld [vmem:[%s841_s21] sm:$0x1] }
 0x33f   : > { %861 = vst [vmem:[#allocation3 + $0x4] sm:$0x1] %v860_v4 }
 0x340   : > { %886 = vsyncadd [#allocation5 + $0x1], 16  ;;  %s887_s16 = sld [smem:[#allocation8 + %s5627_s15]] }
 0x346   : > { %s888_s6 = scalar_lea.vmem %s7055_s4, %s887_s16 }
 0x347   : > { %v907_v5 = vld [vmem:[%s888_s6] sm:$0x1] }
 0x348   : > { %908 = vst [vmem:[#allocation3 + $0x5] sm:$0x1] %v907_v5 }
 0x349   : > { %933 = vsyncadd [#allocation5 + $0x1], 16  ;;  %s934_s22 = sld [smem:[#allocation8 + %s5658_s23]] }
 0x34f   : > { %s935_s9 = scalar_lea.vmem %s7055_s4, %s934_s22 }
 0x350   : > { %v954_v6 = vld [vmem:[%s935_s9] sm:$0x1] }
 0x351   : > { %955 = vst [vmem:[#allocation3 + $0x6] sm:$0x1] %v954_v6 }
 0x352   : > { %980 = vsyncadd [#allocation5 + $0x1], 16  ;;  %s981_s11 = sld [smem:[#allocation8 + %s5674_s27]] }
 0x358   : > { %s982_s2 = scalar_lea.vmem %s7055_s4, %s981_s11 }
 0x359   : > { %v1001_v7 = vld [vmem:[%s982_s2] sm:$0x1] }
 0x35a   : > { %1002 = vst [vmem:[#allocation3 + $0x7] sm:$0x1] %v1001_v7 }
 0x35b   : > { %1027 = vsyncadd [#allocation5 + $0x1], 16  ;;  %s1028_s7 = sld [smem:[#allocation8 + %s5680_s10]] }
 0x361   : > { %s1029_s8 = scalar_lea.vmem %s7055_s4, %s1028_s7 }
 0x362   : > { %v1048_v8 = vld [vmem:[%s1029_s8] sm:$0x1] }
 0x363   : > { %1049 = vst [vmem:[#allocation3 + $0x8] sm:$0x1] %v1048_v8 }
 0x364   : > { %1074 = vsyncadd [#allocation5 + $0x1], 16  ;;  %s7057_s25 = sld [smem:[#allocation188_spill]] }
 0x36a   : > { %s1075_s21 = sld [smem:[#allocation8 + %s7057_s25]] }
 0x370   : > { %s1076_s24 = scalar_lea.vmem %s7055_s4, %s1075_s21 }
 0x371   : > { %v1095_v9 = vld [vmem:[%s1076_s24] sm:$0x1] }
 0x372   : > { %1096 = vst [vmem:[#allocation3 + $0x9] sm:$0x1] %v1095_v9 }
 0x373   : > { %1121 = vsyncadd [#allocation5 + $0x1], 16  ;;  %s7058_s6 = sld [smem:[#allocation189_spill]] }
 0x379   : > { %s1122_s22 = sld [smem:[#allocation8 + %s7058_s6]] }
 0x37f   : > { %s1123_s9 = scalar_lea.vmem %s7055_s4, %s1122_s22 }
 0x380   : > { %v1142_v10 = vld [vmem:[%s1123_s9] sm:$0x1] }
 0x381   : > { %1143 = vst [vmem:[#allocation3 + $0xa] sm:$0x1] %v1142_v10 }
 0x382   : > { %1168 = vsyncadd [#allocation5 + $0x1], 16  ;;  %s7059_s11 = sld [smem:[#allocation190_spill]] }
 0x388   : > { %s1169_s12 = sld [smem:[#allocation8 + %s7059_s11]] }
 0x38e   : > { %s1170_s7 = scalar_lea.vmem %s7055_s4, %s1169_s12 }
 0x38f   : > { %v1189_v11 = vld [vmem:[%s1170_s7] sm:$0x1] }
 0x390   : > { %1190 = vst [vmem:[#allocation3 + $0xb] sm:$0x1] %v1189_v11 }
 0x391   : > { %1215 = vsyncadd [#allocation5 + $0x1], 16  ;;  %s7060_s1 = sld [smem:[#allocation191_spill]] }
 0x397   : > { %s1216_s29 = sld [smem:[#allocation8 + %s7060_s1]] }
 0x39d   : > { %s1217_s16 = scalar_lea.vmem %s7055_s4, %s1216_s29 }
 0x39e   : > { %v1236_v12 = vld [vmem:[%s1217_s16] sm:$0x1] }
 0x39f   : > { %1237 = vst [vmem:[#allocation3 + $0xc] sm:$0x1] %v1236_v12 }
 0x3a0   : > { %1262 = vsyncadd [#allocation5 + $0x1], 16  ;;  %s7061_s19 = sld [smem:[#allocation192_spill]] }
 0x3a6   : > { %s1263_s24 = sld [smem:[#allocation8 + %s7061_s19]] }
 0x3ac   : > { %s1264_s17 = scalar_lea.vmem %s7055_s4, %s1263_s24 }
 0x3ad   : > { %v1283_v13 = vld [vmem:[%s1264_s17] sm:$0x1] }
 0x3ae   : > { %1284 = vst [vmem:[#allocation3 + $0xd] sm:$0x1] %v1283_v13 }
 0x3af   : > { %1309 = vsyncadd [#allocation5 + $0x1], 16  ;;  %s7062_s9 = sld [smem:[#allocation193_spill]] }
 0x3b5   : > { %s1310_s12 = sld [smem:[#allocation8 + %s7062_s9]] }
 0x3bb   : > { %s1311_s7 = scalar_lea.vmem %s7055_s4, %s1310_s12 }
 0x3bc   : > { %v1330_v14 = vld [vmem:[%s1311_s7] sm:$0x1] }
 0x3bd   : > { %1331 = vst [vmem:[#allocation3 + $0xe] sm:$0x1] %v1330_v14 }
 0x3be   : > { %1356 = vsyncadd [#allocation5 + $0x1], 16  ;;  %s7063_s29 = sld [smem:[#allocation194_spill]] }
 0x3c4   : > { %s1357_s8 = sld [smem:[#allocation8 + %s7063_s29]] }
 0x3ca   : > { %s1358_s3 = scalar_lea.vmem %s7055_s4, %s1357_s8 }
 0x3cb   : > { %v1377_v15 = vld [vmem:[%s1358_s3] sm:$0x1] }
 0x3cc   : > { %1378 = vst [vmem:[#allocation3 + $0xf] sm:$0x1] %v1377_v15 }
 0x3cd   : > { %1403 = vsyncadd [#allocation5 + $0x1], 16  ;;  %s7064_s24 = sld [smem:[#allocation195_spill]] }
 0x3d3   : > { %s1404_s22 = sld [smem:[#allocation8 + %s7064_s24]] }
 0x3d9   : > { %s1405_s30 = scalar_lea.vmem %s7055_s4, %s1404_s22 }
 0x3da   : > { %v1424_v16 = vld [vmem:[%s1405_s30] sm:$0x1] }
 0x3db   : > { %1425 = vst [vmem:[#allocation3 + $0x10] sm:$0x1] %v1424_v16 }
 0x3dc   : > { %1450 = vsyncadd [#allocation5 + $0x1], 16  ;;  %s7065_s12 = sld [smem:[#allocation196_spill]] }
 0x3e2   : > { %s1451_s14 = sld [smem:[#allocation8 + %s7065_s12]] }
 0x3e8   : > { %s1452_s29 = scalar_lea.vmem %s7055_s4, %s1451_s14 }
 0x3e9   : > { %v1471_v17 = vld [vmem:[%s1452_s29] sm:$0x1] }
 0x3ea   : > { %1472 = vst [vmem:[#allocation3 + $0x11] sm:$0x1] %v1471_v17 }
 0x3eb   : > { %1497 = vsyncadd [#allocation5 + $0x1], 16  ;;  %s7066_s3 = sld [smem:[#allocation197_spill]] }
 0x3f1   : > { %s1498_s8 = sld [smem:[#allocation8 + %s7066_s3]] }
 0x3f7   : > { %s1499_s24 = scalar_lea.vmem %s7055_s4, %s1498_s8 }
 0x3f8   : > { %v1518_v18 = vld [vmem:[%s1499_s24] sm:$0x1] }
 0x3f9   : > { %1519 = vst [vmem:[#allocation3 + $0x12] sm:$0x1] %v1518_v18 }
 0x3fa   : > { %1544 = vsyncadd [#allocation5 + $0x1], 16  ;;  %s7067_s30 = sld [smem:[#allocation198_spill]] }
 0x400   : > { %s1545_s22 = sld [smem:[#allocation8 + %s7067_s30]] }
 0x406   : > { %s1546_s12 = scalar_lea.vmem %s7055_s4, %s1545_s22 }
 0x407   : > { %v1565_v19 = vld [vmem:[%s1546_s12] sm:$0x1] }
 0x408   : > { %1566 = vst [vmem:[#allocation3 + $0x13] sm:$0x1] %v1565_v19 }
 0x409   : > { %1591 = vsyncadd [#allocation5 + $0x1], 16  ;;  %s7068_s29 = sld [smem:[#allocation199_spill]] }
 0x40f   : > { %s1592_s14 = sld [smem:[#allocation8 + %s7068_s29]] }
 0x415   : > { %s1593_s3 = scalar_lea.vmem %s7055_s4, %s1592_s14 }
 0x416   : > { %v1612_v20 = vld [vmem:[%s1593_s3] sm:$0x1] }
 0x417   : > { %1613 = vst [vmem:[#allocation3 + $0x14] sm:$0x1] %v1612_v20 }
 0x418   : > { %1638 = vsyncadd [#allocation5 + $0x1], 16  ;;  %s7069_s24 = sld [smem:[#allocation200_spill]] }
 0x41e   : > { %s1639_s8 = sld [smem:[#allocation8 + %s7069_s24]] }
 0x424   : > { %s1640_s30 = scalar_lea.vmem %s7055_s4, %s1639_s8 }
 0x425   : > { %v1659_v21 = vld [vmem:[%s1640_s30] sm:$0x1] }
 0x426   : > { %1660 = vst [vmem:[#allocation3 + $0x15] sm:$0x1] %v1659_v21 }
 0x427   : > { %1685 = vsyncadd [#allocation5 + $0x1], 16  ;;  %s7070_s12 = sld [smem:[#allocation201_spill]] }
 0x42d   : > { %s1686_s22 = sld [smem:[#allocation8 + %s7070_s12]] }
 0x433   : > { %s1687_s29 = scalar_lea.vmem %s7055_s4, %s1686_s22 }
 0x434   : > { %v1706_v22 = vld [vmem:[%s1687_s29] sm:$0x1] }
 0x435   : > { %1707 = vst [vmem:[#allocation3 + $0x16] sm:$0x1] %v1706_v22 }
 0x436   : > { %1732 = vsyncadd [#allocation5 + $0x1], 16  ;;  %s7071_s3 = sld [smem:[#allocation202_spill]] }
 0x43c   : > { %s1733_s14 = sld [smem:[#allocation8 + %s7071_s3]] }
 0x442   : > { %s1734_s24 = scalar_lea.vmem %s7055_s4, %s1733_s14 }
 0x443   : > { %v1753_v23 = vld [vmem:[%s1734_s24] sm:$0x1] }
 0x444   : > { %1754 = vst [vmem:[#allocation3 + $0x17] sm:$0x1] %v1753_v23 }
 0x445   : > { %1779 = vsyncadd [#allocation5 + $0x1], 16  ;;  %s7072_s30 = sld [smem:[#allocation203_spill]] }
 0x44b   : > { %s1780_s8 = sld [smem:[#allocation8 + %s7072_s30]] }
 0x451   : > { %s1781_s12 = scalar_lea.vmem %s7055_s4, %s1780_s8 }
 0x452   : > { %v1800_v24 = vld [vmem:[%s1781_s12] sm:$0x1] }
 0x453   : > { %1801 = vst [vmem:[#allocation3 + $0x18] sm:$0x1] %v1800_v24 }
 0x454   : > { %1826 = vsyncadd [#allocation5 + $0x1], 16  ;;  %s7073_s29 = sld [smem:[#allocation204_spill]] }
 0x45a   : > { %s1827_s22 = sld [smem:[#allocation8 + %s7073_s29]] }
 0x460   : > { %s1828_s3 = scalar_lea.vmem %s7055_s4, %s1827_s22 }
 0x461   : > { %v1847_v25 = vld [vmem:[%s1828_s3] sm:$0x1] }
 0x462   : > { %1848 = vst [vmem:[#allocation3 + $0x19] sm:$0x1] %v1847_v25 }
 0x463   : > { %1873 = vsyncadd [#allocation5 + $0x1], 16  ;;  %s7074_s24 = sld [smem:[#allocation205_spill]] }
 0x469   : > { %s1874_s14 = sld [smem:[#allocation8 + %s7074_s24]] }
 0x46f   : > { %s1875_s30 = scalar_lea.vmem %s7055_s4, %s1874_s14 }
 0x470   : > { %v1894_v26 = vld [vmem:[%s1875_s30] sm:$0x1] }
 0x471   : > { %1895 = vst [vmem:[#allocation3 + $0x1a] sm:$0x1] %v1894_v26 }
 0x472   : > { %1920 = vsyncadd [#allocation5 + $0x1], 16  ;;  %s7075_s12 = sld [smem:[#allocation206_spill]] }
 0x478   : > { %s1921_s8 = sld [smem:[#allocation8 + %s7075_s12]] }
 0x47e   : > { %s1922_s29 = scalar_lea.vmem %s7055_s4, %s1921_s8 }
 0x47f   : > { %v1941_v27 = vld [vmem:[%s1922_s29] sm:$0x1] }
 0x480   : > { %1942 = vst [vmem:[#allocation3 + $0x1b] sm:$0x1] %v1941_v27 }
 0x481   : > { %1967 = vsyncadd [#allocation5 + $0x1], 16  ;;  %s7076_s3 = sld [smem:[#allocation207_spill]] }
 0x487   : > { %s1968_s22 = sld [smem:[#allocation8 + %s7076_s3]] }
 0x48d   : > { %s1969_s24 = scalar_lea.vmem %s7055_s4, %s1968_s22 }
 0x48e   : > { %v1988_v28 = vld [vmem:[%s1969_s24] sm:$0x1] }
 0x48f   : > { %1989 = vst [vmem:[#allocation3 + $0x1c] sm:$0x1] %v1988_v28 }
 0x490   : > { %2014 = vsyncadd [#allocation5 + $0x1], 16  ;;  %s7077_s30 = sld [smem:[#allocation208_spill]] }
 0x496   : > { %s2015_s14 = sld [smem:[#allocation8 + %s7077_s30]] }
 0x49c   : > { %s2016_s12 = scalar_lea.vmem %s7055_s4, %s2015_s14 }
 0x49d   : > { %v2035_v29 = vld [vmem:[%s2016_s12] sm:$0x1] }
 0x49e   : > { %2036 = vst [vmem:[#allocation3 + $0x1d] sm:$0x1] %v2035_v29 }
 0x49f   : > { %2061 = vsyncadd [#allocation5 + $0x1], 16  ;;  %s7078_s29 = sld [smem:[#allocation209_spill]] }
 0x4a5   : > { %s2062_s8 = sld [smem:[#allocation8 + %s7078_s29]] }
 0x4ab   : > { %s2063_s3 = scalar_lea.vmem %s7055_s4, %s2062_s8 }
 0x4ac   : > { %v2082_v30 = vld [vmem:[%s2063_s3] sm:$0x1] }
 0x4ad   : > { %2083 = vst [vmem:[#allocation3 + $0x1e] sm:$0x1] %v2082_v30 }
 0x4ae   : > { %2108 = vsyncadd [#allocation5 + $0x1], 16  ;;  %s2109_s24 = sld [smem:[#allocation8 + %s6178_s26]] }
 0x4b4   : > { %s2110_s17 = scalar_lea.vmem %s7055_s4, %s2109_s24 }
 0x4b5   : > { %v2129_v31 = vld [vmem:[%s2110_s17] sm:$0x1] }
 0x4b6   : > { %2130 = vst [vmem:[#allocation3 + $0x1f] sm:$0x1] %v2129_v31 }
 0x4b7   : > { %2155 = vsyncadd [#allocation5 + $0x1], 16  ;;  %s2156_s12 = sld [smem:[#allocation9 + %s5542_s13]]  ;;  %s5394_s14 = smov [#allocation4]  }
 0x4b8   : > { %s2167_s2 = sshll.u32 %s5394_s14, 4  ;;  %s6336_s7 = sld [smem:[#allocation9 + %s5550_s18]]  ;;  %s6338_s2 = int_to_ptr.vmem [resolvable:$true] %s2167_s2 }
 0x4b9   : > { %s5395_s3 = smov [#allocation4 + $0x1]   ;;  %s6341_s21 = sld [smem:[#allocation9 + %s5558_s20]] }
 0x4ba   : > { %s2182_s8 = sshll.u32 %s5395_s3, 4  ;;  %s5396_s16 = smov [#allocation4 + $0x2]   ;;  %s6343_s8 = int_to_ptr.vmem [resolvable:$true] %s2182_s8 }
 0x4bb   : > { %s2197_s24 = sshll.u32 %s5396_s16, 4  ;;  %s6346_s22 = sld [smem:[#allocation9 + %s5604_s28]]  ;;  %s6348_s24 = int_to_ptr.vmem [resolvable:$true] %s2197_s24 }
 0x4bc   : > { %s7079_s18 = sld [smem:[#allocation214_spill]] }
 0x4bd   : > { %s3558_s5 = sshll.u32 %s2156_s12, 4 }
 0x4be   : > { %s3559_s4 = sshll.u32 %s6336_s7, 4 }
 0x4c2   : > { %s2158_s14 = scalar_lea.hbm %s7079_s18, %s3558_s5  ;;  %s6357_s20 = scalar_lea.hbm %s7079_s18, 2048 }
 0x4c3   : > { %s4519_s26 = scalar_lea.hbm %s2158_s14, 16  ;;  %p4522_p10 = scmp.lt.u32.totalorder %s2158_s14, %s7079_s18 }
 0x4c4   : > { %p4520_p9 = scmp.ne.s32.totalorder %s2158_s14, %s4519_s26  ;;  %p4523_p11 = scmp.lt.u32.totalorder %s6357_s20, %s4519_s26 }
 0x4c5   : > { %p4525_p13 = scmp.lt.u32.totalorder %s4519_s26, %s2158_s14 }
 0x4c6   : > { %p4524_p12 = por %p4523_p11, %p4522_p10 }
 0x4c8   : > { %p4526_p0 = por %p4525_p13, %p4524_p12 }
 0x4ca   : > { %p4527_p1 = pnand %p4526_p0, %p4520_p9 }
 0x4cc   : > { %4530 = shalt.err (!%p4527_p1)  }
 0x4cd   : > { %s4531_s28 = scalar_lea.vmem %s6338_s2, 16  ;;  %s6366_s29 = scalar_lea.vmem %s6338_s2, 512 }
 0x4ce   : > { %p4532_p2 = scmp.ne.s32.totalorder %s6338_s2, %s4531_s28  ;;  %p4536_p3 = scmp.lt.s32.totalorder %s6338_s2, %s6338_s2 }
 0x4cf   : > { %p4537_p6 = scmp.lt.s32.totalorder %s6366_s29, %s4531_s28 }
 0x4d1   : > { %p4538_p7 = por %p4537_p6, %p4536_p3 }
 0x4d3   : > { %p4539_p8 = pnand %p4538_p7, %p4532_p2 }
 0x4d5   : > { %4542 = shalt.err (!%p4539_p8)  }
 0x4d6   : > { %2170 = dma.hbm_to_vmem [thread:$0]  %s2158_s14, 16, %s6338_s2, [#allocation5 + $0x2] }
 0x4d7   : > { %s2173_s30 = scalar_lea.hbm %s7079_s18, %s3559_s4  ;;  %s3560_s12 = sshll.u32 %s6341_s21, 4 }
 0x4d8   : > { %s4543_s7 = scalar_lea.hbm %s2173_s30, 16  ;;  %p4546_p10 = scmp.lt.u32.totalorder %s2173_s30, %s7079_s18 }
 0x4d9   : > { %p4544_p9 = scmp.ne.s32.totalorder %s2173_s30, %s4543_s7  ;;  %p4547_p11 = scmp.lt.u32.totalorder %s6357_s20, %s4543_s7 }
 0x4da   : > { %p4549_p13 = scmp.lt.u32.totalorder %s4543_s7, %s2173_s30 }
 0x4db   : > { %p4548_p12 = por %p4547_p11, %p4546_p10 }
 0x4dd   : > { %p4550_p0 = por %p4549_p13, %p4548_p12 }
 0x4df   : > { %p4551_p1 = pnand %p4550_p0, %p4544_p9 }
 0x4e1   : > { %4554 = shalt.err (!%p4551_p1)  }
 0x4e2   : > { %s4555_s13 = scalar_lea.vmem %s6343_s8, 16  ;;  %p4560_p3 = scmp.lt.s32.totalorder %s6343_s8, %s6338_s2 }
 0x4e3   : > { %p4556_p2 = scmp.ne.s32.totalorder %s6343_s8, %s4555_s13  ;;  %p4561_p6 = scmp.lt.s32.totalorder %s6366_s29, %s4555_s13 }
 0x4e5   : > { %p4562_p7 = por %p4561_p6, %p4560_p3 }
 0x4e7   : > { %p4563_p8 = pnand %p4562_p7, %p4556_p2 }
 0x4e9   : > { %4566 = shalt.err (!%p4563_p8)  }
 0x4ea   : > { %2185 = dma.hbm_to_vmem [thread:$0]  %s2173_s30, 16, %s6343_s8, [#allocation5 + $0x2] }
 0x4eb   : > { %s2188_s17 = scalar_lea.hbm %s7079_s18, %s3560_s12  ;;  %s3561_s14 = sshll.u32 %s6346_s22, 4 }
 0x4ec   : > { %s4567_s3 = scalar_lea.hbm %s2188_s17, 16  ;;  %p4570_p10 = scmp.lt.u32.totalorder %s2188_s17, %s7079_s18 }
 0x4ed   : > { %p4568_p9 = scmp.ne.s32.totalorder %s2188_s17, %s4567_s3  ;;  %p4571_p11 = scmp.lt.u32.totalorder %s6357_s20, %s4567_s3 }
 0x4ee   : > { %p4573_p13 = scmp.lt.u32.totalorder %s4567_s3, %s2188_s17 }
 0x4ef   : > { %p4572_p12 = por %p4571_p11, %p4570_p10 }
 0x4f1   : > { %p4574_p0 = por %p4573_p13, %p4572_p12 }
 0x4f3   : > { %p4575_p1 = pnand %p4574_p0, %p4568_p9 }
 0x4f5   : > { %4578 = shalt.err (!%p4575_p1)  }
 0x4f6   : > { %s4579_s8 = scalar_lea.vmem %s6348_s24, 16  ;;  %p4584_p3 = scmp.lt.s32.totalorder %s6348_s24, %s6338_s2 }
 0x4f7   : > { %p4580_p2 = scmp.ne.s32.totalorder %s6348_s24, %s4579_s8  ;;  %p4585_p6 = scmp.lt.s32.totalorder %s6366_s29, %s4579_s8 }
 0x4f9   : > { %p4586_p7 = por %p4585_p6, %p4584_p3 }
 0x4fb   : > { %p4587_p8 = pnand %p4586_p7, %p4580_p2 }
 0x4fd   : > { %4590 = shalt.err (!%p4587_p8)  }
 0x4fe   : > { %2200 = dma.hbm_to_vmem [thread:$0]  %s2188_s17, 16, %s6348_s24, [#allocation5 + $0x2] }
 0x4ff   : > { %s2203_s30 = scalar_lea.hbm %s7079_s18, %s3561_s14  ;;  %s5397_s12 = smov [#allocation4 + $0x3]  }
 0x500   : > { %s2212_s7 = sshll.u32 %s5397_s12, 4  ;;  %s6404_s16 = sld [smem:[#allocation9 + %s5623_s0]]  ;;  %s2213_s7 = int_to_ptr.vmem [resolvable:$true] %s2212_s7 }
 0x501   : > { %s4591_s5 = scalar_lea.hbm %s2203_s30, 16  ;;  %p4594_p10 = scmp.lt.u32.totalorder %s2203_s30, %s7079_s18 }
 0x502   : > { %p4592_p9 = scmp.ne.s32.totalorder %s2203_s30, %s4591_s5  ;;  %p4595_p11 = scmp.lt.u32.totalorder %s6357_s20, %s4591_s5 }
 0x503   : > { %p4597_p13 = scmp.lt.u32.totalorder %s4591_s5, %s2203_s30 }
 0x504   : > { %p4596_p12 = por %p4595_p11, %p4594_p10 }
 0x506   : > { %p4598_p0 = por %p4597_p13, %p4596_p12 }
 0x508   : > { %p4599_p1 = pnand %p4598_p0, %p4592_p9 }
 0x50a   : > { %4602 = shalt.err (!%p4599_p1)  }
 0x50b   : > { %s4603_s24 = scalar_lea.vmem %s2213_s7, 16  ;;  %p4608_p3 = scmp.lt.s32.totalorder %s2213_s7, %s6338_s2 }
 0x50c   : > { %p4604_p2 = scmp.ne.s32.totalorder %s2213_s7, %s4603_s24  ;;  %p4609_p6 = scmp.lt.s32.totalorder %s6366_s29, %s4603_s24 }
 0x50e   : > { %p4610_p7 = por %p4609_p6, %p4608_p3 }
 0x510   : > { %p4611_p8 = pnand %p4610_p7, %p4604_p2 }
 0x512   : > { %4614 = shalt.err (!%p4611_p8)  }
 0x513   : > { %2215 = dma.hbm_to_vmem [thread:$0]  %s2203_s30, 16, %s2213_s7, [#allocation5 + $0x2] }
 0x514   : > { %s5398_s0 = smov [#allocation4 + $0x4]   ;;  %s6413_s17 = sld [smem:[#allocation9 + %s5627_s15]] }
 0x515   : > { %s2227_s21 = sshll.u32 %s5398_s0, 4  ;;  %s5399_s14 = smov [#allocation4 + $0x5]   ;;  %s2228_s21 = int_to_ptr.vmem [resolvable:$true] %s2227_s21 }
 0x516   : > { %s2242_s3 = sshll.u32 %s5399_s14, 4  ;;  %s6416_s28 = sld [smem:[#allocation9 + %s5658_s23]]  ;;  %s6419_s3 = int_to_ptr.vmem [resolvable:$true] %s2242_s3 }
 0x517   : > { %s3562_s26 = sshll.u32 %s6404_s16, 4 }
 0x518   : > { %s2218_s9 = scalar_lea.hbm %s7079_s18, %s3562_s26 }
 0x519   : > { %s4615_s30 = scalar_lea.hbm %s2218_s9, 16  ;;  %p4618_p10 = scmp.lt.u32.totalorder %s2218_s9, %s7079_s18 }
 0x51a   : > { %p4616_p9 = scmp.ne.s32.totalorder %s2218_s9, %s4615_s30  ;;  %p4619_p11 = scmp.lt.u32.totalorder %s6357_s20, %s4615_s30 }
 0x51b   : > { %p4621_p13 = scmp.lt.u32.totalorder %s4615_s30, %s2218_s9 }
 0x51c   : > { %p4620_p12 = por %p4619_p11, %p4618_p10 }
 0x51e   : > { %p4622_p0 = por %p4621_p13, %p4620_p12 }
 0x520   : > { %p4623_p1 = pnand %p4622_p0, %p4616_p9 }
 0x522   : > { %4626 = shalt.err (!%p4623_p1)  }
 0x523   : > { %s4627_s15 = scalar_lea.vmem %s2228_s21, 16  ;;  %p4632_p3 = scmp.lt.s32.totalorder %s2228_s21, %s6338_s2 }
 0x524   : > { %p4628_p2 = scmp.ne.s32.totalorder %s2228_s21, %s4627_s15  ;;  %p4633_p6 = scmp.lt.s32.totalorder %s6366_s29, %s4627_s15 }
 0x526   : > { %p4634_p7 = por %p4633_p6, %p4632_p3 }
 0x528   : > { %p4635_p8 = pnand %p4634_p7, %p4628_p2 }
 0x52a   : > { %4638 = shalt.err (!%p4635_p8)  }
 0x52b   : > { %2230 = dma.hbm_to_vmem [thread:$0]  %s2218_s9, 16, %s2228_s21, [#allocation5 + $0x2] }
 0x52c   : > { %s3563_s23 = sshll.u32 %s6413_s17, 4  ;;  %s5400_s16 = smov [#allocation4 + $0x6]  }
 0x52d   : > { %s2257_s5 = sshll.u32 %s5400_s16, 4  ;;  %s2233_s24 = scalar_lea.hbm %s7079_s18, %s3563_s23  ;;  %s6434_s5 = int_to_ptr.vmem [resolvable:$true] %s2257_s5 }
 0x52e   : > { %s4639_s0 = scalar_lea.hbm %s2233_s24, 16  ;;  %p4642_p10 = scmp.lt.u32.totalorder %s2233_s24, %s7079_s18 }
 0x52f   : > { %p4640_p9 = scmp.ne.s32.totalorder %s2233_s24, %s4639_s0  ;;  %p4643_p11 = scmp.lt.u32.totalorder %s6357_s20, %s4639_s0 }
 0x530   : > { %p4645_p13 = scmp.lt.u32.totalorder %s4639_s0, %s2233_s24 }
 0x531   : > { %p4644_p12 = por %p4643_p11, %p4642_p10 }
 0x533   : > { %p4646_p0 = por %p4645_p13, %p4644_p12 }
 0x535   : > { %p4647_p1 = pnand %p4646_p0, %p4640_p9 }
 0x537   : > { %4650 = shalt.err (!%p4647_p1)  }
 0x538   : > { %s4651_s21 = scalar_lea.vmem %s6419_s3, 16  ;;  %p4656_p3 = scmp.lt.s32.totalorder %s6419_s3, %s6338_s2 }
 0x539   : > { %p4652_p2 = scmp.ne.s32.totalorder %s6419_s3, %s4651_s21  ;;  %p4657_p6 = scmp.lt.s32.totalorder %s6366_s29, %s4651_s21 }
 0x53b   : > { %p4658_p7 = por %p4657_p6, %p4656_p3 }
 0x53d   : > { %p4659_p8 = pnand %p4658_p7, %p4652_p2 }
 0x53f   : > { %4662 = shalt.err (!%p4659_p8)  }
 0x540   : > { %2245 = dma.hbm_to_vmem [thread:$0]  %s2233_s24, 16, %s6419_s3, [#allocation5 + $0x2] }
 0x541   : > { %s3564_s17 = sshll.u32 %s6416_s28, 4  ;;  %s6448_s8 = sld [smem:[#allocation9 + %s5674_s27]] }
 0x542   : > { %s2248_s30 = scalar_lea.hbm %s7079_s18, %s3564_s17 }
 0x543   : > { %s4663_s12 = scalar_lea.hbm %s2248_s30, 16  ;;  %p4666_p10 = scmp.lt.u32.totalorder %s2248_s30, %s7079_s18 }
 0x544   : > { %p4664_p9 = scmp.ne.s32.totalorder %s2248_s30, %s4663_s12  ;;  %p4667_p11 = scmp.lt.u32.totalorder %s6357_s20, %s4663_s12 }
 0x545   : > { %p4669_p13 = scmp.lt.u32.totalorder %s4663_s12, %s2248_s30 }
 0x546   : > { %p4668_p12 = por %p4667_p11, %p4666_p10 }
 0x548   : > { %p4670_p0 = por %p4669_p13, %p4668_p12 }
 0x54a   : > { %p4671_p1 = pnand %p4670_p0, %p4664_p9 }
 0x54c   : > { %4674 = shalt.err (!%p4671_p1)  }
 0x54d   : > { %s4675_s27 = scalar_lea.vmem %s6434_s5, 16  ;;  %p4680_p3 = scmp.lt.s32.totalorder %s6434_s5, %s6338_s2 }
 0x54e   : > { %p4676_p2 = scmp.ne.s32.totalorder %s6434_s5, %s4675_s27  ;;  %p4681_p6 = scmp.lt.s32.totalorder %s6366_s29, %s4675_s27 }
 0x550   : > { %p4682_p7 = por %p4681_p6, %p4680_p3 }
 0x552   : > { %p4683_p8 = pnand %p4682_p7, %p4676_p2 }
 0x554   : > { %4686 = shalt.err (!%p4683_p8)  }
 0x555   : > { %2260 = dma.hbm_to_vmem [thread:$0]  %s2248_s30, 16, %s6434_s5, [#allocation5 + $0x2] }
 0x556   : > { %s5401_s3 = smov [#allocation4 + $0x7]   ;;  %s6464_s23 = sld [smem:[#allocation9 + %s5680_s10]] }
 0x557   : > { %s2272_s28 = sshll.u32 %s5401_s3, 4  ;;  %s5402_s16 = smov [#allocation4 + $0x8]   ;;  %s2273_s28 = int_to_ptr.vmem [resolvable:$true] %s2272_s28 }
 0x558   : > { %s2287_s13 = sshll.u32 %s5402_s16, 4  ;;  %s6467_s4 = sld [smem:[#allocation9 + %s7057_s25]]  ;;  %s6470_s13 = int_to_ptr.vmem [resolvable:$true] %s2287_s13 }
 0x559   : > { %s3565_s24 = sshll.u32 %s6448_s8, 4 }
 0x55a   : > { %s2263_s26 = scalar_lea.hbm %s7079_s18, %s3565_s24 }
 0x55b   : > { %s4687_s21 = scalar_lea.hbm %s2263_s26, 16  ;;  %p4690_p10 = scmp.lt.u32.totalorder %s2263_s26, %s7079_s18 }
 0x55c   : > { %p4688_p9 = scmp.ne.s32.totalorder %s2263_s26, %s4687_s21  ;;  %p4691_p11 = scmp.lt.u32.totalorder %s6357_s20, %s4687_s21 }
 0x55d   : > { %p4693_p13 = scmp.lt.u32.totalorder %s4687_s21, %s2263_s26 }
 0x55e   : > { %p4692_p12 = por %p4691_p11, %p4690_p10 }
 0x560   : > { %p4694_p0 = por %p4693_p13, %p4692_p12 }
 0x562   : > { %p4695_p1 = pnand %p4694_p0, %p4688_p9 }
 0x564   : > { %4698 = shalt.err (!%p4695_p1)  }
 0x565   : > { %s4699_s10 = scalar_lea.vmem %s2273_s28, 16  ;;  %p4704_p3 = scmp.lt.s32.totalorder %s2273_s28, %s6338_s2 }
 0x566   : > { %p4700_p2 = scmp.ne.s32.totalorder %s2273_s28, %s4699_s10  ;;  %p4705_p6 = scmp.lt.s32.totalorder %s6366_s29, %s4699_s10 }
 0x568   : > { %p4706_p7 = por %p4705_p6, %p4704_p3 }
 0x56a   : > { %p4707_p8 = pnand %p4706_p7, %p4700_p2 }
 0x56c   : > { %4710 = shalt.err (!%p4707_p8)  }
 0x56d   : > { %2275 = dma.hbm_to_vmem [thread:$0]  %s2263_s26, 16, %s2273_s28, [#allocation5 + $0x2] }
 0x56e   : > { %s3566_s25 = sshll.u32 %s6464_s23, 4  ;;  %s5403_s8 = smov [#allocation4 + $0x9]  }
 0x56f   : > { %s2302_s22 = sshll.u32 %s5403_s8, 4  ;;  %s2278_s12 = scalar_lea.hbm %s7079_s18, %s3566_s25  ;;  %s6485_s22 = int_to_ptr.vmem [resolvable:$true] %s2302_s22 }
 0x570   : > { %s4711_s7 = scalar_lea.hbm %s2278_s12, 16  ;;  %p4714_p10 = scmp.lt.u32.totalorder %s2278_s12, %s7079_s18 }
 0x571   : > { %p4712_p9 = scmp.ne.s32.totalorder %s2278_s12, %s4711_s7  ;;  %p4715_p11 = scmp.lt.u32.totalorder %s6357_s20, %s4711_s7 }
 0x572   : > { %p4717_p13 = scmp.lt.u32.totalorder %s4711_s7, %s2278_s12 }
 0x573   : > { %p4716_p12 = por %p4715_p11, %p4714_p10 }
 0x575   : > { %p4718_p0 = por %p4717_p13, %p4716_p12 }
 0x577   : > { %p4719_p1 = pnand %p4718_p0, %p4712_p9 }
 0x579   : > { %4722 = shalt.err (!%p4719_p1)  }
 0x57a   : > { %s4723_s3 = scalar_lea.vmem %s6470_s13, 16  ;;  %p4728_p3 = scmp.lt.s32.totalorder %s6470_s13, %s6338_s2 }
 0x57b   : > { %p4724_p2 = scmp.ne.s32.totalorder %s6470_s13, %s4723_s3  ;;  %p4729_p6 = scmp.lt.s32.totalorder %s6366_s29, %s4723_s3 }
 0x57d   : > { %p4730_p7 = por %p4729_p6, %p4728_p3 }
 0x57f   : > { %p4731_p8 = pnand %p4730_p7, %p4724_p2 }
 0x581   : > { %4734 = shalt.err (!%p4731_p8)  }
 0x582   : > { %2290 = dma.hbm_to_vmem [thread:$0]  %s2278_s12, 16, %s6470_s13, [#allocation5 + $0x2] }
 0x583   : > { %s3567_s28 = sshll.u32 %s6467_s4, 4  ;;  %s6499_s23 = sld [smem:[#allocation9 + %s7058_s6]] }
 0x584   : > { %s2293_s0 = scalar_lea.hbm %s7079_s18, %s3567_s28 }
 0x585   : > { %s4735_s14 = scalar_lea.hbm %s2293_s0, 16  ;;  %p4738_p10 = scmp.lt.u32.totalorder %s2293_s0, %s7079_s18 }
 0x586   : > { %p4736_p9 = scmp.ne.s32.totalorder %s2293_s0, %s4735_s14  ;;  %p4739_p11 = scmp.lt.u32.totalorder %s6357_s20, %s4735_s14 }
 0x587   : > { %p4741_p13 = scmp.lt.u32.totalorder %s4735_s14, %s2293_s0 }
 0x588   : > { %p4740_p12 = por %p4739_p11, %p4738_p10 }
 0x58a   : > { %p4742_p0 = por %p4741_p13, %p4740_p12 }
 0x58c   : > { %p4743_p1 = pnand %p4742_p0, %p4736_p9 }
 0x58e   : > { %4746 = shalt.err (!%p4743_p1)  }
 0x58f   : > { %s4747_s6 = scalar_lea.vmem %s6485_s22, 16  ;;  %p4752_p3 = scmp.lt.s32.totalorder %s6485_s22, %s6338_s2 }
 0x590   : > { %p4748_p2 = scmp.ne.s32.totalorder %s6485_s22, %s4747_s6  ;;  %p4753_p6 = scmp.lt.s32.totalorder %s6366_s29, %s4747_s6 }
 0x592   : > { %p4754_p7 = por %p4753_p6, %p4752_p3 }
 0x594   : > { %p4755_p8 = pnand %p4754_p7, %p4748_p2 }
 0x596   : > { %4758 = shalt.err (!%p4755_p8)  }
 0x597   : > { %2305 = dma.hbm_to_vmem [thread:$0]  %s2293_s0, 16, %s6485_s22, [#allocation5 + $0x2] }
 0x598   : > { %s5404_s13 = smov [#allocation4 + $0xa]   ;;  %s6515_s17 = sld [smem:[#allocation9 + %s7059_s11]] }
 0x599   : > { %s2317_s4 = sshll.u32 %s5404_s13, 4  ;;  %s5405_s5 = smov [#allocation4 + $0xb]   ;;  %s2318_s4 = int_to_ptr.vmem [resolvable:$true] %s2317_s4 }
 0x59a   : > { %s2332_s10 = sshll.u32 %s5405_s5, 4  ;;  %s6518_s25 = sld [smem:[#allocation9 + %s7060_s1]]  ;;  %s6521_s10 = int_to_ptr.vmem [resolvable:$true] %s2332_s10 }
 0x59b   : > { %s3568_s8 = sshll.u32 %s6499_s23, 4 }
 0x59c   : > { %s2308_s12 = scalar_lea.hbm %s7079_s18, %s3568_s8 }
 0x59d   : > { %s4759_s7 = scalar_lea.hbm %s2308_s12, 16  ;;  %p4762_p10 = scmp.lt.u32.totalorder %s2308_s12, %s7079_s18 }
 0x59e   : > { %p4760_p9 = scmp.ne.s32.totalorder %s2308_s12, %s4759_s7  ;;  %p4763_p11 = scmp.lt.u32.totalorder %s6357_s20, %s4759_s7 }
 0x59f   : > { %p4765_p13 = scmp.lt.u32.totalorder %s4759_s7, %s2308_s12 }
 0x5a0   : > { %p4764_p12 = por %p4763_p11, %p4762_p10 }
 0x5a2   : > { %p4766_p0 = por %p4765_p13, %p4764_p12 }
 0x5a4   : > { %p4767_p1 = pnand %p4766_p0, %p4760_p9 }
 0x5a6   : > { %4770 = shalt.err (!%p4767_p1)  }
 0x5a7   : > { %s4771_s11 = scalar_lea.vmem %s2318_s4, 16  ;;  %p4776_p3 = scmp.lt.s32.totalorder %s2318_s4, %s6338_s2 }
 0x5a8   : > { %p4772_p2 = scmp.ne.s32.totalorder %s2318_s4, %s4771_s11  ;;  %p4777_p6 = scmp.lt.s32.totalorder %s6366_s29, %s4771_s11 }
 0x5aa   : > { %p4778_p7 = por %p4777_p6, %p4776_p3 }
 0x5ac   : > { %p4779_p8 = pnand %p4778_p7, %p4772_p2 }
 0x5ae   : > { %4782 = shalt.err (!%p4779_p8)  }
 0x5af   : > { %2320 = dma.hbm_to_vmem [thread:$0]  %s2308_s12, 16, %s2318_s4, [#allocation5 + $0x2] }
 0x5b0   : > { %s3569_s1 = sshll.u32 %s6515_s17, 4  ;;  %s5406_s27 = smov [#allocation4 + $0xc]  }
 0x5b1   : > { %s2347_s3 = sshll.u32 %s5406_s27, 4  ;;  %s2323_s16 = scalar_lea.hbm %s7079_s18, %s3569_s1  ;;  %s6536_s3 = int_to_ptr.vmem [resolvable:$true] %s2347_s3 }
 0x5b2   : > { %s4783_s24 = scalar_lea.hbm %s2323_s16, 16  ;;  %p4786_p10 = scmp.lt.u32.totalorder %s2323_s16, %s7079_s18 }
 0x5b3   : > { %p4784_p9 = scmp.ne.s32.totalorder %s2323_s16, %s4783_s24  ;;  %p4787_p11 = scmp.lt.u32.totalorder %s6357_s20, %s4783_s24 }
 0x5b4   : > { %p4789_p13 = scmp.lt.u32.totalorder %s4783_s24, %s2323_s16 }
 0x5b5   : > { %p4788_p12 = por %p4787_p11, %p4786_p10 }
 0x5b7   : > { %p4790_p0 = por %p4789_p13, %p4788_p12 }
 0x5b9   : > { %p4791_p1 = pnand %p4790_p0, %p4784_p9 }
 0x5bb   : > { %4794 = shalt.err (!%p4791_p1)  }
 0x5bc   : > { %s4795_s26 = scalar_lea.vmem %s6521_s10, 16  ;;  %p4800_p3 = scmp.lt.s32.totalorder %s6521_s10, %s6338_s2 }
 0x5bd   : > { %p4796_p2 = scmp.ne.s32.totalorder %s6521_s10, %s4795_s26  ;;  %p4801_p6 = scmp.lt.s32.totalorder %s6366_s29, %s4795_s26 }
 0x5bf   : > { %p4802_p7 = por %p4801_p6, %p4800_p3 }
 0x5c1   : > { %p4803_p8 = pnand %p4802_p7, %p4796_p2 }
 0x5c3   : > { %4806 = shalt.err (!%p4803_p8)  }
 0x5c4   : > { %2335 = dma.hbm_to_vmem [thread:$0]  %s2323_s16, 16, %s6521_s10, [#allocation5 + $0x2] }
 0x5c5   : > { %s3570_s21 = sshll.u32 %s6518_s25, 4  ;;  %s6550_s6 = sld [smem:[#allocation9 + %s7061_s19]] }
 0x5c6   : > { %s2338_s17 = scalar_lea.hbm %s7079_s18, %s3570_s21 }
 0x5c7   : > { %s4807_s5 = scalar_lea.hbm %s2338_s17, 16  ;;  %p4810_p10 = scmp.lt.u32.totalorder %s2338_s17, %s7079_s18 }
 0x5c8   : > { %p4808_p9 = scmp.ne.s32.totalorder %s2338_s17, %s4807_s5  ;;  %p4811_p11 = scmp.lt.u32.totalorder %s6357_s20, %s4807_s5 }
 0x5c9   : > { %p4813_p13 = scmp.lt.u32.totalorder %s4807_s5, %s2338_s17 }
 0x5ca   : > { %p4812_p12 = por %p4811_p11, %p4810_p10 }
 0x5cc   : > { %p4814_p0 = por %p4813_p13, %p4812_p12 }
 0x5ce   : > { %p4815_p1 = pnand %p4814_p0, %p4808_p9 }
 0x5d0   : > { %4818 = shalt.err (!%p4815_p1)  }
 0x5d1   : > { %s4819_s19 = scalar_lea.vmem %s6536_s3, 16  ;;  %p4824_p3 = scmp.lt.s32.totalorder %s6536_s3, %s6338_s2 }
 0x5d2   : > { %p4820_p2 = scmp.ne.s32.totalorder %s6536_s3, %s4819_s19  ;;  %p4825_p6 = scmp.lt.s32.totalorder %s6366_s29, %s4819_s19 }
 0x5d4   : > { %p4826_p7 = por %p4825_p6, %p4824_p3 }
 0x5d6   : > { %p4827_p8 = pnand %p4826_p7, %p4820_p2 }
 0x5d8   : > { %4830 = shalt.err (!%p4827_p8)  }
 0x5d9   : > { %s7080_s10 = sld [smem:[#allocation193_spill]]  ;;  %s7081_s25 = sld [smem:[#allocation194_spill]] }
 0x5da   : > { %2350 = dma.hbm_to_vmem [thread:$0]  %s2338_s17, 16, %s6536_s3, [#allocation5 + $0x2] }
 0x5db   : > { %s5407_s30 = smov [#allocation4 + $0xd]   ;;  %s5408_s15 = smov [#allocation4 + $0xe]  }
 0x5dc   : > { %s2362_s12 = sshll.u32 %s5407_s30, 4  ;;  %s2377_s22 = sshll.u32 %s5408_s15, 4  ;;  %s2363_s12 = int_to_ptr.vmem [resolvable:$true] %s2362_s12  ;;  %s6572_s22 = int_to_ptr.vmem [resolvable:$true] %s2377_s22 }
 0x5dd   : > { %s3571_s1 = sshll.u32 %s6550_s6, 4 }
 0x5de   : > { %s2353_s23 = scalar_lea.hbm %s7079_s18, %s3571_s1 }
 0x5df   : > { %s6566_s7 = sld [smem:[#allocation9 + %s7080_s10]]  ;;  %s4831_s16 = scalar_lea.hbm %s2353_s23, 16 }
 0x5e0   : > { %s6569_s11 = sld [smem:[#allocation9 + %s7081_s25]]  ;;  %p4832_p9 = scmp.ne.s32.totalorder %s2353_s23, %s4831_s16 }
 0x5e1   : > { %p4834_p10 = scmp.lt.u32.totalorder %s2353_s23, %s7079_s18  ;;  %p4835_p11 = scmp.lt.u32.totalorder %s6357_s20, %s4831_s16 }
 0x5e2   : > { %p4837_p13 = scmp.lt.u32.totalorder %s4831_s16, %s2353_s23 }
 0x5e3   : > { %p4836_p12 = por %p4835_p11, %p4834_p10 }
 0x5e5   : > { %p4838_p0 = por %p4837_p13, %p4836_p12 }
 0x5e7   : > { %p4839_p1 = pnand %p4838_p0, %p4832_p9 }
 0x5e9   : > { %4842 = shalt.err (!%p4839_p1)  }
 0x5ea   : > { %s4843_s0 = scalar_lea.vmem %s2363_s12, 16  ;;  %p4848_p3 = scmp.lt.s32.totalorder %s2363_s12, %s6338_s2 }
 0x5eb   : > { %p4844_p2 = scmp.ne.s32.totalorder %s2363_s12, %s4843_s0  ;;  %p4849_p6 = scmp.lt.s32.totalorder %s6366_s29, %s4843_s0 }
 0x5ed   : > { %p4850_p7 = por %p4849_p6, %p4848_p3 }
 0x5ef   : > { %p4851_p8 = pnand %p4850_p7, %p4844_p2 }
 0x5f1   : > { %4854 = shalt.err (!%p4851_p8)  }
 0x5f2   : > { %2365 = dma.hbm_to_vmem [thread:$0]  %s2353_s23, 16, %s2363_s12, [#allocation5 + $0x2] }
 0x5f3   : > { %s3572_s14 = sshll.u32 %s6566_s7, 4  ;;  %s5409_s26 = smov [#allocation4 + $0xf]  }
 0x5f4   : > { %s2392_s21 = sshll.u32 %s5409_s26, 4  ;;  %s2368_s4 = scalar_lea.hbm %s7079_s18, %s3572_s14  ;;  %s6587_s21 = int_to_ptr.vmem [resolvable:$true] %s2392_s21 }
 0x5f5   : > { %s4855_s17 = scalar_lea.hbm %s2368_s4, 16  ;;  %p4858_p10 = scmp.lt.u32.totalorder %s2368_s4, %s7079_s18 }
 0x5f6   : > { %p4856_p9 = scmp.ne.s32.totalorder %s2368_s4, %s4855_s17  ;;  %p4859_p11 = scmp.lt.u32.totalorder %s6357_s20, %s4855_s17 }
 0x5f7   : > { %p4861_p13 = scmp.lt.u32.totalorder %s4855_s17, %s2368_s4 }
 0x5f8   : > { %p4860_p12 = por %p4859_p11, %p4858_p10 }
 0x5fa   : > { %p4862_p0 = por %p4861_p13, %p4860_p12 }
 0x5fc   : > { %p4863_p1 = pnand %p4862_p0, %p4856_p9 }
 0x5fe   : > { %4866 = shalt.err (!%p4863_p1)  }
 0x5ff   : > { %s4867_s9 = scalar_lea.vmem %s6572_s22, 16  ;;  %p4872_p3 = scmp.lt.s32.totalorder %s6572_s22, %s6338_s2 }
 0x600   : > { %p4868_p2 = scmp.ne.s32.totalorder %s6572_s22, %s4867_s9  ;;  %p4873_p6 = scmp.lt.s32.totalorder %s6366_s29, %s4867_s9 }
 0x602   : > { %p4874_p7 = por %p4873_p6, %p4872_p3 }
 0x604   : > { %p4875_p8 = pnand %p4874_p7, %p4868_p2 }
 0x606   : > { %4878 = shalt.err (!%p4875_p8)  }
 0x607   : > { %s7082_s19 = sld [smem:[#allocation195_spill]]  ;;  %s3573_s10 = sshll.u32 %s6569_s11, 4 }
 0x608   : > { %2380 = dma.hbm_to_vmem [thread:$0]  %s2368_s4, 16, %s6572_s22, [#allocation5 + $0x2] }
 0x609   : > { %s2383_s7 = scalar_lea.hbm %s7079_s18, %s3573_s10 }
 0x60a   : > { %s4879_s15 = scalar_lea.hbm %s2383_s7, 16  ;;  %p4882_p10 = scmp.lt.u32.totalorder %s2383_s7, %s7079_s18 }
 0x60b   : > { %p4880_p9 = scmp.ne.s32.totalorder %s2383_s7, %s4879_s15  ;;  %p4883_p11 = scmp.lt.u32.totalorder %s6357_s20, %s4879_s15 }
 0x60c   : > { %p4885_p13 = scmp.lt.u32.totalorder %s4879_s15, %s2383_s7 }
 0x60d   : > { %s6601_s25 = sld [smem:[#allocation9 + %s7082_s19]]  ;;  %p4884_p12 = por %p4883_p11, %p4882_p10 }
 0x60f   : > { %p4886_p0 = por %p4885_p13, %p4884_p12 }
 0x611   : > { %p4887_p1 = pnand %p4886_p0, %p4880_p9 }
 0x613   : > { %4890 = shalt.err (!%p4887_p1)  }
 0x614   : > { %s4891_s22 = scalar_lea.vmem %s6587_s21, 16  ;;  %p4896_p3 = scmp.lt.s32.totalorder %s6587_s21, %s6338_s2 }
 0x615   : > { %p4892_p2 = scmp.ne.s32.totalorder %s6587_s21, %s4891_s22  ;;  %p4897_p6 = scmp.lt.s32.totalorder %s6366_s29, %s4891_s22 }
 0x617   : > { %p4898_p7 = por %p4897_p6, %p4896_p3 }
 0x619   : > { %p4899_p8 = pnand %p4898_p7, %p4892_p2 }
 0x61b   : > { %4902 = shalt.err (!%p4899_p8)  }
 0x61c   : > { %s7083_s11 = sld [smem:[#allocation196_spill]]  ;;  %s7084_s28 = sld [smem:[#allocation197_spill]] }
 0x61d   : > { %2395 = dma.hbm_to_vmem [thread:$0]  %s2383_s7, 16, %s6587_s21, [#allocation5 + $0x2] }
 0x61e   : > { %s5410_s23 = smov [#allocation4 + $0x10]   ;;  %s5411_s3 = smov [#allocation4 + $0x11]  }
 0x61f   : > { %s2407_s16 = sshll.u32 %s5410_s23, 4  ;;  %s2422_s0 = sshll.u32 %s5411_s3, 4  ;;  %s2408_s16 = int_to_ptr.vmem [resolvable:$true] %s2407_s16  ;;  %s6623_s0 = int_to_ptr.vmem [resolvable:$true] %s2422_s0 }
 0x620   : > { %s3574_s26 = sshll.u32 %s6601_s25, 4 }
 0x621   : > { %s2398_s4 = scalar_lea.hbm %s7079_s18, %s3574_s26 }
 0x622   : > { %s6617_s24 = sld [smem:[#allocation9 + %s7083_s11]]  ;;  %s4903_s17 = scalar_lea.hbm %s2398_s4, 16 }
 0x623   : > { %s6620_s14 = sld [smem:[#allocation9 + %s7084_s28]]  ;;  %p4904_p9 = scmp.ne.s32.totalorder %s2398_s4, %s4903_s17 }
 0x624   : > { %p4906_p10 = scmp.lt.u32.totalorder %s2398_s4, %s7079_s18  ;;  %p4907_p11 = scmp.lt.u32.totalorder %s6357_s20, %s4903_s17 }
 0x625   : > { %p4909_p13 = scmp.lt.u32.totalorder %s4903_s17, %s2398_s4 }
 0x626   : > { %p4908_p12 = por %p4907_p11, %p4906_p10 }
 0x628   : > { %p4910_p0 = por %p4909_p13, %p4908_p12 }
 0x62a   : > { %p4911_p1 = pnand %p4910_p0, %p4904_p9 }
 0x62c   : > { %4914 = shalt.err (!%p4911_p1)  }
 0x62d   : > { %s4915_s8 = scalar_lea.vmem %s2408_s16, 16  ;;  %p4920_p3 = scmp.lt.s32.totalorder %s2408_s16, %s6338_s2 }
 0x62e   : > { %p4916_p2 = scmp.ne.s32.totalorder %s2408_s16, %s4915_s8  ;;  %p4921_p6 = scmp.lt.s32.totalorder %s6366_s29, %s4915_s8 }
 0x630   : > { %p4922_p7 = por %p4921_p6, %p4920_p3 }
 0x632   : > { %p4923_p8 = pnand %p4922_p7, %p4916_p2 }
 0x634   : > { %4926 = shalt.err (!%p4923_p8)  }
 0x635   : > { %2410 = dma.hbm_to_vmem [thread:$0]  %s2398_s4, 16, %s2408_s16, [#allocation5 + $0x2] }
 0x636   : > { %s3575_s9 = sshll.u32 %s6617_s24, 4  ;;  %s5412_s19 = smov [#allocation4 + $0x12]  }
 0x637   : > { %s2437_s10 = sshll.u32 %s5412_s19, 4  ;;  %s2413_s12 = scalar_lea.hbm %s7079_s18, %s3575_s9  ;;  %s6638_s10 = int_to_ptr.vmem [resolvable:$true] %s2437_s10 }
 0x638   : > { %s4927_s7 = scalar_lea.hbm %s2413_s12, 16  ;;  %p4930_p10 = scmp.lt.u32.totalorder %s2413_s12, %s7079_s18 }
 0x639   : > { %p4928_p9 = scmp.ne.s32.totalorder %s2413_s12, %s4927_s7  ;;  %p4931_p11 = scmp.lt.u32.totalorder %s6357_s20, %s4927_s7 }
 0x63a   : > { %p4933_p13 = scmp.lt.u32.totalorder %s4927_s7, %s2413_s12 }
 0x63b   : > { %p4932_p12 = por %p4931_p11, %p4930_p10 }
 0x63d   : > { %p4934_p0 = por %p4933_p13, %p4932_p12 }
 0x63f   : > { %p4935_p1 = pnand %p4934_p0, %p4928_p9 }
 0x641   : > { %4938 = shalt.err (!%p4935_p1)  }
 0x642   : > { %s4939_s27 = scalar_lea.vmem %s6623_s0, 16  ;;  %p4944_p3 = scmp.lt.s32.totalorder %s6623_s0, %s6338_s2 }
 0x643   : > { %p4940_p2 = scmp.ne.s32.totalorder %s6623_s0, %s4939_s27  ;;  %p4945_p6 = scmp.lt.s32.totalorder %s6366_s29, %s4939_s27 }
 0x645   : > { %p4946_p7 = por %p4945_p6, %p4944_p3 }
 0x647   : > { %p4947_p8 = pnand %p4946_p7, %p4940_p2 }
 0x649   : > { %4950 = shalt.err (!%p4947_p8)  }
 0x64a   : > { %s7085_s22 = sld [smem:[#allocation198_spill]]  ;;  %s3576_s11 = sshll.u32 %s6620_s14, 4 }
 0x64b   : > { %2425 = dma.hbm_to_vmem [thread:$0]  %s2413_s12, 16, %s6623_s0, [#allocation5 + $0x2] }
 0x64c   : > { %s2428_s24 = scalar_lea.hbm %s7079_s18, %s3576_s11 }
 0x64d   : > { %s4951_s3 = scalar_lea.hbm %s2428_s24, 16  ;;  %p4954_p10 = scmp.lt.u32.totalorder %s2428_s24, %s7079_s18 }
 0x64e   : > { %p4952_p9 = scmp.ne.s32.totalorder %s2428_s24, %s4951_s3  ;;  %p4955_p11 = scmp.lt.u32.totalorder %s6357_s20, %s4951_s3 }
 0x64f   : > { %p4957_p13 = scmp.lt.u32.totalorder %s4951_s3, %s2428_s24 }
 0x650   : > { %s6652_s28 = sld [smem:[#allocation9 + %s7085_s22]]  ;;  %p4956_p12 = por %p4955_p11, %p4954_p10 }
 0x652   : > { %p4958_p0 = por %p4957_p13, %p4956_p12 }
 0x654   : > { %p4959_p1 = pnand %p4958_p0, %p4952_p9 }
 0x656   : > { %4962 = shalt.err (!%p4959_p1)  }
 0x657   : > { %s4963_s0 = scalar_lea.vmem %s6638_s10, 16  ;;  %p4968_p3 = scmp.lt.s32.totalorder %s6638_s10, %s6338_s2 }
 0x658   : > { %p4964_p2 = scmp.ne.s32.totalorder %s6638_s10, %s4963_s0  ;;  %p4969_p6 = scmp.lt.s32.totalorder %s6366_s29, %s4963_s0 }
 0x65a   : > { %p4970_p7 = por %p4969_p6, %p4968_p3 }
 0x65c   : > { %p4971_p8 = pnand %p4970_p7, %p4964_p2 }
 0x65e   : > { %4974 = shalt.err (!%p4971_p8)  }
 0x65f   : > { %s7086_s14 = sld [smem:[#allocation199_spill]]  ;;  %s7087_s13 = sld [smem:[#allocation200_spill]] }
 0x660   : > { %2440 = dma.hbm_to_vmem [thread:$0]  %s2428_s24, 16, %s6638_s10, [#allocation5 + $0x2] }
 0x661   : > { %s5413_s4 = smov [#allocation4 + $0x13]   ;;  %s5414_s21 = smov [#allocation4 + $0x14]  }
 0x662   : > { %s2452_s17 = sshll.u32 %s5413_s4, 4  ;;  %s2467_s8 = sshll.u32 %s5414_s21, 4  ;;  %s2453_s17 = int_to_ptr.vmem [resolvable:$true] %s2452_s17  ;;  %s6674_s8 = int_to_ptr.vmem [resolvable:$true] %s2467_s8 }
 0x663   : > { %s3577_s19 = sshll.u32 %s6652_s28, 4 }
 0x664   : > { %s2443_s12 = scalar_lea.hbm %s7079_s18, %s3577_s19 }
 0x665   : > { %s6668_s5 = sld [smem:[#allocation9 + %s7086_s14]]  ;;  %s4975_s7 = scalar_lea.hbm %s2443_s12, 16 }
 0x666   : > { %s6671_s9 = sld [smem:[#allocation9 + %s7087_s13]]  ;;  %p4976_p9 = scmp.ne.s32.totalorder %s2443_s12, %s4975_s7 }
 0x667   : > { %p4978_p10 = scmp.lt.u32.totalorder %s2443_s12, %s7079_s18  ;;  %p4979_p11 = scmp.lt.u32.totalorder %s6357_s20, %s4975_s7 }
 0x668   : > { %p4981_p13 = scmp.lt.u32.totalorder %s4975_s7, %s2443_s12 }
 0x669   : > { %p4980_p12 = por %p4979_p11, %p4978_p10 }
 0x66b   : > { %p4982_p0 = por %p4981_p13, %p4980_p12 }
 0x66d   : > { %p4983_p1 = pnand %p4982_p0, %p4976_p9 }
 0x66f   : > { %4986 = shalt.err (!%p4983_p1)  }
 0x670   : > { %s4987_s1 = scalar_lea.vmem %s2453_s17, 16  ;;  %p4992_p3 = scmp.lt.s32.totalorder %s2453_s17, %s6338_s2 }
 0x671   : > { %p4988_p2 = scmp.ne.s32.totalorder %s2453_s17, %s4987_s1  ;;  %p4993_p6 = scmp.lt.s32.totalorder %s6366_s29, %s4987_s1 }
 0x673   : > { %p4994_p7 = por %p4993_p6, %p4992_p3 }
 0x675   : > { %p4995_p8 = pnand %p4994_p7, %p4988_p2 }
 0x677   : > { %4998 = shalt.err (!%p4995_p8)  }
 0x678   : > { %2455 = dma.hbm_to_vmem [thread:$0]  %s2443_s12, 16, %s2453_s17, [#allocation5 + $0x2] }
 0x679   : > { %s3578_s27 = sshll.u32 %s6668_s5, 4  ;;  %s5415_s22 = smov [#allocation4 + $0x15]  }
 0x67a   : > { %s2482_s11 = sshll.u32 %s5415_s22, 4  ;;  %s2458_s16 = scalar_lea.hbm %s7079_s18, %s3578_s27  ;;  %s6689_s11 = int_to_ptr.vmem [resolvable:$true] %s2482_s11 }
 0x67b   : > { %s4999_s24 = scalar_lea.hbm %s2458_s16, 16  ;;  %p5002_p10 = scmp.lt.u32.totalorder %s2458_s16, %s7079_s18 }
 0x67c   : > { %p5000_p9 = scmp.ne.s32.totalorder %s2458_s16, %s4999_s24  ;;  %p5003_p11 = scmp.lt.u32.totalorder %s6357_s20, %s4999_s24 }
 0x67d   : > { %p5005_p13 = scmp.lt.u32.totalorder %s4999_s24, %s2458_s16 }
 0x67e   : > { %p5004_p12 = por %p5003_p11, %p5002_p10 }
 0x680   : > { %p5006_p0 = por %p5005_p13, %p5004_p12 }
 0x682   : > { %p5007_p1 = pnand %p5006_p0, %p5000_p9 }
 0x684   : > { %5010 = shalt.err (!%p5007_p1)  }
 0x685   : > { %s5011_s6 = scalar_lea.vmem %s6674_s8, 16  ;;  %p5016_p3 = scmp.lt.s32.totalorder %s6674_s8, %s6338_s2 }
 0x686   : > { %p5012_p2 = scmp.ne.s32.totalorder %s6674_s8, %s5011_s6  ;;  %p5017_p6 = scmp.lt.s32.totalorder %s6366_s29, %s5011_s6 }
 0x688   : > { %p5018_p7 = por %p5017_p6, %p5016_p3 }
 0x68a   : > { %p5019_p8 = pnand %p5018_p7, %p5012_p2 }
 0x68c   : > { %5022 = shalt.err (!%p5019_p8)  }
 0x68d   : > { %s7088_s0 = sld [smem:[#allocation201_spill]]  ;;  %s3579_s14 = sshll.u32 %s6671_s9, 4 }
 0x68e   : > { %2470 = dma.hbm_to_vmem [thread:$0]  %s2458_s16, 16, %s6674_s8, [#allocation5 + $0x2] }
 0x68f   : > { %s2473_s5 = scalar_lea.hbm %s7079_s18, %s3579_s14 }
 0x690   : > { %s5023_s21 = scalar_lea.hbm %s2473_s5, 16  ;;  %p5026_p10 = scmp.lt.u32.totalorder %s2473_s5, %s7079_s18 }
 0x691   : > { %p5024_p9 = scmp.ne.s32.totalorder %s2473_s5, %s5023_s21  ;;  %p5027_p11 = scmp.lt.u32.totalorder %s6357_s20, %s5023_s21 }
 0x692   : > { %p5029_p13 = scmp.lt.u32.totalorder %s5023_s21, %s2473_s5 }
 0x693   : > { %s6703_s13 = sld [smem:[#allocation9 + %s7088_s0]]  ;;  %p5028_p12 = por %p5027_p11, %p5026_p10 }
 0x695   : > { %p5030_p0 = por %p5029_p13, %p5028_p12 }
 0x697   : > { %p5031_p1 = pnand %p5030_p0, %p5024_p9 }
 0x699   : > { %5034 = shalt.err (!%p5031_p1)  }
 0x69a   : > { %s5035_s8 = scalar_lea.vmem %s6689_s11, 16  ;;  %p5040_p3 = scmp.lt.s32.totalorder %s6689_s11, %s6338_s2 }
 0x69b   : > { %p5036_p2 = scmp.ne.s32.totalorder %s6689_s11, %s5035_s8  ;;  %p5041_p6 = scmp.lt.s32.totalorder %s6366_s29, %s5035_s8 }
 0x69d   : > { %p5042_p7 = por %p5041_p6, %p5040_p3 }
 0x69f   : > { %p5043_p8 = pnand %p5042_p7, %p5036_p2 }
 0x6a1   : > { %5046 = shalt.err (!%p5043_p8)  }
 0x6a2   : > { %s7089_s9 = sld [smem:[#allocation202_spill]]  ;;  %s7090_s30 = sld [smem:[#allocation203_spill]] }
 0x6a3   : > { %2485 = dma.hbm_to_vmem [thread:$0]  %s2473_s5, 16, %s6689_s11, [#allocation5 + $0x2] }
 0x6a4   : > { %s5416_s12 = smov [#allocation4 + $0x16]   ;;  %s5417_s10 = smov [#allocation4 + $0x17]  }
 0x6a5   : > { %s2497_s7 = sshll.u32 %s5416_s12, 4  ;;  %s2512_s1 = sshll.u32 %s5417_s10, 4  ;;  %s2498_s7 = int_to_ptr.vmem [resolvable:$true] %s2497_s7  ;;  %s6725_s1 = int_to_ptr.vmem [resolvable:$true] %s2512_s1 }
 0x6a6   : > { %s3580_s22 = sshll.u32 %s6703_s13, 4 }
 0x6a7   : > { %s2488_s16 = scalar_lea.hbm %s7079_s18, %s3580_s22 }
 0x6a8   : > { %s6719_s15 = sld [smem:[#allocation9 + %s7089_s9]]  ;;  %s5047_s24 = scalar_lea.hbm %s2488_s16, 16 }
 0x6a9   : > { %s6722_s27 = sld [smem:[#allocation9 + %s7090_s30]]  ;;  %p5048_p9 = scmp.ne.s32.totalorder %s2488_s16, %s5047_s24 }
 0x6aa   : > { %p5050_p10 = scmp.lt.u32.totalorder %s2488_s16, %s7079_s18  ;;  %p5051_p11 = scmp.lt.u32.totalorder %s6357_s20, %s5047_s24 }
 0x6ab   : > { %p5053_p13 = scmp.lt.u32.totalorder %s5047_s24, %s2488_s16 }
 0x6ac   : > { %p5052_p12 = por %p5051_p11, %p5050_p10 }
 0x6ae   : > { %p5054_p0 = por %p5053_p13, %p5052_p12 }
 0x6b0   : > { %p5055_p1 = pnand %p5054_p0, %p5048_p9 }
 0x6b2   : > { %5058 = shalt.err (!%p5055_p1)  }
 0x6b3   : > { %s5059_s26 = scalar_lea.vmem %s2498_s7, 16  ;;  %p5064_p3 = scmp.lt.s32.totalorder %s2498_s7, %s6338_s2 }
 0x6b4   : > { %p5060_p2 = scmp.ne.s32.totalorder %s2498_s7, %s5059_s26  ;;  %p5065_p6 = scmp.lt.s32.totalorder %s6366_s29, %s5059_s26 }
 0x6b6   : > { %p5066_p7 = por %p5065_p6, %p5064_p3 }
 0x6b8   : > { %p5067_p8 = pnand %p5066_p7, %p5060_p2 }
 0x6ba   : > { %5070 = shalt.err (!%p5067_p8)  }
 0x6bb   : > { %2500 = dma.hbm_to_vmem [thread:$0]  %s2488_s16, 16, %s2498_s7, [#allocation5 + $0x2] }
 0x6bc   : > { %s3581_s6 = sshll.u32 %s6719_s15, 4  ;;  %s5418_s0 = smov [#allocation4 + $0x18]  }
 0x6bd   : > { %s2527_s14 = sshll.u32 %s5418_s0, 4  ;;  %s2503_s17 = scalar_lea.hbm %s7079_s18, %s3581_s6  ;;  %s6740_s14 = int_to_ptr.vmem [resolvable:$true] %s2527_s14 }
 0x6be   : > { %s5071_s5 = scalar_lea.hbm %s2503_s17, 16  ;;  %p5074_p10 = scmp.lt.u32.totalorder %s2503_s17, %s7079_s18 }
 0x6bf   : > { %p5072_p9 = scmp.ne.s32.totalorder %s2503_s17, %s5071_s5  ;;  %p5075_p11 = scmp.lt.u32.totalorder %s6357_s20, %s5071_s5 }
 0x6c0   : > { %p5077_p13 = scmp.lt.u32.totalorder %s5071_s5, %s2503_s17 }
 0x6c1   : > { %p5076_p12 = por %p5075_p11, %p5074_p10 }
 0x6c3   : > { %p5078_p0 = por %p5077_p13, %p5076_p12 }
 0x6c5   : > { %p5079_p1 = pnand %p5078_p0, %p5072_p9 }
 0x6c7   : > { %5082 = shalt.err (!%p5079_p1)  }
 0x6c8   : > { %s5083_s25 = scalar_lea.vmem %s6725_s1, 16  ;;  %p5088_p3 = scmp.lt.s32.totalorder %s6725_s1, %s6338_s2 }
 0x6c9   : > { %p5084_p2 = scmp.ne.s32.totalorder %s6725_s1, %s5083_s25  ;;  %p5089_p6 = scmp.lt.s32.totalorder %s6366_s29, %s5083_s25 }
 0x6cb   : > { %p5090_p7 = por %p5089_p6, %p5088_p3 }
 0x6cd   : > { %p5091_p8 = pnand %p5090_p7, %p5084_p2 }
 0x6cf   : > { %5094 = shalt.err (!%p5091_p8)  }
 0x6d0   : > { %s7091_s8 = sld [smem:[#allocation204_spill]]  ;;  %s3582_s9 = sshll.u32 %s6722_s27, 4 }
 0x6d1   : > { %2515 = dma.hbm_to_vmem [thread:$0]  %s2503_s17, 16, %s6725_s1, [#allocation5 + $0x2] }
 0x6d2   : > { %s2518_s15 = scalar_lea.hbm %s7079_s18, %s3582_s9 }
 0x6d3   : > { %s5095_s10 = scalar_lea.hbm %s2518_s15, 16  ;;  %p5098_p10 = scmp.lt.u32.totalorder %s2518_s15, %s7079_s18 }
 0x6d4   : > { %p5096_p9 = scmp.ne.s32.totalorder %s2518_s15, %s5095_s10  ;;  %p5099_p11 = scmp.lt.u32.totalorder %s6357_s20, %s5095_s10 }
 0x6d5   : > { %p5101_p13 = scmp.lt.u32.totalorder %s5095_s10, %s2518_s15 }
 0x6d6   : > { %s6754_s30 = sld [smem:[#allocation9 + %s7091_s8]]  ;;  %p5100_p12 = por %p5099_p11, %p5098_p10 }
 0x6d8   : > { %p5102_p0 = por %p5101_p13, %p5100_p12 }
 0x6da   : > { %p5103_p1 = pnand %p5102_p0, %p5096_p9 }
 0x6dc   : > { %5106 = shalt.err (!%p5103_p1)  }
 0x6dd   : > { %s5107_s1 = scalar_lea.vmem %s6740_s14, 16  ;;  %p5112_p3 = scmp.lt.s32.totalorder %s6740_s14, %s6338_s2 }
 0x6de   : > { %p5108_p2 = scmp.ne.s32.totalorder %s6740_s14, %s5107_s1  ;;  %p5113_p6 = scmp.lt.s32.totalorder %s6366_s29, %s5107_s1 }
 0x6e0   : > { %p5114_p7 = por %p5113_p6, %p5112_p3 }
 0x6e2   : > { %p5115_p8 = pnand %p5114_p7, %p5108_p2 }
 0x6e4   : > { %5118 = shalt.err (!%p5115_p8)  }
 0x6e5   : > { %s7092_s27 = sld [smem:[#allocation205_spill]]  ;;  %s7093_s23 = sld [smem:[#allocation206_spill]] }
 0x6e6   : > { %2530 = dma.hbm_to_vmem [thread:$0]  %s2518_s15, 16, %s6740_s14, [#allocation5 + $0x2] }
 0x6e7   : > { %s5419_s16 = smov [#allocation4 + $0x19]   ;;  %s5420_s11 = smov [#allocation4 + $0x1a]  }
 0x6e8   : > { %s2542_s24 = sshll.u32 %s5419_s16, 4  ;;  %s2557_s26 = sshll.u32 %s5420_s11, 4  ;;  %s2543_s24 = int_to_ptr.vmem [resolvable:$true] %s2542_s24  ;;  %s6776_s26 = int_to_ptr.vmem [resolvable:$true] %s2557_s26 }
 0x6e9   : > { %s3583_s0 = sshll.u32 %s6754_s30, 4 }
 0x6ea   : > { %s2533_s17 = scalar_lea.hbm %s7079_s18, %s3583_s0 }
 0x6eb   : > { %s6770_s3 = sld [smem:[#allocation9 + %s7092_s27]]  ;;  %s5119_s5 = scalar_lea.hbm %s2533_s17, 16 }
 0x6ec   : > { %s6773_s6 = sld [smem:[#allocation9 + %s7093_s23]]  ;;  %p5120_p9 = scmp.ne.s32.totalorder %s2533_s17, %s5119_s5 }
 0x6ed   : > { %p5122_p10 = scmp.lt.u32.totalorder %s2533_s17, %s7079_s18  ;;  %p5123_p11 = scmp.lt.u32.totalorder %s6357_s20, %s5119_s5 }
 0x6ee   : > { %p5125_p13 = scmp.lt.u32.totalorder %s5119_s5, %s2533_s17 }
 0x6ef   : > { %p5124_p12 = por %p5123_p11, %p5122_p10 }
 0x6f1   : > { %p5126_p0 = por %p5125_p13, %p5124_p12 }
 0x6f3   : > { %p5127_p1 = pnand %p5126_p0, %p5120_p9 }
 0x6f5   : > { %5130 = shalt.err (!%p5127_p1)  }
 0x6f6   : > { %s5131_s19 = scalar_lea.vmem %s2543_s24, 16  ;;  %p5136_p3 = scmp.lt.s32.totalorder %s2543_s24, %s6338_s2 }
 0x6f7   : > { %p5132_p2 = scmp.ne.s32.totalorder %s2543_s24, %s5131_s19  ;;  %p5137_p6 = scmp.lt.s32.totalorder %s6366_s29, %s5131_s19 }
 0x6f9   : > { %p5138_p7 = por %p5137_p6, %p5136_p3 }
 0x6fb   : > { %p5139_p8 = pnand %p5138_p7, %p5132_p2 }
 0x6fd   : > { %5142 = shalt.err (!%p5139_p8)  }
 0x6fe   : > { %2545 = dma.hbm_to_vmem [thread:$0]  %s2533_s17, 16, %s2543_s24, [#allocation5 + $0x2] }
 0x6ff   : > { %s3584_s25 = sshll.u32 %s6770_s3, 4  ;;  %s5421_s8 = smov [#allocation4 + $0x1b]  }
 0x700   : > { %s2572_s9 = sshll.u32 %s5421_s8, 4  ;;  %s2548_s7 = scalar_lea.hbm %s7079_s18, %s3584_s25  ;;  %s6791_s9 = int_to_ptr.vmem [resolvable:$true] %s2572_s9 }
 0x701   : > { %s5143_s15 = scalar_lea.hbm %s2548_s7, 16  ;;  %p5146_p10 = scmp.lt.u32.totalorder %s2548_s7, %s7079_s18 }
 0x702   : > { %p5144_p9 = scmp.ne.s32.totalorder %s2548_s7, %s5143_s15  ;;  %p5147_p11 = scmp.lt.u32.totalorder %s6357_s20, %s5143_s15 }
 0x703   : > { %p5149_p13 = scmp.lt.u32.totalorder %s5143_s15, %s2548_s7 }
 0x704   : > { %p5148_p12 = por %p5147_p11, %p5146_p10 }
 0x706   : > { %p5150_p0 = por %p5149_p13, %p5148_p12 }
 0x708   : > { %p5151_p1 = pnand %p5150_p0, %p5144_p9 }
 0x70a   : > { %5154 = shalt.err (!%p5151_p1)  }
 0x70b   : > { %s5155_s28 = scalar_lea.vmem %s6776_s26, 16  ;;  %p5160_p3 = scmp.lt.s32.totalorder %s6776_s26, %s6338_s2 }
 0x70c   : > { %p5156_p2 = scmp.ne.s32.totalorder %s6776_s26, %s5155_s28  ;;  %p5161_p6 = scmp.lt.s32.totalorder %s6366_s29, %s5155_s28 }
 0x70e   : > { %p5162_p7 = por %p5161_p6, %p5160_p3 }
 0x710   : > { %p5163_p8 = pnand %p5162_p7, %p5156_p2 }
 0x712   : > { %5166 = shalt.err (!%p5163_p8)  }
 0x713   : > { %s7094_s1 = sld [smem:[#allocation207_spill]]  ;;  %s3585_s27 = sshll.u32 %s6773_s6, 4 }
 0x714   : > { %2560 = dma.hbm_to_vmem [thread:$0]  %s2548_s7, 16, %s6776_s26, [#allocation5 + $0x2] }
 0x715   : > { %s2563_s3 = scalar_lea.hbm %s7079_s18, %s3585_s27 }
 0x716   : > { %s5167_s11 = scalar_lea.hbm %s2563_s3, 16  ;;  %p5170_p10 = scmp.lt.u32.totalorder %s2563_s3, %s7079_s18 }
 0x717   : > { %p5168_p9 = scmp.ne.s32.totalorder %s2563_s3, %s5167_s11  ;;  %p5171_p11 = scmp.lt.u32.totalorder %s6357_s20, %s5167_s11 }
 0x718   : > { %p5173_p13 = scmp.lt.u32.totalorder %s5167_s11, %s2563_s3 }
 0x719   : > { %s6805_s23 = sld [smem:[#allocation9 + %s7094_s1]]  ;;  %p5172_p12 = por %p5171_p11, %p5170_p10 }
 0x71b   : > { %p5174_p0 = por %p5173_p13, %p5172_p12 }
 0x71d   : > { %p5175_p1 = pnand %p5174_p0, %p5168_p9 }
 0x71f   : > { %5178 = shalt.err (!%p5175_p1)  }
 0x720   : > { %s5179_s26 = scalar_lea.vmem %s6791_s9, 16  ;;  %p5184_p3 = scmp.lt.s32.totalorder %s6791_s9, %s6338_s2 }
 0x721   : > { %p5180_p2 = scmp.ne.s32.totalorder %s6791_s9, %s5179_s26  ;;  %p5185_p6 = scmp.lt.s32.totalorder %s6366_s29, %s5179_s26 }
 0x723   : > { %p5186_p7 = por %p5185_p6, %p5184_p3 }
 0x725   : > { %p5187_p8 = pnand %p5186_p7, %p5180_p2 }
 0x727   : > { %5190 = shalt.err (!%p5187_p8)  }
 0x728   : > { %s7095_s6 = sld [smem:[#allocation208_spill]]  ;;  %s7096_s4 = sld [smem:[#allocation209_spill]] }
 0x729   : > { %2575 = dma.hbm_to_vmem [thread:$0]  %s2563_s3, 16, %s6791_s9, [#allocation5 + $0x2] }
 0x72a   : > { %s5422_s17 = smov [#allocation4 + $0x1c]   ;;  %s5423_s14 = smov [#allocation4 + $0x1d]  }
 0x72b   : > { %s2587_s5 = sshll.u32 %s5422_s17, 4  ;;  %s2602_s19 = sshll.u32 %s5423_s14, 4  ;;  %s2588_s5 = int_to_ptr.vmem [resolvable:$true] %s2587_s5  ;;  %s6827_s19 = int_to_ptr.vmem [resolvable:$true] %s2602_s19 }
 0x72c   : > { %s3586_s8 = sshll.u32 %s6805_s23, 4 }
 0x72d   : > { %s2578_s7 = scalar_lea.hbm %s7079_s18, %s3586_s8 }
 0x72e   : > { %s6821_s21 = sld [smem:[#allocation9 + %s7095_s6]]  ;;  %s5191_s15 = scalar_lea.hbm %s2578_s7, 16 }
 0x72f   : > { %s6824_s25 = sld [smem:[#allocation9 + %s7096_s4]]  ;;  %p5192_p9 = scmp.ne.s32.totalorder %s2578_s7, %s5191_s15 }
 0x730   : > { %p5194_p10 = scmp.lt.u32.totalorder %s2578_s7, %s7079_s18  ;;  %p5195_p11 = scmp.lt.u32.totalorder %s6357_s20, %s5191_s15 }
 0x731   : > { %p5197_p13 = scmp.lt.u32.totalorder %s5191_s15, %s2578_s7 }
 0x732   : > { %p5196_p12 = por %p5195_p11, %p5194_p10 }
 0x734   : > { %p5198_p0 = por %p5197_p13, %p5196_p12 }
 0x736   : > { %p5199_p1 = pnand %p5198_p0, %p5192_p9 }
 0x738   : > { %5202 = shalt.err (!%p5199_p1)  }
 0x739   : > { %s5203_s22 = scalar_lea.vmem %s2588_s5, 16  ;;  %p5208_p3 = scmp.lt.s32.totalorder %s2588_s5, %s6338_s2 }
 0x73a   : > { %p5204_p2 = scmp.ne.s32.totalorder %s2588_s5, %s5203_s22  ;;  %p5209_p6 = scmp.lt.s32.totalorder %s6366_s29, %s5203_s22 }
 0x73c   : > { %p5210_p7 = por %p5209_p6, %p5208_p3 }
 0x73e   : > { %p5211_p8 = pnand %p5210_p7, %p5204_p2 }
 0x740   : > { %5214 = shalt.err (!%p5211_p8)  }
 0x741   : > { %2590 = dma.hbm_to_vmem [thread:$0]  %s2578_s7, 16, %s2588_s5, [#allocation5 + $0x2] }
 0x742   : > { %s3587_s28 = sshll.u32 %s6821_s21, 4  ;;  %s5424_s1 = smov [#allocation4 + $0x1e]  }
 0x743   : > { %s2617_s27 = sshll.u32 %s5424_s1, 4  ;;  %s2593_s24 = scalar_lea.hbm %s7079_s18, %s3587_s28  ;;  %s6842_s27 = int_to_ptr.vmem [resolvable:$true] %s2617_s27 }
 0x744   : > { %s5215_s3 = scalar_lea.hbm %s2593_s24, 16  ;;  %p5218_p10 = scmp.lt.u32.totalorder %s2593_s24, %s7079_s18 }
 0x745   : > { %p5216_p9 = scmp.ne.s32.totalorder %s2593_s24, %s5215_s3  ;;  %p5219_p11 = scmp.lt.u32.totalorder %s6357_s20, %s5215_s3 }
 0x746   : > { %p5221_p13 = scmp.lt.u32.totalorder %s5215_s3, %s2593_s24 }
 0x747   : > { %p5220_p12 = por %p5219_p11, %p5218_p10 }
 0x749   : > { %p5222_p0 = por %p5221_p13, %p5220_p12 }
 0x74b   : > { %p5223_p1 = pnand %p5222_p0, %p5216_p9 }
 0x74d   : > { %5226 = shalt.err (!%p5223_p1)  }
 0x74e   : > { %s5227_s13 = scalar_lea.vmem %s6827_s19, 16  ;;  %p5232_p3 = scmp.lt.s32.totalorder %s6827_s19, %s6338_s2 }
 0x74f   : > { %p5228_p2 = scmp.ne.s32.totalorder %s6827_s19, %s5227_s13  ;;  %p5233_p6 = scmp.lt.s32.totalorder %s6366_s29, %s5227_s13 }
 0x751   : > { %p5234_p7 = por %p5233_p6, %p5232_p3 }
 0x753   : > { %p5235_p8 = pnand %p5234_p7, %p5228_p2 }
 0x755   : > { %5238 = shalt.err (!%p5235_p8)  }
 0x756   : > { %s7097_s26 = sld [smem:[#allocation210_spill]]  ;;  %s3588_s6 = sshll.u32 %s6824_s25, 4 }
 0x757   : > { %2605 = dma.hbm_to_vmem [thread:$0]  %s2593_s24, 16, %s6827_s19, [#allocation5 + $0x2] }
 0x758   : > { %s2608_s21 = scalar_lea.hbm %s7079_s18, %s3588_s6 }
 0x759   : > { %s5239_s14 = scalar_lea.hbm %s2608_s21, 16  ;;  %p5242_p10 = scmp.lt.u32.totalorder %s2608_s21, %s7079_s18 }
 0x75a   : > { %p5240_p9 = scmp.ne.s32.totalorder %s2608_s21, %s5239_s14  ;;  %p5243_p11 = scmp.lt.u32.totalorder %s6357_s20, %s5239_s14 }
 0x75b   : > { %p5245_p13 = scmp.lt.u32.totalorder %s5239_s14, %s2608_s21 }
 0x75c   : > { %s2621_s4 = sld [smem:[#allocation9 + %s7097_s26]]  ;;  %p5244_p12 = por %p5243_p11, %p5242_p10 }
 0x75e   : > { %p5246_p0 = por %p5245_p13, %p5244_p12 }
 0x760   : > { %p5247_p1 = pnand %p5246_p0, %p5240_p9 }
 0x762   : > { %5250 = shalt.err (!%p5247_p1)  }
 0x763   : > { %s5251_s19 = scalar_lea.vmem %s6842_s27, 16  ;;  %p5256_p3 = scmp.lt.s32.totalorder %s6842_s27, %s6338_s2 }
 0x764   : > { %p5252_p2 = scmp.ne.s32.totalorder %s6842_s27, %s5251_s19  ;;  %p5257_p6 = scmp.lt.s32.totalorder %s6366_s29, %s5251_s19 }
 0x766   : > { %p5258_p7 = por %p5257_p6, %p5256_p3 }
 0x768   : > { %p5259_p8 = pnand %p5258_p7, %p5252_p2 }
 0x76a   : > { %5262 = shalt.err (!%p5259_p8)  }
 0x76b   : > { %2620 = dma.hbm_to_vmem [thread:$0]  %s2608_s21, 16, %s6842_s27, [#allocation5 + $0x2] }
 0x76c   : > { %s5425_s25 = smov [#allocation4 + $0x1f]   ;;  %s3589_s7 = sshll.u32 %s2621_s4, 4 }
 0x76d   : > { %s2632_s12 = sshll.u32 %s5425_s25, 4  ;;  %s2623_s9 = scalar_lea.hbm %s7079_s18, %s3589_s7  ;;  %s2633_s12 = int_to_ptr.vmem [resolvable:$true] %s2632_s12 }
 0x76e   : > { %s5263_s22 = scalar_lea.hbm %s2623_s9, 16  ;;  %p5266_p10 = scmp.lt.u32.totalorder %s2623_s9, %s7079_s18 }
 0x76f   : > { %p5264_p9 = scmp.ne.s32.totalorder %s2623_s9, %s5263_s22  ;;  %p5267_p11 = scmp.lt.u32.totalorder %s6357_s20, %s5263_s22 }
 0x770   : > { %p5269_p13 = scmp.lt.u32.totalorder %s5263_s22, %s2623_s9 }
 0x771   : > { %p5268_p12 = por %p5267_p11, %p5266_p10 }
 0x773   : > { %p5270_p0 = por %p5269_p13, %p5268_p12 }
 0x775   : > { %p5271_p1 = pnand %p5270_p0, %p5264_p9 }
 0x777   : > { %5274 = shalt.err (!%p5271_p1)  }
 0x778   : > { %s5275_s27 = scalar_lea.vmem %s2633_s12, 16  ;;  %p5280_p3 = scmp.lt.s32.totalorder %s2633_s12, %s6338_s2 }
 0x779   : > { %p5276_p2 = scmp.ne.s32.totalorder %s2633_s12, %s5275_s27  ;;  %p5281_p6 = scmp.lt.s32.totalorder %s6366_s29, %s5275_s27 }
 0x77b   : > { %p5282_p7 = por %p5281_p6, %p5280_p3 }
 0x77d   : > { %p5283_p8 = pnand %p5282_p7, %p5276_p2 }
 0x77f   : > { %5286 = shalt.err (!%p5283_p8)  }
 0x780   : > { %2635 = dma.hbm_to_vmem [thread:$0]  %s2623_s9, 16, %s2633_s12, [#allocation5 + $0x2] }
 0x781   : > { %5333 = dma.done.wait [#allocation5], 512 }
 0x782   : > { %5334 = vsyncadd [#allocation5], 4294966784 }
 0x783   : > { %5335 = dma.done.wait [#allocation5 + $0x1], 512 }
 0x784   : > { %5336 = vsyncadd [#allocation5 + $0x1], 4294966784 }
 0x785   : > { %5337 = dma.done.wait [#allocation5 + $0x2], 512 }
 0x786   : > { %5338 = vsyncadd [#allocation5 + $0x2], 4294966784  ;;  %v2830_v32 = vld [vmem:[#allocation2 + $0x10] sm:$0xff]  ;;  %v2828_v36 = vld [vmem:[#allocation2] sm:$0xff]  ;;  %s7098_s29 = sld [smem:[#allocation215_spill]]  ;;  %s7099_s23 = sld [smem:[#allocation183_spill]] }
 0x787   : > { %v2834_v33 = vld [vmem:[#allocation3 + $0x10] sm:$0xff]  ;;  %v2832_v37 = vld [vmem:[#allocation3] sm:$0xff]  ;;  %v2831_v40 = vld [vmem:[#allocation2 + $0x18] sm:$0xff]  ;;  %s7100_s16 = sld [smem:[#allocation211_spill]]  ;;  %s7101_s11 = sld [smem:[#allocation216_spill]] }
 0x788   : > { %v2842_v34 = vld [vmem:[#allocation4 + $0x10] sm:$0xff]  ;;  %v2838_v35 = vadd.f32 %v2834_v33, %v2830_v32  ;;  %v2840_v38 = vld [vmem:[#allocation4] sm:$0xff]  ;;  %v2836_v39 = vadd.f32 %v2832_v37, %v2828_v36  ;;  %v2835_v41 = vld [vmem:[#allocation3 + $0x18] sm:$0xff]  ;;  %s7102_s0 = sld [smem:[#allocation180_spill]]  ;;  %s7104_s5 = sld [smem:[#allocation217_spill]] }
 0x789   : > { %v2843_v42 = vld [vmem:[#allocation4 + $0x18] sm:$0xff]  ;;  %v2839_v44 = vadd.f32 %v2835_v41, %v2831_v40  ;;  %v2829_v45 = vld [vmem:[#allocation2 + $0x8] sm:$0xff]  ;;  %s5426_s19 = smov [#allocation10]  }
 0x78a   : > { %v6878_v43 = vadd.f32 %v2842_v34, %v2838_v35  ;;  %v2833_v46 = vld [vmem:[#allocation3 + $0x8] sm:$0xff]  ;;  %v2844_v48 = vadd.f32 %v2840_v38, %v2836_v39  ;;  %s5291_s25 = sshll.u32 %s5426_s19, 4  ;;  %s5292_s25 = int_to_ptr.vmem [resolvable:$false] %s5291_s25 }
 0x78b   : > { %v2841_v47 = vld [vmem:[#allocation4 + $0x8] sm:$0xff]  ;;  %v2837_v49 = vadd.f32 %v2833_v46, %v2829_v45  ;;  %v2847_v50 = vadd.f32 %v2843_v42, %v2839_v44  ;;  %s5293_s12 = scalar_lea.vmem %s5292_s25, 1024 }
 0x78c   : > { %2852 = vadd.xlane.f32.xlu1 %v6878_v43  ;;  %2848 = vadd.xlane.f32.xlu0 %v2844_v48  ;;  %v2860_v53 = vmul.f32 %v2844_v48, %v2844_v48  ;;  %v2862_v55 = vmul.f32 %v6878_v43, %v6878_v43  ;;  %v3590_v23 = vld [vmem:[%s7098_s29] ss:$0 sm:$0xff]  ;;  %s3600_s26 = sshll.u32 %s7099_s23, 9 }
 0x78d   : > { %v2845_v51 = vadd.f32 %v2841_v47, %v2837_v49  ;;  %v2863_v54 = vmul.f32 %v2847_v50, %v2847_v50  ;;  %v3591_v26 = vld [vmem:[%s7101_s11] ss:$0 sm:$0xff]  ;;  %s2940_s6 = sshll.u32 %s7100_s16, 4  ;;  %s6899_s6 = int_to_ptr.vmem [resolvable:$true] %s2940_s6 }
 0x78e   : > { %s6897_s21 = scalar_lea.hbm %s7104_s5, %s3600_s26  ;;  %s7105_s14 = sand.u32 1, %s7102_s0  }
 0x78f   : > { %v2861_v52 = vmul.f32 %v2845_v51, %v2845_v51  ;;  %s6905_s8 = scalar_lea.sflag [#allocation11], %s7105_s14  ;;  %s5287_s30 = scalar_lea.vmem %s6899_s6, 512 }
 0x790   : > { %2854 = vadd.xlane.f32.xlu1 %v2847_v50  ;;  %2850 = vadd.xlane.f32.xlu0 %v2845_v51  ;;  %p5288_p9 = scmp.ne.s32.totalorder %s6899_s6, %s5287_s30  ;;  %p5294_p12 = scmp.lt.s32.totalorder %s6899_s6, %s5292_s25 }
 0x791   : > { %p5295_p13 = scmp.lt.s32.totalorder %s5293_s12, %s5287_s30 }
 0x792   : > { %p5289_p10 = pnand %p5288_p9, %p5530_p4 }
 0x793   : > { %p5296_p0 = por %p5295_p13, %p5294_p12 }
 0x794   : > { %2866 = vadd.xlane.f32.xlu1 %v2861_v52  ;;  %2864 = vadd.xlane.f32.xlu0 %v2860_v53  ;;  %p5290_p11 = pneg %p5289_p10 }
 0x796   : > { %p5297_p1 = pnand %p5296_p0, %p5290_p11 }
 0x798   : > { %2870 = vadd.xlane.f32.xlu1 %v2863_v54  ;;  %2868 = vadd.xlane.f32.xlu0 %v2862_v55 }
 0x819   : > { %v2853_v56 = vpop.xlane.xlu1 %2852  ;;  %v2849_v57 = vpop.xlane.xlu0 %2848 }
 0x81a   : > { %v2856_v60 = vmul.f32 0.0078125, %v2849_v57  ;;  %v2858_v3 = vmul.f32 0.0078125, %v2853_v56 }
 0x81c   : > { %v2876_v4 = vmul.f32 %v2856_v60, %v2856_v60  ;;  %v2878_v13 = vmul.f32 %v2858_v3, %v2858_v3  ;;  %v2884_v22 = vsub.f32 %v2844_v48, %v2856_v60  ;;  %v2886_v31 = vsub.f32 %v6878_v43, %v2858_v3 }
 0x81d   : > { %v2855_v58 = vpop.xlane.xlu1 %2854  ;;  %v2851_v59 = vpop.xlane.xlu0 %2850 }
 0x81e   : > { %v2857_v61 = vmul.f32 0.0078125, %v2851_v59  ;;  %v2859_v63 = vmul.f32 0.0078125, %v2855_v58 }
 0x820   : > { %v2877_v0 = vmul.f32 %v2857_v61, %v2857_v61  ;;  %v2879_v9 = vmul.f32 %v2859_v63, %v2859_v63  ;;  %v2885_v20 = vsub.f32 %v2845_v51, %v2857_v61  ;;  %v2887_v28 = vsub.f32 %v2847_v50, %v2859_v63 }
 0x821   : > { %v2867_v62 = vpop.xlane.xlu1 %2866  ;;  %v2865_v2 = vpop.xlane.xlu0 %2864 }
 0x822   : > { %v2873_v1 = vmul.f32 0.0078125, %v2867_v62  ;;  %v2872_v5 = vmul.f32 0.0078125, %v2865_v2 }
 0x824   : > { %v2881_v6 = vsub.f32 %v2873_v1, %v2877_v0  ;;  %v2880_v7 = vsub.f32 %v2872_v5, %v2876_v4 }
 0x825   : > { %v2871_v8 = vpop.xlane.xlu1 %2870  ;;  %v2869_v12 = vpop.xlane.xlu0 %2868 }
 0x826   : > { %v2889_v10 = vadd.f32 1e-12, %v2881_v6  ;;  %v2875_v11 = vmul.f32 0.0078125, %v2871_v8  ;;  %v2888_v14 = vadd.f32 1e-12, %v2880_v7  ;;  %v2874_v15 = vmul.f32 0.0078125, %v2869_v12 }
 0x828   : > { %3709 = vrsqrt.f32 %v2889_v10  ;;  %v2883_v16 = vsub.f32 %v2875_v11, %v2879_v9  ;;  %v2882_v17 = vsub.f32 %v2874_v15, %v2878_v13 }
 0x829   : > { %3711 = vrsqrt.f32 %v2888_v14 }
 0x82a   : > { %v2891_v18 = vadd.f32 1e-12, %v2883_v16  ;;  %v2890_v19 = vadd.f32 1e-12, %v2882_v17 }
 0x82c   : > { %3713 = vrsqrt.f32 %v2891_v18 }
 0x82d   : > { %3715 = vrsqrt.f32 %v2890_v19 }
 0x832   : > { %v3710_v21 = vpop.eup %3709 }
 0x833   : > { %v3712_v24 = vpop.eup %3711  ;;  %v2897_v25 = vmul.f32 %v3710_v21, %v2885_v20 }
 0x834   : > { %v2896_v27 = vmul.f32 %v3712_v24, %v2884_v22 }
 0x835   : > { %v2908_v29 = vmul.f32 %v3590_v23, %v2897_v25 }
 0x836   : > { %v3714_v30 = vpop.eup %3713  ;;  %v2907_v32 = vmul.f32 %v3590_v23, %v2896_v27 }
 0x837   : > { %v3716_v33 = vpop.eup %3715  ;;  %v2919_v34 = vadd.f32 %v3591_v26, %v2908_v29  ;;  %v2899_v35 = vmul.f32 %v3714_v30, %v2887_v28 }
 0x838   : > { %v2918_v36 = vadd.f32 %v3591_v26, %v2907_v32  ;;  %v2898_v37 = vmul.f32 %v3716_v33, %v2886_v31 }
 0x839   : > { %2923 = vst [vmem:[%s7100_s16 + $0x8] sm:$0xff] %v2919_v34  ;;  %v2910_v38 = vmul.f32 %v3590_v23, %v2899_v35 }
 0x83a   : > { %2922 = vst [vmem:[%s7100_s16] sm:$0xff] %v2918_v36  ;;  %v2909_v39 = vmul.f32 %v3590_v23, %v2898_v37 }
 0x83b   : > { %v2921_v40 = vadd.f32 %v3591_v26, %v2910_v38 }
 0x83c   : > { %v2920_v41 = vadd.f32 %v3591_v26, %v2909_v39 }
 0x83d   : > { %2925 = vst [vmem:[%s7100_s16 + $0x18] sm:$0xff] %v2921_v40 }
 0x83e   : > { %2924 = vst [vmem:[%s7100_s16 + $0x10] sm:$0xff] %v2920_v41 }
 0x83f   : > { %5300 = shalt.err (!%p5297_p1)
}
 0x840   : > { %s5301_s7 = scalar_lea.hbm %s6897_s21, 512  ;;  %s5305_s9 = scalar_lea.hbm %s7104_s5, 2048 }
 0x841   : > { %p5302_p2 = scmp.ne.s32.totalorder %s6897_s21, %s5301_s7  ;;  %p5306_p7 = scmp.lt.u32.totalorder %s6897_s21, %s7104_s5 }
 0x842   : > { %p5307_p8 = scmp.lt.u32.totalorder %s5305_s9, %s5301_s7  ;;  %p5309_p10 = scmp.lt.u32.totalorder %s5301_s7, %s6897_s21 }
 0x843   : > { %p5303_p3 = pnand %p5302_p2, %p5530_p4 }
 0x844   : > { %p5308_p9 = por %p5307_p8, %p5306_p7 }
 0x845   : > { %p5304_p6 = pneg %p5303_p3 }
 0x846   : > { %p5310_p11 = por %p5309_p10, %p5308_p9 }
 0x848   : > { %p5311_p12 = pnand %p5310_p11, %p5304_p6 }
 0x84a   : > { %5314 = shalt.err (!%p5311_p12)
}
 0x84b   : > { %s5427_s1 = smov 128   ;;  %s5428_s27 = smov 8  }
 0x84c   : > { %3601 = dma.vmem_to_hbm [thread:$0]  (%p5530_p4), %s6899_s6, 512, %s6897_s21, %s6905_s8, %s5427_s1, %s5427_s1, %s5428_s27  }
 0x84d PF: > { %s7106_s2 = sld [smem:[#allocation182_spill]]  ;;  %s7107_s20 = sld [smem:[#allocation179_spill]] }
 0x853   : > { %p3607_p13 = scmp.ge.s32.totalorder %s7106_s2, 2  ;;  %s2955_s23 = sand.u32 1, %s7107_s20  }
 0x854   : > { %s2956_s16 = scalar_lea.sflag [#allocation11], %s2955_s23 }
 0x855   : > { %p3604_p0 = pnand %p3607_p13, %p5534_p5 }
 0x857   : > { %5340 = dma.done.wait (!%p3604_p0), %s2956_s16, 512  }
 0x858   : > { %5342 = vsyncadd (!%p3604_p0), %s2956_s16, 4294966784  ;;  %s7109_s25 = sld [smem:[#allocation184_spill]]  ;;  %s7110_s2 = sld [smem:[#allocation180_spill]] }
 0x859   : > { %s7111_s23 = sld [smem:[#allocation181_spill]]  ;;  %s7112_s24 = sld [smem:[#allocation185_spill]] }
 0x85e   : > { %p30_p1 = scmp.ge.s32.totalorder %s7109_s25, 6  }
 0x860   :  { %32 = sbr.rel (!%p30_p1) target bundleno = 37 (0x25), region = 1789 }
 0x867   :  { %2961 = vsyncpa [#allocation11], 1 }
 0x868   :  { %2963 = vsyncpa [#allocation11 + $0x1], 1 }
 0x869   :  { %2964 = vsyncmov [#allocation5] }
 0x86c   :  { %s2965_s3 = vpop.sfrf %2964 }
 0x86d   :  { %p3597_p4 = scmp.ne.s32.totalorder %s2965_s3, 0 }
 0x86f   :  { %2969 = shalt.err (%p3597_p4)  }
 0x870   :  { %2971 = vsyncmov [#allocation5 + $0x1] }
 0x873   :  { %s2972_s11 = vpop.sfrf %2971 }
 0x874   :  { %p3598_p5 = scmp.ne.s32.totalorder %s2972_s11, 0 }
 0x876   :  { %2976 = shalt.err (%p3598_p5)  }
 0x877   :  { %2978 = vsyncmov [#allocation5 + $0x2] }
 0x87a   :  { %s2979_s0 = vpop.sfrf %2978 }
 0x87b   :  { %p3599_p2 = scmp.ne.s32.totalorder %s2979_s0, 0 }
 0x87d   :  { %2983 = shalt.err (%p3599_p2)  }

</bundles_post_ra>
